<compile_context>
chip_gen: v7x
topology: tpu7x:2x2x1
jax: 0.10.0
libtpu: 0.0.40
codegen_flags: <defaults>
</compile_context>

<pallas_src>
import functools

import jax
import jax.numpy as jnp
from jax import lax
from jax.experimental import pallas as pl
from jax.experimental.pallas import tpu as pltpu


def _round_up(x, m):
    return (x + m - 1) // m * m


# --------------------------------------------------------------------------
# Pallas kernels
# --------------------------------------------------------------------------

def _matmul_kernel(*refs, n_k, has_bias, pre_act, post_act):
    """A (tm, tk) @ W (tk, C) with K-grid reduction, fused pre-act / bias / post-act."""
    if has_bias:
        a_ref, w_ref, b_ref, o_ref, acc_ref = refs
    else:
        a_ref, w_ref, o_ref, acc_ref = refs
        b_ref = None
    k = pl.program_id(1)

    @pl.when(k == 0)
    def _init():
        acc_ref[...] = jnp.zeros_like(acc_ref)

    a = a_ref[...]
    if pre_act == "lrelu":
        a = jnp.where(a >= 0, a, 0.2 * a)
    elif pre_act == "relu":
        a = jnp.maximum(a, 0.0)
    acc_ref[...] += jnp.dot(a.astype(jnp.bfloat16),
                            w_ref[...].astype(jnp.bfloat16),
                            preferred_element_type=jnp.float32)

    @pl.when(k == n_k - 1)
    def _finalize():
        out = acc_ref[...]
        if has_bias:
            out = out + b_ref[...]
        if post_act == "tanh":
            out = jnp.tanh(out)
        o_ref[...] = out.astype(o_ref.dtype)


def _affine_kernel(y_ref, s_ref, t_ref, o_ref):
    """Per-channel y * scale + shift (folded BatchNorm)."""
    o_ref[...] = (y_ref[...] * s_ref[...] + t_ref[...]).astype(o_ref.dtype)


# --------------------------------------------------------------------------
# Pallas wrappers
# --------------------------------------------------------------------------

def matmul_pallas(a, w, bias, *, pre_act=None, post_act=None, tm_max=256, tk_max=512):
    """(M, K) @ (K, C) with fused pre-activation, optional bias and post-activation."""
    M, K = a.shape
    Kw, C = w.shape
    assert K == Kw

    # M tiling: full-dim single block for small M, otherwise 256-row tiles
    # (ragged last tile handled by Pallas' masked boundary blocks -- no padding).
    tm = M if M <= 1024 else tm_max
    n_m = (M + tm - 1) // tm
    # K tiling: reduction grid axis with a VMEM f32 accumulator.
    tk = tk_max if (K > tk_max and K % tk_max == 0) else K
    n_k = K // tk

    has_bias = bias is not None
    kernel = functools.partial(_matmul_kernel, n_k=n_k, has_bias=has_bias,
                               pre_act=pre_act, post_act=post_act)

    in_specs = [
        pl.BlockSpec((tm, tk), lambda m, k: (m, k)),
        pl.BlockSpec((tk, C), lambda m, k: (k, 0)),
    ]
    args = [a, w]
    if has_bias:
        in_specs.append(pl.BlockSpec((1, C), lambda m, k: (0, 0)))
        args.append(bias.reshape(1, C).astype(jnp.float32))

    return pl.pallas_call(
        kernel,
        out_shape=jax.ShapeDtypeStruct((M, C), jnp.float32),
        grid_spec=pltpu.PrefetchScalarGridSpec(
            num_scalar_prefetch=0,
            grid=(n_m, n_k),
            in_specs=in_specs,
            out_specs=pl.BlockSpec((tm, C), lambda m, k: (m, 0)),
            scratch_shapes=[pltpu.VMEM((tm, C), jnp.float32)],
        ),
        compiler_params=pltpu.CompilerParams(
            dimension_semantics=("parallel", "arbitrary")),
    )(*args)


def batchnorm2d_pallas(y_nhwc, gamma, beta, eps=1e-5, tm_max=1024):
    """Training-mode BatchNorm2d: batch stats over (N, H, W), biased variance."""
    N, H, W, C = y_nhwc.shape
    y2 = y_nhwc.reshape(-1, C)
    M = y2.shape[0]

    # Single fused pass for the (tiny) per-channel statistics.
    s1 = jnp.sum(y2, axis=0)
    s2 = jnp.sum(y2 * y2, axis=0)
    mean = s1 / M
    var = jnp.maximum(s2 / M - mean * mean, 0.0)
    inv = lax.rsqrt(var + eps)
    scale = (gamma * inv).reshape(1, C)
    shift = (beta - mean * gamma * inv).reshape(1, C)

    tm = M if M <= 2048 else tm_max
    n_m = (M + tm - 1) // tm
    out = pl.pallas_call(
        _affine_kernel,
        out_shape=jax.ShapeDtypeStruct((M, C), jnp.float32),
        grid_spec=pltpu.PrefetchScalarGridSpec(
            num_scalar_prefetch=0,
            grid=(n_m,),
            in_specs=[
                pl.BlockSpec((tm, C), lambda m: (m, 0)),
                pl.BlockSpec((1, C), lambda m: (0, 0)),
                pl.BlockSpec((1, C), lambda m: (0, 0)),
            ],
            out_specs=pl.BlockSpec((tm, C), lambda m: (m, 0)),
        ),
        compiler_params=pltpu.CompilerParams(dimension_semantics=("parallel",)),
    )(y2, scale, shift)
    return out.reshape(N, H, W, C)


# --------------------------------------------------------------------------
# Conv / ConvTranspose lowering (patch extraction / pixel shuffle stay in glue)
# --------------------------------------------------------------------------

def conv2d_pallas(x, w_t, bias, *, pre_act):
    """Conv2d(k=4, s=2, p=1). w_t has PyTorch layout (Cout, Cin, 4, 4)."""
    N, H, W, Cin = x.shape
    Cout = w_t.shape[0]
    OH, OW = H // 2, W // 2
    xp = jnp.pad(x, ((0, 0), (1, 1), (1, 1), (0, 0))).astype(jnp.bfloat16)
    # TODO(synk): for very large images, gather the 16 taps inside the kernel
    # (banded input blocks + strided ref loads) instead of materializing the
    # inflated bf16 patch matrix in HBM.
    taps = [xp[:, kh:kh + 2 * OH:2, kw:kw + 2 * OW:2, :]
            for kh in range(4) for kw in range(4)]
    patches = jnp.concatenate(taps, axis=-1).reshape(N * OH * OW, 16 * Cin)
    w_mat = jnp.transpose(w_t, (2, 3, 1, 0)).reshape(16 * Cin, Cout).astype(jnp.bfloat16)
    y = matmul_pallas(patches, w_mat, bias, pre_act=pre_act, post_act=None)
    return y.reshape(N, OH, OW, Cout)


def conv_transpose2d_pallas(x, w_t, bias, *, pre_act, post_act):
    """ConvTranspose2d(k=4, s=2, p=1) via the sub-pixel (output-parity) decomposition.
    w_t has PyTorch layout (Cin, Cout, 4, 4)."""
    N, H, W, Cin = x.shape
    Cout = w_t.shape[1]
    xp = jnp.pad(x, ((0, 0), (1, 1), (1, 1), (0, 0))).astype(jnp.bfloat16)

    # 2x2-window, stride-1 im2col over the padded input: (N*(H+1)*(W+1), 4*Cin)
    taps = [xp[:, dh:dh + H + 1, dw:dw + W + 1, :] for dh in (0, 1) for dw in (0, 1)]
    patches = jnp.concatenate(taps, axis=-1).reshape(N * (H + 1) * (W + 1), 4 * Cin)

    # Per output parity (ry, rx): O[2i+ry, 2j+rx] = sum_{dh,dw} Ip[i+ry+dh, j+rx+dw]
    #                                               . W[:, :, 3-ry-2dh, 3-rx-2dw]
    mats = []
    for ry in (0, 1):
        for rx in (0, 1):
            sub = w_t[:, :, jnp.array([3 - ry, 1 - ry]), :]
            sub = sub[:, :, :, jnp.array([3 - rx, 1 - rx])]          # (Cin, Cout, 2, 2)
            mats.append(jnp.transpose(sub, (2, 3, 0, 1)).reshape(4 * Cin, Cout))
    w_mat = jnp.concatenate(mats, axis=-1).astype(jnp.bfloat16)       # (4Cin, 4Cout)
    b_cat = None if bias is None else jnp.tile(bias, 4)

    y = matmul_pallas(patches, w_mat, b_cat, pre_act=pre_act, post_act=post_act)
    y = y.reshape(N, H + 1, W + 1, 4, Cout)

    # Pixel-shuffle the four parity planes back to (N, 2H, 2W, Cout).
    y00 = y[:, :H, :W, 0]
    y01 = y[:, :H, 1:, 1]
    y10 = y[:, 1:, :W, 2]
    y11 = y[:, 1:, 1:, 3]
    o = jnp.stack([y00, y01, y10, y11], axis=-2).reshape(N, H, W, 2, 2, Cout)
    o = jnp.transpose(o, (0, 1, 3, 2, 4, 5)).reshape(N, 2 * H, 2 * W, Cout)
    return o


# --------------------------------------------------------------------------
# UnetGenerator: parameters + (shared) forward structure
# --------------------------------------------------------------------------

def init_params(key, input_nc, output_nc, num_downs, ngf):
    """Deterministic synthetic parameters with the exact PyTorch shapes.
    norm_layer = BatchNorm2d => use_bias = False everywhere except the outermost
    ConvTranspose2d (which uses the default bias=True)."""
    assert num_downs >= 5
    outer = [output_nc, ngf, 2 * ngf, 4 * ngf] + [8 * ngf] * (num_downs - 4)
    inner = [ngf, 2 * ngf, 4 * ngf, 8 * ngf] + [8 * ngf] * (num_downs - 4)
    kit = iter(jax.random.split(key, 8 * num_downs))

    def w_init(shape):
        return 0.05 * jax.random.normal(next(kit), shape, jnp.float32)

    params = []
    for l in range(num_downs):
        outermost = l == 0
        innermost = l == num_downs - 1
        cin = input_nc if outermost else outer[l]
        p = {"dw": w_init((inner[l], cin, 4, 4))}                 # Conv2d weight
        if not outermost and not innermost:                        # downnorm
            p["dg"] = 1.0 + 0.1 * jax.random.normal(next(kit), (inner[l],), jnp.float32)
            p["dbeta"] = 0.1 * jax.random.normal(next(kit), (inner[l],), jnp.float32)
        up_in = inner[l] if innermost else 2 * inner[l]
        p["uw"] = w_init((up_in, outer[l], 4, 4))                  # ConvTranspose2d weight
        if outermost:
            p["ub"] = 0.05 * jax.random.normal(next(kit), (outer[l],), jnp.float32)
        else:                                                      # upnorm
            p["ug"] = 1.0 + 0.1 * jax.random.normal(next(kit), (outer[l],), jnp.float32)
            p["ubeta"] = 0.1 * jax.random.normal(next(kit), (outer[l],), jnp.float32)
        params.append(p)
    return params


def unet_forward(params, x_nchw, ops):
    """Recursive UnetSkipConnectionBlock structure (outermost = level 0)."""
    conv, convt, bn = ops
    L = len(params)
    x = jnp.transpose(x_nchw, (0, 2, 3, 1))          # NCHW -> NHWC

    def block(l, h):
        p = params[l]
        if l == 0:        # outermost: [downconv] + sub + [ReLU, upconv(+bias), Tanh]
            d = conv(h, p["dw"], None, pre_act=None)
            s = block(l + 1, d)
            return convt(s, p["uw"], p["ub"], pre_act="relu", post_act="tanh")
        if l == L - 1:    # innermost: [LReLU, downconv] + [ReLU, upconv, BN]; concat skip
            d = conv(h, p["dw"], None, pre_act="lrelu")
            u = convt(d, p["uw"], None, pre_act="relu", post_act=None)
            u = bn(u, p["ug"], p["ubeta"])
            return jnp.concatenate([h, u], axis=-1)
        # middle: [LReLU, downconv, BN] + sub + [ReLU, upconv, BN]; concat skip
        d = conv(h, p["dw"], None, pre_act="lrelu")
        d = bn(d, p["dg"], p["dbeta"])
        s = block(l + 1, d)
        u = convt(s, p["uw"], None, pre_act="relu", post_act=None)
        u = bn(u, p["ug"], p["ubeta"])
        return jnp.concatenate([h, u], axis=-1)

    y = block(0, x)
    return jnp.transpose(y, (0, 3, 1, 2))            # NHWC -> NCHW


# --------------------------------------------------------------------------
# Pure-JAX reference ops (lax convs) for the correctness check
# --------------------------------------------------------------------------

def _ref_act(x, kind):
    if kind == "lrelu":
        return jnp.where(x >= 0, x, 0.2 * x)
    if kind == "relu":
        return jnp.maximum(x, 0.0)
    return x


def _ref_conv(x, w_t, bias, *, pre_act):
    x = _ref_act(x, pre_act)
    w_hwio = jnp.transpose(w_t, (2, 3, 1, 0))
    y = lax.conv_general_dilated(x, w_hwio, (2, 2), [(1, 1), (1, 1)],
                                 dimension_numbers=("NHWC", "HWIO", "NHWC"))
    if bias is not None:
        y = y + bias.reshape(1, 1, 1, -1)
    return y


def _ref_convt(x, w_t, bias, *, pre_act, post_act):
    x = _ref_act(x, pre_act)
    # ConvT(k=4,s=2,p=1) == conv(stride 1, lhs_dilation 2, pad 2) with flipped kernel.
    w_hwio = jnp.transpose(w_t[:, :, ::-1, ::-1], (2, 3, 0, 1))
    y = lax.conv_general_dilated(x, w_hwio, (1, 1), [(2, 2), (2, 2)],
                                 lhs_dilation=(2, 2),
                                 dimension_numbers=("NHWC", "HWIO", "NHWC"))
    if bias is not None:
        y = y + bias.reshape(1, 1, 1, -1)
    if post_act == "tanh":
        y = jnp.tanh(y)
    return y


def _ref_bn(y, gamma, beta, eps=1e-5):
    mean = jnp.mean(y, axis=(0, 1, 2))
    var = jnp.mean(jnp.square(y - mean), axis=(0, 1, 2))
    return (y - mean) * lax.rsqrt(var + eps) * gamma + beta


_PALLAS_OPS = (conv2d_pallas, conv_transpose2d_pallas, batchnorm2d_pallas)
_REF_OPS = (_ref_conv, _ref_convt, _ref_bn)


# --------------------------------------------------------------------------

if __name__ == "__main__":
    key = jax.random.PRNGKey(0)
    k_param, k_x = jax.random.split(key)

    # Small but consistent config: 5 downsampling stages => spatial must be 32.
    input_nc, output_nc, num_downs, ngf = 3, 3, 5, 8
    params = init_params(k_param, input_nc, output_nc, num_downs, ngf)
    x = jax.random.normal(k_x, (2, input_nc, 32, 32), jnp.float32)   # NCHW like PyTorch

    pallas_fwd = jax.jit(lambda p, v: unet_forward(p, v, _PALLAS_OPS))
    ref_fwd = jax.jit(lambda p, v: unet_forward(p, v, _REF_OPS))

    out = jax.block_until_ready(pallas_fwd(params, x))
    assert out.shape == (2, output_nc, 32, 32), out.shape
    assert bool(jnp.all(jnp.isfinite(out)))

    ref = jax.block_until_ready(ref_fwd(params, x))
    max_err = float(jnp.max(jnp.abs(out - ref)))
    mean_err = float(jnp.mean(jnp.abs(out - ref)))
    # bf16 MXU operands vs. the all-f32 reference -> small numerical drift.
    assert max_err < 1e-1 and mean_err < 2e-2, (max_err, mean_err)

    print("KERNEL_OK")
</pallas_src>

<mosaic_0001>
module attributes {stable_mosaic.version = 11 : i64} {
  func.func @_matmul_kernel(%arg0: i32, %arg1: i32, %arg2: memref<512x48xbf16, #tpu.memory_space<vmem>>, %arg3: memref<48x8xbf16, #tpu.memory_space<vmem>>, %arg4: memref<512x8xf32, #tpu.memory_space<vmem>>, %arg5: memref<512x8xf32, #tpu.memory_space<vmem>>) attributes {dimension_semantics = [#tpu.dimension_semantics<parallel>, #tpu.dimension_semantics<arbitrary>], iteration_bounds = array<i64: 1, 1>, scalar_prefetch = 0 : i64, scratch_operands = 1 : i64, tpu.core_type = #tpu.core_type<tc>, window_params = [{transform_indices = @transform_0, window_bounds = array<i64: 512, 48>}, {transform_indices = @transform_1, window_bounds = array<i64: 48, 8>}, {transform_indices = @transform_2, window_bounds = array<i64: 512, 8>}]} {
    %c0_i32 = arith.constant 0 : i32
    %0 = arith.cmpi eq, %arg1, %c0_i32 : i32
    %1 = arith.extui %0 : i1 to i32
    %c0_i32_0 = arith.constant 0 : i32
    %2 = arith.cmpi ne, %1, %c0_i32_0 : i32
    scf.if %2 {
      %cst_10 = arith.constant 0.000000e+00 : f32
      %12 = vector.broadcast %cst_10 : f32 to vector<512x8xf32>
      %c0_11 = arith.constant 0 : index
      %c0_12 = arith.constant 0 : index
      %13 = vector.load %arg5[%c0_11, %c0_12] : memref<512x8xf32, #tpu.memory_space<vmem>>, vector<512x8xf32>
      tpu.vector_store %arg5[%c0_11, %c0_12], %12 {strides = array<i32>} : memref<512x8xf32, #tpu.memory_space<vmem>>, vector<512x8xf32>,
    } else {
    }
    %c0 = arith.constant 0 : index
    %c0_1 = arith.constant 0 : index
    %3 = vector.load %arg2[%c0, %c0_1] : memref<512x48xbf16, #tpu.memory_space<vmem>>, vector<512x48xbf16>
    %c0_2 = arith.constant 0 : index
    %c0_3 = arith.constant 0 : index
    %4 = vector.load %arg5[%c0_2, %c0_3] : memref<512x8xf32, #tpu.memory_space<vmem>>, vector<512x8xf32>
    %c0_4 = arith.constant 0 : index
    %c0_5 = arith.constant 0 : index
    %5 = vector.load %arg3[%c0_4, %c0_5] : memref<48x8xbf16, #tpu.memory_space<vmem>>, vector<48x8xbf16>
    %cst = arith.constant dense<0.000000e+00> : vector<512x8xf32>
    %6 = tpu.matmul %3, %5, %cst {dimension_numbers = #tpu.dot_dimension_numbers<[1], [0], [0], [1], [0, 0, 1, 1], [], []>} : vector<512x48xbf16>, vector<48x8xbf16>, vector<512x8xf32> -> vector<512x8xf32>
    %7 = arith.addf %4, %6 : vector<512x8xf32>
    %c0_6 = arith.constant 0 : index
    %c0_7 = arith.constant 0 : index
    %8 = vector.load %arg5[%c0_6, %c0_7] : memref<512x8xf32, #tpu.memory_space<vmem>>, vector<512x8xf32>
    tpu.vector_store %arg5[%c0_6, %c0_7], %7 {strides = array<i32>} : memref<512x8xf32, #tpu.memory_space<vmem>>, vector<512x8xf32>,
    %c0_i32_8 = arith.constant 0 : i32
    %9 = arith.cmpi eq, %arg1, %c0_i32_8 : i32
    %10 = arith.extui %9 : i1 to i32
    %c0_i32_9 = arith.constant 0 : i32
    %11 = arith.cmpi ne, %10, %c0_i32_9 : i32
    scf.if %11 {
      %c0_10 = arith.constant 0 : index
      %c0_11 = arith.constant 0 : index
      %12 = vector.load %arg5[%c0_10, %c0_11] : memref<512x8xf32, #tpu.memory_space<vmem>>, vector<512x8xf32>
      %c0_12 = arith.constant 0 : index
      %c0_13 = arith.constant 0 : index
      %13 = vector.load %arg4[%c0_12, %c0_13] : memref<512x8xf32, #tpu.memory_space<vmem>>, vector<512x8xf32>
      tpu.vector_store %arg4[%c0_12, %c0_13], %12 {strides = array<i32>} : memref<512x8xf32, #tpu.memory_space<vmem>>, vector<512x8xf32>,
    } else {
    }
    return
  }
  func.func @transform_0(%arg0: i32, %arg1: i32) -> (i32, i32) {
    %c0_i32 = arith.constant 0 : i32
    return %arg0, %arg1 : i32, i32
  }
  func.func @transform_1(%arg0: i32, %arg1: i32) -> (i32, i32) {
    %c0_i32 = arith.constant 0 : i32
    %c0_i32_0 = arith.constant 0 : i32
    return %arg1, %c0_i32 : i32, i32
  }
  func.func @transform_2(%arg0: i32, %arg1: i32) -> (i32, i32) {
    %c0_i32 = arith.constant 0 : i32
    %c0_i32_0 = arith.constant 0 : i32
    return %arg0, %c0_i32 : i32, i32
  }
}

module attributes {stable_mosaic.version = 11 : i64} {
  func.func @_matmul_kernel(%arg0: i32, %arg1: i32, %arg2: memref<128x128xbf16, #tpu.memory_space<vmem>>, %arg3: memref<128x16xbf16, #tpu.memory_space<vmem>>, %arg4: memref<128x16xf32, #tpu.memory_space<vmem>>, %arg5: memref<128x16xf32, #tpu.memory_space<vmem>>) attributes {dimension_semantics = [#tpu.dimension_semantics<parallel>, #tpu.dimension_semantics<arbitrary>], iteration_bounds = array<i64: 1, 1>, scalar_prefetch = 0 : i64, scratch_operands = 1 : i64, tpu.core_type = #tpu.core_type<tc>, window_params = [{transform_indices = @transform_0, window_bounds = array<i64: 128, 128>}, {transform_indices = @transform_1, window_bounds = array<i64: 128, 16>}, {transform_indices = @transform_2, window_bounds = array<i64: 128, 16>}]} {
    %c0_i32 = arith.constant 0 : i32
    %0 = arith.cmpi eq, %arg1, %c0_i32 : i32
    %1 = arith.extui %0 : i1 to i32
    %c0_i32_0 = arith.constant 0 : i32
    %2 = arith.cmpi ne, %1, %c0_i32_0 : i32
    scf.if %2 {
      %cst_12 = arith.constant 0.000000e+00 : f32
      %17 = vector.broadcast %cst_12 : f32 to vector<128x16xf32>
      %c0_13 = arith.constant 0 : index
      %c0_14 = arith.constant 0 : index
      %18 = vector.load %arg5[%c0_13, %c0_14] : memref<128x16xf32, #tpu.memory_space<vmem>>, vector<128x16xf32>
      tpu.vector_store %arg5[%c0_13, %c0_14], %17 {strides = array<i32>} : memref<128x16xf32, #tpu.memory_space<vmem>>, vector<128x16xf32>,
    } else {
    }
    %c0 = arith.constant 0 : index
    %c0_1 = arith.constant 0 : index
    %3 = vector.load %arg2[%c0, %c0_1] : memref<128x128xbf16, #tpu.memory_space<vmem>>, vector<128x128xbf16>
    %cst = arith.constant 0.000000e+00 : bf16
    %4 = vector.broadcast %cst : bf16 to vector<128x128xbf16>
    %5 = arith.cmpf oge, %3, %4 : vector<128x128xbf16>
    %cst_2 = arith.constant 2.001950e-01 : bf16
    %6 = vector.broadcast %cst_2 : bf16 to vector<128x128xbf16>
    %7 = arith.mulf %6, %3 : vector<128x128xbf16>
    %8 = arith.select %5, %3, %7 : vector<128x128xi1>, vector<128x128xbf16>
    %c0_3 = arith.constant 0 : index
    %c0_4 = arith.constant 0 : index
    %9 = vector.load %arg5[%c0_3, %c0_4] : memref<128x16xf32, #tpu.memory_space<vmem>>, vector<128x16xf32>
    %c0_5 = arith.constant 0 : index
    %c0_6 = arith.constant 0 : index
    %10 = vector.load %arg3[%c0_5, %c0_6] : memref<128x16xbf16, #tpu.memory_space<vmem>>, vector<128x16xbf16>
    %cst_7 = arith.constant dense<0.000000e+00> : vector<128x16xf32>
    %11 = tpu.matmul %8, %10, %cst_7 {dimension_numbers = #tpu.dot_dimension_numbers<[1], [0], [0], [1], [0, 0, 1, 1], [], []>} : vector<128x128xbf16>, vector<128x16xbf16>, vector<128x16xf32> -> vector<128x16xf32>
    %12 = arith.addf %9, %11 : vector<128x16xf32>
    %c0_8 = arith.constant 0 : index
    %c0_9 = arith.constant 0 : index
    %13 = vector.load %arg5[%c0_8, %c0_9] : memref<128x16xf32, #tpu.memory_space<vmem>>, vector<128x16xf32>
    tpu.vector_store %arg5[%c0_8, %c0_9], %12 {strides = array<i32>} : memref<128x16xf32, #tpu.memory_space<vmem>>, vector<128x16xf32>,
    %c0_i32_10 = arith.constant 0 : i32
    %14 = arith.cmpi eq, %arg1, %c0_i32_10 : i32
    %15 = arith.extui %14 : i1 to i32
    %c0_i32_11 = arith.constant 0 : i32
    %16 = arith.cmpi ne, %15, %c0_i32_11 : i32
    scf.if %16 {
      %c0_12 = arith.constant 0 : index
      %c0_13 = arith.constant 0 : index
      %17 = vector.load %arg5[%c0_12, %c0_13] : memref<128x16xf32, #tpu.memory_space<vmem>>, vector<128x16xf32>
      %c0_14 = arith.constant 0 : index
      %c0_15 = arith.constant 0 : index
      %18 = vector.load %arg4[%c0_14, %c0_15] : memref<128x16xf32, #tpu.memory_space<vmem>>, vector<128x16xf32>
      tpu.vector_store %arg4[%c0_14, %c0_15], %17 {strides = array<i32>} : memref<128x16xf32, #tpu.memory_space<vmem>>, vector<128x16xf32>,
    } else {
    }
    return
  }
  func.func @transform_0(%arg0: i32, %arg1: i32) -> (i32, i32) {
    %c0_i32 = arith.constant 0 : i32
    return %arg0, %arg1 : i32, i32
  }
  func.func @transform_1(%arg0: i32, %arg1: i32) -> (i32, i32) {
    %c0_i32 = arith.constant 0 : i32
    %c0_i32_0 = arith.constant 0 : i32
    return %arg1, %c0_i32 : i32, i32
  }
  func.func @transform_2(%arg0: i32, %arg1: i32) -> (i32, i32) {
    %c0_i32 = arith.constant 0 : i32
    %c0_i32_0 = arith.constant 0 : i32
    return %arg0, %c0_i32 : i32, i32
  }
}

module attributes {stable_mosaic.version = 11 : i64} {
  func.func @_affine_kernel(%arg0: i32, %arg1: memref<128x16xf32, #tpu.memory_space<vmem>>, %arg2: memref<1x16xf32, #tpu.memory_space<vmem>>, %arg3: memref<1x16xf32, #tpu.memory_space<vmem>>, %arg4: memref<128x16xf32, #tpu.memory_space<vmem>>) attributes {dimension_semantics = [#tpu.dimension_semantics<parallel>], iteration_bounds = array<i64: 1>, scalar_prefetch = 0 : i64, scratch_operands = 0 : i64, tpu.core_type = #tpu.core_type<tc>, window_params = [{transform_indices = @transform_0, window_bounds = array<i64: 128, 16>}, {pipeline_mode = #tpu.pipeline_mode<synchronous>, transform_indices = @transform_1, window_bounds = array<i64: 1, 16>}, {pipeline_mode = #tpu.pipeline_mode<synchronous>, transform_indices = @transform_2, window_bounds = array<i64: 1, 16>}, {transform_indices = @transform_3, window_bounds = array<i64: 128, 16>}]} {
    %c0 = arith.constant 0 : index
    %c0_0 = arith.constant 0 : index
    %0 = vector.load %arg1[%c0, %c0_0] : memref<128x16xf32, #tpu.memory_space<vmem>>, vector<128x16xf32>
    %c0_1 = arith.constant 0 : index
    %c0_2 = arith.constant 0 : index
    %1 = vector.load %arg2[%c0_1, %c0_2] : memref<1x16xf32, #tpu.memory_space<vmem>>, vector<1x16xf32>
    %2 = vector.broadcast %1 : vector<1x16xf32> to vector<128x16xf32>
    %3 = arith.mulf %0, %2 : vector<128x16xf32>
    %c0_3 = arith.constant 0 : index
    %c0_4 = arith.constant 0 : index
    %4 = vector.load %arg3[%c0_3, %c0_4] : memref<1x16xf32, #tpu.memory_space<vmem>>, vector<1x16xf32>
    %5 = vector.broadcast %4 : vector<1x16xf32> to vector<128x16xf32>
    %6 = arith.addf %3, %5 : vector<128x16xf32>
    %c0_5 = arith.constant 0 : index
    %c0_6 = arith.constant 0 : index
    %7 = vector.load %arg4[%c0_5, %c0_6] : memref<128x16xf32, #tpu.memory_space<vmem>>, vector<128x16xf32>
    tpu.vector_store %arg4[%c0_5, %c0_6], %6 {strides = array<i32>} : memref<128x16xf32, #tpu.memory_space<vmem>>, vector<128x16xf32>,
    return
  }
  func.func @transform_0(%arg0: i32) -> (i32, i32) {
    %c0_i32 = arith.constant 0 : i32
    %c0_i32_0 = arith.constant 0 : i32
    return %arg0, %c0_i32 : i32, i32
  }
  func.func @transform_1(%arg0: i32) -> (i32, i32) {
    %c0_i32 = arith.constant 0 : i32
    %c0_i32_0 = arith.constant 0 : i32
    %c0_i32_1 = arith.constant 0 : i32
    return %c0_i32, %c0_i32_0 : i32, i32
  }
  func.func @transform_2(%arg0: i32) -> (i32, i32) {
    %c0_i32 = arith.constant 0 : i32
    %c0_i32_0 = arith.constant 0 : i32
    %c0_i32_1 = arith.constant 0 : i32
    return %c0_i32, %c0_i32_0 : i32, i32
  }
  func.func @transform_3(%arg0: i32) -> (i32, i32) {
    %c0_i32 = arith.constant 0 : i32
    %c0_i32_0 = arith.constant 0 : i32
    return %arg0, %c0_i32 : i32, i32
  }
}

module attributes {stable_mosaic.version = 11 : i64} {
  func.func @_matmul_kernel(%arg0: i32, %arg1: i32, %arg2: memref<32x256xbf16, #tpu.memory_space<vmem>>, %arg3: memref<256x32xbf16, #tpu.memory_space<vmem>>, %arg4: memref<32x32xf32, #tpu.memory_space<vmem>>, %arg5: memref<32x32xf32, #tpu.memory_space<vmem>>) attributes {dimension_semantics = [#tpu.dimension_semantics<parallel>, #tpu.dimension_semantics<arbitrary>], iteration_bounds = array<i64: 1, 1>, scalar_prefetch = 0 : i64, scratch_operands = 1 : i64, tpu.core_type = #tpu.core_type<tc>, window_params = [{transform_indices = @transform_0, window_bounds = array<i64: 32, 256>}, {transform_indices = @transform_1, window_bounds = array<i64: 256, 32>}, {transform_indices = @transform_2, window_bounds = array<i64: 32, 32>}]} {
    %c0_i32 = arith.constant 0 : i32
    %0 = arith.cmpi eq, %arg1, %c0_i32 : i32
    %1 = arith.extui %0 : i1 to i32
    %c0_i32_0 = arith.constant 0 : i32
    %2 = arith.cmpi ne, %1, %c0_i32_0 : i32
    scf.if %2 {
      %cst_12 = arith.constant 0.000000e+00 : f32
      %17 = vector.broadcast %cst_12 : f32 to vector<32x32xf32>
      %c0_13 = arith.constant 0 : index
      %c0_14 = arith.constant 0 : index
      %18 = vector.load %arg5[%c0_13, %c0_14] : memref<32x32xf32, #tpu.memory_space<vmem>>, vector<32x32xf32>
      tpu.vector_store %arg5[%c0_13, %c0_14], %17 {strides = array<i32>} : memref<32x32xf32, #tpu.memory_space<vmem>>, vector<32x32xf32>,
    } else {
    }
    %c0 = arith.constant 0 : index
    %c0_1 = arith.constant 0 : index
    %3 = vector.load %arg2[%c0, %c0_1] : memref<32x256xbf16, #tpu.memory_space<vmem>>, vector<32x256xbf16>
    %cst = arith.constant 0.000000e+00 : bf16
    %4 = vector.broadcast %cst : bf16 to vector<32x256xbf16>
    %5 = arith.cmpf oge, %3, %4 : vector<32x256xbf16>
    %cst_2 = arith.constant 2.001950e-01 : bf16
    %6 = vector.broadcast %cst_2 : bf16 to vector<32x256xbf16>
    %7 = arith.mulf %6, %3 : vector<32x256xbf16>
    %8 = arith.select %5, %3, %7 : vector<32x256xi1>, vector<32x256xbf16>
    %c0_3 = arith.constant 0 : index
    %c0_4 = arith.constant 0 : index
    %9 = vector.load %arg5[%c0_3, %c0_4] : memref<32x32xf32, #tpu.memory_space<vmem>>, vector<32x32xf32>
    %c0_5 = arith.constant 0 : index
    %c0_6 = arith.constant 0 : index
    %10 = vector.load %arg3[%c0_5, %c0_6] : memref<256x32xbf16, #tpu.memory_space<vmem>>, vector<256x32xbf16>
    %cst_7 = arith.constant dense<0.000000e+00> : vector<32x32xf32>
    %11 = tpu.matmul %8, %10, %cst_7 {dimension_numbers = #tpu.dot_dimension_numbers<[1], [0], [0], [1], [0, 0, 1, 1], [], []>} : vector<32x256xbf16>, vector<256x32xbf16>, vector<32x32xf32> -> vector<32x32xf32>
    %12 = arith.addf %9, %11 : vector<32x32xf32>
    %c0_8 = arith.constant 0 : index
    %c0_9 = arith.constant 0 : index
    %13 = vector.load %arg5[%c0_8, %c0_9] : memref<32x32xf32, #tpu.memory_space<vmem>>, vector<32x32xf32>
    tpu.vector_store %arg5[%c0_8, %c0_9], %12 {strides = array<i32>} : memref<32x32xf32, #tpu.memory_space<vmem>>, vector<32x32xf32>,
    %c0_i32_10 = arith.constant 0 : i32
    %14 = arith.cmpi eq, %arg1, %c0_i32_10 : i32
    %15 = arith.extui %14 : i1 to i32
    %c0_i32_11 = arith.constant 0 : i32
    %16 = arith.cmpi ne, %15, %c0_i32_11 : i32
    scf.if %16 {
      %c0_12 = arith.constant 0 : index
      %c0_13 = arith.constant 0 : index
      %17 = vector.load %arg5[%c0_12, %c0_13] : memref<32x32xf32, #tpu.memory_space<vmem>>, vector<32x32xf32>
      %c0_14 = arith.constant 0 : index
      %c0_15 = arith.constant 0 : index
      %18 = vector.load %arg4[%c0_14, %c0_15] : memref<32x32xf32, #tpu.memory_space<vmem>>, vector<32x32xf32>
      tpu.vector_store %arg4[%c0_14, %c0_15], %17 {strides = array<i32>} : memref<32x32xf32, #tpu.memory_space<vmem>>, vector<32x32xf32>,
    } else {
    }
    return
  }
  func.func @transform_0(%arg0: i32, %arg1: i32) -> (i32, i32) {
    %c0_i32 = arith.constant 0 : i32
    return %arg0, %arg1 : i32, i32
  }
  func.func @transform_1(%arg0: i32, %arg1: i32) -> (i32, i32) {
    %c0_i32 = arith.constant 0 : i32
    %c0_i32_0 = arith.constant 0 : i32
    return %arg1, %c0_i32 : i32, i32
  }
  func.func @transform_2(%arg0: i32, %arg1: i32) -> (i32, i32) {
    %c0_i32 = arith.constant 0 : i32
    %c0_i32_0 = arith.constant 0 : i32
    return %arg0, %c0_i32 : i32, i32
  }
}

module attributes {stable_mosaic.version = 11 : i64} {
  func.func @_affine_kernel(%arg0: i32, %arg1: memref<32x32xf32, #tpu.memory_space<vmem>>, %arg2: memref<1x32xf32, #tpu.memory_space<vmem>>, %arg3: memref<1x32xf32, #tpu.memory_space<vmem>>, %arg4: memref<32x32xf32, #tpu.memory_space<vmem>>) attributes {dimension_semantics = [#tpu.dimension_semantics<parallel>], iteration_bounds = array<i64: 1>, scalar_prefetch = 0 : i64, scratch_operands = 0 : i64, tpu.core_type = #tpu.core_type<tc>, window_params = [{transform_indices = @transform_0, window_bounds = array<i64: 32, 32>}, {pipeline_mode = #tpu.pipeline_mode<synchronous>, transform_indices = @transform_1, window_bounds = array<i64: 1, 32>}, {pipeline_mode = #tpu.pipeline_mode<synchronous>, transform_indices = @transform_2, window_bounds = array<i64: 1, 32>}, {transform_indices = @transform_3, window_bounds = array<i64: 32, 32>}]} {
    %c0 = arith.constant 0 : index
    %c0_0 = arith.constant 0 : index
    %0 = vector.load %arg1[%c0, %c0_0] : memref<32x32xf32, #tpu.memory_space<vmem>>, vector<32x32xf32>
    %c0_1 = arith.constant 0 : index
    %c0_2 = arith.constant 0 : index
    %1 = vector.load %arg2[%c0_1, %c0_2] : memref<1x32xf32, #tpu.memory_space<vmem>>, vector<1x32xf32>
    %2 = vector.broadcast %1 : vector<1x32xf32> to vector<32x32xf32>
    %3 = arith.mulf %0, %2 : vector<32x32xf32>
    %c0_3 = arith.constant 0 : index
    %c0_4 = arith.constant 0 : index
    %4 = vector.load %arg3[%c0_3, %c0_4] : memref<1x32xf32, #tpu.memory_space<vmem>>, vector<1x32xf32>
    %5 = vector.broadcast %4 : vector<1x32xf32> to vector<32x32xf32>
    %6 = arith.addf %3, %5 : vector<32x32xf32>
    %c0_5 = arith.constant 0 : index
    %c0_6 = arith.constant 0 : index
    %7 = vector.load %arg4[%c0_5, %c0_6] : memref<32x32xf32, #tpu.memory_space<vmem>>, vector<32x32xf32>
    tpu.vector_store %arg4[%c0_5, %c0_6], %6 {strides = array<i32>} : memref<32x32xf32, #tpu.memory_space<vmem>>, vector<32x32xf32>,
    return
  }
  func.func @transform_0(%arg0: i32) -> (i32, i32) {
    %c0_i32 = arith.constant 0 : i32
    %c0_i32_0 = arith.constant 0 : i32
    return %arg0, %c0_i32 : i32, i32
  }
  func.func @transform_1(%arg0: i32) -> (i32, i32) {
    %c0_i32 = arith.constant 0 : i32
    %c0_i32_0 = arith.constant 0 : i32
    %c0_i32_1 = arith.constant 0 : i32
    return %c0_i32, %c0_i32_0 : i32, i32
  }
  func.func @transform_2(%arg0: i32) -> (i32, i32) {
    %c0_i32 = arith.constant 0 : i32
    %c0_i32_0 = arith.constant 0 : i32
    %c0_i32_1 = arith.constant 0 : i32
    return %c0_i32, %c0_i32_0 : i32, i32
  }
  func.func @transform_3(%arg0: i32) -> (i32, i32) {
    %c0_i32 = arith.constant 0 : i32
    %c0_i32_0 = arith.constant 0 : i32
    return %arg0, %c0_i32 : i32, i32
  }
}

module attributes {stable_mosaic.version = 11 : i64} {
  func.func @_matmul_kernel(%arg0: i32, %arg1: i32, %arg2: memref<8x512xbf16, #tpu.memory_space<vmem>>, %arg3: memref<512x64xbf16, #tpu.memory_space<vmem>>, %arg4: memref<8x64xf32, #tpu.memory_space<vmem>>, %arg5: memref<8x64xf32, #tpu.memory_space<vmem>>) attributes {dimension_semantics = [#tpu.dimension_semantics<parallel>, #tpu.dimension_semantics<arbitrary>], iteration_bounds = array<i64: 1, 1>, scalar_prefetch = 0 : i64, scratch_operands = 1 : i64, tpu.core_type = #tpu.core_type<tc>, window_params = [{transform_indices = @transform_0, window_bounds = array<i64: 8, 512>}, {transform_indices = @transform_1, window_bounds = array<i64: 512, 64>}, {transform_indices = @transform_2, window_bounds = array<i64: 8, 64>}]} {
    %c0_i32 = arith.constant 0 : i32
    %0 = arith.cmpi eq, %arg1, %c0_i32 : i32
    %1 = arith.extui %0 : i1 to i32
    %c0_i32_0 = arith.constant 0 : i32
    %2 = arith.cmpi ne, %1, %c0_i32_0 : i32
    scf.if %2 {
      %cst_12 = arith.constant 0.000000e+00 : f32
      %17 = vector.broadcast %cst_12 : f32 to vector<8x64xf32>
      %c0_13 = arith.constant 0 : index
      %c0_14 = arith.constant 0 : index
      %18 = vector.load %arg5[%c0_13, %c0_14] : memref<8x64xf32, #tpu.memory_space<vmem>>, vector<8x64xf32>
      tpu.vector_store %arg5[%c0_13, %c0_14], %17 {strides = array<i32>} : memref<8x64xf32, #tpu.memory_space<vmem>>, vector<8x64xf32>,
    } else {
    }
    %c0 = arith.constant 0 : index
    %c0_1 = arith.constant 0 : index
    %3 = vector.load %arg2[%c0, %c0_1] : memref<8x512xbf16, #tpu.memory_space<vmem>>, vector<8x512xbf16>
    %cst = arith.constant 0.000000e+00 : bf16
    %4 = vector.broadcast %cst : bf16 to vector<8x512xbf16>
    %5 = arith.cmpf oge, %3, %4 : vector<8x512xbf16>
    %cst_2 = arith.constant 2.001950e-01 : bf16
    %6 = vector.broadcast %cst_2 : bf16 to vector<8x512xbf16>
    %7 = arith.mulf %6, %3 : vector<8x512xbf16>
    %8 = arith.select %5, %3, %7 : vector<8x512xi1>, vector<8x512xbf16>
    %c0_3 = arith.constant 0 : index
    %c0_4 = arith.constant 0 : index
    %9 = vector.load %arg5[%c0_3, %c0_4] : memref<8x64xf32, #tpu.memory_space<vmem>>, vector<8x64xf32>
    %c0_5 = arith.constant 0 : index
    %c0_6 = arith.constant 0 : index
    %10 = vector.load %arg3[%c0_5, %c0_6] : memref<512x64xbf16, #tpu.memory_space<vmem>>, vector<512x64xbf16>
    %cst_7 = arith.constant dense<0.000000e+00> : vector<8x64xf32>
    %11 = tpu.matmul %8, %10, %cst_7 {dimension_numbers = #tpu.dot_dimension_numbers<[1], [0], [0], [1], [0, 0, 1, 1], [], []>} : vector<8x512xbf16>, vector<512x64xbf16>, vector<8x64xf32> -> vector<8x64xf32>
    %12 = arith.addf %9, %11 : vector<8x64xf32>
    %c0_8 = arith.constant 0 : index
    %c0_9 = arith.constant 0 : index
    %13 = vector.load %arg5[%c0_8, %c0_9] : memref<8x64xf32, #tpu.memory_space<vmem>>, vector<8x64xf32>
    tpu.vector_store %arg5[%c0_8, %c0_9], %12 {strides = array<i32>} : memref<8x64xf32, #tpu.memory_space<vmem>>, vector<8x64xf32>,
    %c0_i32_10 = arith.constant 0 : i32
    %14 = arith.cmpi eq, %arg1, %c0_i32_10 : i32
    %15 = arith.extui %14 : i1 to i32
    %c0_i32_11 = arith.constant 0 : i32
    %16 = arith.cmpi ne, %15, %c0_i32_11 : i32
    scf.if %16 {
      %c0_12 = arith.constant 0 : index
      %c0_13 = arith.constant 0 : index
      %17 = vector.load %arg5[%c0_12, %c0_13] : memref<8x64xf32, #tpu.memory_space<vmem>>, vector<8x64xf32>
      %c0_14 = arith.constant 0 : index
      %c0_15 = arith.constant 0 : index
      %18 = vector.load %arg4[%c0_14, %c0_15] : memref<8x64xf32, #tpu.memory_space<vmem>>, vector<8x64xf32>
      tpu.vector_store %arg4[%c0_14, %c0_15], %17 {strides = array<i32>} : memref<8x64xf32, #tpu.memory_space<vmem>>, vector<8x64xf32>,
    } else {
    }
    return
  }
  func.func @transform_0(%arg0: i32, %arg1: i32) -> (i32, i32) {
    %c0_i32 = arith.constant 0 : i32
    return %arg0, %arg1 : i32, i32
  }
  func.func @transform_1(%arg0: i32, %arg1: i32) -> (i32, i32) {
    %c0_i32 = arith.constant 0 : i32
    %c0_i32_0 = arith.constant 0 : i32
    return %arg1, %c0_i32 : i32, i32
  }
  func.func @transform_2(%arg0: i32, %arg1: i32) -> (i32, i32) {
    %c0_i32 = arith.constant 0 : i32
    %c0_i32_0 = arith.constant 0 : i32
    return %arg0, %c0_i32 : i32, i32
  }
}

module attributes {stable_mosaic.version = 11 : i64} {
  func.func @_affine_kernel(%arg0: i32, %arg1: memref<8x64xf32, #tpu.memory_space<vmem>>, %arg2: memref<1x64xf32, #tpu.memory_space<vmem>>, %arg3: memref<1x64xf32, #tpu.memory_space<vmem>>, %arg4: memref<8x64xf32, #tpu.memory_space<vmem>>) attributes {dimension_semantics = [#tpu.dimension_semantics<parallel>], iteration_bounds = array<i64: 1>, scalar_prefetch = 0 : i64, scratch_operands = 0 : i64, tpu.core_type = #tpu.core_type<tc>, window_params = [{transform_indices = @transform_0, window_bounds = array<i64: 8, 64>}, {pipeline_mode = #tpu.pipeline_mode<synchronous>, transform_indices = @transform_1, window_bounds = array<i64: 1, 64>}, {pipeline_mode = #tpu.pipeline_mode<synchronous>, transform_indices = @transform_2, window_bounds = array<i64: 1, 64>}, {transform_indices = @transform_3, window_bounds = array<i64: 8, 64>}]} {
    %c0 = arith.constant 0 : index
    %c0_0 = arith.constant 0 : index
    %0 = vector.load %arg1[%c0, %c0_0] : memref<8x64xf32, #tpu.memory_space<vmem>>, vector<8x64xf32>
    %c0_1 = arith.constant 0 : index
    %c0_2 = arith.constant 0 : index
    %1 = vector.load %arg2[%c0_1, %c0_2] : memref<1x64xf32, #tpu.memory_space<vmem>>, vector<1x64xf32>
    %2 = vector.broadcast %1 : vector<1x64xf32> to vector<8x64xf32>
    %3 = arith.mulf %0, %2 : vector<8x64xf32>
    %c0_3 = arith.constant 0 : index
    %c0_4 = arith.constant 0 : index
    %4 = vector.load %arg3[%c0_3, %c0_4] : memref<1x64xf32, #tpu.memory_space<vmem>>, vector<1x64xf32>
    %5 = vector.broadcast %4 : vector<1x64xf32> to vector<8x64xf32>
    %6 = arith.addf %3, %5 : vector<8x64xf32>
    %c0_5 = arith.constant 0 : index
    %c0_6 = arith.constant 0 : index
    %7 = vector.load %arg4[%c0_5, %c0_6] : memref<8x64xf32, #tpu.memory_space<vmem>>, vector<8x64xf32>
    tpu.vector_store %arg4[%c0_5, %c0_6], %6 {strides = array<i32>} : memref<8x64xf32, #tpu.memory_space<vmem>>, vector<8x64xf32>,
    return
  }
  func.func @transform_0(%arg0: i32) -> (i32, i32) {
    %c0_i32 = arith.constant 0 : i32
    %c0_i32_0 = arith.constant 0 : i32
    return %arg0, %c0_i32 : i32, i32
  }
  func.func @transform_1(%arg0: i32) -> (i32, i32) {
    %c0_i32 = arith.constant 0 : i32
    %c0_i32_0 = arith.constant 0 : i32
    %c0_i32_1 = arith.constant 0 : i32
    return %c0_i32, %c0_i32_0 : i32, i32
  }
  func.func @transform_2(%arg0: i32) -> (i32, i32) {
    %c0_i32 = arith.constant 0 : i32
    %c0_i32_0 = arith.constant 0 : i32
    %c0_i32_1 = arith.constant 0 : i32
    return %c0_i32, %c0_i32_0 : i32, i32
  }
  func.func @transform_3(%arg0: i32) -> (i32, i32) {
    %c0_i32 = arith.constant 0 : i32
    %c0_i32_0 = arith.constant 0 : i32
    return %arg0, %c0_i32 : i32, i32
  }
}

module attributes {stable_mosaic.version = 11 : i64} {
  func.func @_matmul_kernel(%arg0: i32, %arg1: i32, %arg2: memref<2x512xbf16, #tpu.memory_space<vmem>>, %arg3: memref<512x64xbf16, #tpu.memory_space<vmem>>, %arg4: memref<2x64xf32, #tpu.memory_space<vmem>>, %arg5: memref<2x64xf32, #tpu.memory_space<vmem>>) attributes {dimension_semantics = [#tpu.dimension_semantics<parallel>, #tpu.dimension_semantics<arbitrary>], iteration_bounds = array<i64: 1, 2>, scalar_prefetch = 0 : i64, scratch_operands = 1 : i64, tpu.core_type = #tpu.core_type<tc>, window_params = [{transform_indices = @transform_0, window_bounds = array<i64: 2, 512>}, {transform_indices = @transform_1, window_bounds = array<i64: 512, 64>}, {transform_indices = @transform_2, window_bounds = array<i64: 2, 64>}]} {
    %c0_i32 = arith.constant 0 : i32
    %0 = arith.cmpi eq, %arg1, %c0_i32 : i32
    %1 = arith.extui %0 : i1 to i32
    %c0_i32_0 = arith.constant 0 : i32
    %2 = arith.cmpi ne, %1, %c0_i32_0 : i32
    scf.if %2 {
      %cst_11 = arith.constant 0.000000e+00 : f32
      %17 = vector.broadcast %cst_11 : f32 to vector<2x64xf32>
      %c0_12 = arith.constant 0 : index
      %c0_13 = arith.constant 0 : index
      %18 = vector.load %arg5[%c0_12, %c0_13] : memref<2x64xf32, #tpu.memory_space<vmem>>, vector<2x64xf32>
      tpu.vector_store %arg5[%c0_12, %c0_13], %17 {strides = array<i32>} : memref<2x64xf32, #tpu.memory_space<vmem>>, vector<2x64xf32>,
    } else {
    }
    %c0 = arith.constant 0 : index
    %c0_1 = arith.constant 0 : index
    %3 = vector.load %arg2[%c0, %c0_1] : memref<2x512xbf16, #tpu.memory_space<vmem>>, vector<2x512xbf16>
    %cst = arith.constant 0.000000e+00 : bf16
    %4 = vector.broadcast %cst : bf16 to vector<2x512xbf16>
    %5 = arith.cmpf oge, %3, %4 : vector<2x512xbf16>
    %cst_2 = arith.constant 2.001950e-01 : bf16
    %6 = vector.broadcast %cst_2 : bf16 to vector<2x512xbf16>
    %7 = arith.mulf %6, %3 : vector<2x512xbf16>
    %8 = arith.select %5, %3, %7 : vector<2x512xi1>, vector<2x512xbf16>
    %c0_3 = arith.constant 0 : index
    %c0_4 = arith.constant 0 : index
    %9 = vector.load %arg5[%c0_3, %c0_4] : memref<2x64xf32, #tpu.memory_space<vmem>>, vector<2x64xf32>
    %c0_5 = arith.constant 0 : index
    %c0_6 = arith.constant 0 : index
    %10 = vector.load %arg3[%c0_5, %c0_6] : memref<512x64xbf16, #tpu.memory_space<vmem>>, vector<512x64xbf16>
    %cst_7 = arith.constant dense<0.000000e+00> : vector<2x64xf32>
    %11 = tpu.matmul %8, %10, %cst_7 {dimension_numbers = #tpu.dot_dimension_numbers<[1], [0], [0], [1], [0, 0, 1, 1], [], []>} : vector<2x512xbf16>, vector<512x64xbf16>, vector<2x64xf32> -> vector<2x64xf32>
    %12 = arith.addf %9, %11 : vector<2x64xf32>
    %c0_8 = arith.constant 0 : index
    %c0_9 = arith.constant 0 : index
    %13 = vector.load %arg5[%c0_8, %c0_9] : memref<2x64xf32, #tpu.memory_space<vmem>>, vector<2x64xf32>
    tpu.vector_store %arg5[%c0_8, %c0_9], %12 {strides = array<i32>} : memref<2x64xf32, #tpu.memory_space<vmem>>, vector<2x64xf32>,
    %c1_i32 = arith.constant 1 : i32
    %14 = arith.cmpi eq, %arg1, %c1_i32 : i32
    %15 = arith.extui %14 : i1 to i32
    %c0_i32_10 = arith.constant 0 : i32
    %16 = arith.cmpi ne, %15, %c0_i32_10 : i32
    scf.if %16 {
      %c0_11 = arith.constant 0 : index
      %c0_12 = arith.constant 0 : index
      %17 = vector.load %arg5[%c0_11, %c0_12] : memref<2x64xf32, #tpu.memory_space<vmem>>, vector<2x64xf32>
      %c0_13 = arith.constant 0 : index
      %c0_14 = arith.constant 0 : index
      %18 = vector.load %arg4[%c0_13, %c0_14] : memref<2x64xf32, #tpu.memory_space<vmem>>, vector<2x64xf32>
      tpu.vector_store %arg4[%c0_13, %c0_14], %17 {strides = array<i32>} : memref<2x64xf32, #tpu.memory_space<vmem>>, vector<2x64xf32>,
    } else {
    }
    return
  }
  func.func @transform_0(%arg0: i32, %arg1: i32) -> (i32, i32) {
    %c0_i32 = arith.constant 0 : i32
    return %arg0, %arg1 : i32, i32
  }
  func.func @transform_1(%arg0: i32, %arg1: i32) -> (i32, i32) {
    %c0_i32 = arith.constant 0 : i32
    %c0_i32_0 = arith.constant 0 : i32
    return %arg1, %c0_i32 : i32, i32
  }
  func.func @transform_2(%arg0: i32, %arg1: i32) -> (i32, i32) {
    %c0_i32 = arith.constant 0 : i32
    %c0_i32_0 = arith.constant 0 : i32
    return %arg0, %c0_i32 : i32, i32
  }
}

module attributes {stable_mosaic.version = 11 : i64} {
  func.func @_matmul_kernel(%arg0: i32, %arg1: i32, %arg2: memref<8x256xbf16, #tpu.memory_space<vmem>>, %arg3: memref<256x256xbf16, #tpu.memory_space<vmem>>, %arg4: memref<8x256xf32, #tpu.memory_space<vmem>>, %arg5: memref<8x256xf32, #tpu.memory_space<vmem>>) attributes {dimension_semantics = [#tpu.dimension_semantics<parallel>, #tpu.dimension_semantics<arbitrary>], iteration_bounds = array<i64: 1, 1>, scalar_prefetch = 0 : i64, scratch_operands = 1 : i64, tpu.core_type = #tpu.core_type<tc>, window_params = [{transform_indices = @transform_0, window_bounds = array<i64: 8, 256>}, {transform_indices = @transform_1, window_bounds = array<i64: 256, 256>}, {transform_indices = @transform_2, window_bounds = array<i64: 8, 256>}]} {
    %c0_i32 = arith.constant 0 : i32
    %0 = arith.cmpi eq, %arg1, %c0_i32 : i32
    %1 = arith.extui %0 : i1 to i32
    %c0_i32_0 = arith.constant 0 : i32
    %2 = arith.cmpi ne, %1, %c0_i32_0 : i32
    scf.if %2 {
      %cst_11 = arith.constant 0.000000e+00 : f32
      %14 = vector.broadcast %cst_11 : f32 to vector<8x256xf32>
      %c0_12 = arith.constant 0 : index
      %c0_13 = arith.constant 0 : index
      %15 = vector.load %arg5[%c0_12, %c0_13] : memref<8x256xf32, #tpu.memory_space<vmem>>, vector<8x256xf32>
      tpu.vector_store %arg5[%c0_12, %c0_13], %14 {strides = array<i32>} : memref<8x256xf32, #tpu.memory_space<vmem>>, vector<8x256xf32>,
    } else {
    }
    %c0 = arith.constant 0 : index
    %c0_1 = arith.constant 0 : index
    %3 = vector.load %arg2[%c0, %c0_1] : memref<8x256xbf16, #tpu.memory_space<vmem>>, vector<8x256xbf16>
    %cst = arith.constant 0.000000e+00 : bf16
    %4 = vector.broadcast %cst : bf16 to vector<8x256xbf16>
    %5 = arith.maximumf %3, %4 : vector<8x256xbf16>
    %c0_2 = arith.constant 0 : index
    %c0_3 = arith.constant 0 : index
    %6 = vector.load %arg5[%c0_2, %c0_3] : memref<8x256xf32, #tpu.memory_space<vmem>>, vector<8x256xf32>
    %c0_4 = arith.constant 0 : index
    %c0_5 = arith.constant 0 : index
    %7 = vector.load %arg3[%c0_4, %c0_5] : memref<256x256xbf16, #tpu.memory_space<vmem>>, vector<256x256xbf16>
    %cst_6 = arith.constant dense<0.000000e+00> : vector<8x256xf32>
    %8 = tpu.matmul %5, %7, %cst_6 {dimension_numbers = #tpu.dot_dimension_numbers<[1], [0], [0], [1], [0, 0, 1, 1], [], []>} : vector<8x256xbf16>, vector<256x256xbf16>, vector<8x256xf32> -> vector<8x256xf32>
    %9 = arith.addf %6, %8 : vector<8x256xf32>
    %c0_7 = arith.constant 0 : index
    %c0_8 = arith.constant 0 : index
    %10 = vector.load %arg5[%c0_7, %c0_8] : memref<8x256xf32, #tpu.memory_space<vmem>>, vector<8x256xf32>
    tpu.vector_store %arg5[%c0_7, %c0_8], %9 {strides = array<i32>} : memref<8x256xf32, #tpu.memory_space<vmem>>, vector<8x256xf32>,
    %c0_i32_9 = arith.constant 0 : i32
    %11 = arith.cmpi eq, %arg1, %c0_i32_9 : i32
    %12 = arith.extui %11 : i1 to i32
    %c0_i32_10 = arith.constant 0 : i32
    %13 = arith.cmpi ne, %12, %c0_i32_10 : i32
    scf.if %13 {
      %c0_11 = arith.constant 0 : index
      %c0_12 = arith.constant 0 : index
      %14 = vector.load %arg5[%c0_11, %c0_12] : memref<8x256xf32, #tpu.memory_space<vmem>>, vector<8x256xf32>
      %c0_13 = arith.constant 0 : index
      %c0_14 = arith.constant 0 : index
      %15 = vector.load %arg4[%c0_13, %c0_14] : memref<8x256xf32, #tpu.memory_space<vmem>>, vector<8x256xf32>
      tpu.vector_store %arg4[%c0_13, %c0_14], %14 {strides = array<i32>} : memref<8x256xf32, #tpu.memory_space<vmem>>, vector<8x256xf32>,
    } else {
    }
    return
  }
  func.func @transform_0(%arg0: i32, %arg1: i32) -> (i32, i32) {
    %c0_i32 = arith.constant 0 : i32
    return %arg0, %arg1 : i32, i32
  }
  func.func @transform_1(%arg0: i32, %arg1: i32) -> (i32, i32) {
    %c0_i32 = arith.constant 0 : i32
    %c0_i32_0 = arith.constant 0 : i32
    return %arg1, %c0_i32 : i32, i32
  }
  func.func @transform_2(%arg0: i32, %arg1: i32) -> (i32, i32) {
    %c0_i32 = arith.constant 0 : i32
    %c0_i32_0 = arith.constant 0 : i32
    return %arg0, %c0_i32 : i32, i32
  }
}

module attributes {stable_mosaic.version = 11 : i64} {
  func.func @_matmul_kernel(%arg0: i32, %arg1: i32, %arg2: memref<18x512xbf16, #tpu.memory_space<vmem>>, %arg3: memref<512x128xbf16, #tpu.memory_space<vmem>>, %arg4: memref<18x128xf32, #tpu.memory_space<vmem>>, %arg5: memref<18x128xf32, #tpu.memory_space<vmem>>) attributes {dimension_semantics = [#tpu.dimension_semantics<parallel>, #tpu.dimension_semantics<arbitrary>], iteration_bounds = array<i64: 1, 1>, scalar_prefetch = 0 : i64, scratch_operands = 1 : i64, tpu.core_type = #tpu.core_type<tc>, window_params = [{transform_indices = @transform_0, window_bounds = array<i64: 18, 512>}, {transform_indices = @transform_1, window_bounds = array<i64: 512, 128>}, {transform_indices = @transform_2, window_bounds = array<i64: 18, 128>}]} {
    %c0_i32 = arith.constant 0 : i32
    %0 = arith.cmpi eq, %arg1, %c0_i32 : i32
    %1 = arith.extui %0 : i1 to i32
    %c0_i32_0 = arith.constant 0 : i32
    %2 = arith.cmpi ne, %1, %c0_i32_0 : i32
    scf.if %2 {
      %cst_11 = arith.constant 0.000000e+00 : f32
      %14 = vector.broadcast %cst_11 : f32 to vector<18x128xf32>
      %c0_12 = arith.constant 0 : index
      %c0_13 = arith.constant 0 : index
      %15 = vector.load %arg5[%c0_12, %c0_13] : memref<18x128xf32, #tpu.memory_space<vmem>>, vector<18x128xf32>
      tpu.vector_store %arg5[%c0_12, %c0_13], %14 {strides = array<i32>} : memref<18x128xf32, #tpu.memory_space<vmem>>, vector<18x128xf32>,
    } else {
    }
    %c0 = arith.constant 0 : index
    %c0_1 = arith.constant 0 : index
    %3 = vector.load %arg2[%c0, %c0_1] : memref<18x512xbf16, #tpu.memory_space<vmem>>, vector<18x512xbf16>
    %cst = arith.constant 0.000000e+00 : bf16
    %4 = vector.broadcast %cst : bf16 to vector<18x512xbf16>
    %5 = arith.maximumf %3, %4 : vector<18x512xbf16>
    %c0_2 = arith.constant 0 : index
    %c0_3 = arith.constant 0 : index
    %6 = vector.load %arg5[%c0_2, %c0_3] : memref<18x128xf32, #tpu.memory_space<vmem>>, vector<18x128xf32>
    %c0_4 = arith.constant 0 : index
    %c0_5 = arith.constant 0 : index
    %7 = vector.load %arg3[%c0_4, %c0_5] : memref<512x128xbf16, #tpu.memory_space<vmem>>, vector<512x128xbf16>
    %cst_6 = arith.constant dense<0.000000e+00> : vector<18x128xf32>
    %8 = tpu.matmul %5, %7, %cst_6 {dimension_numbers = #tpu.dot_dimension_numbers<[1], [0], [0], [1], [0, 0, 1, 1], [], []>} : vector<18x512xbf16>, vector<512x128xbf16>, vector<18x128xf32> -> vector<18x128xf32>
    %9 = arith.addf %6, %8 : vector<18x128xf32>
    %c0_7 = arith.constant 0 : index
    %c0_8 = arith.constant 0 : index
    %10 = vector.load %arg5[%c0_7, %c0_8] : memref<18x128xf32, #tpu.memory_space<vmem>>, vector<18x128xf32>
    tpu.vector_store %arg5[%c0_7, %c0_8], %9 {strides = array<i32>} : memref<18x128xf32, #tpu.memory_space<vmem>>, vector<18x128xf32>,
    %c0_i32_9 = arith.constant 0 : i32
    %11 = arith.cmpi eq, %arg1, %c0_i32_9 : i32
    %12 = arith.extui %11 : i1 to i32
    %c0_i32_10 = arith.constant 0 : i32
    %13 = arith.cmpi ne, %12, %c0_i32_10 : i32
    scf.if %13 {
      %c0_11 = arith.constant 0 : index
      %c0_12 = arith.constant 0 : index
      %14 = vector.load %arg5[%c0_11, %c0_12] : memref<18x128xf32, #tpu.memory_space<vmem>>, vector<18x128xf32>
      %c0_13 = arith.constant 0 : index
      %c0_14 = arith.constant 0 : index
      %15 = vector.load %arg4[%c0_13, %c0_14] : memref<18x128xf32, #tpu.memory_space<vmem>>, vector<18x128xf32>
      tpu.vector_store %arg4[%c0_13, %c0_14], %14 {strides = array<i32>} : memref<18x128xf32, #tpu.memory_space<vmem>>, vector<18x128xf32>,
    } else {
    }
    return
  }
  func.func @transform_0(%arg0: i32, %arg1: i32) -> (i32, i32) {
    %c0_i32 = arith.constant 0 : i32
    return %arg0, %arg1 : i32, i32
  }
  func.func @transform_1(%arg0: i32, %arg1: i32) -> (i32, i32) {
    %c0_i32 = arith.constant 0 : i32
    %c0_i32_0 = arith.constant 0 : i32
    return %arg1, %c0_i32 : i32, i32
  }
  func.func @transform_2(%arg0: i32, %arg1: i32) -> (i32, i32) {
    %c0_i32 = arith.constant 0 : i32
    %c0_i32_0 = arith.constant 0 : i32
    return %arg0, %c0_i32 : i32, i32
  }
}

module attributes {stable_mosaic.version = 11 : i64} {
  func.func @_matmul_kernel(%arg0: i32, %arg1: i32, %arg2: memref<50x256xbf16, #tpu.memory_space<vmem>>, %arg3: memref<256x64xbf16, #tpu.memory_space<vmem>>, %arg4: memref<50x64xf32, #tpu.memory_space<vmem>>, %arg5: memref<50x64xf32, #tpu.memory_space<vmem>>) attributes {dimension_semantics = [#tpu.dimension_semantics<parallel>, #tpu.dimension_semantics<arbitrary>], iteration_bounds = array<i64: 1, 1>, scalar_prefetch = 0 : i64, scratch_operands = 1 : i64, tpu.core_type = #tpu.core_type<tc>, window_params = [{transform_indices = @transform_0, window_bounds = array<i64: 50, 256>}, {transform_indices = @transform_1, window_bounds = array<i64: 256, 64>}, {transform_indices = @transform_2, window_bounds = array<i64: 50, 64>}]} {
    %c0_i32 = arith.constant 0 : i32
    %0 = arith.cmpi eq, %arg1, %c0_i32 : i32
    %1 = arith.extui %0 : i1 to i32
    %c0_i32_0 = arith.constant 0 : i32
    %2 = arith.cmpi ne, %1, %c0_i32_0 : i32
    scf.if %2 {
      %cst_11 = arith.constant 0.000000e+00 : f32
      %14 = vector.broadcast %cst_11 : f32 to vector<50x64xf32>
      %c0_12 = arith.constant 0 : index
      %c0_13 = arith.constant 0 : index
      %15 = vector.load %arg5[%c0_12, %c0_13] : memref<50x64xf32, #tpu.memory_space<vmem>>, vector<50x64xf32>
      tpu.vector_store %arg5[%c0_12, %c0_13], %14 {strides = array<i32>} : memref<50x64xf32, #tpu.memory_space<vmem>>, vector<50x64xf32>,
    } else {
    }
    %c0 = arith.constant 0 : index
    %c0_1 = arith.constant 0 : index
    %3 = vector.load %arg2[%c0, %c0_1] : memref<50x256xbf16, #tpu.memory_space<vmem>>, vector<50x256xbf16>
    %cst = arith.constant 0.000000e+00 : bf16
    %4 = vector.broadcast %cst : bf16 to vector<50x256xbf16>
    %5 = arith.maximumf %3, %4 : vector<50x256xbf16>
    %c0_2 = arith.constant 0 : index
    %c0_3 = arith.constant 0 : index
    %6 = vector.load %arg5[%c0_2, %c0_3] : memref<50x64xf32, #tpu.memory_space<vmem>>, vector<50x64xf32>
    %c0_4 = arith.constant 0 : index
    %c0_5 = arith.constant 0 : index
    %7 = vector.load %arg3[%c0_4, %c0_5] : memref<256x64xbf16, #tpu.memory_space<vmem>>, vector<256x64xbf16>
    %cst_6 = arith.constant dense<0.000000e+00> : vector<50x64xf32>
    %8 = tpu.matmul %5, %7, %cst_6 {dimension_numbers = #tpu.dot_dimension_numbers<[1], [0], [0], [1], [0, 0, 1, 1], [], []>} : vector<50x256xbf16>, vector<256x64xbf16>, vector<50x64xf32> -> vector<50x64xf32>
    %9 = arith.addf %6, %8 : vector<50x64xf32>
    %c0_7 = arith.constant 0 : index
    %c0_8 = arith.constant 0 : index
    %10 = vector.load %arg5[%c0_7, %c0_8] : memref<50x64xf32, #tpu.memory_space<vmem>>, vector<50x64xf32>
    tpu.vector_store %arg5[%c0_7, %c0_8], %9 {strides = array<i32>} : memref<50x64xf32, #tpu.memory_space<vmem>>, vector<50x64xf32>,
    %c0_i32_9 = arith.constant 0 : i32
    %11 = arith.cmpi eq, %arg1, %c0_i32_9 : i32
    %12 = arith.extui %11 : i1 to i32
    %c0_i32_10 = arith.constant 0 : i32
    %13 = arith.cmpi ne, %12, %c0_i32_10 : i32
    scf.if %13 {
      %c0_11 = arith.constant 0 : index
      %c0_12 = arith.constant 0 : index
      %14 = vector.load %arg5[%c0_11, %c0_12] : memref<50x64xf32, #tpu.memory_space<vmem>>, vector<50x64xf32>
      %c0_13 = arith.constant 0 : index
      %c0_14 = arith.constant 0 : index
      %15 = vector.load %arg4[%c0_13, %c0_14] : memref<50x64xf32, #tpu.memory_space<vmem>>, vector<50x64xf32>
      tpu.vector_store %arg4[%c0_13, %c0_14], %14 {strides = array<i32>} : memref<50x64xf32, #tpu.memory_space<vmem>>, vector<50x64xf32>,
    } else {
    }
    return
  }
  func.func @transform_0(%arg0: i32, %arg1: i32) -> (i32, i32) {
    %c0_i32 = arith.constant 0 : i32
    return %arg0, %arg1 : i32, i32
  }
  func.func @transform_1(%arg0: i32, %arg1: i32) -> (i32, i32) {
    %c0_i32 = arith.constant 0 : i32
    %c0_i32_0 = arith.constant 0 : i32
    return %arg1, %c0_i32 : i32, i32
  }
  func.func @transform_2(%arg0: i32, %arg1: i32) -> (i32, i32) {
    %c0_i32 = arith.constant 0 : i32
    %c0_i32_0 = arith.constant 0 : i32
    return %arg0, %c0_i32 : i32, i32
  }
}

module attributes {stable_mosaic.version = 11 : i64} {
  func.func @_matmul_kernel(%arg0: i32, %arg1: i32, %arg2: memref<162x128xbf16, #tpu.memory_space<vmem>>, %arg3: memref<128x32xbf16, #tpu.memory_space<vmem>>, %arg4: memref<162x32xf32, #tpu.memory_space<vmem>>, %arg5: memref<162x32xf32, #tpu.memory_space<vmem>>) attributes {dimension_semantics = [#tpu.dimension_semantics<parallel>, #tpu.dimension_semantics<arbitrary>], iteration_bounds = array<i64: 1, 1>, scalar_prefetch = 0 : i64, scratch_operands = 1 : i64, tpu.core_type = #tpu.core_type<tc>, window_params = [{transform_indices = @transform_0, window_bounds = array<i64: 162, 128>}, {transform_indices = @transform_1, window_bounds = array<i64: 128, 32>}, {transform_indices = @transform_2, window_bounds = array<i64: 162, 32>}]} {
    %c0_i32 = arith.constant 0 : i32
    %0 = arith.cmpi eq, %arg1, %c0_i32 : i32
    %1 = arith.extui %0 : i1 to i32
    %c0_i32_0 = arith.constant 0 : i32
    %2 = arith.cmpi ne, %1, %c0_i32_0 : i32
    scf.if %2 {
      %cst_11 = arith.constant 0.000000e+00 : f32
      %14 = vector.broadcast %cst_11 : f32 to vector<162x32xf32>
      %c0_12 = arith.constant 0 : index
      %c0_13 = arith.constant 0 : index
      %15 = vector.load %arg5[%c0_12, %c0_13] : memref<162x32xf32, #tpu.memory_space<vmem>>, vector<162x32xf32>
      tpu.vector_store %arg5[%c0_12, %c0_13], %14 {strides = array<i32>} : memref<162x32xf32, #tpu.memory_space<vmem>>, vector<162x32xf32>,
    } else {
    }
    %c0 = arith.constant 0 : index
    %c0_1 = arith.constant 0 : index
    %3 = vector.load %arg2[%c0, %c0_1] : memref<162x128xbf16, #tpu.memory_space<vmem>>, vector<162x128xbf16>
    %cst = arith.constant 0.000000e+00 : bf16
    %4 = vector.broadcast %cst : bf16 to vector<162x128xbf16>
    %5 = arith.maximumf %3, %4 : vector<162x128xbf16>
    %c0_2 = arith.constant 0 : index
    %c0_3 = arith.constant 0 : index
    %6 = vector.load %arg5[%c0_2, %c0_3] : memref<162x32xf32, #tpu.memory_space<vmem>>, vector<162x32xf32>
    %c0_4 = arith.constant 0 : index
    %c0_5 = arith.constant 0 : index
    %7 = vector.load %arg3[%c0_4, %c0_5] : memref<128x32xbf16, #tpu.memory_space<vmem>>, vector<128x32xbf16>
    %cst_6 = arith.constant dense<0.000000e+00> : vector<162x32xf32>
    %8 = tpu.matmul %5, %7, %cst_6 {dimension_numbers = #tpu.dot_dimension_numbers<[1], [0], [0], [1], [0, 0, 1, 1], [], []>} : vector<162x128xbf16>, vector<128x32xbf16>, vector<162x32xf32> -> vector<162x32xf32>
    %9 = arith.addf %6, %8 : vector<162x32xf32>
    %c0_7 = arith.constant 0 : index
    %c0_8 = arith.constant 0 : index
    %10 = vector.load %arg5[%c0_7, %c0_8] : memref<162x32xf32, #tpu.memory_space<vmem>>, vector<162x32xf32>
    tpu.vector_store %arg5[%c0_7, %c0_8], %9 {strides = array<i32>} : memref<162x32xf32, #tpu.memory_space<vmem>>, vector<162x32xf32>,
    %c0_i32_9 = arith.constant 0 : i32
    %11 = arith.cmpi eq, %arg1, %c0_i32_9 : i32
    %12 = arith.extui %11 : i1 to i32
    %c0_i32_10 = arith.constant 0 : i32
    %13 = arith.cmpi ne, %12, %c0_i32_10 : i32
    scf.if %13 {
      %c0_11 = arith.constant 0 : index
      %c0_12 = arith.constant 0 : index
      %14 = vector.load %arg5[%c0_11, %c0_12] : memref<162x32xf32, #tpu.memory_space<vmem>>, vector<162x32xf32>
      %c0_13 = arith.constant 0 : index
      %c0_14 = arith.constant 0 : index
      %15 = vector.load %arg4[%c0_13, %c0_14] : memref<162x32xf32, #tpu.memory_space<vmem>>, vector<162x32xf32>
      tpu.vector_store %arg4[%c0_13, %c0_14], %14 {strides = array<i32>} : memref<162x32xf32, #tpu.memory_space<vmem>>, vector<162x32xf32>,
    } else {
    }
    return
  }
  func.func @transform_0(%arg0: i32, %arg1: i32) -> (i32, i32) {
    %c0_i32 = arith.constant 0 : i32
    return %arg0, %arg1 : i32, i32
  }
  func.func @transform_1(%arg0: i32, %arg1: i32) -> (i32, i32) {
    %c0_i32 = arith.constant 0 : i32
    %c0_i32_0 = arith.constant 0 : i32
    return %arg1, %c0_i32 : i32, i32
  }
  func.func @transform_2(%arg0: i32, %arg1: i32) -> (i32, i32) {
    %c0_i32 = arith.constant 0 : i32
    %c0_i32_0 = arith.constant 0 : i32
    return %arg0, %c0_i32 : i32, i32
  }
}

module attributes {stable_mosaic.version = 11 : i64} {
  func.func @_affine_kernel(%arg0: i32, %arg1: memref<512x8xf32, #tpu.memory_space<vmem>>, %arg2: memref<1x8xf32, #tpu.memory_space<vmem>>, %arg3: memref<1x8xf32, #tpu.memory_space<vmem>>, %arg4: memref<512x8xf32, #tpu.memory_space<vmem>>) attributes {dimension_semantics = [#tpu.dimension_semantics<parallel>], iteration_bounds = array<i64: 1>, scalar_prefetch = 0 : i64, scratch_operands = 0 : i64, tpu.core_type = #tpu.core_type<tc>, window_params = [{transform_indices = @transform_0, window_bounds = array<i64: 512, 8>}, {pipeline_mode = #tpu.pipeline_mode<synchronous>, transform_indices = @transform_1, window_bounds = array<i64: 1, 8>}, {pipeline_mode = #tpu.pipeline_mode<synchronous>, transform_indices = @transform_2, window_bounds = array<i64: 1, 8>}, {transform_indices = @transform_3, window_bounds = array<i64: 512, 8>}]} {
    %c0 = arith.constant 0 : index
    %c0_0 = arith.constant 0 : index
    %0 = vector.load %arg1[%c0, %c0_0] : memref<512x8xf32, #tpu.memory_space<vmem>>, vector<512x8xf32>
    %c0_1 = arith.constant 0 : index
    %c0_2 = arith.constant 0 : index
    %1 = vector.load %arg2[%c0_1, %c0_2] : memref<1x8xf32, #tpu.memory_space<vmem>>, vector<1x8xf32>
    %2 = vector.broadcast %1 : vector<1x8xf32> to vector<512x8xf32>
    %3 = arith.mulf %0, %2 : vector<512x8xf32>
    %c0_3 = arith.constant 0 : index
    %c0_4 = arith.constant 0 : index
    %4 = vector.load %arg3[%c0_3, %c0_4] : memref<1x8xf32, #tpu.memory_space<vmem>>, vector<1x8xf32>
    %5 = vector.broadcast %4 : vector<1x8xf32> to vector<512x8xf32>
    %6 = arith.addf %3, %5 : vector<512x8xf32>
    %c0_5 = arith.constant 0 : index
    %c0_6 = arith.constant 0 : index
    %7 = vector.load %arg4[%c0_5, %c0_6] : memref<512x8xf32, #tpu.memory_space<vmem>>, vector<512x8xf32>
    tpu.vector_store %arg4[%c0_5, %c0_6], %6 {strides = array<i32>} : memref<512x8xf32, #tpu.memory_space<vmem>>, vector<512x8xf32>,
    return
  }
  func.func @transform_0(%arg0: i32) -> (i32, i32) {
    %c0_i32 = arith.constant 0 : i32
    %c0_i32_0 = arith.constant 0 : i32
    return %arg0, %c0_i32 : i32, i32
  }
  func.func @transform_1(%arg0: i32) -> (i32, i32) {
    %c0_i32 = arith.constant 0 : i32
    %c0_i32_0 = arith.constant 0 : i32
    %c0_i32_1 = arith.constant 0 : i32
    return %c0_i32, %c0_i32_0 : i32, i32
  }
  func.func @transform_2(%arg0: i32) -> (i32, i32) {
    %c0_i32 = arith.constant 0 : i32
    %c0_i32_0 = arith.constant 0 : i32
    %c0_i32_1 = arith.constant 0 : i32
    return %c0_i32, %c0_i32_0 : i32, i32
  }
  func.func @transform_3(%arg0: i32) -> (i32, i32) {
    %c0_i32 = arith.constant 0 : i32
    %c0_i32_0 = arith.constant 0 : i32
    return %arg0, %c0_i32 : i32, i32
  }
}

module attributes {stable_mosaic.version = 11 : i64} {
  func.func @_matmul_kernel(%arg0: i32, %arg1: i32, %arg2: memref<578x64xbf16, #tpu.memory_space<vmem>>, %arg3: memref<64x12xbf16, #tpu.memory_space<vmem>>, %arg4: memref<1x12xf32, #tpu.memory_space<vmem>>, %arg5: memref<578x12xf32, #tpu.memory_space<vmem>>, %arg6: memref<578x12xf32, #tpu.memory_space<vmem>>) attributes {dimension_semantics = [#tpu.dimension_semantics<parallel>, #tpu.dimension_semantics<arbitrary>], iteration_bounds = array<i64: 1, 1>, scalar_prefetch = 0 : i64, scratch_operands = 1 : i64, tpu.core_type = #tpu.core_type<tc>, window_params = [{transform_indices = @transform_0, window_bounds = array<i64: 578, 64>}, {transform_indices = @transform_1, window_bounds = array<i64: 64, 12>}, {pipeline_mode = #tpu.pipeline_mode<synchronous>, transform_indices = @transform_2, window_bounds = array<i64: 1, 12>}, {transform_indices = @transform_3, window_bounds = array<i64: 578, 12>}]} {
    %c0_i32 = arith.constant 0 : i32
    %0 = arith.cmpi eq, %arg1, %c0_i32 : i32
    %1 = arith.extui %0 : i1 to i32
    %c0_i32_0 = arith.constant 0 : i32
    %2 = arith.cmpi ne, %1, %c0_i32_0 : i32
    scf.if %2 {
      %cst_11 = arith.constant 0.000000e+00 : f32
      %14 = vector.broadcast %cst_11 : f32 to vector<578x12xf32>
      %c0_12 = arith.constant 0 : index
      %c0_13 = arith.constant 0 : index
      %15 = vector.load %arg6[%c0_12, %c0_13] : memref<578x12xf32, #tpu.memory_space<vmem>>, vector<578x12xf32>
      tpu.vector_store %arg6[%c0_12, %c0_13], %14 {strides = array<i32>} : memref<578x12xf32, #tpu.memory_space<vmem>>, vector<578x12xf32>,
    } else {
    }
    %c0 = arith.constant 0 : index
    %c0_1 = arith.constant 0 : index
    %3 = vector.load %arg2[%c0, %c0_1] : memref<578x64xbf16, #tpu.memory_space<vmem>>, vector<578x64xbf16>
    %cst = arith.constant 0.000000e+00 : bf16
    %4 = vector.broadcast %cst : bf16 to vector<578x64xbf16>
    %5 = arith.maximumf %3, %4 : vector<578x64xbf16>
    %c0_2 = arith.constant 0 : index
    %c0_3 = arith.constant 0 : index
    %6 = vector.load %arg6[%c0_2, %c0_3] : memref<578x12xf32, #tpu.memory_space<vmem>>, vector<578x12xf32>
    %c0_4 = arith.constant 0 : index
    %c0_5 = arith.constant 0 : index
    %7 = vector.load %arg3[%c0_4, %c0_5] : memref<64x12xbf16, #tpu.memory_space<vmem>>, vector<64x12xbf16>
    %cst_6 = arith.constant dense<0.000000e+00> : vector<578x12xf32>
    %8 = tpu.matmul %5, %7, %cst_6 {dimension_numbers = #tpu.dot_dimension_numbers<[1], [0], [0], [1], [0, 0, 1, 1], [], []>} : vector<578x64xbf16>, vector<64x12xbf16>, vector<578x12xf32> -> vector<578x12xf32>
    %9 = arith.addf %6, %8 : vector<578x12xf32>
    %c0_7 = arith.constant 0 : index
    %c0_8 = arith.constant 0 : index
    %10 = vector.load %arg6[%c0_7, %c0_8] : memref<578x12xf32, #tpu.memory_space<vmem>>, vector<578x12xf32>
    tpu.vector_store %arg6[%c0_7, %c0_8], %9 {strides = array<i32>} : memref<578x12xf32, #tpu.memory_space<vmem>>, vector<578x12xf32>,
    %c0_i32_9 = arith.constant 0 : i32
    %11 = arith.cmpi eq, %arg1, %c0_i32_9 : i32
    %12 = arith.extui %11 : i1 to i32
    %c0_i32_10 = arith.constant 0 : i32
    %13 = arith.cmpi ne, %12, %c0_i32_10 : i32
    scf.if %13 {
      %c0_11 = arith.constant 0 : index
      %c0_12 = arith.constant 0 : index
      %14 = vector.load %arg6[%c0_11, %c0_12] : memref<578x12xf32, #tpu.memory_space<vmem>>, vector<578x12xf32>
      %c0_13 = arith.constant 0 : index
      %c0_14 = arith.constant 0 : index
      %15 = vector.load %arg4[%c0_13, %c0_14] : memref<1x12xf32, #tpu.memory_space<vmem>>, vector<1x12xf32>
      %16 = vector.broadcast %15 : vector<1x12xf32> to vector<578x12xf32>
      %17 = arith.addf %14, %16 : vector<578x12xf32>
      %18 = math.tanh %17 : vector<578x12xf32>
      %c0_15 = arith.constant 0 : index
      %c0_16 = arith.constant 0 : index
      %19 = vector.load %arg5[%c0_15, %c0_16] : memref<578x12xf32, #tpu.memory_space<vmem>>, vector<578x12xf32>
      tpu.vector_store %arg5[%c0_15, %c0_16], %18 {strides = array<i32>} : memref<578x12xf32, #tpu.memory_space<vmem>>, vector<578x12xf32>,
    } else {
    }
    return
  }
  func.func @transform_0(%arg0: i32, %arg1: i32) -> (i32, i32) {
    %c0_i32 = arith.constant 0 : i32
    return %arg0, %arg1 : i32, i32
  }
  func.func @transform_1(%arg0: i32, %arg1: i32) -> (i32, i32) {
    %c0_i32 = arith.constant 0 : i32
    %c0_i32_0 = arith.constant 0 : i32
    return %arg1, %c0_i32 : i32, i32
  }
  func.func @transform_2(%arg0: i32, %arg1: i32) -> (i32, i32) {
    %c0_i32 = arith.constant 0 : i32
    %c0_i32_0 = arith.constant 0 : i32
    %c0_i32_1 = arith.constant 0 : i32
    return %c0_i32, %c0_i32_0 : i32, i32
  }
  func.func @transform_3(%arg0: i32, %arg1: i32) -> (i32, i32) {
    %c0_i32 = arith.constant 0 : i32
    %c0_i32_0 = arith.constant 0 : i32
    return %arg0, %c0_i32 : i32, i32
  }
}

</mosaic_0001>

<bundles_post_ra>
// kernel: _lambda_.17
= control target key start
LH: loop header
LB: loop body
LE: loop exit
PB: predicated region body
PF: predicated region fallthrough
CT: control target
= control target key end

     0   :  { %vm16_vm0 = vcmask 64512   ;;  %v1257_v1 = vmov 0.0   ;;  %vm393_vm1 = vcmask 392192   ;;  %s1864_s1 = inlined_call_operand.vmem [shape: bf16[48,8], index: 1, kind: input, shape index: {}]   ;;  %s1865_s0 = inlined_call_operand.vmem [shape: bf16[512,48], index: 0, kind: input, shape index: {}]   ;;  %s1866_s2 = inlined_call_operand.vmem [shape: f32[512,8], index: 2, kind: output, shape index: {}]  }
   0x1   :  { %v1276_v0 = vld [vmem:[%s1864_s1] sm:$0xff]   ;;  %19 = vst.msk [vmem:[#allocation2 + $0x10] sm:$0xff] %vm16_vm0, %v1257_v1  ;;  %17 = vst.msk [vmem:[#allocation2] sm:$0xff] %vm16_vm0, %v1257_v1  ;;  %v1223_v2 = vld [vmem:[%s1864_s1 + $0x8] sm:$0xff]  }
   0x2   :  { %18 = vst.msk [vmem:[#allocation2 + $0x8] sm:$0xff] %vm16_vm0, %v1257_v1  ;;  %20 = vst.msk [vmem:[#allocation2 + $0x18] sm:$0xff] %vm16_vm0, %v1257_v1  ;;  %1145 = vmatprep.subr.bf16.mxu0 %v1276_v0  ;;  %1215 = vmatprep.subr.bf16.mxu1 %v1276_v0  ;;  %v1224_v3 = vld [vmem:[%s1864_s1 + $0x10] sm:$0xff]   ;;  %v1225_v4 = vld [vmem:[%s1865_s0] sm:$0xff]  }
   0x3   :  { %21 = vst.msk [vmem:[#allocation2 + $0x20] sm:$0xff] %vm16_vm0, %v1257_v1  ;;  %22 = vst.msk [vmem:[#allocation2 + $0x28] sm:$0xff] %vm16_vm0, %v1257_v1  ;;  %1146 = vmatpush3.bf16.msra.mxu0 %v1276_v0  ;;  %1218 = vmatpush3.bf16.msra.mxu1 %v1276_v0  ;;  %v1226_v5 = vld [vmem:[%s1865_s0 + $0x80] sm:$0xff]   ;;  %v1227_v6 = vld [vmem:[%s1865_s0 + $0x8] sm:$0xff]  }
   0x4   :  { %23 = vst.msk [vmem:[#allocation2 + $0x30] sm:$0xff] %vm16_vm0, %v1257_v1  ;;  %24 = vst.msk [vmem:[#allocation2 + $0x38] sm:$0xff] %vm16_vm0, %v1257_v1  ;;  %1147 = vmatprep.subr.bf16.mxu0 %v1223_v2  ;;  %1216 = vmatprep.subr.bf16.mxu1 %v1223_v2  ;;  %v1228_v7 = vld [vmem:[%s1865_s0 + $0x88] sm:$0xff]   ;;  %v1229_v8 = vld [vmem:[%s1865_s0 + $0x10] sm:$0xff]  }
   0x5   :  { %25 = vst.msk [vmem:[#allocation2 + $0x40] sm:$0xff] %vm16_vm0, %v1257_v1  ;;  %26 = vst.msk [vmem:[#allocation2 + $0x48] sm:$0xff] %vm16_vm0, %v1257_v1  ;;  %1151 = vmatprep.mubr.msk.bf16.mxu0 %vm393_vm1, %v1225_v4  ;;  %1183 = vmatprep.mubr.msk.bf16.mxu1 %vm393_vm1, %v1226_v5  ;;  %v1230_v9 = vld [vmem:[%s1865_s0 + $0x90] sm:$0xff]   ;;  %v1231_v10 = vld [vmem:[%s1865_s0 + $0x18] sm:$0xff]  }
   0x6   :  { %27 = vst.msk [vmem:[#allocation2 + $0x50] sm:$0xff] %vm16_vm0, %v1257_v1  ;;  %28 = vst.msk [vmem:[#allocation2 + $0x58] sm:$0xff] %vm16_vm0, %v1257_v1  ;;  %v1232_v11 = vld [vmem:[%s1865_s0 + $0x98] sm:$0xff]   ;;  %v1233_v12 = vld [vmem:[%s1865_s0 + $0x20] sm:$0xff]  }
   0x7   :  { %29 = vst.msk [vmem:[#allocation2 + $0x60] sm:$0xff] %vm16_vm0, %v1257_v1  ;;  %30 = vst.msk [vmem:[#allocation2 + $0x68] sm:$0xff] %vm16_vm0, %v1257_v1  ;;  %1148 = vmatpush3.bf16.msra.mxu0 %v1223_v2  ;;  %1219 = vmatpush3.bf16.msra.mxu1 %v1223_v2  ;;  %v1234_v13 = vld [vmem:[%s1865_s0 + $0xa0] sm:$0xff]   ;;  %v1235_v14 = vld [vmem:[%s1865_s0 + $0x28] sm:$0xff]  }
   0x8   :  { %31 = vst.msk [vmem:[#allocation2 + $0x70] sm:$0xff] %vm16_vm0, %v1257_v1  ;;  %32 = vst.msk [vmem:[#allocation2 + $0x78] sm:$0xff] %vm16_vm0, %v1257_v1  ;;  %1149 = vmatprep.subr.bf16.mxu0 %v1224_v3  ;;  %1217 = vmatprep.subr.bf16.mxu1 %v1224_v3  ;;  %v1236_v15 = vld [vmem:[%s1865_s0 + $0xa8] sm:$0xff]   ;;  %v1237_v16 = vld [vmem:[%s1865_s0 + $0x30] sm:$0xff]  }
   0x9   :  { %33 = vst.msk [vmem:[#allocation2 + $0x80] sm:$0xff] %vm16_vm0, %v1257_v1  ;;  %34 = vst.msk [vmem:[#allocation2 + $0x88] sm:$0xff] %vm16_vm0, %v1257_v1  ;;  %v1238_v17 = vld [vmem:[%s1865_s0 + $0xb0] sm:$0xff]   ;;  %v1239_v18 = vld [vmem:[%s1865_s0 + $0x38] sm:$0xff]  }
   0xa   :  { %35 = vst.msk [vmem:[#allocation2 + $0x90] sm:$0xff] %vm16_vm0, %v1257_v1  ;;  %36 = vst.msk [vmem:[#allocation2 + $0x98] sm:$0xff] %vm16_vm0, %v1257_v1  ;;  %v1240_v19 = vld [vmem:[%s1865_s0 + $0xb8] sm:$0xff]   ;;  %v1241_v20 = vld [vmem:[%s1865_s0 + $0x40] sm:$0xff]  }
   0xb   :  { %37 = vst.msk [vmem:[#allocation2 + $0xa0] sm:$0xff] %vm16_vm0, %v1257_v1  ;;  %38 = vst.msk [vmem:[#allocation2 + $0xa8] sm:$0xff] %vm16_vm0, %v1257_v1  ;;  %1150 = vmatpush3.bf16.msra.mxu0 %v1224_v3  ;;  %1220 = vmatpush3.bf16.msra.mxu1 %v1224_v3  ;;  %v1242_v21 = vld [vmem:[%s1865_s0 + $0xc0] sm:$0xff]   ;;  %v1243_v22 = vld [vmem:[%s1865_s0 + $0x48] sm:$0xff]  }
   0xc   :  { %39 = vst.msk [vmem:[#allocation2 + $0xb0] sm:$0xff] %vm16_vm0, %v1257_v1  ;;  %40 = vst.msk [vmem:[#allocation2 + $0xb8] sm:$0xff] %vm16_vm0, %v1257_v1  ;;  %v1244_v23 = vld [vmem:[%s1865_s0 + $0xc8] sm:$0xff]   ;;  %v1245_v24 = vld [vmem:[%s1865_s0 + $0x50] sm:$0xff]  }
   0xd   :  { %41 = vst.msk [vmem:[#allocation2 + $0xc0] sm:$0xff] %vm16_vm0, %v1257_v1  ;;  %42 = vst.msk [vmem:[#allocation2 + $0xc8] sm:$0xff] %vm16_vm0, %v1257_v1  ;;  %v1246_v25 = vld [vmem:[%s1865_s0 + $0xd0] sm:$0xff]   ;;  %v1247_v26 = vld [vmem:[%s1865_s0 + $0x58] sm:$0xff]  }
   0xe   :  { %43 = vst.msk [vmem:[#allocation2 + $0xd0] sm:$0xff] %vm16_vm0, %v1257_v1  ;;  %44 = vst.msk [vmem:[#allocation2 + $0xd8] sm:$0xff] %vm16_vm0, %v1257_v1  ;;  %1152 = vmatmul.mubr.msk.bf16.vlgmr.msra.gmra.mrb[0].mxu0 %vm393_vm1, %v1227_v6  ;;  %1184 = vmatmul.mubr.msk.bf16.vlgmr.msra.gmra.mrb[0].mxu1 %vm393_vm1, %v1228_v7  ;;  %v1248_v27 = vld [vmem:[%s1865_s0 + $0xd8] sm:$0xff]   ;;  %v1249_v28 = vld [vmem:[%s1865_s0 + $0x60] sm:$0xff]  }
   0xf   :  { %45 = vst.msk [vmem:[#allocation2 + $0xe0] sm:$0xff] %vm16_vm0, %v1257_v1  ;;  %46 = vst.msk [vmem:[#allocation2 + $0xe8] sm:$0xff] %vm16_vm0, %v1257_v1  ;;  %1155 = vmatprep.mubr.msk.bf16.mxu0 %vm393_vm1, %v1229_v8  ;;  %1187 = vmatprep.mubr.msk.bf16.mxu1 %vm393_vm1, %v1230_v9  ;;  %v1250_v29 = vld [vmem:[%s1865_s0 + $0xe0] sm:$0xff]   ;;  %v1251_v30 = vld [vmem:[%s1865_s0 + $0x68] sm:$0xff]  }
  0x10   :  { %47 = vst.msk [vmem:[#allocation2 + $0xf0] sm:$0xff] %vm16_vm0, %v1257_v1  ;;  %48 = vst.msk [vmem:[#allocation2 + $0xf8] sm:$0xff] %vm16_vm0, %v1257_v1  ;;  %v1252_v31 = vld [vmem:[%s1865_s0 + $0xe8] sm:$0xff]   ;;  %v1253_v32 = vld [vmem:[%s1865_s0 + $0x70] sm:$0xff]  }
  0x11   :  { %49 = vst.msk [vmem:[#allocation2 + $0x100] sm:$0xff] %vm16_vm0, %v1257_v1  ;;  %50 = vst.msk [vmem:[#allocation2 + $0x108] sm:$0xff] %vm16_vm0, %v1257_v1  ;;  %v1254_v33 = vld [vmem:[%s1865_s0 + $0xf0] sm:$0xff]   ;;  %v1255_v34 = vld [vmem:[%s1865_s0 + $0x78] sm:$0xff]  }
  0x12   :  { %51 = vst.msk [vmem:[#allocation2 + $0x110] sm:$0xff] %vm16_vm0, %v1257_v1  ;;  %52 = vst.msk [vmem:[#allocation2 + $0x118] sm:$0xff] %vm16_vm0, %v1257_v1  ;;  %v1256_v35 = vld [vmem:[%s1865_s0 + $0xf8] sm:$0xff]   ;;  %v147_v36 = vld [vmem:[#allocation2 + $0x10] sm:$0xff] }
  0x13   :  { %53 = vst.msk [vmem:[#allocation2 + $0x120] sm:$0xff] %vm16_vm0, %v1257_v1  ;;  %54 = vst.msk [vmem:[#allocation2 + $0x128] sm:$0xff] %vm16_vm0, %v1257_v1  ;;  %v145_v38 = vld [vmem:[#allocation2] sm:$0xff]  ;;  %v148_v42 = vld [vmem:[#allocation2 + $0x18] sm:$0xff] }
  0x14   :  { %55 = vst.msk [vmem:[#allocation2 + $0x130] sm:$0xff] %vm16_vm0, %v1257_v1  ;;  %56 = vst.msk [vmem:[#allocation2 + $0x138] sm:$0xff] %vm16_vm0, %v1257_v1  ;;  %v146_v48 = vld [vmem:[#allocation2 + $0x8] sm:$0xff]  ;;  %v151_v60 = vld [vmem:[#allocation2 + $0x30] sm:$0xff] }
  0x15   :  { %57 = vst.msk [vmem:[#allocation2 + $0x140] sm:$0xff] %vm16_vm0, %v1257_v1  ;;  %58 = vst.msk [vmem:[#allocation2 + $0x148] sm:$0xff] %vm16_vm0, %v1257_v1  ;;  %v149_v62 = vld [vmem:[#allocation2 + $0x20] sm:$0xff]  ;;  %v152_v2 = vld [vmem:[#allocation2 + $0x38] sm:$0xff] }
  0x16   :  { %59 = vst.msk [vmem:[#allocation2 + $0x150] sm:$0xff] %vm16_vm0, %v1257_v1  ;;  %60 = vst.msk [vmem:[#allocation2 + $0x158] sm:$0xff] %vm16_vm0, %v1257_v1  ;;  %1156 = vmatmul.mubr.msk.bf16.gmra.mrb[4].mxu0 %vm393_vm1, %v1231_v10  ;;  %1188 = vmatmul.mubr.msk.bf16.gmra.mrb[4].mxu1 %vm393_vm1, %v1232_v11  ;;  %v150_v8 = vld [vmem:[#allocation2 + $0x28] sm:$0xff] }
  0x17   :  { %61 = vst.msk [vmem:[#allocation2 + $0x160] sm:$0xff] %vm16_vm0, %v1257_v1  ;;  %62 = vst.msk [vmem:[#allocation2 + $0x168] sm:$0xff] %vm16_vm0, %v1257_v1  ;;  %1159 = vmatprep.mubr.msk.bf16.mxu0 %vm393_vm1, %v1233_v12  ;;  %1191 = vmatprep.mubr.msk.bf16.mxu1 %vm393_vm1, %v1234_v13 }
  0x18   :  { %63 = vst.msk [vmem:[#allocation2 + $0x170] sm:$0xff] %vm16_vm0, %v1257_v1  ;;  %64 = vst.msk [vmem:[#allocation2 + $0x178] sm:$0xff] %vm16_vm0, %v1257_v1  ;;  %v177_v39 = vld [vmem:[#allocation2 + $0x100] sm:$0xff]  ;;  %v178_v49 = vld [vmem:[#allocation2 + $0x108] sm:$0xff] }
  0x19   :  { %65 = vst.msk [vmem:[#allocation2 + $0x180] sm:$0xff] %vm16_vm0, %v1257_v1  ;;  %66 = vst.msk [vmem:[#allocation2 + $0x188] sm:$0xff] %vm16_vm0, %v1257_v1  ;;  %v179_v37 = vld [vmem:[#allocation2 + $0x110] sm:$0xff]  ;;  %v180_v43 = vld [vmem:[#allocation2 + $0x118] sm:$0xff] }
  0x1a   :  { %67 = vst.msk [vmem:[#allocation2 + $0x190] sm:$0xff] %vm16_vm0, %v1257_v1  ;;  %68 = vst.msk [vmem:[#allocation2 + $0x198] sm:$0xff] %vm16_vm0, %v1257_v1  ;;  %v181_v63 = vld [vmem:[#allocation2 + $0x120] sm:$0xff]  ;;  %v182_v9 = vld [vmem:[#allocation2 + $0x128] sm:$0xff] }
  0x1b   :  { %69 = vst.msk [vmem:[#allocation2 + $0x1a0] sm:$0xff] %vm16_vm0, %v1257_v1  ;;  %70 = vst.msk [vmem:[#allocation2 + $0x1a8] sm:$0xff] %vm16_vm0, %v1257_v1  ;;  %v183_v61 = vld [vmem:[#allocation2 + $0x130] sm:$0xff]  ;;  %v184_v3 = vld [vmem:[#allocation2 + $0x138] sm:$0xff] }
  0x1c   :  { %71 = vst.msk [vmem:[#allocation2 + $0x1b0] sm:$0xff] %vm16_vm0, %v1257_v1  ;;  %72 = vst.msk [vmem:[#allocation2 + $0x1b8] sm:$0xff] %vm16_vm0, %v1257_v1 }
  0x1d   :  { %73 = vst.msk [vmem:[#allocation2 + $0x1c0] sm:$0xff] %vm16_vm0, %v1257_v1  ;;  %74 = vst.msk [vmem:[#allocation2 + $0x1c8] sm:$0xff] %vm16_vm0, %v1257_v1 }
  0x1e   :  { %75 = vst.msk [vmem:[#allocation2 + $0x1d0] sm:$0xff] %vm16_vm0, %v1257_v1  ;;  %76 = vst.msk [vmem:[#allocation2 + $0x1d8] sm:$0xff] %vm16_vm0, %v1257_v1  ;;  %1160 = vmatmul.mubr.msk.bf16.gmra.mrb[8].mxu0 %vm393_vm1, %v1235_v14  ;;  %1192 = vmatmul.mubr.msk.bf16.gmra.mrb[8].mxu1 %vm393_vm1, %v1236_v15 }
  0x1f   :  { %77 = vst.msk [vmem:[#allocation2 + $0x1e0] sm:$0xff] %vm16_vm0, %v1257_v1  ;;  %78 = vst.msk [vmem:[#allocation2 + $0x1e8] sm:$0xff] %vm16_vm0, %v1257_v1  ;;  %1163 = vmatprep.mubr.msk.bf16.mxu0 %vm393_vm1, %v1237_v16  ;;  %1195 = vmatprep.mubr.msk.bf16.mxu1 %vm393_vm1, %v1238_v17 }
  0x20   :  { %79 = vst.msk [vmem:[#allocation2 + $0x1f0] sm:$0xff] %vm16_vm0, %v1257_v1  ;;  %80 = vst.msk [vmem:[#allocation2 + $0x1f8] sm:$0xff] %vm16_vm0, %v1257_v1 }
  0x26   :  { %1164 = vmatmul.mubr.msk.bf16.gmra.mrb[12].mxu0 %vm393_vm1, %v1239_v18  ;;  %1196 = vmatmul.mubr.msk.bf16.gmra.mrb[12].mxu1 %vm393_vm1, %v1240_v19 }
  0x27   :  { %1167 = vmatprep.mubr.msk.bf16.mxu0 %vm393_vm1, %v1241_v20  ;;  %1199 = vmatprep.mubr.msk.bf16.mxu1 %vm393_vm1, %v1242_v21 }
  0x2e   :  { %1168 = vmatmul.mubr.msk.bf16.gmra.mrb[16].mxu0 %vm393_vm1, %v1243_v22  ;;  %1200 = vmatmul.mubr.msk.bf16.gmra.mrb[16].mxu1 %vm393_vm1, %v1244_v23 }
  0x2f   :  { %1171 = vmatprep.mubr.msk.bf16.mxu0 %vm393_vm1, %v1245_v24  ;;  %1203 = vmatprep.mubr.msk.bf16.mxu1 %vm393_vm1, %v1246_v25 }
  0x36   :  { %1172 = vmatmul.mubr.msk.bf16.gmra.mrb[20].mxu0 %vm393_vm1, %v1247_v26  ;;  %1204 = vmatmul.mubr.msk.bf16.gmra.mrb[20].mxu1 %vm393_vm1, %v1248_v27 }
  0x37   :  { %1175 = vmatprep.mubr.msk.bf16.mxu0 %vm393_vm1, %v1249_v28  ;;  %1207 = vmatprep.mubr.msk.bf16.mxu1 %vm393_vm1, %v1250_v29  ;;  %v155_v28 = vld [vmem:[#allocation2 + $0x50] sm:$0xff] }
  0x38   :  { %v187_v29 = vld [vmem:[#allocation2 + $0x150] sm:$0xff] }
  0x3e   :  { %1176 = vmatmul.mubr.msk.bf16.gmra.mrb[24].mxu0 %vm393_vm1, %v1251_v30  ;;  %1208 = vmatmul.mubr.msk.bf16.gmra.mrb[24].mxu1 %vm393_vm1, %v1252_v31  ;;  %v153_v30 = vld [vmem:[#allocation2 + $0x40] sm:$0xff] }
  0x3f   :  { %1179 = vmatprep.mubr.msk.bf16.mxu0 %vm393_vm1, %v1253_v32  ;;  %1211 = vmatprep.mubr.msk.bf16.mxu1 %vm393_vm1, %v1254_v33  ;;  %v185_v31 = vld [vmem:[#allocation2 + $0x140] sm:$0xff] }
  0x46   :  { %1180 = vmatmul.mubr.msk.bf16.gmra.mrb[28].mxu0 %vm393_vm1, %v1255_v34  ;;  %1212 = vmatmul.mubr.msk.bf16.gmra.mrb[28].mxu1 %vm393_vm1, %v1256_v35  ;;  %v156_v34 = vld [vmem:[#allocation2 + $0x58] sm:$0xff] }
  0x47   :  { %v188_v35 = vld [vmem:[#allocation2 + $0x158] sm:$0xff] }
  0xe1   :  { %v1153_v40 = vpop.f32.mrb[0].mxu0  ;;  %v1185_v41 = vpop.f32.mrb[0].mxu1 }
  0xe2   :  { %v781_v44 = vadd.f32 %v1153_v40, %v147_v36  ;;  %v813_v45 = vadd.f32 %v1185_v41, %v179_v37  ;;  %v524_v46 = vpop.f32.mrb[1].mxu0  ;;  %v652_v47 = vpop.f32.mrb[1].mxu1  ;;  %v154_v40 = vld [vmem:[#allocation2 + $0x48] sm:$0xff] }
  0xe3   :  { %v779_v50 = vadd.f32 %v524_v46, %v145_v38  ;;  %v811_v51 = vadd.f32 %v652_v47, %v177_v39  ;;  %v1154_v52 = vpop.f32.mrb[2].mxu0  ;;  %v1186_v53 = vpop.f32.mrb[2].mxu1  ;;  %v186_v41 = vld [vmem:[#allocation2 + $0x148] sm:$0xff] }
  0xe4   :  { %846 = vst.msk [vmem:[#allocation2 + $0x10] sm:$0xff] %vm16_vm0, %v781_v44  ;;  %878 = vst.msk [vmem:[#allocation2 + $0x110] sm:$0xff] %vm16_vm0, %v813_v45  ;;  %v782_v54 = vadd.f32 %v1154_v52, %v148_v42  ;;  %v814_v55 = vadd.f32 %v1186_v53, %v180_v43  ;;  %v527_v56 = vpop.f32.mrb[3].mxu0  ;;  %v655_v57 = vpop.f32.mrb[3].mxu1 }
  0xe5   :  { %844 = vst.msk [vmem:[#allocation2] sm:$0xff] %vm16_vm0, %v779_v50  ;;  %876 = vst.msk [vmem:[#allocation2 + $0x100] sm:$0xff] %vm16_vm0, %v811_v51  ;;  %v780_v58 = vadd.f32 %v527_v56, %v146_v48  ;;  %v812_v59 = vadd.f32 %v655_v57, %v178_v49 }
  0xe6   :  { %847 = vst.msk [vmem:[#allocation2 + $0x18] sm:$0xff] %vm16_vm0, %v782_v54  ;;  %879 = vst.msk [vmem:[#allocation2 + $0x118] sm:$0xff] %vm16_vm0, %v814_v55 }
  0xe7   :  { %845 = vst.msk [vmem:[#allocation2 + $0x8] sm:$0xff] %vm16_vm0, %v780_v58  ;;  %877 = vst.msk [vmem:[#allocation2 + $0x108] sm:$0xff] %vm16_vm0, %v812_v59 }
  0xe9   :  { %v1157_v0 = vpop.f32.mrb[4].mxu0  ;;  %v1189_v1 = vpop.f32.mrb[4].mxu1 }
  0xea   :  { %v785_v4 = vadd.f32 %v1157_v0, %v151_v60  ;;  %v817_v5 = vadd.f32 %v1189_v1, %v183_v61  ;;  %v540_v6 = vpop.f32.mrb[5].mxu0  ;;  %v668_v7 = vpop.f32.mrb[5].mxu1  ;;  %v159_v60 = vld [vmem:[#allocation2 + $0x70] sm:$0xff] }
  0xeb   :  { %v913_v10 = vld [vmem:[#allocation2 + $0x10] sm:$0xff]  ;;  %v783_v12 = vadd.f32 %v540_v6, %v149_v62  ;;  %v815_v13 = vadd.f32 %v668_v7, %v181_v63  ;;  %v1158_v14 = vpop.f32.mrb[6].mxu0  ;;  %v1190_v15 = vpop.f32.mrb[6].mxu1  ;;  %v157_v62 = vld [vmem:[#allocation2 + $0x60] sm:$0xff] }
  0xec   :  { %v945_v11 = vld [vmem:[#allocation2 + $0x110] sm:$0xff]  ;;  %977 = vst.msk [vmem:[%s1866_s2 + $0x10] sm:$0xff] %vm16_vm0, %v913_v10  ;;  %v911_v16 = vld [vmem:[#allocation2] sm:$0xff]  ;;  %850 = vst.msk [vmem:[#allocation2 + $0x30] sm:$0xff] %vm16_vm0, %v785_v4  ;;  %v786_v18 = vadd.f32 %v1158_v14, %v152_v2  ;;  %v818_v19 = vadd.f32 %v1190_v15, %v184_v3  ;;  %v543_v20 = vpop.f32.mrb[7].mxu0  ;;  %v671_v21 = vpop.f32.mrb[7].mxu1 }
  0xed   :  { %1009 = vst.msk [vmem:[%s1866_s2 + $0x110] sm:$0xff] %vm16_vm0, %v945_v11  ;;  %v943_v17 = vld [vmem:[#allocation2 + $0x100] sm:$0xff]  ;;  %882 = vst.msk [vmem:[#allocation2 + $0x130] sm:$0xff] %vm16_vm0, %v817_v5  ;;  %v914_v22 = vld [vmem:[#allocation2 + $0x18] sm:$0xff]  ;;  %v784_v24 = vadd.f32 %v543_v20, %v150_v8  ;;  %v816_v25 = vadd.f32 %v671_v21, %v182_v9 }
  0xee   :  { %975 = vst.msk [vmem:[%s1866_s2] sm:$0xff] %vm16_vm0, %v911_v16  ;;  %1007 = vst.msk [vmem:[%s1866_s2 + $0x100] sm:$0xff] %vm16_vm0, %v943_v17  ;;  %v946_v23 = vld [vmem:[#allocation2 + $0x118] sm:$0xff]  ;;  %v912_v26 = vld [vmem:[#allocation2 + $0x8] sm:$0xff] }
  0xef   :  { %848 = vst.msk [vmem:[#allocation2 + $0x20] sm:$0xff] %vm16_vm0, %v783_v12  ;;  %880 = vst.msk [vmem:[#allocation2 + $0x120] sm:$0xff] %vm16_vm0, %v815_v13  ;;  %v944_v27 = vld [vmem:[#allocation2 + $0x108] sm:$0xff]  ;;  %v191_v61 = vld [vmem:[#allocation2 + $0x170] sm:$0xff] }
  0xf0   :  { %978 = vst.msk [vmem:[%s1866_s2 + $0x18] sm:$0xff] %vm16_vm0, %v914_v22  ;;  %1010 = vst.msk [vmem:[%s1866_s2 + $0x118] sm:$0xff] %vm16_vm0, %v946_v23  ;;  %v189_v63 = vld [vmem:[#allocation2 + $0x160] sm:$0xff]  ;;  %v160_v2 = vld [vmem:[#allocation2 + $0x78] sm:$0xff] }
  0xf1   :  { %851 = vst.msk [vmem:[#allocation2 + $0x38] sm:$0xff] %vm16_vm0, %v786_v18  ;;  %883 = vst.msk [vmem:[#allocation2 + $0x138] sm:$0xff] %vm16_vm0, %v818_v19  ;;  %v1161_v32 = vpop.f32.mrb[8].mxu0  ;;  %v1193_v33 = vpop.f32.mrb[8].mxu1  ;;  %v192_v3 = vld [vmem:[#allocation2 + $0x178] sm:$0xff]  ;;  %v158_v8 = vld [vmem:[#allocation2 + $0x68] sm:$0xff] }
  0xf2   :  { %976 = vst.msk [vmem:[%s1866_s2 + $0x8] sm:$0xff] %vm16_vm0, %v912_v26  ;;  %1008 = vst.msk [vmem:[%s1866_s2 + $0x108] sm:$0xff] %vm16_vm0, %v944_v27  ;;  %v789_v36 = vadd.f32 %v1161_v32, %v155_v28  ;;  %v821_v37 = vadd.f32 %v1193_v33, %v187_v29  ;;  %v556_v38 = vpop.f32.mrb[9].mxu0  ;;  %v684_v39 = vpop.f32.mrb[9].mxu1  ;;  %v190_v9 = vld [vmem:[#allocation2 + $0x168] sm:$0xff]  ;;  %v163_v28 = vld [vmem:[#allocation2 + $0x90] sm:$0xff] }
  0xf3   :  { %849 = vst.msk [vmem:[#allocation2 + $0x28] sm:$0xff] %vm16_vm0, %v784_v24  ;;  %881 = vst.msk [vmem:[#allocation2 + $0x128] sm:$0xff] %vm16_vm0, %v816_v25  ;;  %v917_v42 = vld [vmem:[#allocation2 + $0x30] sm:$0xff]  ;;  %v787_v44 = vadd.f32 %v556_v38, %v153_v30  ;;  %v819_v45 = vadd.f32 %v684_v39, %v185_v31  ;;  %v1162_v46 = vpop.f32.mrb[10].mxu0  ;;  %v1194_v47 = vpop.f32.mrb[10].mxu1  ;;  %v161_v30 = vld [vmem:[#allocation2 + $0x80] sm:$0xff] }
  0xf4   :  { %v949_v43 = vld [vmem:[#allocation2 + $0x130] sm:$0xff]  ;;  %981 = vst.msk [vmem:[%s1866_s2 + $0x30] sm:$0xff] %vm16_vm0, %v917_v42  ;;  %854 = vst.msk [vmem:[#allocation2 + $0x50] sm:$0xff] %vm16_vm0, %v789_v36  ;;  %v790_v50 = vadd.f32 %v1162_v46, %v156_v34  ;;  %v822_v51 = vadd.f32 %v1194_v47, %v188_v35  ;;  %v559_v52 = vpop.f32.mrb[11].mxu0  ;;  %v687_v53 = vpop.f32.mrb[11].mxu1  ;;  %v193_v31 = vld [vmem:[#allocation2 + $0x180] sm:$0xff] }
  0xf5   :  { %1013 = vst.msk [vmem:[%s1866_s2 + $0x130] sm:$0xff] %vm16_vm0, %v949_v43  ;;  %886 = vst.msk [vmem:[#allocation2 + $0x150] sm:$0xff] %vm16_vm0, %v821_v37  ;;  %v788_v56 = vadd.f32 %v559_v52, %v154_v40  ;;  %v820_v57 = vadd.f32 %v687_v53, %v186_v41  ;;  %v195_v29 = vld [vmem:[#allocation2 + $0x190] sm:$0xff]  ;;  %v164_v34 = vld [vmem:[#allocation2 + $0x98] sm:$0xff] }
  0xf6   :  { %v915_v48 = vld [vmem:[#allocation2 + $0x20] sm:$0xff]  ;;  %852 = vst.msk [vmem:[#allocation2 + $0x40] sm:$0xff] %vm16_vm0, %v787_v44  ;;  %884 = vst.msk [vmem:[#allocation2 + $0x140] sm:$0xff] %vm16_vm0, %v819_v45  ;;  %v196_v35 = vld [vmem:[#allocation2 + $0x198] sm:$0xff] }
  0xf7   :  { %v947_v49 = vld [vmem:[#allocation2 + $0x120] sm:$0xff]  ;;  %979 = vst.msk [vmem:[%s1866_s2 + $0x20] sm:$0xff] %vm16_vm0, %v915_v48  ;;  %855 = vst.msk [vmem:[#allocation2 + $0x58] sm:$0xff] %vm16_vm0, %v790_v50  ;;  %v162_v40 = vld [vmem:[#allocation2 + $0x88] sm:$0xff] }
  0xf8   :  { %1011 = vst.msk [vmem:[%s1866_s2 + $0x120] sm:$0xff] %vm16_vm0, %v947_v49  ;;  %v918_v54 = vld [vmem:[#allocation2 + $0x38] sm:$0xff]  ;;  %887 = vst.msk [vmem:[#allocation2 + $0x158] sm:$0xff] %vm16_vm0, %v822_v51  ;;  %v194_v41 = vld [vmem:[#allocation2 + $0x188] sm:$0xff] }
  0xf9   :  { %v950_v55 = vld [vmem:[#allocation2 + $0x138] sm:$0xff]  ;;  %982 = vst.msk [vmem:[%s1866_s2 + $0x38] sm:$0xff] %vm16_vm0, %v918_v54  ;;  %853 = vst.msk [vmem:[#allocation2 + $0x48] sm:$0xff] %vm16_vm0, %v788_v56  ;;  %v1165_v0 = vpop.f32.mrb[12].mxu0  ;;  %v1197_v1 = vpop.f32.mrb[12].mxu1 }
  0xfa   :  { %1014 = vst.msk [vmem:[%s1866_s2 + $0x138] sm:$0xff] %vm16_vm0, %v950_v55  ;;  %v916_v58 = vld [vmem:[#allocation2 + $0x28] sm:$0xff]  ;;  %885 = vst.msk [vmem:[#allocation2 + $0x148] sm:$0xff] %vm16_vm0, %v820_v57  ;;  %v793_v4 = vadd.f32 %v1165_v0, %v159_v60  ;;  %v825_v5 = vadd.f32 %v1197_v1, %v191_v61  ;;  %v572_v6 = vpop.f32.mrb[13].mxu0  ;;  %v700_v7 = vpop.f32.mrb[13].mxu1  ;;  %v167_v60 = vld [vmem:[#allocation2 + $0xb0] sm:$0xff] }
  0xfb   :  { %v948_v59 = vld [vmem:[#allocation2 + $0x128] sm:$0xff]  ;;  %980 = vst.msk [vmem:[%s1866_s2 + $0x28] sm:$0xff] %vm16_vm0, %v916_v58  ;;  %v921_v10 = vld [vmem:[#allocation2 + $0x50] sm:$0xff]  ;;  %v791_v12 = vadd.f32 %v572_v6, %v157_v62  ;;  %v823_v13 = vadd.f32 %v700_v7, %v189_v63  ;;  %v1166_v14 = vpop.f32.mrb[14].mxu0  ;;  %v1198_v15 = vpop.f32.mrb[14].mxu1  ;;  %v165_v62 = vld [vmem:[#allocation2 + $0xa0] sm:$0xff] }
  0xfc   :  { %1012 = vst.msk [vmem:[%s1866_s2 + $0x128] sm:$0xff] %vm16_vm0, %v948_v59  ;;  %v953_v11 = vld [vmem:[#allocation2 + $0x150] sm:$0xff]  ;;  %985 = vst.msk [vmem:[%s1866_s2 + $0x50] sm:$0xff] %vm16_vm0, %v921_v10  ;;  %v794_v18 = vadd.f32 %v1166_v14, %v160_v2  ;;  %v826_v19 = vadd.f32 %v1198_v15, %v192_v3  ;;  %v575_v20 = vpop.f32.mrb[15].mxu0  ;;  %v703_v21 = vpop.f32.mrb[15].mxu1  ;;  %v197_v63 = vld [vmem:[#allocation2 + $0x1a0] sm:$0xff] }
  0xfd   :  { %1017 = vst.msk [vmem:[%s1866_s2 + $0x150] sm:$0xff] %vm16_vm0, %v953_v11  ;;  %v919_v16 = vld [vmem:[#allocation2 + $0x40] sm:$0xff]  ;;  %858 = vst.msk [vmem:[#allocation2 + $0x70] sm:$0xff] %vm16_vm0, %v793_v4  ;;  %v792_v24 = vadd.f32 %v575_v20, %v158_v8  ;;  %v824_v25 = vadd.f32 %v703_v21, %v190_v9  ;;  %v199_v61 = vld [vmem:[#allocation2 + $0x1b0] sm:$0xff] }
  0xfe   :  { %v951_v17 = vld [vmem:[#allocation2 + $0x140] sm:$0xff]  ;;  %890 = vst.msk [vmem:[#allocation2 + $0x170] sm:$0xff] %vm16_vm0, %v825_v5  ;;  %983 = vst.msk [vmem:[%s1866_s2 + $0x40] sm:$0xff] %vm16_vm0, %v919_v16  ;;  %v922_v22 = vld [vmem:[#allocation2 + $0x58] sm:$0xff] }
  0xff   :  { %1015 = vst.msk [vmem:[%s1866_s2 + $0x140] sm:$0xff] %vm16_vm0, %v951_v17  ;;  %v954_v23 = vld [vmem:[#allocation2 + $0x158] sm:$0xff]  ;;  %856 = vst.msk [vmem:[#allocation2 + $0x60] sm:$0xff] %vm16_vm0, %v791_v12  ;;  %v166_v8 = vld [vmem:[#allocation2 + $0xa8] sm:$0xff] }
 0x100   :  { %888 = vst.msk [vmem:[#allocation2 + $0x160] sm:$0xff] %vm16_vm0, %v823_v13  ;;  %986 = vst.msk [vmem:[%s1866_s2 + $0x58] sm:$0xff] %vm16_vm0, %v922_v22  ;;  %v920_v26 = vld [vmem:[#allocation2 + $0x48] sm:$0xff]  ;;  %v168_v2 = vld [vmem:[#allocation2 + $0xb8] sm:$0xff] }
 0x101   :  { %1018 = vst.msk [vmem:[%s1866_s2 + $0x158] sm:$0xff] %vm16_vm0, %v954_v23  ;;  %v952_v27 = vld [vmem:[#allocation2 + $0x148] sm:$0xff]  ;;  %859 = vst.msk [vmem:[#allocation2 + $0x78] sm:$0xff] %vm16_vm0, %v794_v18  ;;  %v1169_v32 = vpop.f32.mrb[16].mxu0  ;;  %v1201_v33 = vpop.f32.mrb[16].mxu1  ;;  %v200_v3 = vld [vmem:[#allocation2 + $0x1b8] sm:$0xff] }
 0x102   :  { %891 = vst.msk [vmem:[#allocation2 + $0x178] sm:$0xff] %vm16_vm0, %v826_v19  ;;  %984 = vst.msk [vmem:[%s1866_s2 + $0x48] sm:$0xff] %vm16_vm0, %v920_v26  ;;  %v797_v36 = vadd.f32 %v1169_v32, %v163_v28  ;;  %v829_v37 = vadd.f32 %v1201_v33, %v195_v29  ;;  %v588_v38 = vpop.f32.mrb[17].mxu0  ;;  %v716_v39 = vpop.f32.mrb[17].mxu1  ;;  %v198_v9 = vld [vmem:[#allocation2 + $0x1a8] sm:$0xff]  ;;  %v171_v28 = vld [vmem:[#allocation2 + $0xd0] sm:$0xff] }
 0x103   :  { %1016 = vst.msk [vmem:[%s1866_s2 + $0x148] sm:$0xff] %vm16_vm0, %v952_v27  ;;  %857 = vst.msk [vmem:[#allocation2 + $0x68] sm:$0xff] %vm16_vm0, %v792_v24  ;;  %v795_v44 = vadd.f32 %v588_v38, %v161_v30  ;;  %v827_v45 = vadd.f32 %v716_v39, %v193_v31  ;;  %v1170_v46 = vpop.f32.mrb[18].mxu0  ;;  %v1202_v47 = vpop.f32.mrb[18].mxu1  ;;  %v203_v29 = vld [vmem:[#allocation2 + $0x1d0] sm:$0xff]  ;;  %v169_v30 = vld [vmem:[#allocation2 + $0xc0] sm:$0xff] }
 0x104   :  { %889 = vst.msk [vmem:[#allocation2 + $0x168] sm:$0xff] %vm16_vm0, %v824_v25  ;;  %v925_v42 = vld [vmem:[#allocation2 + $0x70] sm:$0xff]  ;;  %862 = vst.msk [vmem:[#allocation2 + $0x90] sm:$0xff] %vm16_vm0, %v797_v36  ;;  %v798_v50 = vadd.f32 %v1170_v46, %v164_v34  ;;  %v830_v51 = vadd.f32 %v1202_v47, %v196_v35  ;;  %v591_v52 = vpop.f32.mrb[19].mxu0  ;;  %v719_v53 = vpop.f32.mrb[19].mxu1  ;;  %v201_v31 = vld [vmem:[#allocation2 + $0x1c0] sm:$0xff] }
 0x105   :  { %v957_v43 = vld [vmem:[#allocation2 + $0x170] sm:$0xff]  ;;  %989 = vst.msk [vmem:[%s1866_s2 + $0x70] sm:$0xff] %vm16_vm0, %v925_v42  ;;  %894 = vst.msk [vmem:[#allocation2 + $0x190] sm:$0xff] %vm16_vm0, %v829_v37  ;;  %v796_v56 = vadd.f32 %v591_v52, %v162_v40  ;;  %v828_v57 = vadd.f32 %v719_v53, %v194_v41  ;;  %v172_v34 = vld [vmem:[#allocation2 + $0xd8] sm:$0xff] }
 0x106   :  { %1021 = vst.msk [vmem:[%s1866_s2 + $0x170] sm:$0xff] %vm16_vm0, %v957_v43  ;;  %v923_v48 = vld [vmem:[#allocation2 + $0x60] sm:$0xff]  ;;  %860 = vst.msk [vmem:[#allocation2 + $0x80] sm:$0xff] %vm16_vm0, %v795_v44  ;;  %v204_v35 = vld [vmem:[#allocation2 + $0x1d8] sm:$0xff] }
 0x107   :  { %v955_v49 = vld [vmem:[#allocation2 + $0x160] sm:$0xff]  ;;  %987 = vst.msk [vmem:[%s1866_s2 + $0x60] sm:$0xff] %vm16_vm0, %v923_v48  ;;  %892 = vst.msk [vmem:[#allocation2 + $0x180] sm:$0xff] %vm16_vm0, %v827_v45  ;;  %v170_v40 = vld [vmem:[#allocation2 + $0xc8] sm:$0xff] }
 0x108   :  { %1019 = vst.msk [vmem:[%s1866_s2 + $0x160] sm:$0xff] %vm16_vm0, %v955_v49  ;;  %v926_v54 = vld [vmem:[#allocation2 + $0x78] sm:$0xff]  ;;  %863 = vst.msk [vmem:[#allocation2 + $0x98] sm:$0xff] %vm16_vm0, %v798_v50  ;;  %v202_v41 = vld [vmem:[#allocation2 + $0x1c8] sm:$0xff] }
 0x109   :  { %v958_v55 = vld [vmem:[#allocation2 + $0x178] sm:$0xff]  ;;  %990 = vst.msk [vmem:[%s1866_s2 + $0x78] sm:$0xff] %vm16_vm0, %v926_v54  ;;  %895 = vst.msk [vmem:[#allocation2 + $0x198] sm:$0xff] %vm16_vm0, %v830_v51  ;;  %v1173_v0 = vpop.f32.mrb[20].mxu0  ;;  %v1205_v1 = vpop.f32.mrb[20].mxu1 }
 0x10a   :  { %1022 = vst.msk [vmem:[%s1866_s2 + $0x178] sm:$0xff] %vm16_vm0, %v958_v55  ;;  %v924_v58 = vld [vmem:[#allocation2 + $0x68] sm:$0xff]  ;;  %861 = vst.msk [vmem:[#allocation2 + $0x88] sm:$0xff] %vm16_vm0, %v796_v56  ;;  %v801_v4 = vadd.f32 %v1173_v0, %v167_v60  ;;  %v833_v5 = vadd.f32 %v1205_v1, %v199_v61  ;;  %v604_v6 = vpop.f32.mrb[21].mxu0  ;;  %v732_v7 = vpop.f32.mrb[21].mxu1  ;;  %v175_v60 = vld [vmem:[#allocation2 + $0xf0] sm:$0xff] }
 0x10b   :  { %v956_v59 = vld [vmem:[#allocation2 + $0x168] sm:$0xff]  ;;  %988 = vst.msk [vmem:[%s1866_s2 + $0x68] sm:$0xff] %vm16_vm0, %v924_v58  ;;  %893 = vst.msk [vmem:[#allocation2 + $0x188] sm:$0xff] %vm16_vm0, %v828_v57  ;;  %v929_v10 = vld [vmem:[#allocation2 + $0x90] sm:$0xff]  ;;  %v799_v12 = vadd.f32 %v604_v6, %v165_v62  ;;  %v831_v13 = vadd.f32 %v732_v7, %v197_v63  ;;  %v1174_v14 = vpop.f32.mrb[22].mxu0  ;;  %v1206_v15 = vpop.f32.mrb[22].mxu1 }
 0x10c   :  { %1020 = vst.msk [vmem:[%s1866_s2 + $0x168] sm:$0xff] %vm16_vm0, %v956_v59  ;;  %v961_v11 = vld [vmem:[#allocation2 + $0x190] sm:$0xff]  ;;  %993 = vst.msk [vmem:[%s1866_s2 + $0x90] sm:$0xff] %vm16_vm0, %v929_v10  ;;  %v802_v18 = vadd.f32 %v1174_v14, %v168_v2  ;;  %v834_v19 = vadd.f32 %v1206_v15, %v200_v3  ;;  %v607_v20 = vpop.f32.mrb[23].mxu0  ;;  %v735_v21 = vpop.f32.mrb[23].mxu1  ;;  %v173_v62 = vld [vmem:[#allocation2 + $0xe0] sm:$0xff] }
 0x10d   :  { %1025 = vst.msk [vmem:[%s1866_s2 + $0x190] sm:$0xff] %vm16_vm0, %v961_v11  ;;  %v927_v16 = vld [vmem:[#allocation2 + $0x80] sm:$0xff]  ;;  %866 = vst.msk [vmem:[#allocation2 + $0xb0] sm:$0xff] %vm16_vm0, %v801_v4  ;;  %v800_v24 = vadd.f32 %v607_v20, %v166_v8  ;;  %v832_v25 = vadd.f32 %v735_v21, %v198_v9  ;;  %v207_v61 = vld [vmem:[#allocation2 + $0x1f0] sm:$0xff] }
 0x10e   :  { %v959_v17 = vld [vmem:[#allocation2 + $0x180] sm:$0xff]  ;;  %898 = vst.msk [vmem:[#allocation2 + $0x1b0] sm:$0xff] %vm16_vm0, %v833_v5  ;;  %991 = vst.msk [vmem:[%s1866_s2 + $0x80] sm:$0xff] %vm16_vm0, %v927_v16  ;;  %v176_v2 = vld [vmem:[#allocation2 + $0xf8] sm:$0xff] }
 0x10f   :  { %1023 = vst.msk [vmem:[%s1866_s2 + $0x180] sm:$0xff] %vm16_vm0, %v959_v17  ;;  %v930_v22 = vld [vmem:[#allocation2 + $0x98] sm:$0xff]  ;;  %864 = vst.msk [vmem:[#allocation2 + $0xa0] sm:$0xff] %vm16_vm0, %v799_v12  ;;  %v205_v63 = vld [vmem:[#allocation2 + $0x1e0] sm:$0xff] }
 0x110   :  { %v962_v23 = vld [vmem:[#allocation2 + $0x198] sm:$0xff]  ;;  %896 = vst.msk [vmem:[#allocation2 + $0x1a0] sm:$0xff] %vm16_vm0, %v831_v13  ;;  %994 = vst.msk [vmem:[%s1866_s2 + $0x98] sm:$0xff] %vm16_vm0, %v930_v22  ;;  %v174_v8 = vld [vmem:[#allocation2 + $0xe8] sm:$0xff] }
 0x111   :  { %1026 = vst.msk [vmem:[%s1866_s2 + $0x198] sm:$0xff] %vm16_vm0, %v962_v23  ;;  %v928_v26 = vld [vmem:[#allocation2 + $0x88] sm:$0xff]  ;;  %867 = vst.msk [vmem:[#allocation2 + $0xb8] sm:$0xff] %vm16_vm0, %v802_v18  ;;  %v1177_v32 = vpop.f32.mrb[24].mxu0  ;;  %v1209_v33 = vpop.f32.mrb[24].mxu1  ;;  %v208_v3 = vld [vmem:[#allocation2 + $0x1f8] sm:$0xff] }
 0x112   :  { %v960_v27 = vld [vmem:[#allocation2 + $0x188] sm:$0xff]  ;;  %899 = vst.msk [vmem:[#allocation2 + $0x1b8] sm:$0xff] %vm16_vm0, %v834_v19  ;;  %992 = vst.msk [vmem:[%s1866_s2 + $0x88] sm:$0xff] %vm16_vm0, %v928_v26  ;;  %v805_v36 = vadd.f32 %v1177_v32, %v171_v28  ;;  %v837_v37 = vadd.f32 %v1209_v33, %v203_v29  ;;  %v620_v38 = vpop.f32.mrb[25].mxu0  ;;  %v748_v39 = vpop.f32.mrb[25].mxu1 }
 0x113   :  { %1024 = vst.msk [vmem:[%s1866_s2 + $0x188] sm:$0xff] %vm16_vm0, %v960_v27  ;;  %865 = vst.msk [vmem:[#allocation2 + $0xa8] sm:$0xff] %vm16_vm0, %v800_v24  ;;  %v803_v44 = vadd.f32 %v620_v38, %v169_v30  ;;  %v835_v45 = vadd.f32 %v748_v39, %v201_v31  ;;  %v1178_v46 = vpop.f32.mrb[26].mxu0  ;;  %v1210_v47 = vpop.f32.mrb[26].mxu1  ;;  %v206_v9 = vld [vmem:[#allocation2 + $0x1e8] sm:$0xff] }
 0x114   :  { %897 = vst.msk [vmem:[#allocation2 + $0x1a8] sm:$0xff] %vm16_vm0, %v832_v25  ;;  %v933_v42 = vld [vmem:[#allocation2 + $0xb0] sm:$0xff]  ;;  %870 = vst.msk [vmem:[#allocation2 + $0xd0] sm:$0xff] %vm16_vm0, %v805_v36  ;;  %v806_v50 = vadd.f32 %v1178_v46, %v172_v34  ;;  %v838_v51 = vadd.f32 %v1210_v47, %v204_v35  ;;  %v623_v52 = vpop.f32.mrb[27].mxu0  ;;  %v751_v53 = vpop.f32.mrb[27].mxu1 }
 0x115   :  { %v965_v43 = vld [vmem:[#allocation2 + $0x1b0] sm:$0xff]  ;;  %997 = vst.msk [vmem:[%s1866_s2 + $0xb0] sm:$0xff] %vm16_vm0, %v933_v42  ;;  %902 = vst.msk [vmem:[#allocation2 + $0x1d0] sm:$0xff] %vm16_vm0, %v837_v37  ;;  %v804_v56 = vadd.f32 %v623_v52, %v170_v40  ;;  %v836_v57 = vadd.f32 %v751_v53, %v202_v41 }
 0x116   :  { %1029 = vst.msk [vmem:[%s1866_s2 + $0x1b0] sm:$0xff] %vm16_vm0, %v965_v43  ;;  %v931_v48 = vld [vmem:[#allocation2 + $0xa0] sm:$0xff]  ;;  %868 = vst.msk [vmem:[#allocation2 + $0xc0] sm:$0xff] %vm16_vm0, %v803_v44 }
 0x117   :  { %v963_v49 = vld [vmem:[#allocation2 + $0x1a0] sm:$0xff]  ;;  %995 = vst.msk [vmem:[%s1866_s2 + $0xa0] sm:$0xff] %vm16_vm0, %v931_v48  ;;  %900 = vst.msk [vmem:[#allocation2 + $0x1c0] sm:$0xff] %vm16_vm0, %v835_v45 }
 0x118   :  { %1027 = vst.msk [vmem:[%s1866_s2 + $0x1a0] sm:$0xff] %vm16_vm0, %v963_v49  ;;  %v934_v54 = vld [vmem:[#allocation2 + $0xb8] sm:$0xff]  ;;  %871 = vst.msk [vmem:[#allocation2 + $0xd8] sm:$0xff] %vm16_vm0, %v806_v50 }
 0x119   :  { %v966_v55 = vld [vmem:[#allocation2 + $0x1b8] sm:$0xff]  ;;  %998 = vst.msk [vmem:[%s1866_s2 + $0xb8] sm:$0xff] %vm16_vm0, %v934_v54  ;;  %903 = vst.msk [vmem:[#allocation2 + $0x1d8] sm:$0xff] %vm16_vm0, %v838_v51  ;;  %v1181_v0 = vpop.f32.mrb[28].mxu0  ;;  %v1213_v1 = vpop.f32.mrb[28].mxu1 }
 0x11a   :  { %1030 = vst.msk [vmem:[%s1866_s2 + $0x1b8] sm:$0xff] %vm16_vm0, %v966_v55  ;;  %v932_v58 = vld [vmem:[#allocation2 + $0xa8] sm:$0xff]  ;;  %869 = vst.msk [vmem:[#allocation2 + $0xc8] sm:$0xff] %vm16_vm0, %v804_v56  ;;  %v809_v4 = vadd.f32 %v1181_v0, %v175_v60  ;;  %v841_v5 = vadd.f32 %v1213_v1, %v207_v61  ;;  %v636_v6 = vpop.f32.mrb[29].mxu0  ;;  %v764_v7 = vpop.f32.mrb[29].mxu1 }
 0x11b   :  { %v964_v59 = vld [vmem:[#allocation2 + $0x1a8] sm:$0xff]  ;;  %996 = vst.msk [vmem:[%s1866_s2 + $0xa8] sm:$0xff] %vm16_vm0, %v932_v58  ;;  %901 = vst.msk [vmem:[#allocation2 + $0x1c8] sm:$0xff] %vm16_vm0, %v836_v57  ;;  %v937_v10 = vld [vmem:[#allocation2 + $0xd0] sm:$0xff]  ;;  %v807_v12 = vadd.f32 %v636_v6, %v173_v62  ;;  %v839_v13 = vadd.f32 %v764_v7, %v205_v63  ;;  %v1182_v14 = vpop.f32.mrb[30].mxu0  ;;  %v1214_v15 = vpop.f32.mrb[30].mxu1 }
 0x11c   :  { %1028 = vst.msk [vmem:[%s1866_s2 + $0x1a8] sm:$0xff] %vm16_vm0, %v964_v59  ;;  %v969_v11 = vld [vmem:[#allocation2 + $0x1d0] sm:$0xff]  ;;  %1001 = vst.msk [vmem:[%s1866_s2 + $0xd0] sm:$0xff] %vm16_vm0, %v937_v10  ;;  %v810_v18 = vadd.f32 %v1182_v14, %v176_v2  ;;  %v842_v19 = vadd.f32 %v1214_v15, %v208_v3  ;;  %v639_v20 = vpop.f32.mrb[31].mxu0  ;;  %v767_v21 = vpop.f32.mrb[31].mxu1 }
 0x11d   :  { %1033 = vst.msk [vmem:[%s1866_s2 + $0x1d0] sm:$0xff] %vm16_vm0, %v969_v11  ;;  %v935_v16 = vld [vmem:[#allocation2 + $0xc0] sm:$0xff]  ;;  %874 = vst.msk [vmem:[#allocation2 + $0xf0] sm:$0xff] %vm16_vm0, %v809_v4  ;;  %v808_v24 = vadd.f32 %v639_v20, %v174_v8  ;;  %v840_v25 = vadd.f32 %v767_v21, %v206_v9 }
 0x11e   :  { %v967_v17 = vld [vmem:[#allocation2 + $0x1c0] sm:$0xff]  ;;  %906 = vst.msk [vmem:[#allocation2 + $0x1f0] sm:$0xff] %vm16_vm0, %v841_v5  ;;  %999 = vst.msk [vmem:[%s1866_s2 + $0xc0] sm:$0xff] %vm16_vm0, %v935_v16 }
 0x11f   :  { %1031 = vst.msk [vmem:[%s1866_s2 + $0x1c0] sm:$0xff] %vm16_vm0, %v967_v17  ;;  %v938_v22 = vld [vmem:[#allocation2 + $0xd8] sm:$0xff]  ;;  %872 = vst.msk [vmem:[#allocation2 + $0xe0] sm:$0xff] %vm16_vm0, %v807_v12 }
 0x120   :  { %v970_v23 = vld [vmem:[#allocation2 + $0x1d8] sm:$0xff]  ;;  %904 = vst.msk [vmem:[#allocation2 + $0x1e0] sm:$0xff] %vm16_vm0, %v839_v13  ;;  %1002 = vst.msk [vmem:[%s1866_s2 + $0xd8] sm:$0xff] %vm16_vm0, %v938_v22 }
 0x121   :  { %1034 = vst.msk [vmem:[%s1866_s2 + $0x1d8] sm:$0xff] %vm16_vm0, %v970_v23  ;;  %v936_v26 = vld [vmem:[#allocation2 + $0xc8] sm:$0xff]  ;;  %875 = vst.msk [vmem:[#allocation2 + $0xf8] sm:$0xff] %vm16_vm0, %v810_v18 }
 0x122   :  { %v968_v27 = vld [vmem:[#allocation2 + $0x1c8] sm:$0xff]  ;;  %907 = vst.msk [vmem:[#allocation2 + $0x1f8] sm:$0xff] %vm16_vm0, %v842_v19  ;;  %1000 = vst.msk [vmem:[%s1866_s2 + $0xc8] sm:$0xff] %vm16_vm0, %v936_v26 }
 0x123   :  { %1032 = vst.msk [vmem:[%s1866_s2 + $0x1c8] sm:$0xff] %vm16_vm0, %v968_v27  ;;  %873 = vst.msk [vmem:[#allocation2 + $0xe8] sm:$0xff] %vm16_vm0, %v808_v24 }
 0x124   :  { %905 = vst.msk [vmem:[#allocation2 + $0x1e8] sm:$0xff] %vm16_vm0, %v840_v25  ;;  %v941_v28 = vld [vmem:[#allocation2 + $0xf0] sm:$0xff] }
 0x125   :  { %v973_v29 = vld [vmem:[#allocation2 + $0x1f0] sm:$0xff]  ;;  %1005 = vst.msk [vmem:[%s1866_s2 + $0xf0] sm:$0xff] %vm16_vm0, %v941_v28 }
 0x126   :  { %1037 = vst.msk [vmem:[%s1866_s2 + $0x1f0] sm:$0xff] %vm16_vm0, %v973_v29  ;;  %v939_v30 = vld [vmem:[#allocation2 + $0xe0] sm:$0xff] }
 0x127   :  { %v971_v31 = vld [vmem:[#allocation2 + $0x1e0] sm:$0xff]  ;;  %1003 = vst.msk [vmem:[%s1866_s2 + $0xe0] sm:$0xff] %vm16_vm0, %v939_v30 }
 0x128   :  { %1035 = vst.msk [vmem:[%s1866_s2 + $0x1e0] sm:$0xff] %vm16_vm0, %v971_v31  ;;  %v942_v32 = vld [vmem:[#allocation2 + $0xf8] sm:$0xff] }
 0x129   :  { %v974_v33 = vld [vmem:[#allocation2 + $0x1f8] sm:$0xff]  ;;  %1006 = vst.msk [vmem:[%s1866_s2 + $0xf8] sm:$0xff] %vm16_vm0, %v942_v32 }
 0x12a   :  { %1038 = vst.msk [vmem:[%s1866_s2 + $0x1f8] sm:$0xff] %vm16_vm0, %v974_v33  ;;  %v940_v34 = vld [vmem:[#allocation2 + $0xe8] sm:$0xff] }
 0x12b   :  { %v972_v35 = vld [vmem:[#allocation2 + $0x1e8] sm:$0xff]  ;;  %1004 = vst.msk [vmem:[%s1866_s2 + $0xe8] sm:$0xff] %vm16_vm0, %v940_v34 }
 0x12c   :  { %1036 = vst.msk [vmem:[%s1866_s2 + $0x1e8] sm:$0xff] %vm16_vm0, %v972_v35 }

// kernel: _lambda_.18
= control target key start
LH: loop header
LB: loop body
LE: loop exit
PB: predicated region body
PF: predicated region fallthrough
CT: control target
= control target key end

     0   :  { %vm17_vm0 = vcmask 130048   ;;  %v484_v1 = vmov 0.0   ;;  %s672_s1 = inlined_call_operand.vmem [shape: bf16[128,16], index: 1, kind: input, shape index: {}]   ;;  %s673_s0 = inlined_call_operand.vmem [shape: bf16[128,128], index: 0, kind: input, shape index: {}]   ;;  %s674_s2 = inlined_call_operand.vmem [shape: f32[128,16], index: 2, kind: output, shape index: {}]  }
   0x1   :  { %v476_v0 = vld [vmem:[%s672_s1] sm:$0xff]   ;;  %20 = vst.msk [vmem:[#allocation2 + $0x10] sm:$0xff] %vm17_vm0, %v484_v1  ;;  %18 = vst.msk [vmem:[#allocation2] sm:$0xff] %vm17_vm0, %v484_v1  ;;  %v477_v2 = vld [vmem:[%s672_s1 + $0x8] sm:$0xff]  }
   0x2   :  { %19 = vst.msk [vmem:[#allocation2 + $0x8] sm:$0xff] %vm17_vm0, %v484_v1  ;;  %21 = vst.msk [vmem:[#allocation2 + $0x18] sm:$0xff] %vm17_vm0, %v484_v1  ;;  %427 = vmatprep.subr.bf16.mxu0 %v476_v0  ;;  %459 = vmatprep.subr.bf16.mxu1 %v476_v0  ;;  %v478_v3 = vld [vmem:[%s672_s1 + $0x10] sm:$0xff]   ;;  %v479_v4 = vld [vmem:[%s672_s1 + $0x18] sm:$0xff]  }
   0x3   :  { %22 = vst.msk [vmem:[#allocation2 + $0x20] sm:$0xff] %vm17_vm0, %v484_v1  ;;  %23 = vst.msk [vmem:[#allocation2 + $0x28] sm:$0xff] %vm17_vm0, %v484_v1  ;;  %428 = vmatpush3.bf16.msra.mxu0 %v476_v0  ;;  %467 = vmatpush3.bf16.msra.mxu1 %v476_v0  ;;  %v34_v5 = vld [vmem:[%s673_s0] sm:$0xf]  ;;  %v35_v6 = vld [vmem:[%s673_s0 + $0x4] sm:$0xf] }
   0x4   :  { %24 = vst.msk [vmem:[#allocation2 + $0x30] sm:$0xff] %vm17_vm0, %v484_v1  ;;  %25 = vst.msk [vmem:[#allocation2 + $0x38] sm:$0xff] %vm17_vm0, %v484_v1  ;;  %429 = vmatprep.subr.bf16.mxu0 %v477_v2  ;;  %460 = vmatprep.subr.bf16.mxu1 %v477_v2  ;;  %v42_v7 = vld [vmem:[%s673_s0 + $0x20] sm:$0xf]  ;;  %vm50_vm1 = vcmp.ge.bf16.partialorder %v34_v5, 0  ;;  %vm51_vm2 = vcmp.ge.bf16.partialorder %v35_v6, 0 }
   0x5   :  { %26 = vst.msk [vmem:[#allocation2 + $0x40] sm:$0xff] %vm17_vm0, %v484_v1  ;;  %27 = vst.msk [vmem:[#allocation2 + $0x48] sm:$0xff] %vm17_vm0, %v484_v1  ;;  %v66_v8 = vmul.bf16 1045249613, %v34_v5  ;;  %v67_v9 = vmul.bf16 1045249613, %v35_v6 }
   0x6   :  { %28 = vst.msk [vmem:[#allocation2 + $0x50] sm:$0xff] %vm17_vm0, %v484_v1  ;;  %29 = vst.msk [vmem:[#allocation2 + $0x58] sm:$0xff] %vm17_vm0, %v484_v1  ;;  %v43_v10 = vld [vmem:[%s673_s0 + $0x24] sm:$0xf]  ;;  %vm58_vm3 = vcmp.ge.bf16.partialorder %v42_v7, 0  ;;  %v481_v20 = vld [vmem:[%s672_s1 + $0x28] sm:$0xff]  }
   0x7   :  { %30 = vst.msk [vmem:[#allocation2 + $0x60] sm:$0xff] %vm17_vm0, %v484_v1  ;;  %31 = vst.msk [vmem:[#allocation2 + $0x68] sm:$0xff] %vm17_vm0, %v484_v1  ;;  %430 = vmatpush3.bf16.msra.mxu0 %v477_v2  ;;  %468 = vmatpush3.bf16.msra.mxu1 %v477_v2  ;;  %v74_v11 = vmul.bf16 1045249613, %v42_v7  ;;  %v82_v12 = vsel %vm50_vm1, %v34_v5, %v66_v8  ;;  %v83_v13 = vsel %vm51_vm2, %v35_v6, %v67_v9  ;;  %v480_v15 = vld [vmem:[%s672_s1 + $0x20] sm:$0xff]   ;;  %v482_v23 = vld [vmem:[%s672_s1 + $0x30] sm:$0xff]  }
   0x8   :  { %32 = vst.msk [vmem:[#allocation2 + $0x70] sm:$0xff] %vm17_vm0, %v484_v1  ;;  %33 = vst.msk [vmem:[#allocation2 + $0x78] sm:$0xff] %vm17_vm0, %v484_v1  ;;  %431 = vmatprep.subr.bf16.mxu0 %v478_v3  ;;  %461 = vmatprep.subr.bf16.mxu1 %v478_v3  ;;  %vm59_vm4 = vcmp.ge.bf16.partialorder %v43_v10, 0  ;;  %v75_v14 = vmul.bf16 1045249613, %v43_v10  ;;  %v395_v16 = vcombine.low %v82_v12, %v83_v13  ;;  %v483_v31 = vld [vmem:[%s672_s1 + $0x38] sm:$0xff]  }
   0x9   :  { %v90_v17 = vsel %vm58_vm3, %v42_v7, %v74_v11  ;;  %v36_v21 = vld [vmem:[%s673_s0 + $0x8] sm:$0xf]  ;;  %v37_v22 = vld [vmem:[%s673_s0 + $0xc] sm:$0xf]  ;;  %v38_v27 = vld [vmem:[%s673_s0 + $0x10] sm:$0xf] }
   0xa   :  { %v91_v18 = vsel %vm59_vm4, %v43_v10, %v75_v14  ;;  %443 = vmatprep.mubr.bf16.mxu0 %v395_v16  ;;  %v44_v24 = vld [vmem:[%s673_s0 + $0x28] sm:$0xf]  ;;  %v45_v25 = vld [vmem:[%s673_s0 + $0x2c] sm:$0xf]  ;;  %v68_v26 = vmul.bf16 1045249613, %v36_v21 }
   0xb   :  { %432 = vmatpush3.bf16.msra.mxu0 %v478_v3  ;;  %469 = vmatpush3.bf16.msra.mxu1 %v478_v3  ;;  %v399_v19 = vcombine.low %v90_v17, %v91_v18  ;;  %v39_v28 = vld [vmem:[%s673_s0 + $0x14] sm:$0xf]  ;;  %vm52_vm5 = vcmp.ge.bf16.partialorder %v36_v21, 0  ;;  %vm53_vm6 = vcmp.ge.bf16.partialorder %v37_v22, 0  ;;  %v46_v29 = vld [vmem:[%s673_s0 + $0x30] sm:$0xf] }
   0xc   :  { %433 = vmatprep.subr.bf16.mxu0 %v479_v4  ;;  %462 = vmatprep.subr.bf16.mxu1 %v479_v4  ;;  %v47_v30 = vld [vmem:[%s673_s0 + $0x34] sm:$0xf]  ;;  %v69_v32 = vmul.bf16 1045249613, %v37_v22  ;;  %vm60_vm7 = vcmp.ge.bf16.partialorder %v44_v24, 0  ;;  %vm61_vm8 = vcmp.ge.bf16.partialorder %v45_v25, 0  ;;  %v84_v39 = vsel %vm52_vm5, %v36_v21, %v68_v26 }
   0xd   :  { %451 = vmatprep.mubr.bf16.mxu1 %v399_v19  ;;  %v76_v33 = vmul.bf16 1045249613, %v44_v24  ;;  %v77_v34 = vmul.bf16 1045249613, %v45_v25  ;;  %v70_v35 = vmul.bf16 1045249613, %v38_v27 }
   0xe   :  { %v71_v36 = vmul.bf16 1045249613, %v39_v28  ;;  %vm54_vm9 = vcmp.ge.bf16.partialorder %v38_v27, 0  ;;  %vm55_vm10 = vcmp.ge.bf16.partialorder %v39_v28, 0  ;;  %v78_v37 = vmul.bf16 1045249613, %v46_v29 }
   0xf   :  { %434 = vmatpush3.bf16.msra.mxu0 %v479_v4  ;;  %470 = vmatpush3.bf16.msra.mxu1 %v479_v4  ;;  %v79_v38 = vmul.bf16 1045249613, %v47_v30  ;;  %vm62_vm11 = vcmp.ge.bf16.partialorder %v46_v29, 0  ;;  %vm63_vm12 = vcmp.ge.bf16.partialorder %v47_v30, 0  ;;  %v85_v40 = vsel %vm53_vm6, %v37_v22, %v69_v32  ;;  %v40_v45 = vld [vmem:[%s673_s0 + $0x18] sm:$0xf] }
  0x10   :  { %435 = vmatprep.subr.bf16.mxu0 %v480_v15  ;;  %463 = vmatprep.subr.bf16.mxu1 %v480_v15  ;;  %v92_v41 = vsel %vm60_vm7, %v44_v24, %v76_v33  ;;  %v93_v42 = vsel %vm61_vm8, %v45_v25, %v77_v34  ;;  %v86_v43 = vsel %vm54_vm9, %v38_v27, %v70_v35  ;;  %v41_v48 = vld [vmem:[%s673_s0 + $0x1c] sm:$0xf]  ;;  %v48_v49 = vld [vmem:[%s673_s0 + $0x38] sm:$0xf]  ;;  %vm56_vm13 = vcmp.ge.bf16.partialorder %v40_v45, 0  ;;  %v100_v1 = vld [vmem:[#allocation2 + $0x10] sm:$0xff] }
  0x11   :  { %v87_v44 = vsel %vm55_vm10, %v39_v28, %v71_v36  ;;  %v94_v46 = vsel %vm62_vm11, %v46_v29, %v78_v37  ;;  %v95_v47 = vsel %vm63_vm12, %v47_v30, %v79_v38  ;;  %v49_v50 = vld [vmem:[%s673_s0 + $0x3c] sm:$0xf]  ;;  %v396_v51 = vcombine.low %v84_v39, %v85_v40  ;;  %v108_v2 = vld [vmem:[#allocation2 + $0x50] sm:$0xff]  ;;  %v98_v3 = vld [vmem:[#allocation2] sm:$0xff] }
  0x12   :  { %v400_v52 = vcombine.low %v92_v41, %v93_v42  ;;  %v397_v53 = vcombine.low %v86_v43, %v87_v44  ;;  %v72_v54 = vmul.bf16 1045249613, %v40_v45  ;;  %v401_v55 = vcombine.low %v94_v46, %v95_v47  ;;  %v106_v4 = vld [vmem:[#allocation2 + $0x40] sm:$0xff]  ;;  %v101_v7 = vld [vmem:[#allocation2 + $0x18] sm:$0xff]  ;;  %v99_v13 = vld [vmem:[#allocation2 + $0x8] sm:$0xff] }
  0x13   :  { %436 = vmatpush3.bf16.msra.mxu0 %v480_v15  ;;  %471 = vmatpush3.bf16.msra.mxu1 %v480_v15  ;;  %v73_v56 = vmul.bf16 1045249613, %v41_v48  ;;  %v80_v57 = vmul.bf16 1045249613, %v48_v49  ;;  %v81_v58 = vmul.bf16 1045249613, %v49_v50 }
  0x14   :  { %437 = vmatprep.subr.bf16.mxu0 %v481_v20  ;;  %464 = vmatprep.subr.bf16.mxu1 %v481_v20  ;;  %vm57_vm14 = vcmp.ge.bf16.partialorder %v41_v48, 0  ;;  %vm64_vm15 = vcmp.ge.bf16.partialorder %v48_v49, 0  ;;  %vm65_vm1 = vcmp.ge.bf16.partialorder %v49_v50, 0  ;;  %v88_v59 = vsel %vm56_vm13, %v40_v45, %v72_v54  ;;  %v109_v8 = vld [vmem:[#allocation2 + $0x58] sm:$0xff]  ;;  %v107_v14 = vld [vmem:[#allocation2 + $0x48] sm:$0xff]  ;;  %v104_v25 = vld [vmem:[#allocation2 + $0x30] sm:$0xff] }
  0x15   :  { %v89_v60 = vsel %vm57_vm14, %v41_v48, %v73_v56  ;;  %v96_v61 = vsel %vm64_vm15, %v48_v49, %v80_v57  ;;  %v97_v62 = vsel %vm65_vm1, %v49_v50, %v81_v58  ;;  %v112_v26 = vld [vmem:[#allocation2 + $0x70] sm:$0xff]  ;;  %v102_v27 = vld [vmem:[#allocation2 + $0x20] sm:$0xff]  ;;  %v113_v32 = vld [vmem:[#allocation2 + $0x78] sm:$0xff] }
  0x16   :  { %v398_v63 = vcombine.low %v88_v59, %v89_v60  ;;  %v402_v0 = vcombine.low %v96_v61, %v97_v62  ;;  %v110_v28 = vld [vmem:[#allocation2 + $0x60] sm:$0xff]  ;;  %v103_v37 = vld [vmem:[#allocation2 + $0x28] sm:$0xff] }
  0x17   :  { %438 = vmatpush3.bf16.msra.mxu0 %v481_v20  ;;  %472 = vmatpush3.bf16.msra.mxu1 %v481_v20  ;;  %v111_v38 = vld [vmem:[#allocation2 + $0x68] sm:$0xff] }
  0x18   :  { %439 = vmatprep.subr.bf16.mxu0 %v482_v23  ;;  %465 = vmatprep.subr.bf16.mxu1 %v482_v23 }
  0x1b   :  { %440 = vmatpush3.bf16.msra.mxu0 %v482_v23  ;;  %473 = vmatpush3.bf16.msra.mxu1 %v482_v23 }
  0x1c   :  { %441 = vmatprep.subr.bf16.mxu0 %v483_v31  ;;  %466 = vmatprep.subr.bf16.mxu1 %v483_v31 }
  0x1f   :  { %442 = vmatpush3.bf16.msra.mxu0 %v483_v31  ;;  %474 = vmatpush3.bf16.msra.mxu1 %v483_v31  ;;  %v105_v31 = vld [vmem:[#allocation2 + $0x38] sm:$0xff] }
  0x22   :  { %444 = vmatmul.mubr.bf16.vlgmr.msra.gmra.mrb[0].mxu0 %v396_v51  ;;  %452 = vmatmul.mubr.bf16.vlgmr.msra.gmra.mrb[0].mxu1 %v400_v52 }
  0x23   :  { %447 = vmatprep.mubr.bf16.mxu0 %v397_v53  ;;  %455 = vmatprep.mubr.bf16.mxu1 %v401_v55 }
  0x2a   :  { %448 = vmatmul.mubr.bf16.gmra.mrb[4].mxu0 %v398_v63  ;;  %456 = vmatmul.mubr.bf16.gmra.mrb[4].mxu1 %v402_v0 }
  0xf5   :  { %v445_v5 = vpop.f32.mrb[0].mxu0  ;;  %v453_v6 = vpop.f32.mrb[0].mxu1 }
  0xf6   :  { %v325_v9 = vadd.f32 %v445_v5, %v100_v1  ;;  %v333_v10 = vadd.f32 %v453_v6, %v108_v2  ;;  %v260_v11 = vpop.f32.mrb[1].mxu0  ;;  %v292_v12 = vpop.f32.mrb[1].mxu1 }
  0xf7   :  { %v323_v15 = vadd.f32 %v260_v11, %v98_v3  ;;  %v331_v16 = vadd.f32 %v292_v12, %v106_v4  ;;  %v446_v17 = vpop.f32.mrb[2].mxu0  ;;  %v454_v18 = vpop.f32.mrb[2].mxu1 }
  0xf8   :  { %342 = vst.msk [vmem:[#allocation2 + $0x10] sm:$0xff] %vm17_vm0, %v325_v9  ;;  %350 = vst.msk [vmem:[#allocation2 + $0x50] sm:$0xff] %vm17_vm0, %v333_v10  ;;  %v326_v19 = vadd.f32 %v446_v17, %v101_v7  ;;  %v334_v20 = vadd.f32 %v454_v18, %v109_v8  ;;  %v263_v21 = vpop.f32.mrb[3].mxu0  ;;  %v295_v22 = vpop.f32.mrb[3].mxu1 }
  0xf9   :  { %340 = vst.msk [vmem:[#allocation2] sm:$0xff] %vm17_vm0, %v323_v15  ;;  %348 = vst.msk [vmem:[#allocation2 + $0x40] sm:$0xff] %vm17_vm0, %v331_v16  ;;  %v324_v23 = vadd.f32 %v263_v21, %v99_v13  ;;  %v332_v24 = vadd.f32 %v295_v22, %v107_v14 }
  0xfa   :  { %343 = vst.msk [vmem:[#allocation2 + $0x18] sm:$0xff] %vm17_vm0, %v326_v19  ;;  %351 = vst.msk [vmem:[#allocation2 + $0x58] sm:$0xff] %vm17_vm0, %v334_v20 }
  0xfb   :  { %341 = vst.msk [vmem:[#allocation2 + $0x8] sm:$0xff] %vm17_vm0, %v324_v23  ;;  %349 = vst.msk [vmem:[#allocation2 + $0x48] sm:$0xff] %vm17_vm0, %v332_v24 }
  0xfd   :  { %v449_v29 = vpop.f32.mrb[4].mxu0  ;;  %v457_v30 = vpop.f32.mrb[4].mxu1 }
  0xfe   :  { %v329_v33 = vadd.f32 %v449_v29, %v104_v25  ;;  %v337_v34 = vadd.f32 %v457_v30, %v112_v26  ;;  %v276_v35 = vpop.f32.mrb[5].mxu0  ;;  %v308_v36 = vpop.f32.mrb[5].mxu1 }
  0xff   :  { %v361_v39 = vld [vmem:[#allocation2 + $0x10] sm:$0xff]  ;;  %v327_v41 = vadd.f32 %v276_v35, %v102_v27  ;;  %v335_v42 = vadd.f32 %v308_v36, %v110_v28  ;;  %v450_v43 = vpop.f32.mrb[6].mxu0  ;;  %v458_v44 = vpop.f32.mrb[6].mxu1 }
 0x100   :  { %v369_v40 = vld [vmem:[#allocation2 + $0x50] sm:$0xff]  ;;  %377 = vst.msk [vmem:[%s674_s2 + $0x10] sm:$0xff] %vm17_vm0, %v361_v39  ;;  %v359_v45 = vld [vmem:[#allocation2] sm:$0xff]  ;;  %346 = vst.msk [vmem:[#allocation2 + $0x30] sm:$0xff] %vm17_vm0, %v329_v33  ;;  %v330_v47 = vadd.f32 %v450_v43, %v105_v31  ;;  %v338_v48 = vadd.f32 %v458_v44, %v113_v32  ;;  %v279_v49 = vpop.f32.mrb[7].mxu0  ;;  %v311_v50 = vpop.f32.mrb[7].mxu1 }
 0x101   :  { %385 = vst.msk [vmem:[%s674_s2 + $0x50] sm:$0xff] %vm17_vm0, %v369_v40  ;;  %v367_v46 = vld [vmem:[#allocation2 + $0x40] sm:$0xff]  ;;  %354 = vst.msk [vmem:[#allocation2 + $0x70] sm:$0xff] %vm17_vm0, %v337_v34  ;;  %v362_v51 = vld [vmem:[#allocation2 + $0x18] sm:$0xff]  ;;  %v328_v53 = vadd.f32 %v279_v49, %v103_v37  ;;  %v336_v54 = vadd.f32 %v311_v50, %v111_v38 }
 0x102   :  { %375 = vst.msk [vmem:[%s674_s2] sm:$0xff] %vm17_vm0, %v359_v45  ;;  %383 = vst.msk [vmem:[%s674_s2 + $0x40] sm:$0xff] %vm17_vm0, %v367_v46  ;;  %v370_v52 = vld [vmem:[#allocation2 + $0x58] sm:$0xff]  ;;  %v360_v55 = vld [vmem:[#allocation2 + $0x8] sm:$0xff] }
 0x103   :  { %344 = vst.msk [vmem:[#allocation2 + $0x20] sm:$0xff] %vm17_vm0, %v327_v41  ;;  %352 = vst.msk [vmem:[#allocation2 + $0x60] sm:$0xff] %vm17_vm0, %v335_v42  ;;  %v368_v56 = vld [vmem:[#allocation2 + $0x48] sm:$0xff] }
 0x104   :  { %378 = vst.msk [vmem:[%s674_s2 + $0x18] sm:$0xff] %vm17_vm0, %v362_v51  ;;  %386 = vst.msk [vmem:[%s674_s2 + $0x58] sm:$0xff] %vm17_vm0, %v370_v52 }
 0x105   :  { %347 = vst.msk [vmem:[#allocation2 + $0x38] sm:$0xff] %vm17_vm0, %v330_v47  ;;  %355 = vst.msk [vmem:[#allocation2 + $0x78] sm:$0xff] %vm17_vm0, %v338_v48 }
 0x106   :  { %376 = vst.msk [vmem:[%s674_s2 + $0x8] sm:$0xff] %vm17_vm0, %v360_v55  ;;  %384 = vst.msk [vmem:[%s674_s2 + $0x48] sm:$0xff] %vm17_vm0, %v368_v56 }
 0x107   :  { %345 = vst.msk [vmem:[#allocation2 + $0x28] sm:$0xff] %vm17_vm0, %v328_v53  ;;  %353 = vst.msk [vmem:[#allocation2 + $0x68] sm:$0xff] %vm17_vm0, %v336_v54  ;;  %v365_v57 = vld [vmem:[#allocation2 + $0x30] sm:$0xff] }
 0x108   :  { %v373_v58 = vld [vmem:[#allocation2 + $0x70] sm:$0xff]  ;;  %381 = vst.msk [vmem:[%s674_s2 + $0x30] sm:$0xff] %vm17_vm0, %v365_v57 }
 0x109   :  { %389 = vst.msk [vmem:[%s674_s2 + $0x70] sm:$0xff] %vm17_vm0, %v373_v58 }
 0x10a   :  { %v363_v59 = vld [vmem:[#allocation2 + $0x20] sm:$0xff] }
 0x10b   :  { %v371_v60 = vld [vmem:[#allocation2 + $0x60] sm:$0xff]  ;;  %379 = vst.msk [vmem:[%s674_s2 + $0x20] sm:$0xff] %vm17_vm0, %v363_v59 }
 0x10c   :  { %387 = vst.msk [vmem:[%s674_s2 + $0x60] sm:$0xff] %vm17_vm0, %v371_v60  ;;  %v366_v61 = vld [vmem:[#allocation2 + $0x38] sm:$0xff] }
 0x10d   :  { %v374_v62 = vld [vmem:[#allocation2 + $0x78] sm:$0xff]  ;;  %382 = vst.msk [vmem:[%s674_s2 + $0x38] sm:$0xff] %vm17_vm0, %v366_v61 }
 0x10e   :  { %390 = vst.msk [vmem:[%s674_s2 + $0x78] sm:$0xff] %vm17_vm0, %v374_v62  ;;  %v364_v63 = vld [vmem:[#allocation2 + $0x28] sm:$0xff] }
 0x10f   :  { %v372_v0 = vld [vmem:[#allocation2 + $0x68] sm:$0xff]  ;;  %380 = vst.msk [vmem:[%s674_s2 + $0x28] sm:$0xff] %vm17_vm0, %v364_v63 }
 0x110   :  { %388 = vst.msk [vmem:[%s674_s2 + $0x68] sm:$0xff] %vm17_vm0, %v372_v0 }

// kernel: _lambda_.19
= control target key start
LH: loop header
LB: loop body
LE: loop exit
PB: predicated region body
PF: predicated region fallthrough
CT: control target
= control target key end

     0   :  { %vm76_vm0 = vcmask 130048   ;;  %s237_s0 = inlined_call_operand.vmem [shape: f32[128,16], index: 0, kind: input, shape index: {}]   ;;  %s238_s1 = inlined_call_operand.vmem [shape: f32[1,16], index: 1, kind: input, shape index: {}]   ;;  %s239_s2 = inlined_call_operand.vmem [shape: f32[1,16], index: 2, kind: input, shape index: {}]   ;;  %s240_s3 = inlined_call_operand.vmem [shape: f32[128,16], index: 3, kind: output, shape index: {}]  }
   0x1   :  { %v14_v0 = vld [vmem:[%s237_s0] sm:$0xff]  ;;  %v15_v4 = vld [vmem:[%s237_s0 + $0x8] sm:$0xff]  ;;  %v16_v5 = vld [vmem:[%s237_s0 + $0x10] sm:$0xff] }
   0x2   :  { %v97_v1 = vld [vmem:[%s238_s1] ss:$0 sm:$0xff]  ;;  %v17_v6 = vld [vmem:[%s237_s0 + $0x18] sm:$0xff]  ;;  %v19_v11 = vld [vmem:[%s237_s0 + $0x28] sm:$0xff] }
   0x3   :  { %v98_v2 = vld [vmem:[%s239_s2] ss:$0 sm:$0xff]  ;;  %v37_v3 = vmul.f32 %v97_v1, %v14_v0  ;;  %v38_v7 = vmul.f32 %v97_v1, %v15_v4  ;;  %v39_v8 = vmul.f32 %v97_v1, %v16_v5  ;;  %v40_v9 = vmul.f32 %v97_v1, %v17_v6  ;;  %v20_v12 = vld [vmem:[%s237_s0 + $0x30] sm:$0xff]  ;;  %v21_v17 = vld [vmem:[%s237_s0 + $0x38] sm:$0xff] }
   0x4   :  { %v18_v10 = vld [vmem:[%s237_s0 + $0x20] sm:$0xff]  ;;  %v42_v15 = vmul.f32 %v97_v1, %v19_v11  ;;  %v43_v16 = vmul.f32 %v97_v1, %v20_v12  ;;  %v23_v19 = vld [vmem:[%s237_s0 + $0x48] sm:$0xff]  ;;  %v44_v23 = vmul.f32 %v97_v1, %v21_v17  ;;  %v24_v24 = vld [vmem:[%s237_s0 + $0x50] sm:$0xff] }
   0x5   :  { %v60_v13 = vadd.f32 %v98_v2, %v37_v3  ;;  %v41_v14 = vmul.f32 %v97_v1, %v18_v10  ;;  %v22_v18 = vld [vmem:[%s237_s0 + $0x40] sm:$0xff]  ;;  %v61_v20 = vadd.f32 %v98_v2, %v38_v7  ;;  %v62_v21 = vadd.f32 %v98_v2, %v39_v8  ;;  %v25_v25 = vld [vmem:[%s237_s0 + $0x58] sm:$0xff]  ;;  %v27_v31 = vld [vmem:[%s237_s0 + $0x68] sm:$0xff] }
   0x6   :  { %v63_v22 = vadd.f32 %v98_v2, %v40_v9  ;;  %v26_v26 = vld [vmem:[%s237_s0 + $0x60] sm:$0xff]  ;;  %v65_v28 = vadd.f32 %v98_v2, %v42_v15  ;;  %v66_v29 = vadd.f32 %v98_v2, %v43_v16  ;;  %v45_v30 = vmul.f32 %v97_v1, %v22_v18  ;;  %v28_v32 = vld [vmem:[%s237_s0 + $0x70] sm:$0xff]  ;;  %v29_v33 = vld [vmem:[%s237_s0 + $0x78] sm:$0xff] }
   0x7   :  { %77 = vst.msk [vmem:[%s240_s3] sm:$0xff] %vm76_vm0, %v60_v13  ;;  %v64_v27 = vadd.f32 %v98_v2, %v41_v14  ;;  %78 = vst.msk [vmem:[%s240_s3 + $0x8] sm:$0xff] %vm76_vm0, %v61_v20  ;;  %v67_v34 = vadd.f32 %v98_v2, %v44_v23  ;;  %v46_v35 = vmul.f32 %v97_v1, %v23_v19 }
   0x8   :  { %79 = vst.msk [vmem:[%s240_s3 + $0x10] sm:$0xff] %vm76_vm0, %v62_v21  ;;  %80 = vst.msk [vmem:[%s240_s3 + $0x18] sm:$0xff] %vm76_vm0, %v63_v22  ;;  %v47_v36 = vmul.f32 %v97_v1, %v24_v24  ;;  %v48_v37 = vmul.f32 %v97_v1, %v25_v25  ;;  %v68_v38 = vadd.f32 %v98_v2, %v45_v30 }
   0x9   :  { %81 = vst.msk [vmem:[%s240_s3 + $0x20] sm:$0xff] %vm76_vm0, %v64_v27  ;;  %82 = vst.msk [vmem:[%s240_s3 + $0x28] sm:$0xff] %vm76_vm0, %v65_v28  ;;  %v49_v39 = vmul.f32 %v97_v1, %v26_v26  ;;  %v50_v40 = vmul.f32 %v97_v1, %v27_v31  ;;  %v51_v41 = vmul.f32 %v97_v1, %v28_v32 }
   0xa   :  { %83 = vst.msk [vmem:[%s240_s3 + $0x30] sm:$0xff] %vm76_vm0, %v66_v29  ;;  %84 = vst.msk [vmem:[%s240_s3 + $0x38] sm:$0xff] %vm76_vm0, %v67_v34  ;;  %v69_v42 = vadd.f32 %v98_v2, %v46_v35  ;;  %v70_v43 = vadd.f32 %v98_v2, %v47_v36  ;;  %v71_v44 = vadd.f32 %v98_v2, %v48_v37 }
   0xb   :  { %v52_v45 = vmul.f32 %v97_v1, %v29_v33  ;;  %85 = vst.msk [vmem:[%s240_s3 + $0x40] sm:$0xff] %vm76_vm0, %v68_v38  ;;  %v72_v46 = vadd.f32 %v98_v2, %v49_v39  ;;  %v73_v47 = vadd.f32 %v98_v2, %v50_v40  ;;  %v74_v48 = vadd.f32 %v98_v2, %v51_v41 }
   0xc   :  { %86 = vst.msk [vmem:[%s240_s3 + $0x48] sm:$0xff] %vm76_vm0, %v69_v42  ;;  %87 = vst.msk [vmem:[%s240_s3 + $0x50] sm:$0xff] %vm76_vm0, %v70_v43 }
   0xd   :  { %88 = vst.msk [vmem:[%s240_s3 + $0x58] sm:$0xff] %vm76_vm0, %v71_v44  ;;  %v75_v49 = vadd.f32 %v98_v2, %v52_v45  ;;  %89 = vst.msk [vmem:[%s240_s3 + $0x60] sm:$0xff] %vm76_vm0, %v72_v46 }
   0xe   :  { %90 = vst.msk [vmem:[%s240_s3 + $0x68] sm:$0xff] %vm76_vm0, %v73_v47  ;;  %91 = vst.msk [vmem:[%s240_s3 + $0x70] sm:$0xff] %vm76_vm0, %v74_v48 }
   0xf   :  { %92 = vst.msk [vmem:[%s240_s3 + $0x78] sm:$0xff] %vm76_vm0, %v75_v49 }

// kernel: _lambda_.20
= control target key start
LH: loop header
LB: loop body
LE: loop exit
PB: predicated region body
PF: predicated region fallthrough
CT: control target
= control target key end

     0   :  { %vm17_vm4 = vcmask 261120   ;;  %v344_v32 = vmov 0.0   ;;  %s444_s1 = inlined_call_operand.vmem [shape: bf16[256,32], index: 1, kind: input, shape index: {}]   ;;  %s445_s0 = inlined_call_operand.vmem [shape: bf16[32,256], index: 0, kind: input, shape index: {}]   ;;  %s446_s2 = inlined_call_operand.vmem [shape: f32[32,32], index: 2, kind: output, shape index: {}]  }
   0x1   :  { %v328_v0 = vld [vmem:[%s444_s1 + $0x40] sm:$0xff]   ;;  %v330_v2 = vld [vmem:[%s444_s1 + $0x48] sm:$0xff]   ;;  %v332_v4 = vld [vmem:[%s444_s1 + $0x50] sm:$0xff]   ;;  %18 = vst.msk [vmem:[#allocation2] sm:$0xff] %vm17_vm4, %v344_v32 }
   0x2   :  { %v329_v1 = vld [vmem:[%s444_s1] sm:$0xff]   ;;  %283 = vmatprep.subr.bf16.mxu0 %v328_v0  ;;  %311 = vmatprep.subr.bf16.mxu1 %v328_v0  ;;  %v331_v3 = vld [vmem:[%s444_s1 + $0x8] sm:$0xff]   ;;  %v333_v5 = vld [vmem:[%s444_s1 + $0x10] sm:$0xff]   ;;  %19 = vst.msk [vmem:[#allocation2 + $0x8] sm:$0xff] %vm17_vm4, %v344_v32 }
   0x3   :  { %284 = vmatpush3.bf16.msra.mxu0 %v329_v1  ;;  %319 = vmatpush3.bf16.msra.mxu1 %v329_v1  ;;  %v334_v6 = vld [vmem:[%s444_s1 + $0x58] sm:$0xff]   ;;  %v336_v8 = vld [vmem:[%s444_s1 + $0x60] sm:$0xff]   ;;  %v338_v10 = vld [vmem:[%s444_s1 + $0x68] sm:$0xff]   ;;  %20 = vst.msk [vmem:[#allocation2 + $0x10] sm:$0xff] %vm17_vm4, %v344_v32 }
   0x4   :  { %285 = vmatprep.subr.bf16.mxu0 %v330_v2  ;;  %312 = vmatprep.subr.bf16.mxu1 %v330_v2  ;;  %v335_v7 = vld [vmem:[%s444_s1 + $0x18] sm:$0xff]   ;;  %v337_v9 = vld [vmem:[%s444_s1 + $0x20] sm:$0xff]   ;;  %v23_v12 = vld [vmem:[%s445_s0 + $0x8] sm:$0xff]  ;;  %21 = vst.msk [vmem:[#allocation2 + $0x18] sm:$0xff] %vm17_vm4, %v344_v32 }
   0x5   :  { %v22_v11 = vld [vmem:[%s445_s0] sm:$0xff]  ;;  %v24_v13 = vld [vmem:[%s445_s0 + $0x10] sm:$0xff]  ;;  %vm27_vm1 = vcmp.ge.bf16.partialorder %v23_v12, 0  ;;  %v31_v15 = vmul.bf16 1045249613, %v23_v12  ;;  %v25_v16 = vld [vmem:[%s445_s0 + $0x18] sm:$0xff] }
   0x6   :  { %vm26_vm0 = vcmp.ge.bf16.partialorder %v22_v11, 0  ;;  %v30_v14 = vmul.bf16 1045249613, %v22_v11  ;;  %vm28_vm2 = vcmp.ge.bf16.partialorder %v24_v13, 0  ;;  %v32_v17 = vmul.bf16 1045249613, %v24_v13 }
   0x7   :  { %286 = vmatpush3.bf16.msra.mxu0 %v331_v3  ;;  %320 = vmatpush3.bf16.msra.mxu1 %v331_v3  ;;  %v339_v18 = vld [vmem:[%s444_s1 + $0x28] sm:$0xff]   ;;  %v35_v20 = vsel %vm27_vm1, %v23_v12, %v31_v15  ;;  %vm29_vm3 = vcmp.ge.bf16.partialorder %v25_v16, 0  ;;  %v33_v21 = vmul.bf16 1045249613, %v25_v16  ;;  %v340_v22 = vld [vmem:[%s444_s1 + $0x70] sm:$0xff]   ;;  %v342_v28 = vld [vmem:[%s444_s1 + $0x78] sm:$0xff]  }
   0x8   :  { %287 = vmatprep.subr.bf16.mxu0 %v332_v4  ;;  %313 = vmatprep.subr.bf16.mxu1 %v332_v4  ;;  %v34_v19 = vsel %vm26_vm0, %v22_v11, %v30_v14  ;;  %v36_v24 = vsel %vm28_vm2, %v24_v13, %v32_v17  ;;  %v341_v27 = vld [vmem:[%s444_s1 + $0x30] sm:$0xff]   ;;  %v343_v29 = vld [vmem:[%s444_s1 + $0x38] sm:$0xff]   ;;  %v38_v35 = vld [vmem:[#allocation2] sm:$0xff] }
   0x9   :  { %v264_v23 = vcombine.high %v34_v19, %v35_v20  ;;  %v37_v25 = vsel %vm29_vm3, %v25_v16, %v33_v21  ;;  %v263_v30 = vcombine.low %v34_v19, %v35_v20  ;;  %v39_v43 = vld [vmem:[#allocation2 + $0x8] sm:$0xff] }
   0xa   :  { %v266_v26 = vcombine.high %v36_v24, %v37_v25  ;;  %v265_v31 = vcombine.low %v36_v24, %v37_v25  ;;  %v40_v37 = vld [vmem:[#allocation2 + $0x10] sm:$0xff] }
   0xb   :  { %288 = vmatpush3.bf16.msra.mxu0 %v333_v5  ;;  %321 = vmatpush3.bf16.msra.mxu1 %v333_v5  ;;  %v41_v45 = vld [vmem:[#allocation2 + $0x18] sm:$0xff] }
   0xc   :  { %289 = vmatprep.subr.bf16.mxu0 %v334_v6  ;;  %314 = vmatprep.subr.bf16.mxu1 %v334_v6 }
   0xd   :  { %222 = vmatprep.mubr.bf16.mxu0 %v264_v23  ;;  %230 = vmatprep.mubr.bf16.mxu1 %v266_v26 }
   0xf   :  { %290 = vmatpush3.bf16.msra.mxu0 %v335_v7  ;;  %322 = vmatpush3.bf16.msra.mxu1 %v335_v7 }
  0x10   :  { %291 = vmatprep.subr.bf16.mxu0 %v336_v8  ;;  %315 = vmatprep.subr.bf16.mxu1 %v336_v8 }
  0x13   :  { %292 = vmatpush3.bf16.msra.mxu0 %v337_v9  ;;  %323 = vmatpush3.bf16.msra.mxu1 %v337_v9 }
  0x14   :  { %293 = vmatprep.subr.bf16.mxu0 %v338_v10  ;;  %316 = vmatprep.subr.bf16.mxu1 %v338_v10 }
  0x17   :  { %294 = vmatpush3.bf16.msra.mxu0 %v339_v18  ;;  %324 = vmatpush3.bf16.msra.mxu1 %v339_v18 }
  0x18   :  { %295 = vmatprep.subr.bf16.mxu0 %v340_v22  ;;  %317 = vmatprep.subr.bf16.mxu1 %v340_v22 }
  0x1b   :  { %296 = vmatpush3.bf16.msra.mxu0 %v341_v27  ;;  %325 = vmatpush3.bf16.msra.mxu1 %v341_v27 }
  0x1c   :  { %297 = vmatprep.subr.bf16.mxu0 %v342_v28  ;;  %318 = vmatprep.subr.bf16.mxu1 %v342_v28 }
  0x1f   :  { %298 = vmatpush3.bf16.msra.mxu0 %v343_v29  ;;  %326 = vmatpush3.bf16.msra.mxu1 %v343_v29 }
  0x22   :  { %223 = vmatmul.mubr.bf16.vlgmr.msra.gmra.mrb[0].mxu0 %v263_v30  ;;  %231 = vmatmul.mubr.bf16.vlgmr.msra.gmra.mrb[0].mxu1 %v265_v31 }
  0xf5   :  { %v299_v33 = vpop.f32.mrb[0].mxu0  ;;  %v305_v34 = vpop.f32.mrb[0].mxu1 }
  0xf6   :  { %v300_v36 = vpop.f32.mrb[1].mxu0  ;;  %v306_v38 = vpop.f32.mrb[1].mxu1 }
  0xf7   :  { %v301_v39 = vadd.f32 %v300_v36, %v299_v33  ;;  %v307_v40 = vadd.f32 %v306_v38, %v305_v34  ;;  %v302_v41 = vpop.f32.mrb[2].mxu0  ;;  %v308_v42 = vpop.f32.mrb[2].mxu1 }
  0xf8   :  { %v303_v44 = vpop.f32.mrb[3].mxu0  ;;  %v309_v46 = vpop.f32.mrb[3].mxu1 }
  0xf9   :  { %v239_v47 = vadd.f32 %v301_v39, %v38_v35  ;;  %v241_v48 = vadd.f32 %v307_v40, %v40_v37  ;;  %v304_v49 = vadd.f32 %v303_v44, %v302_v41  ;;  %v310_v50 = vadd.f32 %v309_v46, %v308_v42 }
  0xfb   :  { %244 = vst.msk [vmem:[#allocation2] sm:$0xff] %vm17_vm4, %v239_v47  ;;  %246 = vst.msk [vmem:[#allocation2 + $0x10] sm:$0xff] %vm17_vm4, %v241_v48  ;;  %v240_v51 = vadd.f32 %v304_v49, %v39_v43  ;;  %v242_v52 = vadd.f32 %v310_v50, %v41_v45 }
  0xfd   :  { %245 = vst.msk [vmem:[#allocation2 + $0x8] sm:$0xff] %vm17_vm4, %v240_v51  ;;  %247 = vst.msk [vmem:[#allocation2 + $0x18] sm:$0xff] %vm17_vm4, %v242_v52 }
 0x102   :  { %v251_v53 = vld [vmem:[#allocation2] sm:$0xff]  ;;  %v253_v54 = vld [vmem:[#allocation2 + $0x10] sm:$0xff] }
 0x103   :  { %255 = vst.msk [vmem:[%s446_s2] sm:$0xff] %vm17_vm4, %v251_v53  ;;  %257 = vst.msk [vmem:[%s446_s2 + $0x10] sm:$0xff] %vm17_vm4, %v253_v54 }
 0x104   :  { %v252_v55 = vld [vmem:[#allocation2 + $0x8] sm:$0xff]  ;;  %v254_v56 = vld [vmem:[#allocation2 + $0x18] sm:$0xff] }
 0x105   :  { %256 = vst.msk [vmem:[%s446_s2 + $0x8] sm:$0xff] %vm17_vm4, %v252_v55  ;;  %258 = vst.msk [vmem:[%s446_s2 + $0x18] sm:$0xff] %vm17_vm4, %v254_v56 }

// kernel: _lambda_.21
= control target key start
LH: loop header
LB: loop body
LE: loop exit
PB: predicated region body
PF: predicated region fallthrough
CT: control target
= control target key end

     0   :  { %vm40_vm0 = vcmask 261120   ;;  %s101_s0 = inlined_call_operand.vmem [shape: f32[32,32], index: 0, kind: input, shape index: {}]   ;;  %s102_s1 = inlined_call_operand.vmem [shape: f32[1,32], index: 1, kind: input, shape index: {}]   ;;  %s103_s2 = inlined_call_operand.vmem [shape: f32[1,32], index: 2, kind: input, shape index: {}]   ;;  %s104_s3 = inlined_call_operand.vmem [shape: f32[32,32], index: 3, kind: output, shape index: {}]  }
   0x1   :  { %v14_v0 = vld [vmem:[%s101_s0] sm:$0xff]  ;;  %v15_v4 = vld [vmem:[%s101_s0 + $0x8] sm:$0xff]  ;;  %v16_v5 = vld [vmem:[%s101_s0 + $0x10] sm:$0xff] }
   0x2   :  { %v49_v1 = vld [vmem:[%s102_s1] ss:$0 sm:$0xff]  ;;  %v17_v6 = vld [vmem:[%s101_s0 + $0x18] sm:$0xff] }
   0x3   :  { %v50_v2 = vld [vmem:[%s103_s2] ss:$0 sm:$0xff]  ;;  %v25_v3 = vmul.f32 %v49_v1, %v14_v0  ;;  %v26_v7 = vmul.f32 %v49_v1, %v15_v4  ;;  %v27_v8 = vmul.f32 %v49_v1, %v16_v5  ;;  %v28_v9 = vmul.f32 %v49_v1, %v17_v6 }
   0x5   :  { %v36_v10 = vadd.f32 %v50_v2, %v25_v3  ;;  %v37_v11 = vadd.f32 %v50_v2, %v26_v7  ;;  %v38_v12 = vadd.f32 %v50_v2, %v27_v8  ;;  %v39_v13 = vadd.f32 %v50_v2, %v28_v9 }
   0x7   :  { %41 = vst.msk [vmem:[%s104_s3] sm:$0xff] %vm40_vm0, %v36_v10  ;;  %42 = vst.msk [vmem:[%s104_s3 + $0x8] sm:$0xff] %vm40_vm0, %v37_v11 }
   0x8   :  { %43 = vst.msk [vmem:[%s104_s3 + $0x10] sm:$0xff] %vm40_vm0, %v38_v12  ;;  %44 = vst.msk [vmem:[%s104_s3 + $0x18] sm:$0xff] %vm40_vm0, %v39_v13 }

// kernel: _lambda_.23
= control target key start
LH: loop header
LB: loop body
LE: loop exit
PB: predicated region body
PF: predicated region fallthrough
CT: control target
= control target key end

     0   :  { %vm31_vm0 = vcmask 523264   ;;  %s71_s0 = inlined_call_operand.vmem [shape: f32[8,64], index: 0, kind: input, shape index: {}]   ;;  %s72_s1 = inlined_call_operand.vmem [shape: f32[1,64], index: 1, kind: input, shape index: {}]   ;;  %s73_s2 = inlined_call_operand.vmem [shape: f32[1,64], index: 2, kind: input, shape index: {}]   ;;  %s74_s3 = inlined_call_operand.vmem [shape: f32[8,64], index: 3, kind: output, shape index: {}]  }
   0x1   :  { %v14_v0 = vld [vmem:[%s71_s0] sm:$0xff] }
   0x2   :  { %v37_v1 = vld [vmem:[%s72_s1] ss:$0 sm:$0xff] }
   0x3   :  { %v38_v2 = vld [vmem:[%s73_s2] ss:$0 sm:$0xff]  ;;  %v22_v3 = vmul.f32 %v37_v1, %v14_v0 }
   0x5   :  { %v30_v4 = vadd.f32 %v38_v2, %v22_v3 }
   0x7   :  { %32 = vst.msk [vmem:[%s74_s3] sm:$0xff] %vm31_vm0, %v30_v4 }

// kernel: _lambda_.22
= control target key start
LH: loop header
LB: loop body
LE: loop exit
PB: predicated region body
PF: predicated region fallthrough
CT: control target
= control target key end

     0   :  { %vm17_vm2 = vcmask 523264   ;;  %v503_v42 = vmov 0.0   ;;  %s627_s1 = inlined_call_operand.vmem [shape: bf16[512,64], index: 1, kind: input, shape index: {}]   ;;  %s628_s0 = inlined_call_operand.vmem [shape: bf16[8,512], index: 0, kind: input, shape index: {}]   ;;  %s629_s2 = inlined_call_operand.vmem [shape: f32[8,64], index: 2, kind: output, shape index: {}]  }
   0x1   :  { %v471_v0 = vld [vmem:[%s627_s1 + $0x40] sm:$0xff]   ;;  %v475_v4 = vld [vmem:[%s627_s1 + $0x48] sm:$0xff]   ;;  %v479_v8 = vld [vmem:[%s627_s1 + $0x50] sm:$0xff]   ;;  %18 = vst.msk [vmem:[#allocation2] sm:$0xff] %vm17_vm2, %v503_v42 }
   0x2   :  { %v472_v1 = vld [vmem:[%s627_s1 + $0xc0] sm:$0xff]   ;;  %426 = vmatprep.subr.bf16.mxu0 %v471_v0  ;;  %v476_v5 = vld [vmem:[%s627_s1 + $0xc8] sm:$0xff]   ;;  %v480_v9 = vld [vmem:[%s627_s1 + $0xd0] sm:$0xff]  }
   0x3   :  { %v473_v2 = vld [vmem:[%s627_s1] sm:$0xff]   ;;  %448 = vmatprep.subr.bf16.mxu1 %v472_v1  ;;  %v477_v6 = vld [vmem:[%s627_s1 + $0x8] sm:$0xff]   ;;  %v481_v10 = vld [vmem:[%s627_s1 + $0x10] sm:$0xff]  }
   0x4   :  { %v474_v3 = vld [vmem:[%s627_s1 + $0x80] sm:$0xff]   ;;  %427 = vmatpush3.bf16.msra.mxu0 %v473_v2  ;;  %v478_v7 = vld [vmem:[%s627_s1 + $0x88] sm:$0xff]   ;;  %v482_v11 = vld [vmem:[%s627_s1 + $0x90] sm:$0xff]  }
   0x5   :  { %449 = vmatpush3.bf16.msra.mxu1 %v474_v3  ;;  %428 = vmatprep.subr.bf16.mxu0 %v475_v4  ;;  %v483_v12 = vld [vmem:[%s627_s1 + $0x58] sm:$0xff]   ;;  %v487_v16 = vld [vmem:[%s627_s1 + $0x60] sm:$0xff]   ;;  %v491_v20 = vld [vmem:[%s627_s1 + $0x68] sm:$0xff]  }
   0x6   :  { %450 = vmatprep.subr.bf16.mxu1 %v476_v5  ;;  %v484_v13 = vld [vmem:[%s627_s1 + $0xd8] sm:$0xff]   ;;  %v488_v17 = vld [vmem:[%s627_s1 + $0xe0] sm:$0xff]   ;;  %v492_v21 = vld [vmem:[%s627_s1 + $0xe8] sm:$0xff]  }
   0x7   :  { %v485_v14 = vld [vmem:[%s627_s1 + $0x18] sm:$0xff]   ;;  %v489_v18 = vld [vmem:[%s627_s1 + $0x20] sm:$0xff]   ;;  %v493_v22 = vld [vmem:[%s627_s1 + $0x28] sm:$0xff]  }
   0x8   :  { %429 = vmatpush3.bf16.msra.mxu0 %v477_v6  ;;  %v486_v15 = vld [vmem:[%s627_s1 + $0x98] sm:$0xff]   ;;  %v490_v19 = vld [vmem:[%s627_s1 + $0xa0] sm:$0xff]   ;;  %v494_v23 = vld [vmem:[%s627_s1 + $0xa8] sm:$0xff]  }
   0x9   :  { %451 = vmatpush3.bf16.msra.mxu1 %v478_v7  ;;  %430 = vmatprep.subr.bf16.mxu0 %v479_v8  ;;  %v495_v24 = vld [vmem:[%s627_s1 + $0x70] sm:$0xff]   ;;  %v499_v28 = vld [vmem:[%s627_s1 + $0x78] sm:$0xff]   ;;  %v19_v32 = vld [vmem:[%s628_s0] sm:$0xff] }
   0xa   :  { %452 = vmatprep.subr.bf16.mxu1 %v480_v9  ;;  %v496_v25 = vld [vmem:[%s627_s1 + $0xf0] sm:$0xff]   ;;  %v500_v29 = vld [vmem:[%s627_s1 + $0xf8] sm:$0xff]   ;;  %v20_v33 = vld [vmem:[%s628_s0 + $0x8] sm:$0xff]  ;;  %vm21_vm0 = vcmp.ge.bf16.partialorder %v19_v32, 0  ;;  %v23_v34 = vmul.bf16 1045249613, %v19_v32 }
   0xb   :  { %v497_v26 = vld [vmem:[%s627_s1 + $0x30] sm:$0xff]   ;;  %v501_v30 = vld [vmem:[%s627_s1 + $0x38] sm:$0xff]   ;;  %vm22_vm1 = vcmp.ge.bf16.partialorder %v20_v33, 0  ;;  %v24_v35 = vmul.bf16 1045249613, %v20_v33  ;;  %v27_v51 = vld [vmem:[#allocation2] sm:$0xff] }
   0xc   :  { %431 = vmatpush3.bf16.msra.mxu0 %v481_v10  ;;  %v498_v27 = vld [vmem:[%s627_s1 + $0xb0] sm:$0xff]   ;;  %v502_v31 = vld [vmem:[%s627_s1 + $0xb8] sm:$0xff]   ;;  %v25_v36 = vsel %vm21_vm0, %v19_v32, %v23_v34 }
   0xd   :  { %453 = vmatpush3.bf16.msra.mxu1 %v482_v11  ;;  %432 = vmatprep.subr.bf16.mxu0 %v483_v12  ;;  %v26_v37 = vsel %vm22_vm1, %v20_v33, %v24_v35  ;;  %v390_v38 = vcombine.low %v25_v36, %v25_v36  ;;  %v391_v39 = vcombine.high %v25_v36, %v25_v36 }
   0xe   :  { %454 = vmatprep.subr.bf16.mxu1 %v484_v13  ;;  %v392_v40 = vcombine.low %v26_v37, %v26_v37  ;;  %v393_v41 = vcombine.high %v26_v37, %v26_v37 }
   0xf   :  { %330 = vmatprep.mubr.bf16.mxu0 %v391_v39 }
  0x10   :  { %433 = vmatpush3.bf16.msra.mxu0 %v485_v14  ;;  %370 = vmatprep.mubr.bf16.mxu1 %v393_v41 }
  0x11   :  { %455 = vmatpush3.bf16.msra.mxu1 %v486_v15  ;;  %434 = vmatprep.subr.bf16.mxu0 %v487_v16 }
  0x12   :  { %456 = vmatprep.subr.bf16.mxu1 %v488_v17 }
  0x14   :  { %435 = vmatpush3.bf16.msra.mxu0 %v489_v18 }
  0x15   :  { %457 = vmatpush3.bf16.msra.mxu1 %v490_v19  ;;  %436 = vmatprep.subr.bf16.mxu0 %v491_v20 }
  0x16   :  { %458 = vmatprep.subr.bf16.mxu1 %v492_v21 }
  0x18   :  { %437 = vmatpush3.bf16.msra.mxu0 %v493_v22 }
  0x19   :  { %459 = vmatpush3.bf16.msra.mxu1 %v494_v23  ;;  %438 = vmatprep.subr.bf16.mxu0 %v495_v24 }
  0x1a   :  { %460 = vmatprep.subr.bf16.mxu1 %v496_v25 }
  0x1c   :  { %439 = vmatpush3.bf16.msra.mxu0 %v497_v26 }
  0x1d   :  { %461 = vmatpush3.bf16.msra.mxu1 %v498_v27  ;;  %440 = vmatprep.subr.bf16.mxu0 %v499_v28 }
  0x1e   :  { %462 = vmatprep.subr.bf16.mxu1 %v500_v29 }
  0x20   :  { %441 = vmatpush3.bf16.msra.mxu0 %v501_v30 }
  0x21   :  { %463 = vmatpush3.bf16.msra.mxu1 %v502_v31 }
  0x23   :  { %331 = vmatmul.mubr.bf16.vlgmr.msra.gmra.mrb[0].mxu0 %v390_v38 }
  0x24   :  { %371 = vmatmul.mubr.bf16.vlgmr.msra.gmra.mrb[0].mxu1 %v392_v40 }
  0xf6   :  { %v442_v43 = vpop.f32.mrb[0].mxu0 }
  0xf7   :  { %v464_v44 = vpop.f32.mrb[0].mxu1  ;;  %v443_v45 = vpop.f32.mrb[1].mxu0 }
  0xf8   :  { %v465_v46 = vpop.f32.mrb[1].mxu1  ;;  %v444_v47 = vadd.f32 %v443_v45, %v442_v43  ;;  %v445_v49 = vpop.f32.mrb[2].mxu0 }
  0xf9   :  { %v466_v48 = vadd.f32 %v465_v46, %v464_v44  ;;  %v467_v50 = vpop.f32.mrb[2].mxu1  ;;  %v446_v52 = vpop.f32.mrb[3].mxu0 }
  0xfa   :  { %v468_v53 = vpop.f32.mrb[3].mxu1 }
  0xfb   :  { %v373_v54 = vadd.f32 %v466_v48, %v444_v47 }
  0xfd   :  { %v378_v55 = vadd.f32 %v373_v54, %v27_v51 }
  0xff   :  { %380 = vst.msk [vmem:[#allocation2] sm:$0xff] %vm17_vm2, %v378_v55 }
 0x106   :  { %v384_v56 = vld [vmem:[#allocation2] sm:$0xff] }
 0x107   :  { %385 = vst.msk [vmem:[%s629_s2] sm:$0xff] %vm17_vm2, %v384_v56 }

// kernel: _lambda_.24
= control target key start
LH: loop header
LB: loop body
LE: loop exit
PB: predicated region body
PF: predicated region fallthrough
CT: control target
= control target key end

     0   :  { %s837_s9 = smov 0   ;;  %s839_s10 = smov 0   ;;  %s921_s0 = inlined_call_operand.vmem [shape: bf16[2,1024], index: 0, kind: input, shape index: {}]   ;;  %s922_s1 = inlined_call_operand.vmem [shape: bf16[1024,64], index: 1, kind: input, shape index: {}]   ;;  %s923_s2 = inlined_call_operand.vmem [shape: f32[2,64], index: 2, kind: output, shape index: {}]  }
   0x1   :  { %s841_s11 = smov 0  }
   0x2 LB: > { %s21_s12 = sadd.s32 1, %s814_s10  ;;  %p653_p0 = scmp.ge.s32.totalorder %s818_s11, 1  ;;  %s818_s11 = sphi %s841_s11, %s12_s11   ;;  %s814_s10 = sphi %s839_s10, %s925_s10   ;;  %s810_s9 = sphi %s837_s9, %s924_s9  }
   0x3   : > { %p22_p1 = scmp.ge.s32.totalorder %s21_s12, 2  ;;  %p141_p2 = scmp.lt.s32.totalorder %s818_s11, 3 }
   0x5   : > { %s927_s12 = smov (%p22_p1, %s21_s12), 0  ;;  %p142_p3 = pnand %p653_p0, %p141_p2 }
   0x6   : > { %s654_s13 = sshll.u32 (!%p142_p3), %s810_s9, 2  ;;  %s655_s14 = sshll.u32 (!%p142_p3), %s810_s9, 6 }
   0x7   : > { %145 = sbr.rel (%p142_p3) target bundleno = 286 (0x11e), region = 28  ;;  %p173_p4 = scmp.lt.s32.totalorder (!%p142_p3), %s654_s13, 7 }
   0x8   : > { %p180_p5 = scmp.lt.s32.totalorder (!%p142_p3), %s655_s14, 127  ;;  %p657_p6 = scmp.ne.s32.totalorder (!%p142_p3), %s810_s9, 0 }
   0xe   : > { %s929_s13 = smov (!%p173_p4, %s654_s13), 7  ;;  %s931_s14 = smov (!%p180_p5, %s655_s14), 127 }
   0xf   : > { %s177_s17 = scalar_lea.vmem %s921_s0, %s929_s13  ;;  %s656_s18 = sshll.u32 %s931_s14, 2  ;;  %vm195_vm0 = vcmask (!%p657_p6), 517120   ;;  %v820_v0 = vmov (!%p657_p6), 0.0  }
  0x10   : > { %s868_s21 = scalar_lea.vmem %s922_s1, %s656_s18  ;;  %194 = sbr.rel (%p657_p6) target bundleno = 23 (0x17), region = 32  ;;  %196 = vst.msk [vmem:[#allocation2] sm:$0x3] (!%p657_p6), %vm195_vm0, %v820_v0 }
  0x17 PF: > { %v764_v1 = vld [vmem:[%s868_s21 + $0x40] sm:$0xff]   ;;  %v768_v5 = vld [vmem:[%s868_s21 + $0x48] sm:$0xff]   ;;  %v772_v9 = vld [vmem:[%s868_s21 + $0x50] sm:$0xff]   ;;  %v270_v31 = vlaneseq  ;;  %v821_v36 = vmov 1966171168   ;;  %vm568_vm2 = vcmask 517120  }
  0x18   : > { %v765_v2 = vld [vmem:[%s868_s21 + $0xc0] sm:$0xff]   ;;  %694 = vmatprep.subr.bf16.mxu0 %v764_v1  ;;  %v769_v6 = vld [vmem:[%s868_s21 + $0xc8] sm:$0xff]   ;;  %v773_v10 = vld [vmem:[%s868_s21 + $0xd0] sm:$0xff]   ;;  %v268_v37 = vunpack.c.l.s4 %v821_v36  ;;  %p690_p7 = scmp.ne.s32.totalorder %s810_s9, 1 }
  0x19   : > { %v766_v3 = vld [vmem:[%s868_s21] sm:$0xff]   ;;  %716 = vmatprep.subr.bf16.mxu1 %v765_v2  ;;  %v770_v7 = vld [vmem:[%s868_s21 + $0x8] sm:$0xff]   ;;  %v774_v11 = vld [vmem:[%s868_s21 + $0x10] sm:$0xff]   ;;  %v271_v38 = vshrl.u32 %v270_v31, 7 }
  0x1a   : > { %v767_v4 = vld [vmem:[%s868_s21 + $0x80] sm:$0xff]   ;;  %695 = vmatpush3.bf16.msra.mxu0 %v766_v3  ;;  %v771_v8 = vld [vmem:[%s868_s21 + $0x88] sm:$0xff]   ;;  %v775_v12 = vld [vmem:[%s868_s21 + $0x90] sm:$0xff]   ;;  %v269_v39 = vunpack.c.0.s8 %v268_v37 }
  0x1b   : > { %717 = vmatpush3.bf16.msra.mxu1 %v767_v4  ;;  %696 = vmatprep.subr.bf16.mxu0 %v768_v5  ;;  %v776_v13 = vld [vmem:[%s868_s21 + $0x58] sm:$0xff]   ;;  %v780_v17 = vld [vmem:[%s868_s21 + $0x60] sm:$0xff]   ;;  %v784_v21 = vld [vmem:[%s868_s21 + $0x68] sm:$0xff]  }
  0x1c   : > { %718 = vmatprep.subr.bf16.mxu1 %v769_v6  ;;  %v777_v14 = vld [vmem:[%s868_s21 + $0xd8] sm:$0xff]   ;;  %v781_v18 = vld [vmem:[%s868_s21 + $0xe0] sm:$0xff]   ;;  %v785_v22 = vld [vmem:[%s868_s21 + $0xe8] sm:$0xff]   ;;  %v272_v41 = vsub.s32 %v269_v39, %v271_v38 }
  0x1d   : > { %v778_v15 = vld [vmem:[%s868_s21 + $0x18] sm:$0xff]   ;;  %v782_v19 = vld [vmem:[%s868_s21 + $0x20] sm:$0xff]   ;;  %v786_v23 = vld [vmem:[%s868_s21 + $0x28] sm:$0xff]  }
  0x1e   : > { %697 = vmatpush3.bf16.msra.mxu0 %v770_v7  ;;  %v779_v16 = vld [vmem:[%s868_s21 + $0x98] sm:$0xff]   ;;  %v783_v20 = vld [vmem:[%s868_s21 + $0xa0] sm:$0xff]   ;;  %v787_v24 = vld [vmem:[%s868_s21 + $0xa8] sm:$0xff]  }
  0x1f   : > { %719 = vmatpush3.bf16.msra.mxu1 %v771_v8  ;;  %698 = vmatprep.subr.bf16.mxu0 %v772_v9  ;;  %v788_v25 = vld [vmem:[%s868_s21 + $0x70] sm:$0xff]   ;;  %v792_v29 = vld [vmem:[%s868_s21 + $0x78] sm:$0xff]   ;;  %v197_v34 = vld [vmem:[%s177_s17] sm:$0xf] }
  0x20   : > { %720 = vmatprep.subr.bf16.mxu1 %v773_v10  ;;  %v789_v26 = vld [vmem:[%s868_s21 + $0xf0] sm:$0xff]   ;;  %v793_v30 = vld [vmem:[%s868_s21 + $0xf8] sm:$0xff]   ;;  %vm198_vm1 = vcmp.ge.bf16.partialorder %v197_v34, 0  ;;  %v199_v35 = vmul.bf16 1045249613, %v197_v34 }
  0x21   : > { %v790_v27 = vld [vmem:[%s868_s21 + $0x30] sm:$0xff]   ;;  %v794_v32 = vld [vmem:[%s868_s21 + $0x38] sm:$0xff]   ;;  %v201_v57 = vld [vmem:[#allocation2] sm:$0x3] }
  0x22   : > { %699 = vmatpush3.bf16.msra.mxu0 %v774_v11  ;;  %v791_v28 = vld [vmem:[%s868_s21 + $0xb0] sm:$0xff]   ;;  %v795_v33 = vld [vmem:[%s868_s21 + $0xb8] sm:$0xff]   ;;  %v200_v40 = vsel %vm198_vm1, %v197_v34, %v199_v35 }
  0x23   : > { %721 = vmatpush3.bf16.msra.mxu1 %v775_v12  ;;  %700 = vmatprep.subr.bf16.mxu0 %v776_v13  ;;  %v273_v42 = vrot.slane %v200_v40, %v272_v41 }
  0x24   : > { %722 = vmatprep.subr.bf16.mxu1 %v777_v14 }
  0x25   : > { %v274_v43 = vcombine.high %v273_v42, %v273_v42  ;;  %v281_v44 = vrot.slane %v273_v42, %v272_v41 }
  0x26   : > { %701 = vmatpush3.bf16.msra.mxu0 %v778_v15 }
  0x27   : > { %723 = vmatpush3.bf16.msra.mxu1 %v779_v16  ;;  %702 = vmatprep.subr.bf16.mxu0 %v780_v17  ;;  %v288_v45 = vrot.slane %v274_v43, %v272_v41  ;;  %v289_v46 = vcombine.high %v281_v44, %v281_v44 }
  0x28   : > { %724 = vmatprep.subr.bf16.mxu1 %v781_v18 }
  0x29   : > { %519 = vmatprep.mubr.bf16.mxu0 %v288_v45  ;;  %v290_v47 = vcombine.high %v288_v45, %v288_v45 }
  0x2a   : > { %703 = vmatpush3.bf16.msra.mxu0 %v782_v19 }
  0x2b   : > { %725 = vmatpush3.bf16.msra.mxu1 %v783_v20  ;;  %704 = vmatprep.subr.bf16.mxu0 %v784_v21 }
  0x2c   : > { %726 = vmatprep.subr.bf16.mxu1 %v785_v22  ;;  %559 = vmatprep.mubr.bf16.mxu1 %v290_v47 }
  0x2e   : > { %705 = vmatpush3.bf16.msra.mxu0 %v786_v23 }
  0x2f   : > { %727 = vmatpush3.bf16.msra.mxu1 %v787_v24  ;;  %706 = vmatprep.subr.bf16.mxu0 %v788_v25 }
  0x30   : > { %728 = vmatprep.subr.bf16.mxu1 %v789_v26 }
  0x32   : > { %707 = vmatpush3.bf16.msra.mxu0 %v790_v27 }
  0x33   : > { %729 = vmatpush3.bf16.msra.mxu1 %v791_v28  ;;  %708 = vmatprep.subr.bf16.mxu0 %v792_v29 }
  0x34   : > { %730 = vmatprep.subr.bf16.mxu1 %v793_v30 }
  0x36   : > { %709 = vmatpush3.bf16.msra.mxu0 %v794_v32 }
  0x37   : > { %731 = vmatpush3.bf16.msra.mxu1 %v795_v33 }
  0x39   : > { %520 = vmatmul.mubr.bf16.vlgmr.msra.gmra.mrb[0].mxu0 %v281_v44 }
  0x3a   : > { %560 = vmatmul.mubr.bf16.vlgmr.msra.gmra.mrb[0].mxu1 %v289_v46 }
 0x10c   : > { %v710_v48 = vpop.f32.mrb[0].mxu0 }
 0x10d   : > { %v711_v49 = vpop.f32.mrb[1].mxu0  ;;  %v732_v50 = vpop.f32.mrb[0].mxu1 }
 0x10e   : > { %v712_v51 = vadd.f32 %v711_v49, %v710_v48  ;;  %v713_v52 = vpop.f32.mrb[2].mxu0  ;;  %v733_v53 = vpop.f32.mrb[1].mxu1 }
 0x10f   : > { %v714_v54 = vpop.f32.mrb[3].mxu0  ;;  %v734_v55 = vadd.f32 %v733_v53, %v732_v50  ;;  %v735_v56 = vpop.f32.mrb[2].mxu1  ;;  %573 = sbr.rel (%p690_p7) target bundleno = 286 (0x11e), region = 36 }
 0x110   : > { %v736_v58 = vpop.f32.mrb[3].mxu1 }
 0x111   : > { %v562_v59 = vadd.f32 %v734_v55, %v712_v51 }
 0x113   : > { %v567_v60 = vadd.f32 %v562_v59, %v201_v57 }
 0x115   : > { %569 = vst.msk [vmem:[#allocation2] sm:$0x3] %vm568_vm2, %v567_v60 }
 0x11c   : > { %v574_v61 = vld [vmem:[#allocation2] sm:$0x3] }
 0x11d   : > { %575 = vst.msk [vmem:[%s923_s2] sm:$0x3] %vm568_vm2, %v574_v61 }
 0x11e PF: > { %s12_s11 = sadd.s32 1, %s818_s11   ;;  %s924_s9 = smov %s814_s10 }
 0x11f   : > { %p9_p8 = scmp.ge.s32.totalorder %s12_s11, 4   ;;  %s925_s10 = smov %s927_s12 }
 0x121   :  { %11 = sbr.rel (!%p9_p8) target bundleno = 2 (0x2), region = 69 }

// kernel: _lambda_.25
= control target key start
LH: loop header
LB: loop body
LE: loop exit
PB: predicated region body
PF: predicated region fallthrough
CT: control target
= control target key end

     0   :  { %v360_v14 = vmov 0   ;;  %s481_s1 = inlined_call_operand.vmem [shape: bf16[256,256], index: 1, kind: input, shape index: {}]   ;;  %s482_s0 = inlined_call_operand.vmem [shape: bf16[8,256], index: 0, kind: input, shape index: {}]   ;;  %s483_s2 = inlined_call_operand.vmem [shape: f32[8,256], index: 2, kind: output, shape index: {}]  }
   0x1   :  { %v312_v0 = vld [vmem:[%s481_s1 + $0x4] ss:$8 sps:$4 sm:$0xff]   ;;  %v314_v1 = vld [vmem:[%s481_s1] ss:$8 sps:$4 sm:$0xff]   ;;  %v315_v2 = vld [vmem:[%s481_s1 + $0x14] ss:$8 sps:$4 sm:$0xff]  }
   0x2   :  { %221 = vmatprep.subr.bf16.mxu0 %v312_v0  ;;  %v317_v3 = vld [vmem:[%s481_s1 + $0x10] ss:$8 sps:$4 sm:$0xff]   ;;  %v318_v4 = vld [vmem:[%s481_s1 + $0x24] ss:$8 sps:$4 sm:$0xff]   ;;  %v320_v5 = vld [vmem:[%s481_s1 + $0x20] ss:$8 sps:$4 sm:$0xff]  }
   0x3   :  { %222 = vmatpush1.bf16.msra.mxu0 %v314_v1  ;;  %v321_v6 = vld [vmem:[%s481_s1 + $0x34] ss:$8 sps:$4 sm:$0xff]   ;;  %v323_v7 = vld [vmem:[%s481_s1 + $0x30] ss:$8 sps:$4 sm:$0xff]   ;;  %v324_v8 = vld [vmem:[%s481_s1 + $0x44] ss:$8 sps:$4 sm:$0xff]  }
   0x4   :  { %223 = vmatprep.subr.bf16.mxu0 %v315_v2  ;;  %v326_v9 = vld [vmem:[%s481_s1 + $0x40] ss:$8 sps:$4 sm:$0xff]   ;;  %v327_v10 = vld [vmem:[%s481_s1 + $0x54] ss:$8 sps:$4 sm:$0xff]   ;;  %v329_v11 = vld [vmem:[%s481_s1 + $0x50] ss:$8 sps:$4 sm:$0xff]  }
   0x5   :  { %v330_v12 = vld [vmem:[%s481_s1 + $0x64] ss:$8 sps:$4 sm:$0xff]   ;;  %v332_v16 = vld [vmem:[%s481_s1 + $0x60] ss:$8 sps:$4 sm:$0xff]   ;;  %v333_v17 = vld [vmem:[%s481_s1 + $0x74] ss:$8 sps:$4 sm:$0xff]  }
   0x6   :  { %v18_v13 = vld [vmem:[%s482_s0] sm:$0xff]  ;;  %v335_v19 = vld [vmem:[%s481_s1 + $0x70] ss:$8 sps:$4 sm:$0xff]   ;;  %v339_v22 = vld [vmem:[%s481_s1 + $0x94] ss:$8 sps:$4 sm:$0xff]  }
   0x7   :  { %224 = vmatpush1.bf16.msra.mxu0 %v317_v3  ;;  %v19_v15 = vmax.bf16 %v360_v14, %v18_v13  ;;  %v336_v20 = vld [vmem:[%s481_s1 + $0x84] ss:$8 sps:$4 sm:$0xff]   ;;  %v338_v21 = vld [vmem:[%s481_s1 + $0x80] ss:$8 sps:$4 sm:$0xff]   ;;  %v341_v23 = vld [vmem:[%s481_s1 + $0x90] ss:$8 sps:$4 sm:$0xff]  }
   0x8   :  { %225 = vmatprep.subr.bf16.mxu0 %v318_v4  ;;  %v342_v24 = vld [vmem:[%s481_s1 + $0xa4] ss:$8 sps:$4 sm:$0xff]   ;;  %v344_v25 = vld [vmem:[%s481_s1 + $0xa0] ss:$8 sps:$4 sm:$0xff]   ;;  %v345_v26 = vld [vmem:[%s481_s1 + $0xb4] ss:$8 sps:$4 sm:$0xff]  }
   0x9   :  { %v278_v18 = vcombine.high %v19_v15, %v19_v15  ;;  %v347_v27 = vld [vmem:[%s481_s1 + $0xb0] ss:$8 sps:$4 sm:$0xff]   ;;  %v348_v28 = vld [vmem:[%s481_s1 + $0xc4] ss:$8 sps:$4 sm:$0xff]   ;;  %v350_v29 = vld [vmem:[%s481_s1 + $0xc0] ss:$8 sps:$4 sm:$0xff]   ;;  %v277_v36 = vcombine.low %v19_v15, %v19_v15 }
   0xa   :  { %v351_v30 = vld [vmem:[%s481_s1 + $0xd4] ss:$8 sps:$4 sm:$0xff]   ;;  %v353_v31 = vld [vmem:[%s481_s1 + $0xd0] ss:$8 sps:$4 sm:$0xff]   ;;  %v354_v32 = vld [vmem:[%s481_s1 + $0xe4] ss:$8 sps:$4 sm:$0xff]  }
   0xb   :  { %226 = vmatpush1.bf16.msra.mxu0 %v320_v5  ;;  %253 = vmatprep.mubr.bf16.mxu0 %v278_v18  ;;  %v356_v33 = vld [vmem:[%s481_s1 + $0xe0] ss:$8 sps:$4 sm:$0xff]   ;;  %v357_v34 = vld [vmem:[%s481_s1 + $0xf4] ss:$8 sps:$4 sm:$0xff]   ;;  %v359_v35 = vld [vmem:[%s481_s1 + $0xf0] ss:$8 sps:$4 sm:$0xff]  }
   0xc   :  { %227 = vmatprep.subr.bf16.mxu0 %v321_v6 }
   0xf   :  { %228 = vmatpush1.bf16.msra.mxu0 %v323_v7 }
  0x10   :  { %229 = vmatprep.subr.bf16.mxu0 %v324_v8 }
  0x13   :  { %230 = vmatpush1.bf16.msra.mxu0 %v326_v9 }
  0x14   :  { %231 = vmatprep.subr.bf16.mxu0 %v327_v10 }
  0x17   :  { %232 = vmatpush1.bf16.msra.mxu0 %v329_v11 }
  0x18   :  { %233 = vmatprep.subr.bf16.mxu0 %v330_v12 }
  0x1b   :  { %234 = vmatpush1.bf16.msra.mxu0 %v332_v16 }
  0x1c   :  { %235 = vmatprep.subr.bf16.mxu0 %v333_v17 }
  0x1f   :  { %236 = vmatpush1.bf16.msra.mxu0 %v335_v19 }
  0x20   :  { %237 = vmatprep.subr.bf16.mxu0 %v336_v20 }
  0x23   :  { %238 = vmatpush1.bf16.msra.mxu0 %v338_v21 }
  0x24   :  { %239 = vmatprep.subr.bf16.mxu0 %v339_v22 }
  0x27   :  { %240 = vmatpush1.bf16.msra.mxu0 %v341_v23 }
  0x28   :  { %241 = vmatprep.subr.bf16.mxu0 %v342_v24 }
  0x2b   :  { %242 = vmatpush1.bf16.msra.mxu0 %v344_v25 }
  0x2c   :  { %243 = vmatprep.subr.bf16.mxu0 %v345_v26 }
  0x2f   :  { %244 = vmatpush1.bf16.msra.mxu0 %v347_v27 }
  0x30   :  { %245 = vmatprep.subr.bf16.mxu0 %v348_v28 }
  0x33   :  { %246 = vmatpush1.bf16.msra.mxu0 %v350_v29 }
  0x34   :  { %247 = vmatprep.subr.bf16.mxu0 %v351_v30 }
  0x37   :  { %248 = vmatpush1.bf16.msra.mxu0 %v353_v31 }
  0x38   :  { %249 = vmatprep.subr.bf16.mxu0 %v354_v32 }
  0x3b   :  { %250 = vmatpush1.bf16.msra.mxu0 %v356_v33 }
  0x3c   :  { %251 = vmatprep.subr.bf16.mxu0 %v357_v34 }
  0x3f   :  { %252 = vmatpush1.bf16.msra.mxu0 %v359_v35 }
  0x42   :  { %254 = vmatmul.mubr.bf16.vlgmr.msra.gmra.mrb[0].mxu0 %v277_v36 }
 0x115   :  { %v255_v37 = vpop.f32.mrb[0].mxu0 }
 0x116   :  { %271 = vst [vmem:[%s483_s2] sm:$0xff] %v255_v37  ;;  %v257_v38 = vpop.f32.mrb[1].mxu0 }
 0x117   :  { %272 = vst [vmem:[%s483_s2 + $0x8] sm:$0xff] %v257_v38  ;;  %v259_v39 = vpop.f32.mrb[2].mxu0 }
 0x118   :  { %v260_v40 = vpop.f32.mrb[3].mxu0 }

// kernel: _lambda_.27
= control target key start
LH: loop header
LB: loop body
LE: loop exit
PB: predicated region body
PF: predicated region fallthrough
CT: control target
= control target key end

     0   :  { %v569_v35 = vmov 0   ;;  %v570_v53 = vmov 0.0   ;;  %s709_s1 = inlined_call_operand.vmem [shape: bf16[512,128], index: 1, kind: input, shape index: {}]   ;;  %s710_s0 = inlined_call_operand.vmem [shape: bf16[18,512], index: 0, kind: input, shape index: {}]   ;;  %s711_s2 = inlined_call_operand.vmem [shape: f32[18,128], index: 2, kind: output, shape index: {}]  }
   0x1   :  { %v537_v0 = vld [vmem:[%s709_s1 + $0x40] sm:$0xff]   ;;  %v541_v4 = vld [vmem:[%s709_s1 + $0x48] sm:$0xff]   ;;  %v545_v8 = vld [vmem:[%s709_s1 + $0x50] sm:$0xff]   ;;  %18 = vst [vmem:[#allocation2 + $0x10] sm:$0x3] %v570_v53 }
   0x2   :  { %v538_v1 = vld [vmem:[%s709_s1 + $0xc0] sm:$0xff]   ;;  %479 = vmatprep.subr.bf16.mxu0 %v537_v0  ;;  %v542_v5 = vld [vmem:[%s709_s1 + $0xc8] sm:$0xff]   ;;  %v546_v9 = vld [vmem:[%s709_s1 + $0xd0] sm:$0xff]  }
   0x3   :  { %v539_v2 = vld [vmem:[%s709_s1] sm:$0xff]   ;;  %507 = vmatprep.subr.bf16.mxu1 %v538_v1  ;;  %v543_v6 = vld [vmem:[%s709_s1 + $0x8] sm:$0xff]   ;;  %v547_v10 = vld [vmem:[%s709_s1 + $0x10] sm:$0xff]  }
   0x4   :  { %v540_v3 = vld [vmem:[%s709_s1 + $0x80] sm:$0xff]   ;;  %480 = vmatpush3.bf16.msra.mxu0 %v539_v2  ;;  %v544_v7 = vld [vmem:[%s709_s1 + $0x88] sm:$0xff]   ;;  %v548_v11 = vld [vmem:[%s709_s1 + $0x90] sm:$0xff]  }
   0x5   :  { %508 = vmatpush3.bf16.msra.mxu1 %v540_v3  ;;  %481 = vmatprep.subr.bf16.mxu0 %v541_v4  ;;  %v549_v12 = vld [vmem:[%s709_s1 + $0x58] sm:$0xff]   ;;  %v553_v16 = vld [vmem:[%s709_s1 + $0x60] sm:$0xff]   ;;  %v557_v20 = vld [vmem:[%s709_s1 + $0x68] sm:$0xff]  }
   0x6   :  { %509 = vmatprep.subr.bf16.mxu1 %v542_v5  ;;  %v550_v13 = vld [vmem:[%s709_s1 + $0xd8] sm:$0xff]   ;;  %v554_v17 = vld [vmem:[%s709_s1 + $0xe0] sm:$0xff]   ;;  %v558_v21 = vld [vmem:[%s709_s1 + $0xe8] sm:$0xff]  }
   0x7   :  { %v551_v14 = vld [vmem:[%s709_s1 + $0x18] sm:$0xff]   ;;  %v555_v18 = vld [vmem:[%s709_s1 + $0x20] sm:$0xff]   ;;  %v559_v22 = vld [vmem:[%s709_s1 + $0x28] sm:$0xff]  }
   0x8   :  { %482 = vmatpush3.bf16.msra.mxu0 %v543_v6  ;;  %v552_v15 = vld [vmem:[%s709_s1 + $0x98] sm:$0xff]   ;;  %v556_v19 = vld [vmem:[%s709_s1 + $0xa0] sm:$0xff]   ;;  %v560_v23 = vld [vmem:[%s709_s1 + $0xa8] sm:$0xff]  }
   0x9   :  { %510 = vmatpush3.bf16.msra.mxu1 %v544_v7  ;;  %483 = vmatprep.subr.bf16.mxu0 %v545_v8  ;;  %v561_v24 = vld [vmem:[%s709_s1 + $0x70] sm:$0xff]   ;;  %v565_v28 = vld [vmem:[%s709_s1 + $0x78] sm:$0xff]   ;;  %v19_v32 = vld [vmem:[%s710_s0] sm:$0xff] }
   0xa   :  { %511 = vmatprep.subr.bf16.mxu1 %v546_v9  ;;  %v562_v25 = vld [vmem:[%s709_s1 + $0xf0] sm:$0xff]   ;;  %v566_v29 = vld [vmem:[%s709_s1 + $0xf8] sm:$0xff]   ;;  %v20_v34 = vld [vmem:[%s710_s0 + $0x8] sm:$0xff]  ;;  %v25_v36 = vmax.bf16 %v569_v35, %v19_v32 }
   0xb   :  { %v563_v26 = vld [vmem:[%s709_s1 + $0x30] sm:$0xff]   ;;  %v567_v30 = vld [vmem:[%s709_s1 + $0x38] sm:$0xff]   ;;  %v26_v39 = vmax.bf16 %v569_v35, %v20_v34  ;;  %v23_v40 = vld [vmem:[%s710_s0 + $0x20] sm:$0x11] }
   0xc   :  { %484 = vmatpush3.bf16.msra.mxu0 %v547_v10  ;;  %v564_v27 = vld [vmem:[%s709_s1 + $0xb0] sm:$0xff]   ;;  %v568_v31 = vld [vmem:[%s709_s1 + $0xb8] sm:$0xff]   ;;  %v24_v41 = vld [vmem:[%s710_s0 + $0x28] sm:$0x11]  ;;  %v29_v43 = vmax.bf16 %v569_v35, %v23_v40 }
   0xd   :  { %512 = vmatpush3.bf16.msra.mxu1 %v548_v11  ;;  %485 = vmatprep.subr.bf16.mxu0 %v549_v12  ;;  %v21_v33 = vld [vmem:[%s710_s0 + $0x10] sm:$0xff]  ;;  %v22_v38 = vld [vmem:[%s710_s0 + $0x18] sm:$0xff]  ;;  %v30_v44 = vmax.bf16 %v569_v35, %v24_v41 }
   0xe   :  { %513 = vmatprep.subr.bf16.mxu1 %v550_v13  ;;  %v27_v37 = vmax.bf16 %v569_v35, %v21_v33  ;;  %v28_v42 = vmax.bf16 %v569_v35, %v22_v38  ;;  %v444_v49 = vcombine.high %v29_v43, %v29_v43  ;;  %v443_v51 = vcombine.low %v29_v43, %v29_v43  ;;  %v33_v13 = vld [vmem:[#allocation2 + $0x10] sm:$0x3] }
   0xf   :  { %v446_v50 = vcombine.high %v30_v44, %v30_v44  ;;  %v445_v52 = vcombine.low %v30_v44, %v30_v44 }
  0x10   :  { %486 = vmatpush3.bf16.msra.mxu0 %v551_v14  ;;  %v440_v45 = vcombine.high %v25_v36, %v27_v37  ;;  %v439_v46 = vcombine.low %v25_v36, %v27_v37  ;;  %v442_v47 = vcombine.high %v26_v39, %v28_v42  ;;  %v441_v48 = vcombine.low %v26_v39, %v28_v42 }
  0x11   :  { %514 = vmatpush3.bf16.msra.mxu1 %v552_v15  ;;  %487 = vmatprep.subr.bf16.mxu0 %v553_v16 }
  0x12   :  { %515 = vmatprep.subr.bf16.mxu1 %v554_v17  ;;  %356 = vmatprep.mubr.bf16.mxu0 %v440_v45 }
  0x13   :  { %404 = vmatprep.mubr.bf16.mxu1 %v442_v47 }
  0x14   :  { %488 = vmatpush3.bf16.msra.mxu0 %v555_v18 }
  0x15   :  { %516 = vmatpush3.bf16.msra.mxu1 %v556_v19  ;;  %489 = vmatprep.subr.bf16.mxu0 %v557_v20 }
  0x16   :  { %517 = vmatprep.subr.bf16.mxu1 %v558_v21 }
  0x18   :  { %490 = vmatpush3.bf16.msra.mxu0 %v559_v22 }
  0x19   :  { %518 = vmatpush3.bf16.msra.mxu1 %v560_v23  ;;  %491 = vmatprep.subr.bf16.mxu0 %v561_v24 }
  0x1a   :  { %519 = vmatprep.subr.bf16.mxu1 %v562_v25 }
  0x1c   :  { %492 = vmatpush3.bf16.msra.mxu0 %v563_v26 }
  0x1d   :  { %520 = vmatpush3.bf16.msra.mxu1 %v564_v27  ;;  %493 = vmatprep.subr.bf16.mxu0 %v565_v28 }
  0x1e   :  { %521 = vmatprep.subr.bf16.mxu1 %v566_v29 }
  0x20   :  { %494 = vmatpush3.bf16.msra.mxu0 %v567_v30 }
  0x21   :  { %522 = vmatpush3.bf16.msra.mxu1 %v568_v31 }
  0x23   :  { %357 = vmatmul.mubr.bf16.vlgmr.msra.gmra.mrb[0].mxu0 %v439_v46 }
  0x24   :  { %405 = vmatmul.mubr.bf16.vlgmr.msra.gmra.mrb[0].mxu1 %v441_v48  ;;  %364 = vmatprep.mubr.bf16.mxu0 %v444_v49 }
  0x25   :  { %412 = vmatprep.mubr.bf16.mxu1 %v446_v50 }
  0x2b   :  { %365 = vmatmul.mubr.bf16.gmra.mrb[4].mxu0 %v443_v51 }
  0x2c   :  { %413 = vmatmul.mubr.bf16.gmra.mrb[4].mxu1 %v445_v52 }
  0xf6   :  { %v495_v54 = vpop.f32.mrb[0].mxu0 }
  0xf7   :  { %v523_v55 = vpop.f32.mrb[0].mxu1  ;;  %v496_v56 = vpop.f32.mrb[1].mxu0 }
  0xf8   :  { %v497_v57 = vadd.f32 %v496_v56, %v495_v54  ;;  %v524_v58 = vpop.f32.mrb[1].mxu1  ;;  %v498_v59 = vpop.f32.mrb[2].mxu0 }
  0xf9   :  { %v525_v60 = vadd.f32 %v524_v58, %v523_v55  ;;  %v526_v61 = vpop.f32.mrb[2].mxu1  ;;  %v499_v62 = vpop.f32.mrb[3].mxu0 }
  0xfa   :  { %v500_v63 = vadd.f32 %v499_v62, %v498_v59  ;;  %v527_v0 = vpop.f32.mrb[3].mxu1 }
  0xfb   :  { %v407_v1 = vadd.f32 %v525_v60, %v497_v57  ;;  %v528_v2 = vadd.f32 %v527_v0, %v526_v61 }
  0xfd   :  { %v410_v3 = vadd.f32 %v528_v2, %v500_v63  ;;  %432 = vst [vmem:[%s711_s2] sm:$0xff] %v407_v1 }
  0xfe   :  { %v501_v4 = vpop.f32.mrb[4].mxu0 }
  0xff   :  { %v529_v5 = vpop.f32.mrb[4].mxu1  ;;  %v502_v6 = vpop.f32.mrb[5].mxu0  ;;  %433 = vst [vmem:[%s711_s2 + $0x8] sm:$0xff] %v410_v3 }
 0x100   :  { %v503_v7 = vadd.f32 %v502_v6, %v501_v4  ;;  %v530_v8 = vpop.f32.mrb[5].mxu1  ;;  %v504_v9 = vpop.f32.mrb[6].mxu0 }
 0x101   :  { %v531_v10 = vadd.f32 %v530_v8, %v529_v5  ;;  %v532_v11 = vpop.f32.mrb[6].mxu1  ;;  %v505_v12 = vpop.f32.mrb[7].mxu0 }
 0x102   :  { %v533_v14 = vpop.f32.mrb[7].mxu1 }
 0x103   :  { %v415_v15 = vadd.f32 %v531_v10, %v503_v7 }
 0x105   :  { %v422_v16 = vadd.f32 %v415_v15, %v33_v13 }
 0x107   :  { %425 = vst [vmem:[#allocation2 + $0x10] sm:$0x3] %v422_v16 }
 0x10e   :  { %v431_v17 = vld [vmem:[#allocation2 + $0x10] sm:$0x3] }
 0x10f   :  { %434 = vst [vmem:[%s711_s2 + $0x10] sm:$0x3] %v431_v17 }

// kernel: _lambda_.29
= control target key start
LH: loop header
LB: loop body
LE: loop exit
PB: predicated region body
PF: predicated region fallthrough
CT: control target
= control target key end

     0   :  { %v410_v14 = vmov 0   ;;  %vm16_vm0 = vcmask 523264   ;;  %v411_v39 = vmov 0.0   ;;  %vm23_vm1 = vcmask 517120   ;;  %s538_s1 = inlined_call_operand.vmem [shape: bf16[256,64], index: 1, kind: input, shape index: {}]   ;;  %s539_s0 = inlined_call_operand.vmem [shape: bf16[50,256], index: 0, kind: input, shape index: {}]   ;;  %s540_s2 = inlined_call_operand.vmem [shape: f32[50,64], index: 2, kind: output, shape index: {}]  }
   0x1   :  { %v394_v0 = vld [vmem:[%s538_s1 + $0x40] sm:$0xff]   ;;  %v396_v2 = vld [vmem:[%s538_s1 + $0x48] sm:$0xff]   ;;  %v398_v4 = vld [vmem:[%s538_s1 + $0x50] sm:$0xff]   ;;  %17 = vst.msk [vmem:[#allocation2] sm:$0xff] %vm16_vm0, %v411_v39 }
   0x2   :  { %v395_v1 = vld [vmem:[%s538_s1] sm:$0xff]   ;;  %336 = vmatprep.subr.bf16.mxu0 %v394_v0  ;;  %376 = vmatprep.subr.bf16.mxu1 %v394_v0  ;;  %v397_v3 = vld [vmem:[%s538_s1 + $0x8] sm:$0xff]   ;;  %v399_v5 = vld [vmem:[%s538_s1 + $0x10] sm:$0xff]   ;;  %18 = vst.msk [vmem:[#allocation2 + $0x8] sm:$0xff] %vm16_vm0, %v411_v39 }
   0x3   :  { %337 = vmatpush3.bf16.msra.mxu0 %v395_v1  ;;  %384 = vmatpush3.bf16.msra.mxu1 %v395_v1  ;;  %v400_v6 = vld [vmem:[%s538_s1 + $0x58] sm:$0xff]   ;;  %v402_v8 = vld [vmem:[%s538_s1 + $0x60] sm:$0xff]   ;;  %v404_v10 = vld [vmem:[%s538_s1 + $0x68] sm:$0xff]   ;;  %19 = vst.msk [vmem:[#allocation2 + $0x10] sm:$0xff] %vm16_vm0, %v411_v39 }
   0x4   :  { %338 = vmatprep.subr.bf16.mxu0 %v396_v2  ;;  %377 = vmatprep.subr.bf16.mxu1 %v396_v2  ;;  %v401_v7 = vld [vmem:[%s538_s1 + $0x18] sm:$0xff]   ;;  %v403_v9 = vld [vmem:[%s538_s1 + $0x20] sm:$0xff]   ;;  %v26_v12 = vld [vmem:[%s539_s0 + $0x8] sm:$0xff]  ;;  %20 = vst.msk [vmem:[#allocation2 + $0x18] sm:$0xff] %vm16_vm0, %v411_v39 }
   0x5   :  { %v25_v11 = vld [vmem:[%s539_s0] sm:$0xff]  ;;  %v33_v16 = vmax.bf16 %v410_v14, %v26_v12  ;;  %v30_v17 = vld [vmem:[%s539_s0 + $0x28] sm:$0xff]  ;;  %v406_v22 = vld [vmem:[%s538_s1 + $0x70] sm:$0xff]   ;;  %21 = vst.msk [vmem:[#allocation2 + $0x20] sm:$0xff] %vm16_vm0, %v411_v39 }
   0x6   :  { %v29_v13 = vld [vmem:[%s539_s0 + $0x20] sm:$0xff]  ;;  %v32_v15 = vmax.bf16 %v410_v14, %v25_v11  ;;  %v37_v19 = vmax.bf16 %v410_v14, %v30_v17  ;;  %v405_v20 = vld [vmem:[%s538_s1 + $0x28] sm:$0xff]   ;;  %v407_v24 = vld [vmem:[%s538_s1 + $0x30] sm:$0xff]   ;;  %22 = vst.msk [vmem:[#allocation2 + $0x28] sm:$0xff] %vm16_vm0, %v411_v39 }
   0x7   :  { %339 = vmatpush3.bf16.msra.mxu0 %v397_v3  ;;  %385 = vmatpush3.bf16.msra.mxu1 %v397_v3  ;;  %v36_v18 = vmax.bf16 %v410_v14, %v29_v13  ;;  %v408_v25 = vld [vmem:[%s538_s1 + $0x78] sm:$0xff]   ;;  %v27_v26 = vld [vmem:[%s539_s0 + $0x10] sm:$0xff]  ;;  %24 = vst.msk [vmem:[#allocation2 + $0x30] sm:$0x3] %vm23_vm1, %v411_v39 }
   0x8   :  { %340 = vmatprep.subr.bf16.mxu0 %v398_v4  ;;  %378 = vmatprep.subr.bf16.mxu1 %v398_v4  ;;  %v313_v21 = vcombine.high %v32_v15, %v33_v16  ;;  %v28_v27 = vld [vmem:[%s539_s0 + $0x18] sm:$0xff]  ;;  %v31_v28 = vld [vmem:[%s539_s0 + $0x30] sm:$0x11]  ;;  %v34_v30 = vmax.bf16 %v410_v14, %v27_v26  ;;  %v312_v33 = vcombine.low %v32_v15, %v33_v16  ;;  %v39_v42 = vld [vmem:[#allocation2] sm:$0xff] }
   0x9   :  { %v317_v23 = vcombine.high %v36_v18, %v37_v19  ;;  %v409_v29 = vld [vmem:[%s538_s1 + $0x38] sm:$0xff]   ;;  %v35_v31 = vmax.bf16 %v410_v14, %v28_v27  ;;  %v38_v32 = vmax.bf16 %v410_v14, %v31_v28  ;;  %v316_v34 = vcombine.low %v36_v18, %v37_v19  ;;  %v40_v50 = vld [vmem:[#allocation2 + $0x8] sm:$0xff] }
   0xa   :  { %243 = vmatprep.mubr.bf16.mxu0 %v313_v21  ;;  %v41_v62 = vld [vmem:[#allocation2 + $0x10] sm:$0xff] }
   0xb   :  { %341 = vmatpush3.bf16.msra.mxu0 %v399_v5  ;;  %386 = vmatpush3.bf16.msra.mxu1 %v399_v5  ;;  %v315_v35 = vcombine.high %v34_v30, %v35_v31  ;;  %v319_v36 = vcombine.high %v38_v32, %v38_v32  ;;  %v314_v37 = vcombine.low %v34_v30, %v35_v31 }
   0xc   :  { %342 = vmatprep.subr.bf16.mxu0 %v400_v6  ;;  %379 = vmatprep.subr.bf16.mxu1 %v400_v6  ;;  %v318_v38 = vcombine.low %v38_v32, %v38_v32  ;;  %v43_v44 = vld [vmem:[#allocation2 + $0x20] sm:$0xff]  ;;  %v42_v6 = vld [vmem:[#allocation2 + $0x18] sm:$0xff] }
   0xd   :  { %259 = vmatprep.mubr.bf16.mxu1 %v317_v23  ;;  %v44_v52 = vld [vmem:[#allocation2 + $0x28] sm:$0xff] }
   0xe   :  { %v45_v0 = vld [vmem:[#allocation2 + $0x30] sm:$0x3] }
   0xf   :  { %343 = vmatpush3.bf16.msra.mxu0 %v401_v7  ;;  %387 = vmatpush3.bf16.msra.mxu1 %v401_v7 }
  0x10   :  { %344 = vmatprep.subr.bf16.mxu0 %v402_v8  ;;  %380 = vmatprep.subr.bf16.mxu1 %v402_v8 }
  0x13   :  { %345 = vmatpush3.bf16.msra.mxu0 %v403_v9  ;;  %388 = vmatpush3.bf16.msra.mxu1 %v403_v9 }
  0x14   :  { %346 = vmatprep.subr.bf16.mxu0 %v404_v10  ;;  %381 = vmatprep.subr.bf16.mxu1 %v404_v10 }
  0x17   :  { %347 = vmatpush3.bf16.msra.mxu0 %v405_v20  ;;  %389 = vmatpush3.bf16.msra.mxu1 %v405_v20 }
  0x18   :  { %348 = vmatprep.subr.bf16.mxu0 %v406_v22  ;;  %382 = vmatprep.subr.bf16.mxu1 %v406_v22 }
  0x1b   :  { %349 = vmatpush3.bf16.msra.mxu0 %v407_v24  ;;  %390 = vmatpush3.bf16.msra.mxu1 %v407_v24 }
  0x1c   :  { %350 = vmatprep.subr.bf16.mxu0 %v408_v25  ;;  %383 = vmatprep.subr.bf16.mxu1 %v408_v25 }
  0x1f   :  { %351 = vmatpush3.bf16.msra.mxu0 %v409_v29  ;;  %391 = vmatpush3.bf16.msra.mxu1 %v409_v29 }
  0x22   :  { %244 = vmatmul.mubr.bf16.vlgmr.msra.gmra.mrb[0].mxu0 %v312_v33  ;;  %260 = vmatmul.mubr.bf16.vlgmr.msra.gmra.mrb[0].mxu1 %v316_v34 }
  0x23   :  { %251 = vmatprep.mubr.bf16.mxu0 %v315_v35  ;;  %267 = vmatprep.mubr.bf16.mxu1 %v319_v36 }
  0x2a   :  { %252 = vmatmul.mubr.bf16.gmra.mrb[4].mxu0 %v314_v37  ;;  %268 = vmatmul.mubr.bf16.gmra.mrb[4].mxu1 %v318_v38 }
  0xf5   :  { %v352_v40 = vpop.f32.mrb[0].mxu0  ;;  %v364_v41 = vpop.f32.mrb[0].mxu1 }
  0xf6   :  { %v353_v43 = vpop.f32.mrb[1].mxu0  ;;  %v365_v45 = vpop.f32.mrb[1].mxu1 }
  0xf7   :  { %v354_v46 = vadd.f32 %v353_v43, %v352_v40  ;;  %v366_v47 = vadd.f32 %v365_v45, %v364_v41  ;;  %v355_v48 = vpop.f32.mrb[2].mxu0  ;;  %v367_v49 = vpop.f32.mrb[2].mxu1 }
  0xf8   :  { %v356_v51 = vpop.f32.mrb[3].mxu0  ;;  %v368_v53 = vpop.f32.mrb[3].mxu1 }
  0xf9   :  { %v275_v54 = vadd.f32 %v354_v46, %v39_v42  ;;  %v279_v55 = vadd.f32 %v366_v47, %v43_v44  ;;  %v357_v56 = vadd.f32 %v356_v51, %v355_v48  ;;  %v369_v57 = vadd.f32 %v368_v53, %v367_v49 }
  0xfb   :  { %283 = vst.msk [vmem:[#allocation2] sm:$0xff] %vm16_vm0, %v275_v54  ;;  %287 = vst.msk [vmem:[#allocation2 + $0x20] sm:$0xff] %vm16_vm0, %v279_v55  ;;  %v276_v58 = vadd.f32 %v357_v56, %v40_v50  ;;  %v280_v59 = vadd.f32 %v369_v57, %v44_v52 }
  0xfd   :  { %284 = vst.msk [vmem:[#allocation2 + $0x8] sm:$0xff] %vm16_vm0, %v276_v58  ;;  %288 = vst.msk [vmem:[#allocation2 + $0x28] sm:$0xff] %vm16_vm0, %v280_v59  ;;  %v358_v60 = vpop.f32.mrb[4].mxu0  ;;  %v370_v61 = vpop.f32.mrb[4].mxu1 }
  0xfe   :  { %v359_v63 = vpop.f32.mrb[5].mxu0  ;;  %v371_v1 = vpop.f32.mrb[5].mxu1 }
  0xff   :  { %v360_v2 = vadd.f32 %v359_v63, %v358_v60  ;;  %v372_v3 = vadd.f32 %v371_v1, %v370_v61  ;;  %v361_v4 = vpop.f32.mrb[6].mxu0  ;;  %v373_v5 = vpop.f32.mrb[6].mxu1 }
 0x100   :  { %v362_v7 = vpop.f32.mrb[7].mxu0  ;;  %v374_v8 = vpop.f32.mrb[7].mxu1 }
 0x101   :  { %v277_v9 = vadd.f32 %v360_v2, %v41_v62  ;;  %v281_v10 = vadd.f32 %v372_v3, %v45_v0  ;;  %v363_v11 = vadd.f32 %v362_v7, %v361_v4 }
 0x102   :  { %v294_v12 = vld [vmem:[#allocation2] sm:$0xff] }
 0x103   :  { %v298_v13 = vld [vmem:[#allocation2 + $0x20] sm:$0xff]  ;;  %285 = vst.msk [vmem:[#allocation2 + $0x10] sm:$0xff] %vm16_vm0, %v277_v9  ;;  %301 = vst.msk [vmem:[%s540_s2] sm:$0xff] %vm16_vm0, %v294_v12  ;;  %v278_v14 = vadd.f32 %v363_v11, %v42_v6 }
 0x104   :  { %290 = vst.msk [vmem:[#allocation2 + $0x30] sm:$0x3] %vm23_vm1, %v281_v10  ;;  %v295_v15 = vld [vmem:[#allocation2 + $0x8] sm:$0xff] }
 0x105   :  { %305 = vst.msk [vmem:[%s540_s2 + $0x20] sm:$0xff] %vm16_vm0, %v298_v13  ;;  %v299_v16 = vld [vmem:[#allocation2 + $0x28] sm:$0xff]  ;;  %302 = vst.msk [vmem:[%s540_s2 + $0x8] sm:$0xff] %vm16_vm0, %v295_v15 }
 0x106   :  { %306 = vst.msk [vmem:[%s540_s2 + $0x28] sm:$0xff] %vm16_vm0, %v299_v16  ;;  %286 = vst.msk [vmem:[#allocation2 + $0x18] sm:$0xff] %vm16_vm0, %v278_v14 }
 0x10a   :  { %v296_v17 = vld [vmem:[#allocation2 + $0x10] sm:$0xff] }
 0x10b   :  { %v300_v18 = vld [vmem:[#allocation2 + $0x30] sm:$0x3]  ;;  %303 = vst.msk [vmem:[%s540_s2 + $0x10] sm:$0xff] %vm16_vm0, %v296_v17 }
 0x10c   :  { %307 = vst.msk [vmem:[%s540_s2 + $0x30] sm:$0x3] %vm23_vm1, %v300_v18 }
 0x10d   :  { %v297_v19 = vld [vmem:[#allocation2 + $0x18] sm:$0xff] }
 0x10e   :  { %304 = vst.msk [vmem:[%s540_s2 + $0x18] sm:$0xff] %vm16_vm0, %v297_v19 }

// kernel: _lambda_.31
= control target key start
LH: loop header
LB: loop body
LE: loop exit
PB: predicated region body
PF: predicated region fallthrough
CT: control target
= control target key end

     0   :  { %vm16_vm0 = vcmask 261120   ;;  %v568_v0 = vmov 0.0   ;;  %vm569_vm1 = vmmov 0   ;;  %v570_v12 = vmov 0   ;;  %s879_s1 = inlined_call_operand.vmem [shape: bf16[128,32], index: 1, kind: input, shape index: {}]   ;;  %s880_s0 = inlined_call_operand.vmem [shape: bf16[162,128], index: 0, kind: input, shape index: {}]   ;;  %s881_s2 = inlined_call_operand.vmem [shape: f32[162,32], index: 2, kind: output, shape index: {}]  }
   0x1   :  { %481 = vmatprep.subr.bf16.mxu0 %v568_v0  ;;  %v560_v1 = vld [vmem:[%s879_s1] sm:$0xff]   ;;  %541 = vmatprep.subr.bf16.mxu1 %v568_v0  ;;  %17 = vst.msk [vmem:[#allocation2] sm:$0xff] %vm16_vm0, %v568_v0  ;;  %18 = vst.msk [vmem:[#allocation2 + $0x8] sm:$0xff] %vm16_vm0, %v568_v0  ;;  %v561_v2 = vld [vmem:[%s879_s1 + $0x8] sm:$0xff]   ;;  %vm37_vm2 = vcmask 254976  }
   0x2   :  { %19 = vst.msk [vmem:[#allocation2 + $0x10] sm:$0xff] %vm16_vm0, %v568_v0  ;;  %20 = vst.msk [vmem:[#allocation2 + $0x18] sm:$0xff] %vm16_vm0, %v568_v0  ;;  %497 = vmatprep.mubr.msk.bf16.mxu0 %vm569_vm1, %v568_v0  ;;  %521 = vmatprep.mubr.msk.bf16.mxu1 %vm569_vm1, %v568_v0  ;;  %v562_v3 = vld [vmem:[%s879_s1 + $0x10] sm:$0xff]   ;;  %v563_v4 = vld [vmem:[%s879_s1 + $0x18] sm:$0xff]  }
   0x3   :  { %21 = vst.msk [vmem:[#allocation2 + $0x20] sm:$0xff] %vm16_vm0, %v568_v0  ;;  %22 = vst.msk [vmem:[#allocation2 + $0x28] sm:$0xff] %vm16_vm0, %v568_v0  ;;  %482 = vmatpush3.bf16.msra.mxu0 %v560_v1  ;;  %549 = vmatpush3.bf16.msra.mxu1 %v560_v1  ;;  %v564_v5 = vld [vmem:[%s879_s1 + $0x20] sm:$0xff]   ;;  %v565_v6 = vld [vmem:[%s879_s1 + $0x28] sm:$0xff]  }
   0x4   :  { %23 = vst.msk [vmem:[#allocation2 + $0x30] sm:$0xff] %vm16_vm0, %v568_v0  ;;  %24 = vst.msk [vmem:[#allocation2 + $0x38] sm:$0xff] %vm16_vm0, %v568_v0  ;;  %483 = vmatprep.subr.bf16.mxu0 %v568_v0  ;;  %542 = vmatprep.subr.bf16.mxu1 %v568_v0  ;;  %v566_v7 = vld [vmem:[%s879_s1 + $0x30] sm:$0xff]   ;;  %v39_v8 = vld [vmem:[%s880_s0] sm:$0xf] }
   0x5   :  { %25 = vst.msk [vmem:[#allocation2 + $0x40] sm:$0xff] %vm16_vm0, %v568_v0  ;;  %26 = vst.msk [vmem:[#allocation2 + $0x48] sm:$0xff] %vm16_vm0, %v568_v0  ;;  %v40_v9 = vld [vmem:[%s880_s0 + $0x4] sm:$0xf]  ;;  %v51_v10 = vld [vmem:[%s880_s0 + $0x30] sm:$0xf]  ;;  %v60_v13 = vmax.bf16 %v570_v12, %v39_v8 }
   0x6   :  { %27 = vst.msk [vmem:[#allocation2 + $0x50] sm:$0xff] %vm16_vm0, %v568_v0  ;;  %28 = vst.msk [vmem:[#allocation2 + $0x58] sm:$0xff] %vm16_vm0, %v568_v0  ;;  %v52_v11 = vld [vmem:[%s880_s0 + $0x34] sm:$0xf]  ;;  %v61_v14 = vmax.bf16 %v570_v12, %v40_v9  ;;  %v72_v15 = vmax.bf16 %v570_v12, %v51_v10  ;;  %v567_v17 = vld [vmem:[%s879_s1 + $0x38] sm:$0xff]  }
   0x7   :  { %29 = vst.msk [vmem:[#allocation2 + $0x60] sm:$0xff] %vm16_vm0, %v568_v0  ;;  %30 = vst.msk [vmem:[#allocation2 + $0x68] sm:$0xff] %vm16_vm0, %v568_v0  ;;  %484 = vmatpush3.bf16.msra.mxu0 %v561_v2  ;;  %550 = vmatpush3.bf16.msra.mxu1 %v561_v2  ;;  %v73_v16 = vmax.bf16 %v570_v12, %v52_v11  ;;  %v41_v20 = vld [vmem:[%s880_s0 + $0x8] sm:$0xf]  ;;  %v42_v21 = vld [vmem:[%s880_s0 + $0xc] sm:$0xf] }
   0x8   :  { %31 = vst.msk [vmem:[#allocation2 + $0x70] sm:$0xff] %vm16_vm0, %v568_v0  ;;  %32 = vst.msk [vmem:[#allocation2 + $0x78] sm:$0xff] %vm16_vm0, %v568_v0  ;;  %485 = vmatprep.subr.bf16.mxu0 %v568_v0  ;;  %543 = vmatprep.subr.bf16.mxu1 %v568_v0  ;;  %v443_v18 = vcombine.low %v60_v13, %v61_v14  ;;  %v53_v22 = vld [vmem:[%s880_s0 + $0x38] sm:$0xf]  ;;  %v54_v23 = vld [vmem:[%s880_s0 + $0x3c] sm:$0xf]  ;;  %v62_v24 = vmax.bf16 %v570_v12, %v41_v20 }
   0x9   :  { %33 = vst.msk [vmem:[#allocation2 + $0x80] sm:$0xff] %vm16_vm0, %v568_v0  ;;  %34 = vst.msk [vmem:[#allocation2 + $0x88] sm:$0xff] %vm16_vm0, %v568_v0  ;;  %v449_v19 = vcombine.low %v72_v15, %v73_v16  ;;  %v63_v25 = vmax.bf16 %v570_v12, %v42_v21  ;;  %v74_v26 = vmax.bf16 %v570_v12, %v53_v22  ;;  %v43_v30 = vld [vmem:[%s880_s0 + $0x10] sm:$0xf]  ;;  %v44_v31 = vld [vmem:[%s880_s0 + $0x14] sm:$0xf] }
   0xa   :  { %35 = vst.msk [vmem:[#allocation2 + $0x90] sm:$0xff] %vm16_vm0, %v568_v0  ;;  %36 = vst.msk [vmem:[#allocation2 + $0x98] sm:$0xff] %vm16_vm0, %v568_v0  ;;  %v75_v27 = vmax.bf16 %v570_v12, %v54_v23  ;;  %v55_v32 = vld [vmem:[%s880_s0 + $0x40] sm:$0xf]  ;;  %v56_v33 = vld [vmem:[%s880_s0 + $0x44] sm:$0xf]  ;;  %v64_v34 = vmax.bf16 %v570_v12, %v43_v30  ;;  %v65_v35 = vmax.bf16 %v570_v12, %v44_v31 }
   0xb   :  { %486 = vmatpush3.bf16.msra.mxu0 %v562_v3  ;;  %551 = vmatpush3.bf16.msra.mxu1 %v562_v3  ;;  %v444_v28 = vcombine.low %v62_v24, %v63_v25  ;;  %v76_v36 = vmax.bf16 %v570_v12, %v55_v32  ;;  %v77_v37 = vmax.bf16 %v570_v12, %v56_v33  ;;  %v45_v40 = vld [vmem:[%s880_s0 + $0x18] sm:$0xf]  ;;  %v46_v41 = vld [vmem:[%s880_s0 + $0x1c] sm:$0xf]  ;;  %v57_v42 = vld [vmem:[%s880_s0 + $0x48] sm:$0xf] }
   0xc   :  { %487 = vmatprep.subr.bf16.mxu0 %v568_v0  ;;  %544 = vmatprep.subr.bf16.mxu1 %v568_v0  ;;  %v450_v29 = vcombine.low %v74_v26, %v75_v27  ;;  %v445_v38 = vcombine.low %v64_v34, %v65_v35  ;;  %v58_v43 = vld [vmem:[%s880_s0 + $0x4c] sm:$0xf]  ;;  %v66_v44 = vmax.bf16 %v570_v12, %v45_v40  ;;  %v47_v50 = vld [vmem:[%s880_s0 + $0x20] sm:$0xf]  ;;  %v48_v51 = vld [vmem:[%s880_s0 + $0x24] sm:$0xf] }
   0xd   :  { %v451_v39 = vcombine.low %v76_v36, %v77_v37  ;;  %v67_v45 = vmax.bf16 %v570_v12, %v46_v41  ;;  %v78_v46 = vmax.bf16 %v570_v12, %v57_v42  ;;  %v79_v47 = vmax.bf16 %v570_v12, %v58_v43  ;;  %v59_v52 = vld [vmem:[%s880_s0 + $0x50] sm:$0x1]  ;;  %v49_v58 = vld [vmem:[%s880_s0 + $0x28] sm:$0xf]  ;;  %v50_v59 = vld [vmem:[%s880_s0 + $0x2c] sm:$0xf] }
   0xe   :  { %v68_v53 = vmax.bf16 %v570_v12, %v47_v50  ;;  %v69_v54 = vmax.bf16 %v570_v12, %v48_v51  ;;  %v80_v55 = vmax.bf16 %v570_v12, %v59_v52  ;;  %v70_v60 = vmax.bf16 %v570_v12, %v49_v58  ;;  %38 = vst.msk [vmem:[#allocation2 + $0xa0] sm:$0x3] %vm37_vm2, %v568_v0  ;;  %v81_v63 = vld [vmem:[#allocation2] sm:$0xff]  ;;  %v82_v3 = vld [vmem:[#allocation2 + $0x8] sm:$0xff]  ;;  %v83_v15 = vld [vmem:[#allocation2 + $0x10] sm:$0xff] }
   0xf   :  { %488 = vmatpush3.bf16.msra.mxu0 %v563_v4  ;;  %552 = vmatpush3.bf16.msra.mxu1 %v563_v4  ;;  %v446_v48 = vcombine.low %v66_v44, %v67_v45  ;;  %v452_v49 = vcombine.low %v78_v46, %v79_v47  ;;  %v71_v61 = vmax.bf16 %v570_v12, %v50_v59  ;;  %v93_v1 = vld [vmem:[#allocation2 + $0x60] sm:$0xff]  ;;  %v95_v16 = vld [vmem:[#allocation2 + $0x70] sm:$0xff]  ;;  %v96_v20 = vld [vmem:[#allocation2 + $0x78] sm:$0xff] }
  0x10   :  { %489 = vmatprep.subr.bf16.mxu0 %v568_v0  ;;  %545 = vmatprep.subr.bf16.mxu1 %v568_v0  ;;  %v447_v56 = vcombine.low %v68_v53, %v69_v54  ;;  %v453_v57 = vcombine.low %v80_v55, %v80_v55  ;;  %v85_v35 = vld [vmem:[#allocation2 + $0x20] sm:$0xff]  ;;  %v98_v40 = vld [vmem:[#allocation2 + $0x88] sm:$0xff]  ;;  %v87_v55 = vld [vmem:[#allocation2 + $0x30] sm:$0xff] }
  0x11   :  { %v448_v62 = vcombine.low %v70_v60, %v71_v61  ;;  %v97_v36 = vld [vmem:[#allocation2 + $0x80] sm:$0xff]  ;;  %v88_v58 = vld [vmem:[#allocation2 + $0x38] sm:$0xff] }
  0x12   :  { %v100_v60 = vld [vmem:[#allocation2 + $0x98] sm:$0xff] }
  0x13   :  { %490 = vmatpush3.bf16.msra.mxu0 %v564_v5  ;;  %553 = vmatpush3.bf16.msra.mxu1 %v564_v5  ;;  %v94_v5 = vld [vmem:[#allocation2 + $0x68] sm:$0xff] }
  0x14   :  { %491 = vmatprep.subr.bf16.mxu0 %v568_v0  ;;  %546 = vmatprep.subr.bf16.mxu1 %v568_v0 }
  0x17   :  { %492 = vmatpush3.bf16.msra.mxu0 %v565_v6  ;;  %554 = vmatpush3.bf16.msra.mxu1 %v565_v6 }
  0x18   :  { %493 = vmatprep.subr.bf16.mxu0 %v568_v0  ;;  %547 = vmatprep.subr.bf16.mxu1 %v568_v0 }
  0x1b   :  { %494 = vmatpush3.bf16.msra.mxu0 %v566_v7  ;;  %555 = vmatpush3.bf16.msra.mxu1 %v566_v7 }
  0x1c   :  { %495 = vmatprep.subr.bf16.mxu0 %v568_v0  ;;  %548 = vmatprep.subr.bf16.mxu1 %v568_v0 }
  0x1f   :  { %496 = vmatpush3.bf16.msra.mxu0 %v567_v17  ;;  %556 = vmatpush3.bf16.msra.mxu1 %v567_v17 }
  0x22   :  { %498 = vmatmul.mubr.bf16.vlgmr.msra.gmra.mrb[0].mxu0 %v443_v18  ;;  %522 = vmatmul.mubr.bf16.vlgmr.msra.gmra.mrb[0].mxu1 %v449_v19  ;;  %v84_v18 = vld [vmem:[#allocation2 + $0x18] sm:$0xff] }
  0x23   :  { %501 = vmatprep.mubr.msk.bf16.mxu0 %vm569_vm1, %v568_v0  ;;  %525 = vmatprep.mubr.msk.bf16.mxu1 %vm569_vm1, %v568_v0 }
  0x2a   :  { %502 = vmatmul.mubr.bf16.gmra.mrb[4].mxu0 %v444_v28  ;;  %526 = vmatmul.mubr.bf16.gmra.mrb[4].mxu1 %v450_v29 }
  0x2b   :  { %505 = vmatprep.mubr.msk.bf16.mxu0 %vm569_vm1, %v568_v0  ;;  %529 = vmatprep.mubr.msk.bf16.mxu1 %vm569_vm1, %v568_v0 }
  0x32   :  { %506 = vmatmul.mubr.bf16.gmra.mrb[8].mxu0 %v445_v38  ;;  %530 = vmatmul.mubr.bf16.gmra.mrb[8].mxu1 %v451_v39  ;;  %v86_v38 = vld [vmem:[#allocation2 + $0x28] sm:$0xff] }
  0x33   :  { %509 = vmatprep.mubr.msk.bf16.mxu0 %vm569_vm1, %v568_v0  ;;  %533 = vmatprep.mubr.msk.bf16.mxu1 %vm569_vm1, %v568_v0 }
  0x3a   :  { %510 = vmatmul.mubr.bf16.gmra.mrb[12].mxu0 %v446_v48  ;;  %534 = vmatmul.mubr.bf16.gmra.mrb[12].mxu1 %v452_v49 }
  0x3b   :  { %513 = vmatprep.mubr.msk.bf16.mxu0 %vm569_vm1, %v568_v0  ;;  %537 = vmatprep.mubr.msk.bf16.mxu1 %vm569_vm1, %v568_v0 }
  0x42   :  { %514 = vmatmul.mubr.bf16.gmra.mrb[16].mxu0 %v447_v56  ;;  %538 = vmatmul.mubr.bf16.gmra.mrb[16].mxu1 %v453_v57  ;;  %v99_v56 = vld [vmem:[#allocation2 + $0x90] sm:$0xff] }
  0x43   :  { %517 = vmatprep.mubr.msk.bf16.mxu0 %vm569_vm1, %v568_v0 }
  0x4a   :  { %518 = vmatmul.mubr.bf16.gmra.mrb[20].mxu0 %v448_v62 }
  0xf5   :  { %v264_v2 = vpop.f32.mrb[0].mxu0  ;;  %v312_v4 = vpop.f32.mrb[0].mxu1 }
  0xf6   :  { %v350_v6 = vadd.f32 %v264_v2, %v81_v63  ;;  %v499_v7 = vpop.f32.mrb[1].mxu0  ;;  %v362_v8 = vadd.f32 %v312_v4, %v93_v1  ;;  %v523_v9 = vpop.f32.mrb[1].mxu1 }
  0xf7   :  { %v267_v10 = vpop.f32.mrb[2].mxu0  ;;  %v315_v11 = vpop.f32.mrb[2].mxu1 }
  0xf8   :  { %372 = vst.msk [vmem:[#allocation2] sm:$0xff] %vm16_vm0, %v350_v6  ;;  %v351_v12 = vadd.f32 %v267_v10, %v82_v3  ;;  %v500_v13 = vpop.f32.mrb[3].mxu0  ;;  %384 = vst.msk [vmem:[#allocation2 + $0x60] sm:$0xff] %vm16_vm0, %v362_v8  ;;  %v363_v14 = vadd.f32 %v315_v11, %v94_v5  ;;  %v524_v0 = vpop.f32.mrb[3].mxu1 }
  0xf9   :  { %v101_v13 = vld [vmem:[#allocation2 + $0xa0] sm:$0x3]  ;;  %v90_v0 = vld [vmem:[#allocation2 + $0x48] sm:$0xff] }
  0xfa   :  { %373 = vst.msk [vmem:[#allocation2 + $0x8] sm:$0xff] %vm16_vm0, %v351_v12  ;;  %385 = vst.msk [vmem:[#allocation2 + $0x68] sm:$0xff] %vm16_vm0, %v363_v14  ;;  %v89_v12 = vld [vmem:[#allocation2 + $0x40] sm:$0xff] }
  0xfd   :  { %v272_v17 = vpop.f32.mrb[4].mxu0  ;;  %v320_v19 = vpop.f32.mrb[4].mxu1 }
  0xfe   :  { %v352_v21 = vadd.f32 %v272_v17, %v83_v15  ;;  %v503_v22 = vpop.f32.mrb[5].mxu0  ;;  %v364_v23 = vadd.f32 %v320_v19, %v95_v16  ;;  %v527_v24 = vpop.f32.mrb[5].mxu1 }
  0xff   :  { %v397_v25 = vld [vmem:[#allocation2] sm:$0xff]  ;;  %v275_v27 = vpop.f32.mrb[6].mxu0  ;;  %v323_v28 = vpop.f32.mrb[6].mxu1 }
 0x100   :  { %v409_v26 = vld [vmem:[#allocation2 + $0x60] sm:$0xff]  ;;  %418 = vst.msk [vmem:[%s881_s2] sm:$0xff] %vm16_vm0, %v397_v25  ;;  %374 = vst.msk [vmem:[#allocation2 + $0x10] sm:$0xff] %vm16_vm0, %v352_v21  ;;  %v353_v29 = vadd.f32 %v275_v27, %v84_v18  ;;  %v504_v30 = vpop.f32.mrb[7].mxu0  ;;  %v365_v31 = vadd.f32 %v323_v28, %v96_v20  ;;  %v528_v32 = vpop.f32.mrb[7].mxu1 }
 0x101   :  { %430 = vst.msk [vmem:[%s881_s2 + $0x60] sm:$0xff] %vm16_vm0, %v409_v26  ;;  %386 = vst.msk [vmem:[#allocation2 + $0x70] sm:$0xff] %vm16_vm0, %v364_v23  ;;  %v398_v33 = vld [vmem:[#allocation2 + $0x8] sm:$0xff] }
 0x102   :  { %v410_v34 = vld [vmem:[#allocation2 + $0x68] sm:$0xff]  ;;  %419 = vst.msk [vmem:[%s881_s2 + $0x8] sm:$0xff] %vm16_vm0, %v398_v33  ;;  %375 = vst.msk [vmem:[#allocation2 + $0x18] sm:$0xff] %vm16_vm0, %v353_v29  ;;  %v91_v29 = vld [vmem:[#allocation2 + $0x50] sm:$0xff] }
 0x103   :  { %431 = vst.msk [vmem:[%s881_s2 + $0x68] sm:$0xff] %vm16_vm0, %v410_v34  ;;  %387 = vst.msk [vmem:[#allocation2 + $0x78] sm:$0xff] %vm16_vm0, %v365_v31  ;;  %v92_v31 = vld [vmem:[#allocation2 + $0x58] sm:$0xff] }
 0x105   :  { %v280_v37 = vpop.f32.mrb[8].mxu0  ;;  %v328_v39 = vpop.f32.mrb[8].mxu1 }
 0x106   :  { %v354_v41 = vadd.f32 %v280_v37, %v85_v35  ;;  %v507_v42 = vpop.f32.mrb[9].mxu0  ;;  %v366_v43 = vadd.f32 %v328_v39, %v97_v36  ;;  %v531_v44 = vpop.f32.mrb[9].mxu1 }
 0x107   :  { %v399_v45 = vld [vmem:[#allocation2 + $0x10] sm:$0xff]  ;;  %v283_v47 = vpop.f32.mrb[10].mxu0  ;;  %v331_v48 = vpop.f32.mrb[10].mxu1 }
 0x108   :  { %v411_v46 = vld [vmem:[#allocation2 + $0x70] sm:$0xff]  ;;  %420 = vst.msk [vmem:[%s881_s2 + $0x10] sm:$0xff] %vm16_vm0, %v399_v45  ;;  %376 = vst.msk [vmem:[#allocation2 + $0x20] sm:$0xff] %vm16_vm0, %v354_v41  ;;  %v355_v49 = vadd.f32 %v283_v47, %v86_v38  ;;  %v508_v50 = vpop.f32.mrb[11].mxu0  ;;  %v367_v51 = vadd.f32 %v331_v48, %v98_v40  ;;  %v532_v52 = vpop.f32.mrb[11].mxu1 }
 0x109   :  { %432 = vst.msk [vmem:[%s881_s2 + $0x70] sm:$0xff] %vm16_vm0, %v411_v46  ;;  %388 = vst.msk [vmem:[#allocation2 + $0x80] sm:$0xff] %vm16_vm0, %v366_v43  ;;  %v400_v53 = vld [vmem:[#allocation2 + $0x18] sm:$0xff] }
 0x10a   :  { %v412_v54 = vld [vmem:[#allocation2 + $0x78] sm:$0xff]  ;;  %421 = vst.msk [vmem:[%s881_s2 + $0x18] sm:$0xff] %vm16_vm0, %v400_v53  ;;  %377 = vst.msk [vmem:[#allocation2 + $0x28] sm:$0xff] %vm16_vm0, %v355_v49 }
 0x10b   :  { %433 = vst.msk [vmem:[%s881_s2 + $0x78] sm:$0xff] %vm16_vm0, %v412_v54  ;;  %389 = vst.msk [vmem:[#allocation2 + $0x88] sm:$0xff] %vm16_vm0, %v367_v51 }
 0x10d   :  { %v288_v57 = vpop.f32.mrb[12].mxu0  ;;  %v336_v59 = vpop.f32.mrb[12].mxu1 }
 0x10e   :  { %v356_v61 = vadd.f32 %v288_v57, %v87_v55  ;;  %v511_v62 = vpop.f32.mrb[13].mxu0  ;;  %v368_v63 = vadd.f32 %v336_v59, %v99_v56  ;;  %v535_v1 = vpop.f32.mrb[13].mxu1 }
 0x10f   :  { %v401_v2 = vld [vmem:[#allocation2 + $0x20] sm:$0xff]  ;;  %v291_v4 = vpop.f32.mrb[14].mxu0  ;;  %v339_v5 = vpop.f32.mrb[14].mxu1 }
 0x110   :  { %v413_v3 = vld [vmem:[#allocation2 + $0x80] sm:$0xff]  ;;  %422 = vst.msk [vmem:[%s881_s2 + $0x20] sm:$0xff] %vm16_vm0, %v401_v2  ;;  %378 = vst.msk [vmem:[#allocation2 + $0x30] sm:$0xff] %vm16_vm0, %v356_v61  ;;  %v357_v6 = vadd.f32 %v291_v4, %v88_v58  ;;  %v512_v7 = vpop.f32.mrb[15].mxu0  ;;  %v369_v8 = vadd.f32 %v339_v5, %v100_v60  ;;  %v536_v9 = vpop.f32.mrb[15].mxu1 }
 0x111   :  { %434 = vst.msk [vmem:[%s881_s2 + $0x80] sm:$0xff] %vm16_vm0, %v413_v3  ;;  %390 = vst.msk [vmem:[#allocation2 + $0x90] sm:$0xff] %vm16_vm0, %v368_v63  ;;  %v402_v10 = vld [vmem:[#allocation2 + $0x28] sm:$0xff] }
 0x112   :  { %v414_v11 = vld [vmem:[#allocation2 + $0x88] sm:$0xff]  ;;  %423 = vst.msk [vmem:[%s881_s2 + $0x28] sm:$0xff] %vm16_vm0, %v402_v10  ;;  %379 = vst.msk [vmem:[#allocation2 + $0x38] sm:$0xff] %vm16_vm0, %v357_v6 }
 0x113   :  { %435 = vst.msk [vmem:[%s881_s2 + $0x88] sm:$0xff] %vm16_vm0, %v414_v11  ;;  %391 = vst.msk [vmem:[#allocation2 + $0x98] sm:$0xff] %vm16_vm0, %v369_v8 }
 0x115   :  { %v296_v14 = vpop.f32.mrb[16].mxu0  ;;  %v344_v15 = vpop.f32.mrb[16].mxu1 }
 0x116   :  { %v358_v16 = vadd.f32 %v296_v14, %v89_v12  ;;  %v515_v17 = vpop.f32.mrb[17].mxu0  ;;  %v370_v18 = vadd.f32 %v344_v15, %v101_v13  ;;  %v539_v19 = vpop.f32.mrb[17].mxu1 }
 0x117   :  { %v403_v20 = vld [vmem:[#allocation2 + $0x30] sm:$0xff]  ;;  %v299_v22 = vpop.f32.mrb[18].mxu0  ;;  %v347_v23 = vpop.f32.mrb[18].mxu1 }
 0x118   :  { %v415_v21 = vld [vmem:[#allocation2 + $0x90] sm:$0xff]  ;;  %424 = vst.msk [vmem:[%s881_s2 + $0x30] sm:$0xff] %vm16_vm0, %v403_v20  ;;  %380 = vst.msk [vmem:[#allocation2 + $0x40] sm:$0xff] %vm16_vm0, %v358_v16  ;;  %v359_v24 = vadd.f32 %v299_v22, %v90_v0  ;;  %v516_v25 = vpop.f32.mrb[19].mxu0  ;;  %v540_v26 = vpop.f32.mrb[19].mxu1 }
 0x119   :  { %436 = vst.msk [vmem:[%s881_s2 + $0x90] sm:$0xff] %vm16_vm0, %v415_v21  ;;  %v404_v27 = vld [vmem:[#allocation2 + $0x38] sm:$0xff] }
 0x11a   :  { %393 = vst.msk [vmem:[#allocation2 + $0xa0] sm:$0x3] %vm37_vm2, %v370_v18  ;;  %v416_v28 = vld [vmem:[#allocation2 + $0x98] sm:$0xff] }
 0x11b   :  { %425 = vst.msk [vmem:[%s881_s2 + $0x38] sm:$0xff] %vm16_vm0, %v404_v27  ;;  %437 = vst.msk [vmem:[%s881_s2 + $0x98] sm:$0xff] %vm16_vm0, %v416_v28 }
 0x11c   :  { %381 = vst.msk [vmem:[#allocation2 + $0x48] sm:$0xff] %vm16_vm0, %v359_v24 }
 0x11d   :  { %v304_v30 = vpop.f32.mrb[20].mxu0 }
 0x11e   :  { %v360_v32 = vadd.f32 %v304_v30, %v91_v29  ;;  %v519_v33 = vpop.f32.mrb[21].mxu0 }
 0x11f   :  { %v405_v34 = vld [vmem:[#allocation2 + $0x40] sm:$0xff]  ;;  %v307_v36 = vpop.f32.mrb[22].mxu0 }
 0x120   :  { %426 = vst.msk [vmem:[%s881_s2 + $0x40] sm:$0xff] %vm16_vm0, %v405_v34  ;;  %382 = vst.msk [vmem:[#allocation2 + $0x50] sm:$0xff] %vm16_vm0, %v360_v32  ;;  %v361_v37 = vadd.f32 %v307_v36, %v92_v31  ;;  %v520_v38 = vpop.f32.mrb[23].mxu0 }
 0x121   :  { %v417_v35 = vld [vmem:[#allocation2 + $0xa0] sm:$0x3] }
 0x122   :  { %438 = vst.msk [vmem:[%s881_s2 + $0xa0] sm:$0x3] %vm37_vm2, %v417_v35 }
 0x123   :  { %v406_v39 = vld [vmem:[#allocation2 + $0x48] sm:$0xff]  ;;  %383 = vst.msk [vmem:[#allocation2 + $0x58] sm:$0xff] %vm16_vm0, %v361_v37 }
 0x124   :  { %427 = vst.msk [vmem:[%s881_s2 + $0x48] sm:$0xff] %vm16_vm0, %v406_v39 }
 0x127   :  { %v407_v40 = vld [vmem:[#allocation2 + $0x50] sm:$0xff] }
 0x128   :  { %428 = vst.msk [vmem:[%s881_s2 + $0x50] sm:$0xff] %vm16_vm0, %v407_v40 }
 0x12a   :  { %v408_v41 = vld [vmem:[#allocation2 + $0x58] sm:$0xff] }
 0x12b   :  { %429 = vst.msk [vmem:[%s881_s2 + $0x58] sm:$0xff] %vm16_vm0, %v408_v41 }

// kernel: _lambda_.32
= control target key start
LH: loop header
LB: loop body
LE: loop exit
PB: predicated region body
PF: predicated region fallthrough
CT: control target
= control target key end

     0   :  { %vm220_vm0 = vcmask 64512   ;;  %s897_s0 = inlined_call_operand.vmem [shape: f32[512,8], index: 0, kind: input, shape index: {}]   ;;  %s898_s1 = inlined_call_operand.vmem [shape: f32[1,8], index: 1, kind: input, shape index: {}]   ;;  %s899_s2 = inlined_call_operand.vmem [shape: f32[1,8], index: 2, kind: input, shape index: {}]   ;;  %s900_s3 = inlined_call_operand.vmem [shape: f32[512,8], index: 3, kind: output, shape index: {}]  }
   0x1   :  { %v14_v0 = vld [vmem:[%s897_s0] sm:$0xff]  ;;  %v15_v4 = vld [vmem:[%s897_s0 + $0x8] sm:$0xff]  ;;  %v16_v5 = vld [vmem:[%s897_s0 + $0x10] sm:$0xff] }
   0x2   :  { %v317_v1 = vld [vmem:[%s898_s1] ss:$0 sm:$0xff]  ;;  %v17_v6 = vld [vmem:[%s897_s0 + $0x18] sm:$0xff]  ;;  %v19_v11 = vld [vmem:[%s897_s0 + $0x28] sm:$0xff] }
   0x3   :  { %v322_v2 = vld [vmem:[%s899_s2] ss:$0 sm:$0xff]  ;;  %v85_v3 = vmul.f32 %v317_v1, %v14_v0  ;;  %v86_v7 = vmul.f32 %v317_v1, %v15_v4  ;;  %v87_v8 = vmul.f32 %v317_v1, %v16_v5  ;;  %v88_v9 = vmul.f32 %v317_v1, %v17_v6  ;;  %v20_v12 = vld [vmem:[%s897_s0 + $0x30] sm:$0xff]  ;;  %v21_v17 = vld [vmem:[%s897_s0 + $0x38] sm:$0xff] }
   0x4   :  { %v18_v10 = vld [vmem:[%s897_s0 + $0x20] sm:$0xff]  ;;  %v90_v15 = vmul.f32 %v317_v1, %v19_v11  ;;  %v91_v16 = vmul.f32 %v317_v1, %v20_v12  ;;  %v23_v19 = vld [vmem:[%s897_s0 + $0x48] sm:$0xff]  ;;  %v92_v23 = vmul.f32 %v317_v1, %v21_v17  ;;  %v24_v24 = vld [vmem:[%s897_s0 + $0x50] sm:$0xff] }
   0x5   :  { %v156_v13 = vadd.f32 %v322_v2, %v85_v3  ;;  %v89_v14 = vmul.f32 %v317_v1, %v18_v10  ;;  %v22_v18 = vld [vmem:[%s897_s0 + $0x40] sm:$0xff]  ;;  %v157_v20 = vadd.f32 %v322_v2, %v86_v7  ;;  %v158_v21 = vadd.f32 %v322_v2, %v87_v8  ;;  %v25_v25 = vld [vmem:[%s897_s0 + $0x58] sm:$0xff]  ;;  %v27_v31 = vld [vmem:[%s897_s0 + $0x68] sm:$0xff] }
   0x6   :  { %v159_v22 = vadd.f32 %v322_v2, %v88_v9  ;;  %v26_v26 = vld [vmem:[%s897_s0 + $0x60] sm:$0xff]  ;;  %v161_v28 = vadd.f32 %v322_v2, %v90_v15  ;;  %v162_v29 = vadd.f32 %v322_v2, %v91_v16  ;;  %v93_v30 = vmul.f32 %v317_v1, %v22_v18  ;;  %v28_v32 = vld [vmem:[%s897_s0 + $0x70] sm:$0xff]  ;;  %v29_v33 = vld [vmem:[%s897_s0 + $0x78] sm:$0xff] }
   0x7   :  { %221 = vst.msk [vmem:[%s900_s3] sm:$0xff] %vm220_vm0, %v156_v13  ;;  %v160_v27 = vadd.f32 %v322_v2, %v89_v14  ;;  %222 = vst.msk [vmem:[%s900_s3 + $0x8] sm:$0xff] %vm220_vm0, %v157_v20  ;;  %v163_v34 = vadd.f32 %v322_v2, %v92_v23  ;;  %v94_v35 = vmul.f32 %v317_v1, %v23_v19  ;;  %v30_v38 = vld [vmem:[%s897_s0 + $0x80] sm:$0xff]  ;;  %v31_v43 = vld [vmem:[%s897_s0 + $0x88] sm:$0xff] }
   0x8   :  { %223 = vst.msk [vmem:[%s900_s3 + $0x10] sm:$0xff] %vm220_vm0, %v158_v21  ;;  %224 = vst.msk [vmem:[%s900_s3 + $0x18] sm:$0xff] %vm220_vm0, %v159_v22  ;;  %v95_v36 = vmul.f32 %v317_v1, %v24_v24  ;;  %v96_v37 = vmul.f32 %v317_v1, %v25_v25  ;;  %v164_v39 = vadd.f32 %v322_v2, %v93_v30  ;;  %v32_v44 = vld [vmem:[%s897_s0 + $0x90] sm:$0xff]  ;;  %v33_v45 = vld [vmem:[%s897_s0 + $0x98] sm:$0xff] }
   0x9   :  { %225 = vst.msk [vmem:[%s900_s3 + $0x20] sm:$0xff] %vm220_vm0, %v160_v27  ;;  %226 = vst.msk [vmem:[%s900_s3 + $0x28] sm:$0xff] %vm220_vm0, %v161_v28  ;;  %v97_v40 = vmul.f32 %v317_v1, %v26_v26  ;;  %v98_v41 = vmul.f32 %v317_v1, %v27_v31  ;;  %v99_v42 = vmul.f32 %v317_v1, %v28_v32  ;;  %v34_v50 = vld [vmem:[%s897_s0 + $0xa0] sm:$0xff]  ;;  %v35_v51 = vld [vmem:[%s897_s0 + $0xa8] sm:$0xff] }
   0xa   :  { %227 = vst.msk [vmem:[%s900_s3 + $0x30] sm:$0xff] %vm220_vm0, %v162_v29  ;;  %228 = vst.msk [vmem:[%s900_s3 + $0x38] sm:$0xff] %vm220_vm0, %v163_v34  ;;  %v165_v46 = vadd.f32 %v322_v2, %v94_v35  ;;  %v166_v47 = vadd.f32 %v322_v2, %v95_v36  ;;  %v167_v48 = vadd.f32 %v322_v2, %v96_v37  ;;  %v36_v52 = vld [vmem:[%s897_s0 + $0xb0] sm:$0xff]  ;;  %v37_v57 = vld [vmem:[%s897_s0 + $0xb8] sm:$0xff] }
   0xb   :  { %v100_v49 = vmul.f32 %v317_v1, %v29_v33  ;;  %229 = vst.msk [vmem:[%s900_s3 + $0x40] sm:$0xff] %vm220_vm0, %v164_v39  ;;  %v168_v53 = vadd.f32 %v322_v2, %v97_v40  ;;  %v169_v54 = vadd.f32 %v322_v2, %v98_v41  ;;  %v170_v55 = vadd.f32 %v322_v2, %v99_v42  ;;  %v38_v62 = vld [vmem:[%s897_s0 + $0xc0] sm:$0xff]  ;;  %v39_v5 = vld [vmem:[%s897_s0 + $0xc8] sm:$0xff]  ;;  %v40_v6 = vld [vmem:[%s897_s0 + $0xd0] sm:$0xff] }
   0xc   :  { %v101_v56 = vmul.f32 %v317_v1, %v30_v38  ;;  %230 = vst.msk [vmem:[%s900_s3 + $0x48] sm:$0xff] %vm220_vm0, %v165_v46  ;;  %231 = vst.msk [vmem:[%s900_s3 + $0x50] sm:$0xff] %vm220_vm0, %v166_v47  ;;  %v102_v59 = vmul.f32 %v317_v1, %v31_v43  ;;  %v103_v60 = vmul.f32 %v317_v1, %v32_v44  ;;  %v41_v7 = vld [vmem:[%s897_s0 + $0xd8] sm:$0xff]  ;;  %v42_v12 = vld [vmem:[%s897_s0 + $0xe0] sm:$0xff] }
   0xd   :  { %232 = vst.msk [vmem:[%s900_s3 + $0x58] sm:$0xff] %vm220_vm0, %v167_v48  ;;  %v171_v58 = vadd.f32 %v322_v2, %v100_v49  ;;  %v104_v61 = vmul.f32 %v317_v1, %v33_v45  ;;  %233 = vst.msk [vmem:[%s900_s3 + $0x60] sm:$0xff] %vm220_vm0, %v168_v53  ;;  %v105_v0 = vmul.f32 %v317_v1, %v34_v50  ;;  %v43_v13 = vld [vmem:[%s897_s0 + $0xe8] sm:$0xff]  ;;  %v44_v14 = vld [vmem:[%s897_s0 + $0xf0] sm:$0xff] }
   0xe   :  { %234 = vst.msk [vmem:[%s900_s3 + $0x68] sm:$0xff] %vm220_vm0, %v169_v54  ;;  %235 = vst.msk [vmem:[%s900_s3 + $0x70] sm:$0xff] %vm220_vm0, %v170_v55  ;;  %v172_v63 = vadd.f32 %v322_v2, %v101_v56  ;;  %v106_v3 = vmul.f32 %v317_v1, %v35_v51  ;;  %v107_v4 = vmul.f32 %v317_v1, %v36_v52  ;;  %v45_v19 = vld [vmem:[%s897_s0 + $0xf8] sm:$0xff]  ;;  %v46_v24 = vld [vmem:[%s897_s0 + $0x100] sm:$0xff] }
   0xf   :  { %236 = vst.msk [vmem:[%s900_s3 + $0x78] sm:$0xff] %vm220_vm0, %v171_v58  ;;  %v173_v8 = vadd.f32 %v322_v2, %v102_v59  ;;  %v174_v9 = vadd.f32 %v322_v2, %v103_v60  ;;  %v175_v10 = vadd.f32 %v322_v2, %v104_v61  ;;  %v108_v11 = vmul.f32 %v317_v1, %v37_v57  ;;  %v47_v29 = vld [vmem:[%s897_s0 + $0x108] sm:$0xff]  ;;  %v48_v30 = vld [vmem:[%s897_s0 + $0x110] sm:$0xff]  ;;  %v49_v31 = vld [vmem:[%s897_s0 + $0x118] sm:$0xff] }
  0x10   :  { %237 = vst.msk [vmem:[%s900_s3 + $0x80] sm:$0xff] %vm220_vm0, %v172_v63  ;;  %v176_v15 = vadd.f32 %v322_v2, %v105_v0  ;;  %v177_v16 = vadd.f32 %v322_v2, %v106_v3  ;;  %v178_v17 = vadd.f32 %v322_v2, %v107_v4  ;;  %v109_v18 = vmul.f32 %v317_v1, %v38_v62  ;;  %v50_v36 = vld [vmem:[%s897_s0 + $0x120] sm:$0xff]  ;;  %v51_v37 = vld [vmem:[%s897_s0 + $0x128] sm:$0xff]  ;;  %v52_v38 = vld [vmem:[%s897_s0 + $0x130] sm:$0xff] }
  0x11   :  { %238 = vst.msk [vmem:[%s900_s3 + $0x88] sm:$0xff] %vm220_vm0, %v173_v8  ;;  %239 = vst.msk [vmem:[%s900_s3 + $0x90] sm:$0xff] %vm220_vm0, %v174_v9  ;;  %v179_v20 = vadd.f32 %v322_v2, %v108_v11  ;;  %v110_v21 = vmul.f32 %v317_v1, %v39_v5  ;;  %v111_v22 = vmul.f32 %v317_v1, %v40_v6  ;;  %v53_v43 = vld [vmem:[%s897_s0 + $0x138] sm:$0xff]  ;;  %v54_v48 = vld [vmem:[%s897_s0 + $0x140] sm:$0xff] }
  0x12   :  { %240 = vst.msk [vmem:[%s900_s3 + $0x98] sm:$0xff] %vm220_vm0, %v175_v10  ;;  %v112_v23 = vmul.f32 %v317_v1, %v41_v7  ;;  %241 = vst.msk [vmem:[%s900_s3 + $0xa0] sm:$0xff] %vm220_vm0, %v176_v15  ;;  %v180_v25 = vadd.f32 %v322_v2, %v109_v18  ;;  %v113_v26 = vmul.f32 %v317_v1, %v42_v12  ;;  %v55_v53 = vld [vmem:[%s897_s0 + $0x148] sm:$0xff]  ;;  %v56_v54 = vld [vmem:[%s897_s0 + $0x150] sm:$0xff] }
  0x13   :  { %242 = vst.msk [vmem:[%s900_s3 + $0xa8] sm:$0xff] %vm220_vm0, %v177_v16  ;;  %243 = vst.msk [vmem:[%s900_s3 + $0xb0] sm:$0xff] %vm220_vm0, %v178_v17  ;;  %v114_v27 = vmul.f32 %v317_v1, %v43_v13  ;;  %v115_v28 = vmul.f32 %v317_v1, %v44_v14  ;;  %v181_v32 = vadd.f32 %v322_v2, %v110_v21  ;;  %v57_v55 = vld [vmem:[%s897_s0 + $0x158] sm:$0xff]  ;;  %v58_v60 = vld [vmem:[%s897_s0 + $0x160] sm:$0xff] }
  0x14   :  { %244 = vst.msk [vmem:[%s900_s3 + $0xb8] sm:$0xff] %vm220_vm0, %v179_v20  ;;  %v182_v33 = vadd.f32 %v322_v2, %v111_v22  ;;  %v183_v34 = vadd.f32 %v322_v2, %v112_v23  ;;  %v116_v35 = vmul.f32 %v317_v1, %v45_v19  ;;  %245 = vst.msk [vmem:[%s900_s3 + $0xc0] sm:$0xff] %vm220_vm0, %v180_v25  ;;  %v59_v61 = vld [vmem:[%s897_s0 + $0x168] sm:$0xff]  ;;  %v60_v62 = vld [vmem:[%s897_s0 + $0x170] sm:$0xff] }
  0x15   :  { %v184_v39 = vadd.f32 %v322_v2, %v113_v26  ;;  %v185_v40 = vadd.f32 %v322_v2, %v114_v27  ;;  %v186_v41 = vadd.f32 %v322_v2, %v115_v28  ;;  %v117_v42 = vmul.f32 %v317_v1, %v46_v24  ;;  %246 = vst.msk [vmem:[%s900_s3 + $0xc8] sm:$0xff] %vm220_vm0, %v181_v32  ;;  %v61_v5 = vld [vmem:[%s897_s0 + $0x178] sm:$0xff]  ;;  %v62_v10 = vld [vmem:[%s897_s0 + $0x180] sm:$0xff]  ;;  %v63_v15 = vld [vmem:[%s897_s0 + $0x188] sm:$0xff] }
  0x16   :  { %247 = vst.msk [vmem:[%s900_s3 + $0xd0] sm:$0xff] %vm220_vm0, %v182_v33  ;;  %248 = vst.msk [vmem:[%s900_s3 + $0xd8] sm:$0xff] %vm220_vm0, %v183_v34  ;;  %v187_v44 = vadd.f32 %v322_v2, %v116_v35  ;;  %v118_v45 = vmul.f32 %v317_v1, %v47_v29  ;;  %v119_v46 = vmul.f32 %v317_v1, %v48_v30  ;;  %v64_v16 = vld [vmem:[%s897_s0 + $0x190] sm:$0xff]  ;;  %v65_v17 = vld [vmem:[%s897_s0 + $0x198] sm:$0xff] }
  0x17   :  { %v120_v47 = vmul.f32 %v317_v1, %v49_v31  ;;  %249 = vst.msk [vmem:[%s900_s3 + $0xe0] sm:$0xff] %vm220_vm0, %v184_v39  ;;  %250 = vst.msk [vmem:[%s900_s3 + $0xe8] sm:$0xff] %vm220_vm0, %v185_v40  ;;  %v188_v49 = vadd.f32 %v322_v2, %v117_v42  ;;  %v121_v50 = vmul.f32 %v317_v1, %v50_v36  ;;  %v66_v22 = vld [vmem:[%s897_s0 + $0x1a0] sm:$0xff]  ;;  %v67_v23 = vld [vmem:[%s897_s0 + $0x1a8] sm:$0xff] }
  0x18   :  { %251 = vst.msk [vmem:[%s900_s3 + $0xf0] sm:$0xff] %vm220_vm0, %v186_v41  ;;  %v122_v51 = vmul.f32 %v317_v1, %v51_v37  ;;  %v123_v52 = vmul.f32 %v317_v1, %v52_v38  ;;  %252 = vst.msk [vmem:[%s900_s3 + $0xf8] sm:$0xff] %vm220_vm0, %v187_v44  ;;  %v189_v56 = vadd.f32 %v322_v2, %v118_v45  ;;  %v68_v24 = vld [vmem:[%s897_s0 + $0x1b0] sm:$0xff]  ;;  %v69_v29 = vld [vmem:[%s897_s0 + $0x1b8] sm:$0xff] }
  0x19   :  { %v190_v57 = vadd.f32 %v322_v2, %v119_v46  ;;  %v191_v58 = vadd.f32 %v322_v2, %v120_v47  ;;  %v124_v59 = vmul.f32 %v317_v1, %v53_v43  ;;  %253 = vst.msk [vmem:[%s900_s3 + $0x100] sm:$0xff] %vm220_vm0, %v188_v49  ;;  %v192_v63 = vadd.f32 %v322_v2, %v121_v50  ;;  %v70_v34 = vld [vmem:[%s897_s0 + $0x1c0] sm:$0xff]  ;;  %v71_v39 = vld [vmem:[%s897_s0 + $0x1c8] sm:$0xff]  ;;  %v72_v40 = vld [vmem:[%s897_s0 + $0x1d0] sm:$0xff] }
  0x1a   :  { %v193_v0 = vadd.f32 %v322_v2, %v122_v51  ;;  %v194_v3 = vadd.f32 %v322_v2, %v123_v52  ;;  %v125_v4 = vmul.f32 %v317_v1, %v54_v48  ;;  %254 = vst.msk [vmem:[%s900_s3 + $0x108] sm:$0xff] %vm220_vm0, %v189_v56  ;;  %v126_v7 = vmul.f32 %v317_v1, %v55_v53  ;;  %v73_v41 = vld [vmem:[%s897_s0 + $0x1d8] sm:$0xff]  ;;  %v74_v46 = vld [vmem:[%s897_s0 + $0x1e0] sm:$0xff]  ;;  %v75_v47 = vld [vmem:[%s897_s0 + $0x1e8] sm:$0xff] }
  0x1b   :  { %255 = vst.msk [vmem:[%s900_s3 + $0x110] sm:$0xff] %vm220_vm0, %v190_v57  ;;  %256 = vst.msk [vmem:[%s900_s3 + $0x118] sm:$0xff] %vm220_vm0, %v191_v58  ;;  %v195_v6 = vadd.f32 %v322_v2, %v124_v59  ;;  %v127_v8 = vmul.f32 %v317_v1, %v56_v54  ;;  %v128_v9 = vmul.f32 %v317_v1, %v57_v55  ;;  %v76_v48 = vld [vmem:[%s897_s0 + $0x1f0] sm:$0xff]  ;;  %v77_v53 = vld [vmem:[%s897_s0 + $0x1f8] sm:$0xff] }
  0x1c   :  { %257 = vst.msk [vmem:[%s900_s3 + $0x120] sm:$0xff] %vm220_vm0, %v192_v63  ;;  %258 = vst.msk [vmem:[%s900_s3 + $0x128] sm:$0xff] %vm220_vm0, %v193_v0  ;;  %v196_v11 = vadd.f32 %v322_v2, %v125_v4  ;;  %v129_v12 = vmul.f32 %v317_v1, %v58_v60  ;;  %v130_v13 = vmul.f32 %v317_v1, %v59_v61 }
  0x1d   :  { %259 = vst.msk [vmem:[%s900_s3 + $0x130] sm:$0xff] %vm220_vm0, %v194_v3  ;;  %v131_v14 = vmul.f32 %v317_v1, %v60_v62  ;;  %260 = vst.msk [vmem:[%s900_s3 + $0x138] sm:$0xff] %vm220_vm0, %v195_v6  ;;  %v197_v18 = vadd.f32 %v322_v2, %v126_v7  ;;  %v198_v19 = vadd.f32 %v322_v2, %v127_v8 }
  0x1e   :  { %v199_v20 = vadd.f32 %v322_v2, %v128_v9  ;;  %v132_v21 = vmul.f32 %v317_v1, %v61_v5  ;;  %261 = vst.msk [vmem:[%s900_s3 + $0x140] sm:$0xff] %vm220_vm0, %v196_v11  ;;  %v200_v25 = vadd.f32 %v322_v2, %v129_v12  ;;  %v201_v26 = vadd.f32 %v322_v2, %v130_v13 }
  0x1f   :  { %v202_v27 = vadd.f32 %v322_v2, %v131_v14  ;;  %v133_v28 = vmul.f32 %v317_v1, %v62_v10  ;;  %262 = vst.msk [vmem:[%s900_s3 + $0x148] sm:$0xff] %vm220_vm0, %v197_v18  ;;  %263 = vst.msk [vmem:[%s900_s3 + $0x150] sm:$0xff] %vm220_vm0, %v198_v19  ;;  %v134_v31 = vmul.f32 %v317_v1, %v63_v15 }
  0x20   :  { %264 = vst.msk [vmem:[%s900_s3 + $0x158] sm:$0xff] %vm220_vm0, %v199_v20  ;;  %v203_v30 = vadd.f32 %v322_v2, %v132_v21  ;;  %v135_v32 = vmul.f32 %v317_v1, %v64_v16  ;;  %v136_v33 = vmul.f32 %v317_v1, %v65_v17  ;;  %265 = vst.msk [vmem:[%s900_s3 + $0x160] sm:$0xff] %vm220_vm0, %v200_v25 }
  0x21   :  { %266 = vst.msk [vmem:[%s900_s3 + $0x168] sm:$0xff] %vm220_vm0, %v201_v26  ;;  %267 = vst.msk [vmem:[%s900_s3 + $0x170] sm:$0xff] %vm220_vm0, %v202_v27  ;;  %v204_v35 = vadd.f32 %v322_v2, %v133_v28  ;;  %v137_v36 = vmul.f32 %v317_v1, %v66_v22  ;;  %v138_v37 = vmul.f32 %v317_v1, %v67_v23 }
  0x22   :  { %v139_v38 = vmul.f32 %v317_v1, %v68_v24  ;;  %268 = vst.msk [vmem:[%s900_s3 + $0x178] sm:$0xff] %vm220_vm0, %v203_v30  ;;  %v205_v42 = vadd.f32 %v322_v2, %v134_v31  ;;  %v206_v43 = vadd.f32 %v322_v2, %v135_v32  ;;  %v207_v44 = vadd.f32 %v322_v2, %v136_v33 }
  0x23   :  { %v140_v45 = vmul.f32 %v317_v1, %v69_v29  ;;  %269 = vst.msk [vmem:[%s900_s3 + $0x180] sm:$0xff] %vm220_vm0, %v204_v35  ;;  %v208_v49 = vadd.f32 %v322_v2, %v137_v36  ;;  %v209_v50 = vadd.f32 %v322_v2, %v138_v37  ;;  %v141_v52 = vmul.f32 %v317_v1, %v70_v34 }
  0x24   :  { %v210_v51 = vadd.f32 %v322_v2, %v139_v38  ;;  %270 = vst.msk [vmem:[%s900_s3 + $0x188] sm:$0xff] %vm220_vm0, %v205_v42  ;;  %271 = vst.msk [vmem:[%s900_s3 + $0x190] sm:$0xff] %vm220_vm0, %v206_v43  ;;  %v142_v55 = vmul.f32 %v317_v1, %v71_v39  ;;  %v143_v56 = vmul.f32 %v317_v1, %v72_v40 }
  0x25   :  { %272 = vst.msk [vmem:[%s900_s3 + $0x198] sm:$0xff] %vm220_vm0, %v207_v44  ;;  %v211_v54 = vadd.f32 %v322_v2, %v140_v45  ;;  %v144_v57 = vmul.f32 %v317_v1, %v73_v41  ;;  %273 = vst.msk [vmem:[%s900_s3 + $0x1a0] sm:$0xff] %vm220_vm0, %v208_v49  ;;  %v212_v58 = vadd.f32 %v322_v2, %v141_v52 }
  0x26   :  { %274 = vst.msk [vmem:[%s900_s3 + $0x1a8] sm:$0xff] %vm220_vm0, %v209_v50  ;;  %275 = vst.msk [vmem:[%s900_s3 + $0x1b0] sm:$0xff] %vm220_vm0, %v210_v51  ;;  %v145_v59 = vmul.f32 %v317_v1, %v74_v46  ;;  %v146_v60 = vmul.f32 %v317_v1, %v75_v47  ;;  %v147_v61 = vmul.f32 %v317_v1, %v76_v48 }
  0x27   :  { %276 = vst.msk [vmem:[%s900_s3 + $0x1b8] sm:$0xff] %vm220_vm0, %v211_v54  ;;  %v213_v62 = vadd.f32 %v322_v2, %v142_v55  ;;  %v214_v63 = vadd.f32 %v322_v2, %v143_v56  ;;  %v215_v0 = vadd.f32 %v322_v2, %v144_v57  ;;  %v148_v3 = vmul.f32 %v317_v1, %v77_v53 }
  0x28   :  { %277 = vst.msk [vmem:[%s900_s3 + $0x1c0] sm:$0xff] %vm220_vm0, %v212_v58  ;;  %v216_v4 = vadd.f32 %v322_v2, %v145_v59  ;;  %v217_v5 = vadd.f32 %v322_v2, %v146_v60  ;;  %v218_v6 = vadd.f32 %v322_v2, %v147_v61 }
  0x29   :  { %278 = vst.msk [vmem:[%s900_s3 + $0x1c8] sm:$0xff] %vm220_vm0, %v213_v62  ;;  %279 = vst.msk [vmem:[%s900_s3 + $0x1d0] sm:$0xff] %vm220_vm0, %v214_v63  ;;  %v219_v1 = vadd.f32 %v322_v2, %v148_v3 }
  0x2a   :  { %280 = vst.msk [vmem:[%s900_s3 + $0x1d8] sm:$0xff] %vm220_vm0, %v215_v0  ;;  %281 = vst.msk [vmem:[%s900_s3 + $0x1e0] sm:$0xff] %vm220_vm0, %v216_v4 }
  0x2b   :  { %282 = vst.msk [vmem:[%s900_s3 + $0x1e8] sm:$0xff] %vm220_vm0, %v217_v5  ;;  %283 = vst.msk [vmem:[%s900_s3 + $0x1f0] sm:$0xff] %vm220_vm0, %v218_v6 }
  0x2c   :  { %284 = vst.msk [vmem:[%s900_s3 + $0x1f8] sm:$0xff] %vm220_vm0, %v219_v1 }

// kernel: tile.9
= control target key start
LH: loop header
LB: loop body
LE: loop exit
PB: predicated region body
PF: predicated region fallthrough
CT: control target
= control target key end

     0   :  { %vm7_vm0 = vcmask 23552   ;;  %s37_s8 = smov 3   ;;  %s38_s9 = smov 6   ;;  %vm13_vm1 = vcmask 97352   ;;  %vm19_vm2 = vcmask 72752   ;;  %vm25_vm3 = vcmask 48152   ;;  %s55_s0 = inlined_call_operand.vmem [shape: f32[4,3], index: 0, kind: input, shape index: {}]   ;;  %s56_s1 = inlined_call_operand.vmem [shape: f32[1,12], index: 1, kind: output, shape index: {}]  }
   0x1   :  { %v4_v0 = vld [vmem:[%s55_s0] sm:$0xf]  ;;  %s36_s0 = smov 9  }
   0x2   :  { %5 = vst [vmem:[#allocation1] sm:$0xf] %v4_v0 }
   0x9   :  { %v10_v1 = vld [vmem:[#allocation1 + $0x3] sm:$0x1]   ;;  %v22_v2 = vld [vmem:[#allocation1 + $0x1] sm:$0x1]   ;;  %v6_v3 = vld [vmem:[#allocation1] sm:$0x1]  }
   0xa   :  { %11 = vrot.lane.b32.xlu0 %v10_v1, %s36_s0  ;;  %23 = vrot.lane.b32.xlu1 %v22_v2, %s37_s8  ;;  %v16_v4 = vld [vmem:[#allocation1 + $0x2] sm:$0x1]   ;;  %8 = vst.msk [vmem:[#allocation0] sm:$0x1] %vm7_vm0, %v6_v3  }
   0xe   :  { %17 = vrot.lane.b32.xlu0 %v16_v4, %s38_s9 }
  0x7c   :  { %v12_v5 = vpop.permute.xlu0 %11   ;;  %v24_v6 = vpop.permute.xlu1 %23  }
  0x7d   :  { %14 = vst.msk [vmem:[#allocation0] sm:$0x1] %vm13_vm1, %v12_v5  }
  0x80   :  { %v18_v7 = vpop.permute.xlu0 %17  }
  0x81   :  { %20 = vst.msk [vmem:[#allocation0] sm:$0x1] %vm19_vm2, %v18_v7  }
  0x82   :  { %26 = vst.msk [vmem:[#allocation0] sm:$0x1] %vm25_vm3, %v24_v6  }
  0x89   :  { %v30_v8 = vld [vmem:[#allocation0] sm:$0x1] }
  0x8a   :  { %32 = vst [vmem:[%s56_s1] sm:$0x1] %v30_v8 }

// kernel: tile.8
= control target key start
LH: loop header
LB: loop body
LE: loop exit
PB: predicated region body
PF: predicated region fallthrough
CT: control target
= control target key end

     0   :  { %s22_s0 = inlined_call_operand.vmem [shape: f32[3], index: 0, kind: input, shape index: {}]   ;;  %s23_s1 = inlined_call_operand.vmem [shape: f32[4,3], index: 1, kind: output, shape index: {}]  }
   0x1   :  { %v4_v0 = vld [vmem:[%s22_s0] ss:$0 sm:$0xff] }
   0x2   :  { %5 = vst [vmem:[%s23_s1] sm:$0xf] %v4_v0 }

// kernel: _lambda_.33
= control target key start
LH: loop header
LB: loop body
LE: loop exit
PB: predicated region body
PF: predicated region fallthrough
CT: control target
= control target key end

     0   :  { %v1860_v0 = vmov 0.0   ;;  %vm1861_vm0 = vmmov 0   ;;  %v1862_v9 = vmov 0   ;;  %vm528_vm1 = vcmask 523264   ;;  %s3126_s1 = inlined_call_operand.vmem [shape: bf16[64,12], index: 1, kind: input, shape index: {}]   ;;  %s3127_s0 = inlined_call_operand.vmem [shape: bf16[578,64], index: 0, kind: input, shape index: {}]   ;;  %s3128_s2 = inlined_call_operand.vmem [shape: f32[1,12], index: 2, kind: input, shape index: {}]   ;;  %s3129_s3 = inlined_call_operand.vmem [shape: f32[578,12], index: 3, kind: output, shape index: {}]  }
   0x1   :  { %1542 = vmatprep.subr.bf16.mxu0 %v1860_v0  ;;  %v1709_v1 = vld [vmem:[%s3126_s1] sm:$0xff]   ;;  %1698 = vmatprep.subr.bf16.mxu1 %v1860_v0  ;;  %v1710_v2 = vld [vmem:[%s3126_s1 + $0x8] sm:$0xff]   ;;  %v1711_v3 = vld [vmem:[%s3126_s1 + $0x10] sm:$0xff]   ;;  %vm19_vm2 = vcmask 97280   ;;  %vm92_vm3 = vcmask 91136  }
   0x2   :  { %1550 = vmatprep.mubr.msk.bf16.mxu0 %vm1861_vm0, %v1860_v0  ;;  %1626 = vmatprep.mubr.msk.bf16.mxu1 %vm1861_vm0, %v1860_v0  ;;  %v94_v4 = vld [vmem:[%s3127_s0] sm:$0xf]  ;;  %v95_v5 = vld [vmem:[%s3127_s0 + $0x4] sm:$0xf]  ;;  %v132_v6 = vld [vmem:[%s3127_s0 + $0x98] sm:$0xf] }
   0x3   :  { %1543 = vmatpush3.bf16.msra.mxu0 %v1709_v1  ;;  %1702 = vmatpush3.bf16.msra.mxu1 %v1709_v1  ;;  %v133_v7 = vld [vmem:[%s3127_s0 + $0x9c] sm:$0xf]  ;;  %v96_v8 = vld [vmem:[%s3127_s0 + $0x8] sm:$0xf]  ;;  %v167_v10 = vmax.bf16 %v1862_v9, %v94_v4  ;;  %v168_v11 = vmax.bf16 %v1862_v9, %v95_v5  ;;  %v205_v12 = vmax.bf16 %v1862_v9, %v132_v6  ;;  %v97_v14 = vld [vmem:[%s3127_s0 + $0xc] sm:$0xf] }
   0x4   :  { %1544 = vmatprep.subr.bf16.mxu0 %v1860_v0  ;;  %1699 = vmatprep.subr.bf16.mxu1 %v1860_v0  ;;  %v206_v13 = vmax.bf16 %v1862_v9, %v133_v7  ;;  %v134_v15 = vld [vmem:[%s3127_s0 + $0xa0] sm:$0xf]  ;;  %v135_v16 = vld [vmem:[%s3127_s0 + $0xa4] sm:$0xf]  ;;  %v1712_v17 = vld [vmem:[%s3126_s1 + $0x18] sm:$0xff]   ;;  %v1948_v22 = vmax.bf16 %v1862_v9, %v96_v8  ;;  %v1951_v23 = vmax.bf16 %v1862_v9, %v97_v14 }
   0x5   :  { %v98_v18 = vld [vmem:[%s3127_s0 + $0x10] sm:$0xf]  ;;  %v99_v19 = vld [vmem:[%s3127_s0 + $0x14] sm:$0xf]  ;;  %v136_v20 = vld [vmem:[%s3127_s0 + $0xa8] sm:$0xf]  ;;  %v1954_v24 = vmax.bf16 %v1862_v9, %v134_v15  ;;  %v1957_v25 = vmax.bf16 %v1862_v9, %v135_v16  ;;  %v1422_v26 = vcombine.low %v167_v10, %v168_v11 }
   0x6   :  { %v137_v21 = vld [vmem:[%s3127_s0 + $0xac] sm:$0xf]  ;;  %v1441_v27 = vcombine.low %v205_v12, %v206_v13  ;;  %v1960_v28 = vmax.bf16 %v1862_v9, %v98_v18  ;;  %v1963_v29 = vmax.bf16 %v1862_v9, %v99_v19  ;;  %v1966_v30 = vmax.bf16 %v1862_v9, %v136_v20  ;;  %v100_v32 = vld [vmem:[%s3127_s0 + $0x18] sm:$0xf]  ;;  %v101_v33 = vld [vmem:[%s3127_s0 + $0x1c] sm:$0xf] }
   0x7   :  { %1545 = vmatpush3.bf16.msra.mxu0 %v1710_v2  ;;  %1703 = vmatpush3.bf16.msra.mxu1 %v1710_v2  ;;  %v1969_v31 = vmax.bf16 %v1862_v9, %v137_v21  ;;  %v138_v34 = vld [vmem:[%s3127_s0 + $0xb0] sm:$0xf]  ;;  %v139_v35 = vld [vmem:[%s3127_s0 + $0xb4] sm:$0xf]  ;;  %v110_v36 = vld [vmem:[%s3127_s0 + $0x40] sm:$0xf]  ;;  %v1423_v38 = vcombine.low %v1948_v22, %v1951_v23  ;;  %v1442_v39 = vcombine.low %v1954_v24, %v1957_v25 }
   0x8   :  { %1546 = vmatprep.subr.bf16.mxu0 %v1860_v0  ;;  %1700 = vmatprep.subr.bf16.mxu1 %v1860_v0  ;;  %v111_v37 = vld [vmem:[%s3127_s0 + $0x44] sm:$0xf]  ;;  %v148_v40 = vld [vmem:[%s3127_s0 + $0xd8] sm:$0xf]  ;;  %v149_v41 = vld [vmem:[%s3127_s0 + $0xdc] sm:$0xf]  ;;  %v1424_v43 = vcombine.low %v1960_v28, %v1963_v29  ;;  %v2007_v44 = vmax.bf16 %v1862_v9, %v100_v32  ;;  %v2010_v45 = vmax.bf16 %v1862_v9, %v101_v33 }
   0x9   :  { %v112_v42 = vld [vmem:[%s3127_s0 + $0x48] sm:$0xf]  ;;  %v113_v46 = vld [vmem:[%s3127_s0 + $0x4c] sm:$0xf]  ;;  %v150_v47 = vld [vmem:[%s3127_s0 + $0xe0] sm:$0xf]  ;;  %v1443_v49 = vcombine.low %v1966_v30, %v1969_v31  ;;  %v2028_v50 = vmax.bf16 %v1862_v9, %v138_v34  ;;  %v2031_v51 = vmax.bf16 %v1862_v9, %v110_v36  ;;  %v2040_v54 = vmax.bf16 %v1862_v9, %v139_v35 }
   0xa   :  { %v151_v48 = vld [vmem:[%s3127_s0 + $0xe4] sm:$0xf]  ;;  %v114_v52 = vld [vmem:[%s3127_s0 + $0x50] sm:$0xf]  ;;  %v115_v53 = vld [vmem:[%s3127_s0 + $0x54] sm:$0xf]  ;;  %v2043_v55 = vmax.bf16 %v1862_v9, %v111_v37  ;;  %v2046_v56 = vmax.bf16 %v1862_v9, %v148_v40  ;;  %v2049_v57 = vmax.bf16 %v1862_v9, %v149_v41  ;;  %v2058_v60 = vmax.bf16 %v1862_v9, %v112_v42 }
   0xb   :  { %1547 = vmatpush3.bf16.msra.mxu0 %v1711_v3  ;;  %1704 = vmatpush3.bf16.msra.mxu1 %v1711_v3  ;;  %v152_v58 = vld [vmem:[%s3127_s0 + $0xe8] sm:$0xf]  ;;  %v153_v59 = vld [vmem:[%s3127_s0 + $0xec] sm:$0xf]  ;;  %v2061_v61 = vmax.bf16 %v1862_v9, %v113_v46  ;;  %v2064_v62 = vmax.bf16 %v1862_v9, %v150_v47  ;;  %v2067_v63 = vmax.bf16 %v1862_v9, %v151_v48  ;;  %v116_v1 = vld [vmem:[%s3127_s0 + $0x58] sm:$0xf] }
   0xc   :  { %1548 = vmatprep.subr.bf16.mxu0 %v1860_v0  ;;  %1701 = vmatprep.subr.bf16.mxu1 %v1860_v0  ;;  %v117_v2 = vld [vmem:[%s3127_s0 + $0x5c] sm:$0xf]  ;;  %v154_v3 = vld [vmem:[%s3127_s0 + $0xf0] sm:$0xf]  ;;  %v1430_v4 = vcombine.low %v2031_v51, %v2043_v55  ;;  %v1449_v5 = vcombine.low %v2046_v56, %v2049_v57  ;;  %v2083_v6 = vmax.bf16 %v1862_v9, %v114_v52  ;;  %v155_v8 = vld [vmem:[%s3127_s0 + $0xf4] sm:$0xf] }
   0xd   :  { %v2086_v7 = vmax.bf16 %v1862_v9, %v115_v53  ;;  %v118_v10 = vld [vmem:[%s3127_s0 + $0x60] sm:$0xf]  ;;  %v119_v11 = vld [vmem:[%s3127_s0 + $0x64] sm:$0xf]  ;;  %v1431_v12 = vcombine.low %v2058_v60, %v2061_v61  ;;  %v1450_v13 = vcombine.low %v2064_v62, %v2067_v63  ;;  %v2102_v14 = vmax.bf16 %v1862_v9, %v152_v58  ;;  %v156_v16 = vld [vmem:[%s3127_s0 + $0xf8] sm:$0xf] }
   0xe   :  { %v2105_v15 = vmax.bf16 %v1862_v9, %v153_v59  ;;  %v2116_v19 = vmax.bf16 %v1862_v9, %v116_v1  ;;  %v2119_v20 = vmax.bf16 %v1862_v9, %v117_v2  ;;  %v2122_v21 = vmax.bf16 %v1862_v9, %v154_v3  ;;  %v120_v22 = vld [vmem:[%s3127_s0 + $0x68] sm:$0xf]  ;;  %v121_v23 = vld [vmem:[%s3127_s0 + $0x6c] sm:$0xf]  ;;  %v158_v32 = vld [vmem:[%s3127_s0 + $0x100] sm:$0xf] }
   0xf   :  { %1549 = vmatpush3.bf16.msra.mxu0 %v1712_v17  ;;  %1705 = vmatpush3.bf16.msra.mxu1 %v1712_v17  ;;  %v157_v17 = vld [vmem:[%s3127_s0 + $0xfc] sm:$0xf]  ;;  %v1432_v18 = vcombine.low %v2083_v6, %v2086_v7  ;;  %v2133_v25 = vmax.bf16 %v1862_v9, %v155_v8  ;;  %v159_v33 = vld [vmem:[%s3127_s0 + $0x104] sm:$0xf]  ;;  %v122_v34 = vld [vmem:[%s3127_s0 + $0x70] sm:$0xf]  ;;  %v2155_v36 = vmax.bf16 %v1862_v9, %v156_v16 }
  0x10   :  { %v2158_v37 = vmax.bf16 %v1862_v9, %v157_v17  ;;  %v123_v40 = vld [vmem:[%s3127_s0 + $0x74] sm:$0xf]  ;;  %v160_v41 = vld [vmem:[%s3127_s0 + $0x108] sm:$0xf]  ;;  %v2178_v46 = vmax.bf16 %v1862_v9, %v120_v22  ;;  %v124_v47 = vld [vmem:[%s3127_s0 + $0x78] sm:$0xf]  ;;  %v2189_v53 = vmax.bf16 %v1862_v9, %v121_v23  ;;  %v2192_v58 = vmax.bf16 %v1862_v9, %v158_v32 }
  0x11   :  { %v125_v48 = vld [vmem:[%s3127_s0 + $0x7c] sm:$0xf]  ;;  %v2195_v59 = vmax.bf16 %v1862_v9, %v159_v33  ;;  %v162_v1 = vld [vmem:[%s3127_s0 + $0x110] sm:$0xf]  ;;  %v163_v2 = vld [vmem:[%s3127_s0 + $0x114] sm:$0xf]  ;;  %v2204_v3 = vmax.bf16 %v1862_v9, %v122_v34  ;;  %v2207_v8 = vmax.bf16 %v1862_v9, %v123_v40  ;;  %v2229_v33 = vmax.bf16 %v1862_v9, %v124_v47 }
  0x12   :  { %1551 = vmatmul.mubr.msk.bf16.vlgmr.msra.gmra.mrb[0].mxu0 %vm528_vm1, %v1422_v26  ;;  %1627 = vmatmul.mubr.msk.bf16.vlgmr.msra.gmra.mrb[0].mxu1 %vm528_vm1, %v1441_v27  ;;  %v2136_v26 = vmax.bf16 %v1862_v9, %v118_v10  ;;  %v2139_v27 = vmax.bf16 %v1862_v9, %v119_v11  ;;  %v2210_v10 = vmax.bf16 %v1862_v9, %v160_v41  ;;  %v126_v16 = vld [vmem:[%s3127_s0 + $0x80] sm:$0xf]  ;;  %v127_v17 = vld [vmem:[%s3127_s0 + $0x84] sm:$0xf]  ;;  %v164_v22 = vld [vmem:[%s3127_s0 + $0x118] sm:$0xf] }
  0x13   :  { %1554 = vmatprep.mubr.msk.bf16.mxu0 %vm1861_vm0, %v1860_v0  ;;  %1630 = vmatprep.mubr.msk.bf16.mxu1 %vm1861_vm0, %v1860_v0  ;;  %v2232_v34 = vmax.bf16 %v1862_v9, %v125_v48  ;;  %v165_v40 = vld [vmem:[%s3127_s0 + $0x11c] sm:$0xf]  ;;  %v128_v41 = vld [vmem:[%s3127_s0 + $0x88] sm:$0xf]  ;;  %v2248_v48 = vmax.bf16 %v1862_v9, %v162_v1  ;;  %v2251_v23 = vmax.bf16 %v1862_v9, %v163_v2  ;;  %v166_v52 = vld [vmem:[%s3127_s0 + $0x120] sm:$0x1] }
  0x14   :  { %v130_v42 = vld [vmem:[%s3127_s0 + $0x90] sm:$0xf]  ;;  %v2265_v1 = vmax.bf16 %v1862_v9, %v127_v17  ;;  %v2268_v2 = vmax.bf16 %v1862_v9, %v164_v22  ;;  %v131_v47 = vld [vmem:[%s3127_s0 + $0x94] sm:$0xf]  ;;  %v2276_v24 = vmax.bf16 %v1862_v9, %v165_v40  ;;  %v2279_v32 = vmax.bf16 %v1862_v9, %v128_v41  ;;  %20 = vst.msk [vmem:[#allocation2] sm:$0xff] %vm19_vm2, %v1860_v0 }
  0x15   :  { %v1456_v35 = vcombine.low %v2248_v48, %v2251_v23  ;;  %v2295_v22 = vmax.bf16 %v1862_v9, %v166_v52  ;;  %v2298_v40 = vmax.bf16 %v1862_v9, %v130_v42  ;;  %v2309_v30 = vmax.bf16 %v1862_v9, %v131_v47  ;;  %21 = vst.msk [vmem:[#allocation2 + $0x8] sm:$0xff] %vm19_vm2, %v1860_v0  ;;  %v102_v42 = vld [vmem:[%s3127_s0 + $0x20] sm:$0xf]  ;;  %v103_v52 = vld [vmem:[%s3127_s0 + $0x24] sm:$0xf] }
  0x16   :  { %v1457_v28 = vcombine.low %v2268_v2, %v2276_v24  ;;  %22 = vst.msk [vmem:[#allocation2 + $0x10] sm:$0xff] %vm19_vm2, %v1860_v0  ;;  %23 = vst.msk [vmem:[#allocation2 + $0x18] sm:$0xff] %vm19_vm2, %v1860_v0  ;;  %v140_v41 = vld [vmem:[%s3127_s0 + $0xb8] sm:$0xf]  ;;  %v3131_v51 = vcombine.low %v2116_v19, %v2119_v20  ;;  %v3132_v55 = vcombine.low %v2122_v21, %v2133_v25 }
  0x17   :  { %24 = vst.msk [vmem:[#allocation2 + $0x20] sm:$0xff] %vm19_vm2, %v1860_v0  ;;  %25 = vst.msk [vmem:[#allocation2 + $0x28] sm:$0xff] %vm19_vm2, %v1860_v0  ;;  %v3133_v56 = vcombine.low %v2136_v26, %v2139_v27  ;;  %v3134_v57 = vcombine.low %v2155_v36, %v2158_v37  ;;  %v3135_v60 = vcombine.low %v2178_v46, %v2189_v53  ;;  %v2683_v53 = vld [vmem:[%s3128_s2] ss:$0 sm:$0xff] }
  0x18   :  { %26 = vst.msk [vmem:[#allocation2 + $0x30] sm:$0xff] %vm19_vm2, %v1860_v0  ;;  %27 = vst.msk [vmem:[#allocation2 + $0x38] sm:$0xff] %vm19_vm2, %v1860_v0  ;;  %v3136_v61 = vcombine.low %v2192_v58, %v2195_v59  ;;  %v3137_v62 = vcombine.low %v2204_v3, %v2207_v8  ;;  %v3140_v6 = vcombine.low %v2298_v40, %v2309_v30 }
  0x19   :  { %28 = vst.msk [vmem:[#allocation2 + $0x40] sm:$0xff] %vm19_vm2, %v1860_v0  ;;  %29 = vst.msk [vmem:[#allocation2 + $0x48] sm:$0xff] %vm19_vm2, %v1860_v0 }
  0x1a   :  { %1555 = vmatmul.mubr.msk.bf16.gmra.mrb[4].mxu0 %vm528_vm1, %v1423_v38  ;;  %1631 = vmatmul.mubr.msk.bf16.gmra.mrb[4].mxu1 %vm528_vm1, %v1442_v39  ;;  %v161_v38 = vld [vmem:[%s3127_s0 + $0x10c] sm:$0xf]  ;;  %v2262_v39 = vmax.bf16 %v1862_v9, %v126_v16  ;;  %30 = vst.msk [vmem:[#allocation2 + $0x50] sm:$0xff] %vm19_vm2, %v1860_v0  ;;  %31 = vst.msk [vmem:[#allocation2 + $0x58] sm:$0xff] %vm19_vm2, %v1860_v0 }
  0x1b   :  { %1558 = vmatprep.mubr.msk.bf16.mxu0 %vm1861_vm0, %v1860_v0  ;;  %1634 = vmatprep.mubr.msk.bf16.mxu1 %vm1861_vm0, %v1860_v0  ;;  %v2213_v11 = vmax.bf16 %v1862_v9, %v161_v38  ;;  %v129_v38 = vld [vmem:[%s3127_s0 + $0x8c] sm:$0xf]  ;;  %32 = vst.msk [vmem:[#allocation2 + $0x60] sm:$0xff] %vm19_vm2, %v1860_v0  ;;  %33 = vst.msk [vmem:[#allocation2 + $0x68] sm:$0xff] %vm19_vm2, %v1860_v0  ;;  %v240_v7 = vld [vmem:[#allocation2] sm:$0xff] }
  0x1c   :  { %v2282_v16 = vmax.bf16 %v1862_v9, %v129_v38  ;;  %v1438_v17 = vcombine.low %v2262_v39, %v2265_v1  ;;  %34 = vst.msk [vmem:[#allocation2 + $0x70] sm:$0xff] %vm19_vm2, %v1860_v0  ;;  %35 = vst.msk [vmem:[#allocation2 + $0x78] sm:$0xff] %vm19_vm2, %v1860_v0  ;;  %v141_v38 = vld [vmem:[%s3127_s0 + $0xbc] sm:$0xf] }
  0x1d   :  { %36 = vst.msk [vmem:[#allocation2 + $0x80] sm:$0xff] %vm19_vm2, %v1860_v0  ;;  %37 = vst.msk [vmem:[#allocation2 + $0x88] sm:$0xff] %vm19_vm2, %v1860_v0  ;;  %v3138_v63 = vcombine.low %v2210_v10, %v2213_v11  ;;  %v242_v39 = vld [vmem:[#allocation2 + $0x10] sm:$0xff]  ;;  %v243_v59 = vld [vmem:[#allocation2 + $0x18] sm:$0xff] }
  0x1e   :  { %v1439_v29 = vcombine.low %v2279_v32, %v2282_v16  ;;  %38 = vst.msk [vmem:[#allocation2 + $0x90] sm:$0xff] %vm19_vm2, %v1860_v0  ;;  %39 = vst.msk [vmem:[#allocation2 + $0x98] sm:$0xff] %vm19_vm2, %v1860_v0 }
  0x1f   :  { %40 = vst.msk [vmem:[#allocation2 + $0xa0] sm:$0xff] %vm19_vm2, %v1860_v0  ;;  %41 = vst.msk [vmem:[#allocation2 + $0xa8] sm:$0xff] %vm19_vm2, %v1860_v0 }
  0x20   :  { %42 = vst.msk [vmem:[#allocation2 + $0xb0] sm:$0xff] %vm19_vm2, %v1860_v0  ;;  %43 = vst.msk [vmem:[#allocation2 + $0xb8] sm:$0xff] %vm19_vm2, %v1860_v0 }
  0x21   :  { %44 = vst.msk [vmem:[#allocation2 + $0xc0] sm:$0xff] %vm19_vm2, %v1860_v0  ;;  %45 = vst.msk [vmem:[#allocation2 + $0xc8] sm:$0xff] %vm19_vm2, %v1860_v0 }
  0x22   :  { %1559 = vmatmul.mubr.msk.bf16.gmra.mrb[8].mxu0 %vm528_vm1, %v1424_v43  ;;  %1635 = vmatmul.mubr.msk.bf16.gmra.mrb[8].mxu1 %vm528_vm1, %v1443_v49  ;;  %46 = vst.msk [vmem:[#allocation2 + $0xd0] sm:$0xff] %vm19_vm2, %v1860_v0  ;;  %47 = vst.msk [vmem:[#allocation2 + $0xd8] sm:$0xff] %vm19_vm2, %v1860_v0  ;;  %v1425_v43 = vcombine.low %v2007_v44, %v2010_v45  ;;  %v1444_v49 = vcombine.low %v2028_v50, %v2040_v54 }
  0x23   :  { %1562 = vmatprep.mubr.msk.bf16.mxu0 %vm1861_vm0, %v1860_v0  ;;  %1638 = vmatprep.mubr.msk.bf16.mxu1 %vm1861_vm0, %v1860_v0  ;;  %48 = vst.msk [vmem:[#allocation2 + $0xe0] sm:$0xff] %vm19_vm2, %v1860_v0  ;;  %49 = vst.msk [vmem:[#allocation2 + $0xe8] sm:$0xff] %vm19_vm2, %v1860_v0  ;;  %v175_v44 = vmax.bf16 %v1862_v9, %v102_v42  ;;  %v176_v45 = vmax.bf16 %v1862_v9, %v103_v52  ;;  %v142_v42 = vld [vmem:[%s3127_s0 + $0xc0] sm:$0xf]  ;;  %v143_v52 = vld [vmem:[%s3127_s0 + $0xc4] sm:$0xf] }
  0x24   :  { %50 = vst.msk [vmem:[#allocation2 + $0xf0] sm:$0xff] %vm19_vm2, %v1860_v0  ;;  %51 = vst.msk [vmem:[#allocation2 + $0xf8] sm:$0xff] %vm19_vm2, %v1860_v0  ;;  %v213_v50 = vmax.bf16 %v1862_v9, %v140_v41  ;;  %v214_v54 = vmax.bf16 %v1862_v9, %v141_v38 }
  0x25   :  { %52 = vst.msk [vmem:[#allocation2 + $0x100] sm:$0xff] %vm19_vm2, %v1860_v0  ;;  %53 = vst.msk [vmem:[#allocation2 + $0x108] sm:$0xff] %vm19_vm2, %v1860_v0  ;;  %v1426_v47 = vcombine.low %v175_v44, %v176_v45  ;;  %v215_v44 = vmax.bf16 %v1862_v9, %v142_v42  ;;  %v216_v45 = vmax.bf16 %v1862_v9, %v143_v52 }
  0x26   :  { %54 = vst.msk [vmem:[#allocation2 + $0x110] sm:$0xff] %vm19_vm2, %v1860_v0  ;;  %55 = vst.msk [vmem:[#allocation2 + $0x118] sm:$0xff] %vm19_vm2, %v1860_v0  ;;  %v1445_v31 = vcombine.low %v213_v50, %v214_v54 }
  0x27   :  { %56 = vst.msk [vmem:[#allocation2 + $0x120] sm:$0xff] %vm19_vm2, %v1860_v0  ;;  %57 = vst.msk [vmem:[#allocation2 + $0x128] sm:$0xff] %vm19_vm2, %v1860_v0  ;;  %v1446_v54 = vcombine.low %v215_v44, %v216_v45 }
  0x28   :  { %58 = vst.msk [vmem:[#allocation2 + $0x130] sm:$0xff] %vm19_vm2, %v1860_v0  ;;  %59 = vst.msk [vmem:[#allocation2 + $0x138] sm:$0xff] %vm19_vm2, %v1860_v0 }
  0x29   :  { %60 = vst.msk [vmem:[#allocation2 + $0x140] sm:$0xff] %vm19_vm2, %v1860_v0  ;;  %61 = vst.msk [vmem:[#allocation2 + $0x148] sm:$0xff] %vm19_vm2, %v1860_v0 }
  0x2a   :  { %62 = vst.msk [vmem:[#allocation2 + $0x150] sm:$0xff] %vm19_vm2, %v1860_v0  ;;  %63 = vst.msk [vmem:[#allocation2 + $0x158] sm:$0xff] %vm19_vm2, %v1860_v0  ;;  %1563 = vmatmul.mubr.msk.bf16.gmra.mrb[12].mxu0 %vm528_vm1, %v1425_v43  ;;  %1639 = vmatmul.mubr.msk.bf16.gmra.mrb[12].mxu1 %vm528_vm1, %v1444_v49  ;;  %v104_v43 = vld [vmem:[%s3127_s0 + $0x28] sm:$0xf]  ;;  %v105_v49 = vld [vmem:[%s3127_s0 + $0x2c] sm:$0xf] }
  0x2b   :  { %64 = vst.msk [vmem:[#allocation2 + $0x160] sm:$0xff] %vm19_vm2, %v1860_v0  ;;  %65 = vst.msk [vmem:[#allocation2 + $0x168] sm:$0xff] %vm19_vm2, %v1860_v0  ;;  %1566 = vmatprep.mubr.msk.bf16.mxu0 %vm1861_vm0, %v1860_v0  ;;  %1642 = vmatprep.mubr.msk.bf16.mxu1 %vm1861_vm0, %v1860_v0  ;;  %v177_v41 = vmax.bf16 %v1862_v9, %v104_v43  ;;  %v178_v38 = vmax.bf16 %v1862_v9, %v105_v49  ;;  %v144_v43 = vld [vmem:[%s3127_s0 + $0xc8] sm:$0xf]  ;;  %v145_v49 = vld [vmem:[%s3127_s0 + $0xcc] sm:$0xf] }
  0x2c   :  { %66 = vst.msk [vmem:[#allocation2 + $0x170] sm:$0xff] %vm19_vm2, %v1860_v0  ;;  %67 = vst.msk [vmem:[#allocation2 + $0x178] sm:$0xff] %vm19_vm2, %v1860_v0 }
  0x2d   :  { %68 = vst.msk [vmem:[#allocation2 + $0x180] sm:$0xff] %vm19_vm2, %v1860_v0  ;;  %69 = vst.msk [vmem:[#allocation2 + $0x188] sm:$0xff] %vm19_vm2, %v1860_v0  ;;  %v1427_v50 = vcombine.low %v177_v41, %v178_v38  ;;  %v217_v41 = vmax.bf16 %v1862_v9, %v144_v43  ;;  %v218_v38 = vmax.bf16 %v1862_v9, %v145_v49 }
  0x2e   :  { %70 = vst.msk [vmem:[#allocation2 + $0x190] sm:$0xff] %vm19_vm2, %v1860_v0  ;;  %71 = vst.msk [vmem:[#allocation2 + $0x198] sm:$0xff] %vm19_vm2, %v1860_v0 }
  0x2f   :  { %72 = vst.msk [vmem:[#allocation2 + $0x1a0] sm:$0xff] %vm19_vm2, %v1860_v0  ;;  %73 = vst.msk [vmem:[#allocation2 + $0x1a8] sm:$0xff] %vm19_vm2, %v1860_v0  ;;  %v1447_v45 = vcombine.low %v217_v41, %v218_v38 }
  0x30   :  { %74 = vst.msk [vmem:[#allocation2 + $0x1b0] sm:$0xff] %vm19_vm2, %v1860_v0  ;;  %75 = vst.msk [vmem:[#allocation2 + $0x1b8] sm:$0xff] %vm19_vm2, %v1860_v0  ;;  %v280_v46 = vld [vmem:[#allocation2 + $0x140] sm:$0xff]  ;;  %v281_v8 = vld [vmem:[#allocation2 + $0x148] sm:$0xff] }
  0x31   :  { %76 = vst.msk [vmem:[#allocation2 + $0x1c0] sm:$0xff] %vm19_vm2, %v1860_v0  ;;  %77 = vst.msk [vmem:[#allocation2 + $0x1c8] sm:$0xff] %vm19_vm2, %v1860_v0 }
  0x32   :  { %78 = vst.msk [vmem:[#allocation2 + $0x1d0] sm:$0xff] %vm19_vm2, %v1860_v0  ;;  %79 = vst.msk [vmem:[#allocation2 + $0x1d8] sm:$0xff] %vm19_vm2, %v1860_v0  ;;  %1567 = vmatmul.mubr.msk.bf16.gmra.mrb[16].mxu0 %vm528_vm1, %v1426_v47  ;;  %1643 = vmatmul.mubr.msk.bf16.gmra.mrb[16].mxu1 %vm528_vm1, %v1445_v31  ;;  %v106_v47 = vld [vmem:[%s3127_s0 + $0x30] sm:$0xf]  ;;  %v107_v31 = vld [vmem:[%s3127_s0 + $0x34] sm:$0xf] }
  0x33   :  { %80 = vst.msk [vmem:[#allocation2 + $0x1e0] sm:$0xff] %vm19_vm2, %v1860_v0  ;;  %81 = vst.msk [vmem:[#allocation2 + $0x1e8] sm:$0xff] %vm19_vm2, %v1860_v0  ;;  %1570 = vmatprep.mubr.msk.bf16.mxu0 %vm1861_vm0, %v1860_v0  ;;  %1646 = vmatprep.mubr.msk.bf16.mxu1 %vm1861_vm0, %v1860_v0  ;;  %v179_v42 = vmax.bf16 %v1862_v9, %v106_v47  ;;  %v180_v52 = vmax.bf16 %v1862_v9, %v107_v31  ;;  %v146_v47 = vld [vmem:[%s3127_s0 + $0xd0] sm:$0xf]  ;;  %v147_v31 = vld [vmem:[%s3127_s0 + $0xd4] sm:$0xf] }
  0x34   :  { %82 = vst.msk [vmem:[#allocation2 + $0x1f0] sm:$0xff] %vm19_vm2, %v1860_v0  ;;  %83 = vst.msk [vmem:[#allocation2 + $0x1f8] sm:$0xff] %vm19_vm2, %v1860_v0 }
  0x35   :  { %84 = vst.msk [vmem:[#allocation2 + $0x200] sm:$0xff] %vm19_vm2, %v1860_v0  ;;  %85 = vst.msk [vmem:[#allocation2 + $0x208] sm:$0xff] %vm19_vm2, %v1860_v0  ;;  %v1428_v44 = vcombine.low %v179_v42, %v180_v52  ;;  %v219_v42 = vmax.bf16 %v1862_v9, %v146_v47  ;;  %v220_v52 = vmax.bf16 %v1862_v9, %v147_v31  ;;  %v245_v31 = vld [vmem:[#allocation2 + $0x28] sm:$0xff] }
  0x36   :  { %86 = vst.msk [vmem:[#allocation2 + $0x210] sm:$0xff] %vm19_vm2, %v1860_v0  ;;  %87 = vst.msk [vmem:[#allocation2 + $0x218] sm:$0xff] %vm19_vm2, %v1860_v0 }
  0x37   :  { %88 = vst.msk [vmem:[#allocation2 + $0x220] sm:$0xff] %vm19_vm2, %v1860_v0  ;;  %89 = vst.msk [vmem:[#allocation2 + $0x228] sm:$0xff] %vm19_vm2, %v1860_v0  ;;  %v1448_v38 = vcombine.low %v219_v42, %v220_v52 }
  0x38   :  { %90 = vst.msk [vmem:[#allocation2 + $0x230] sm:$0xff] %vm19_vm2, %v1860_v0  ;;  %91 = vst.msk [vmem:[#allocation2 + $0x238] sm:$0xff] %vm19_vm2, %v1860_v0 }
  0x39   :  { %93 = vst.msk [vmem:[#allocation2 + $0x240] sm:$0x3] %vm92_vm3, %v1860_v0 }
  0x3a   :  { %1571 = vmatmul.mubr.msk.bf16.gmra.mrb[20].mxu0 %vm528_vm1, %v1427_v50  ;;  %1647 = vmatmul.mubr.msk.bf16.gmra.mrb[20].mxu1 %vm528_vm1, %v1446_v54  ;;  %v108_v50 = vld [vmem:[%s3127_s0 + $0x38] sm:$0xf]  ;;  %v109_v54 = vld [vmem:[%s3127_s0 + $0x3c] sm:$0xf] }
  0x3b   :  { %1574 = vmatprep.mubr.msk.bf16.mxu0 %vm1861_vm0, %v1860_v0  ;;  %1650 = vmatprep.mubr.msk.bf16.mxu1 %vm1861_vm0, %v1860_v0  ;;  %v181_v43 = vmax.bf16 %v1862_v9, %v108_v50  ;;  %v182_v49 = vmax.bf16 %v1862_v9, %v109_v54  ;;  %v3130_v9 = vcombine.low %v2102_v14, %v2105_v15  ;;  %v241_v14 = vld [vmem:[#allocation2 + $0x8] sm:$0xff]  ;;  %v244_v50 = vld [vmem:[#allocation2 + $0x20] sm:$0xff]  ;;  %v282_v54 = vld [vmem:[#allocation2 + $0x150] sm:$0xff] }
  0x3d   :  { %v1429_v41 = vcombine.low %v181_v43, %v182_v49 }
  0x42   :  { %1575 = vmatmul.mubr.msk.bf16.gmra.mrb[24].mxu0 %vm528_vm1, %v1428_v44  ;;  %1651 = vmatmul.mubr.msk.bf16.gmra.mrb[24].mxu1 %vm528_vm1, %v1447_v45 }
  0x43   :  { %1578 = vmatprep.mubr.msk.bf16.mxu0 %vm1861_vm0, %v1860_v0  ;;  %1654 = vmatprep.mubr.msk.bf16.mxu1 %vm1861_vm0, %v1860_v0 }
  0x4a   :  { %1579 = vmatmul.mubr.msk.bf16.gmra.mrb[28].mxu0 %vm528_vm1, %v1429_v41  ;;  %1655 = vmatmul.mubr.msk.bf16.gmra.mrb[28].mxu1 %vm528_vm1, %v1448_v38 }
  0x4b   :  { %1582 = vmatprep.mubr.msk.bf16.mxu0 %vm1861_vm0, %v1860_v0  ;;  %1658 = vmatprep.mubr.msk.bf16.mxu1 %vm1861_vm0, %v1860_v0 }
  0x52   :  { %1583 = vmatmul.mubr.msk.bf16.gmra.mrb[32].mxu0 %vm528_vm1, %v1430_v4  ;;  %1659 = vmatmul.mubr.msk.bf16.gmra.mrb[32].mxu1 %vm528_vm1, %v1449_v5  ;;  %v3139_v4 = vcombine.low %v2229_v33, %v2232_v34  ;;  %v1458_v5 = vcombine.low %v2295_v22, %v2295_v22 }
  0x53   :  { %1586 = vmatprep.mubr.msk.bf16.mxu0 %vm1861_vm0, %v1860_v0  ;;  %1662 = vmatprep.mubr.msk.bf16.mxu1 %vm1861_vm0, %v1860_v0 }
  0x5a   :  { %1587 = vmatmul.mubr.msk.bf16.gmra.mrb[36].mxu0 %vm528_vm1, %v1431_v12  ;;  %1663 = vmatmul.mubr.msk.bf16.gmra.mrb[36].mxu1 %vm528_vm1, %v1450_v13  ;;  %v278_v12 = vld [vmem:[#allocation2 + $0x130] sm:$0xff] }
  0x5b   :  { %1590 = vmatprep.mubr.msk.bf16.mxu0 %vm1861_vm0, %v1860_v0  ;;  %1666 = vmatprep.mubr.msk.bf16.mxu1 %vm1861_vm0, %v1860_v0 }
  0x62   :  { %1591 = vmatmul.mubr.msk.bf16.gmra.mrb[40].mxu0 %vm528_vm1, %v1432_v18  ;;  %1667 = vmatmul.mubr.msk.bf16.gmra.mrb[40].mxu1 %vm528_vm1, %v3130_v9  ;;  %v279_v18 = vld [vmem:[#allocation2 + $0x138] sm:$0xff] }
  0x63   :  { %1594 = vmatprep.mubr.msk.bf16.mxu0 %vm1861_vm0, %v1860_v0  ;;  %1670 = vmatprep.mubr.msk.bf16.mxu1 %vm1861_vm0, %v1860_v0 }
  0x6a   :  { %1595 = vmatmul.mubr.msk.bf16.gmra.mrb[44].mxu0 %vm528_vm1, %v3131_v51  ;;  %1671 = vmatmul.mubr.msk.bf16.gmra.mrb[44].mxu1 %vm528_vm1, %v3132_v55 }
  0x6b   :  { %1598 = vmatprep.mubr.msk.bf16.mxu0 %vm1861_vm0, %v1860_v0  ;;  %1674 = vmatprep.mubr.msk.bf16.mxu1 %vm1861_vm0, %v1860_v0 }
  0x72   :  { %1599 = vmatmul.mubr.msk.bf16.gmra.mrb[48].mxu0 %vm528_vm1, %v3133_v56  ;;  %1675 = vmatmul.mubr.msk.bf16.gmra.mrb[48].mxu1 %vm528_vm1, %v3134_v57 }
  0x73   :  { %1602 = vmatprep.mubr.msk.bf16.mxu0 %vm1861_vm0, %v1860_v0  ;;  %1678 = vmatprep.mubr.msk.bf16.mxu1 %vm1861_vm0, %v1860_v0 }
  0x7a   :  { %1603 = vmatmul.mubr.msk.bf16.gmra.mrb[52].mxu0 %vm528_vm1, %v3135_v60  ;;  %1679 = vmatmul.mubr.msk.bf16.gmra.mrb[52].mxu1 %vm528_vm1, %v3136_v61 }
  0x7b   :  { %1606 = vmatprep.mubr.msk.bf16.mxu0 %vm1861_vm0, %v1860_v0  ;;  %1682 = vmatprep.mubr.msk.bf16.mxu1 %vm1861_vm0, %v1860_v0 }
  0x82   :  { %1607 = vmatmul.mubr.msk.bf16.gmra.mrb[56].mxu0 %vm528_vm1, %v3137_v62  ;;  %1683 = vmatmul.mubr.msk.bf16.gmra.mrb[56].mxu1 %vm528_vm1, %v3138_v63 }
  0x83   :  { %1610 = vmatprep.mubr.msk.bf16.mxu0 %vm1861_vm0, %v1860_v0  ;;  %1686 = vmatprep.mubr.msk.bf16.mxu1 %vm1861_vm0, %v1860_v0 }
  0x8a   :  { %1611 = vmatmul.mubr.msk.bf16.gmra.mrb[60].mxu0 %vm528_vm1, %v3139_v4  ;;  %1687 = vmatmul.mubr.msk.bf16.gmra.mrb[60].mxu1 %vm528_vm1, %v1456_v35 }
  0x8b   :  { %1614 = vmatprep.mubr.msk.bf16.mxu0 %vm1861_vm0, %v1860_v0  ;;  %1690 = vmatprep.mubr.msk.bf16.mxu1 %vm1861_vm0, %v1860_v0 }
  0x92   :  { %1615 = vmatmul.mubr.msk.bf16.gmra.mrb[64].mxu0 %vm528_vm1, %v1438_v17  ;;  %1691 = vmatmul.mubr.msk.bf16.gmra.mrb[64].mxu1 %vm528_vm1, %v1457_v28 }
  0x93   :  { %1618 = vmatprep.mubr.msk.bf16.mxu0 %vm1861_vm0, %v1860_v0  ;;  %1694 = vmatprep.mubr.msk.bf16.mxu1 %vm1861_vm0, %v1860_v0 }
  0x9a   :  { %1619 = vmatmul.mubr.msk.bf16.gmra.mrb[68].mxu0 %vm528_vm1, %v1439_v29  ;;  %1695 = vmatmul.mubr.msk.bf16.gmra.mrb[68].mxu1 %vm528_vm1, %v1458_v5 }
  0x9b   :  { %1622 = vmatprep.mubr.msk.bf16.mxu0 %vm1861_vm0, %v1860_v0  ;;  %v283_v0 = vld [vmem:[#allocation2 + $0x158] sm:$0xff] }
  0xa2   :  { %1623 = vmatmul.mubr.msk.bf16.gmra.mrb[72].mxu0 %vm528_vm1, %v3140_v6 }
  0xe5   :  { %v674_v13 = vpop.f32.mrb[0].mxu0  ;;  %v826_v15 = vpop.f32.mrb[0].mxu1 }
  0xe6   :  { %v968_v19 = vadd.f32 %v674_v13, %v240_v7  ;;  %v1552_v20 = vpop.f32.mrb[1].mxu0  ;;  %v1006_v21 = vadd.f32 %v826_v15, %v278_v12  ;;  %v1628_v24 = vpop.f32.mrb[1].mxu1  ;;  %v246_v12 = vld [vmem:[#allocation2 + $0x30] sm:$0xff]  ;;  %v284_v13 = vld [vmem:[#allocation2 + $0x160] sm:$0xff] }
  0xe7   :  { %v677_v25 = vpop.f32.mrb[2].mxu0  ;;  %v829_v26 = vpop.f32.mrb[2].mxu1 }
  0xe8   :  { %1042 = vst.msk [vmem:[#allocation2] sm:$0xff] %vm19_vm2, %v968_v19  ;;  %v969_v27 = vadd.f32 %v677_v25, %v241_v14  ;;  %v1553_v35 = vpop.f32.mrb[3].mxu0  ;;  %1080 = vst.msk [vmem:[#allocation2 + $0x130] sm:$0xff] %vm19_vm2, %v1006_v21  ;;  %v1007_v36 = vadd.f32 %v829_v26, %v279_v18  ;;  %v1629_v37 = vpop.f32.mrb[3].mxu1  ;;  %v247_v19 = vld [vmem:[#allocation2 + $0x38] sm:$0xff]  ;;  %v285_v21 = vld [vmem:[#allocation2 + $0x168] sm:$0xff] }
  0xea   :  { %1043 = vst.msk [vmem:[#allocation2 + $0x8] sm:$0xff] %vm19_vm2, %v969_v27  ;;  %1081 = vst.msk [vmem:[#allocation2 + $0x138] sm:$0xff] %vm19_vm2, %v1007_v36 }
  0xed   :  { %v682_v58 = vpop.f32.mrb[4].mxu0  ;;  %v834_v3 = vpop.f32.mrb[4].mxu1 }
  0xee   :  { %v970_v10 = vadd.f32 %v682_v58, %v242_v39  ;;  %v1556_v11 = vpop.f32.mrb[5].mxu0  ;;  %v1008_v23 = vadd.f32 %v834_v3, %v280_v46  ;;  %v1632_v32 = vpop.f32.mrb[5].mxu1 }
  0xef   :  { %v1119_v33 = vld [vmem:[#allocation2] sm:$0xff]  ;;  %v1157_v34 = vld [vmem:[#allocation2 + $0x130] sm:$0xff]  ;;  %v685_v48 = vpop.f32.mrb[6].mxu0  ;;  %v837_v1 = vpop.f32.mrb[6].mxu1 }
  0xf0   :  { %v1199_v2 = vadd.f32 %v2683_v53, %v1119_v33  ;;  %v1237_v16 = vadd.f32 %v2683_v53, %v1157_v34  ;;  %1044 = vst.msk [vmem:[#allocation2 + $0x10] sm:$0xff] %vm19_vm2, %v970_v10  ;;  %v971_v17 = vadd.f32 %v685_v48, %v243_v59  ;;  %v1557_v22 = vpop.f32.mrb[7].mxu0  ;;  %1082 = vst.msk [vmem:[#allocation2 + $0x140] sm:$0xff] %vm19_vm2, %v1008_v23  ;;  %v1633_v28 = vpop.f32.mrb[7].mxu1 }
  0xf1   :  { %v1009_v40 = vadd.f32 %v837_v1, %v281_v8  ;;  %v1120_v29 = vld [vmem:[#allocation2 + $0x8] sm:$0xff]  ;;  %v1158_v30 = vld [vmem:[#allocation2 + $0x138] sm:$0xff]  ;;  %v248_v1 = vld [vmem:[#allocation2 + $0x40] sm:$0xff] }
  0xf2   :  { %1713 = vtanh.f32 %v1199_v2  ;;  %v1200_v44 = vadd.f32 %v2683_v53, %v1120_v29  ;;  %v1238_v45 = vadd.f32 %v2683_v53, %v1158_v30  ;;  %1045 = vst.msk [vmem:[#allocation2 + $0x18] sm:$0xff] %vm19_vm2, %v971_v17  ;;  %v286_v2 = vld [vmem:[#allocation2 + $0x170] sm:$0xff]  ;;  %v287_v29 = vld [vmem:[#allocation2 + $0x178] sm:$0xff] }
  0xf3   :  { %1083 = vst.msk [vmem:[#allocation2 + $0x148] sm:$0xff] %vm19_vm2, %v1009_v40  ;;  %1715 = vtanh.f32 %v1237_v16  ;;  %v249_v40 = vld [vmem:[#allocation2 + $0x48] sm:$0xff] }
  0xf4   :  { %1717 = vtanh.f32 %v1200_v44 }
  0xf5   :  { %1719 = vtanh.f32 %v1238_v45  ;;  %v690_v47 = vpop.f32.mrb[8].mxu0  ;;  %v842_v43 = vpop.f32.mrb[8].mxu1 }
  0xf6   :  { %v972_v49 = vadd.f32 %v690_v47, %v244_v50  ;;  %v1560_v42 = vpop.f32.mrb[9].mxu0  ;;  %v1010_v52 = vadd.f32 %v842_v43, %v282_v54  ;;  %v1636_v41 = vpop.f32.mrb[9].mxu1 }
  0xf7   :  { %v1121_v38 = vld [vmem:[#allocation2 + $0x10] sm:$0xff]  ;;  %v1159_v9 = vld [vmem:[#allocation2 + $0x140] sm:$0xff]  ;;  %v693_v51 = vpop.f32.mrb[10].mxu0  ;;  %v845_v55 = vpop.f32.mrb[10].mxu1 }
  0xf8   :  { %v1201_v56 = vadd.f32 %v2683_v53, %v1121_v38  ;;  %v1239_v57 = vadd.f32 %v2683_v53, %v1159_v9  ;;  %1046 = vst.msk [vmem:[#allocation2 + $0x20] sm:$0xff] %vm19_vm2, %v972_v49  ;;  %v973_v60 = vadd.f32 %v693_v51, %v245_v31  ;;  %v1561_v61 = vpop.f32.mrb[11].mxu0  ;;  %1084 = vst.msk [vmem:[#allocation2 + $0x150] sm:$0xff] %vm19_vm2, %v1010_v52  ;;  %v1637_v63 = vpop.f32.mrb[11].mxu1 }
  0xf9   :  { %v1011_v62 = vadd.f32 %v845_v55, %v283_v0  ;;  %v1122_v4 = vld [vmem:[#allocation2 + $0x18] sm:$0xff]  ;;  %v250_v61 = vld [vmem:[#allocation2 + $0x50] sm:$0xff] }
  0xfa   :  { %v1160_v5 = vld [vmem:[#allocation2 + $0x148] sm:$0xff]  ;;  %1721 = vtanh.f32 %v1201_v56  ;;  %v1202_v6 = vadd.f32 %v2683_v53, %v1122_v4  ;;  %1047 = vst.msk [vmem:[#allocation2 + $0x28] sm:$0xff] %vm19_vm2, %v973_v60 }
  0xfb   :  { %v1240_v7 = vadd.f32 %v2683_v53, %v1160_v5  ;;  %1085 = vst.msk [vmem:[#allocation2 + $0x158] sm:$0xff] %vm19_vm2, %v1011_v62  ;;  %1723 = vtanh.f32 %v1239_v57  ;;  %v288_v62 = vld [vmem:[#allocation2 + $0x180] sm:$0xff] }
  0xfc   :  { %v1714_v14 = vpop.eup %1713  ;;  %1725 = vtanh.f32 %v1202_v6  ;;  %v251_v6 = vld [vmem:[#allocation2 + $0x58] sm:$0xff] }
  0xfd   :  { %v1716_v15 = vpop.eup %1715  ;;  %1345 = vst.msk [vmem:[%s3129_s3] sm:$0xff] %vm19_vm2, %v1714_v14  ;;  %1727 = vtanh.f32 %v1240_v7  ;;  %v698_v18 = vpop.f32.mrb[12].mxu0 }
  0xfe   :  { %v850_v20 = vpop.f32.mrb[12].mxu1  ;;  %v1718_v24 = vpop.eup %1717  ;;  %1383 = vst.msk [vmem:[%s3129_s3 + $0x130] sm:$0xff] %vm19_vm2, %v1716_v15  ;;  %v974_v25 = vadd.f32 %v698_v18, %v246_v12  ;;  %v289_v12 = vld [vmem:[#allocation2 + $0x188] sm:$0xff] }
  0xff   :  { %v1564_v26 = vpop.f32.mrb[13].mxu0  ;;  %v1012_v27 = vadd.f32 %v850_v20, %v284_v13  ;;  %v1640_v35 = vpop.f32.mrb[13].mxu1  ;;  %1346 = vst.msk [vmem:[%s3129_s3 + $0x8] sm:$0xff] %vm19_vm2, %v1718_v24  ;;  %v1123_v37 = vld [vmem:[#allocation2 + $0x20] sm:$0xff]  ;;  %v1161_v39 = vld [vmem:[#allocation2 + $0x150] sm:$0xff] }
 0x100   :  { %v1720_v36 = vpop.eup %1719  ;;  %v701_v46 = vpop.f32.mrb[14].mxu0  ;;  %v1203_v59 = vadd.f32 %v2683_v53, %v1123_v37  ;;  %v1241_v3 = vadd.f32 %v2683_v53, %v1161_v39  ;;  %1048 = vst.msk [vmem:[#allocation2 + $0x30] sm:$0xff] %vm19_vm2, %v974_v25 }
 0x101   :  { %v853_v58 = vpop.f32.mrb[14].mxu1  ;;  %1384 = vst.msk [vmem:[%s3129_s3 + $0x138] sm:$0xff] %vm19_vm2, %v1720_v36  ;;  %v975_v8 = vadd.f32 %v701_v46, %v247_v19  ;;  %v1565_v10 = vpop.f32.mrb[15].mxu0  ;;  %1086 = vst.msk [vmem:[#allocation2 + $0x160] sm:$0xff] %vm19_vm2, %v1012_v27  ;;  %v1124_v32 = vld [vmem:[#allocation2 + $0x28] sm:$0xff] }
 0x102   :  { %v1013_v11 = vadd.f32 %v853_v58, %v285_v21  ;;  %v1641_v23 = vpop.f32.mrb[15].mxu1  ;;  %v1162_v33 = vld [vmem:[#allocation2 + $0x158] sm:$0xff]  ;;  %1729 = vtanh.f32 %v1203_v59  ;;  %v1204_v34 = vadd.f32 %v2683_v53, %v1124_v32  ;;  %v252_v10 = vld [vmem:[#allocation2 + $0x60] sm:$0xff] }
 0x103   :  { %v1242_v48 = vadd.f32 %v2683_v53, %v1162_v33  ;;  %1049 = vst.msk [vmem:[#allocation2 + $0x38] sm:$0xff] %vm19_vm2, %v975_v8  ;;  %1731 = vtanh.f32 %v1241_v3 }
 0x104   :  { %1087 = vst.msk [vmem:[#allocation2 + $0x168] sm:$0xff] %vm19_vm2, %v1013_v11  ;;  %v1722_v16 = vpop.eup %1721  ;;  %1733 = vtanh.f32 %v1204_v34  ;;  %v290_v11 = vld [vmem:[#allocation2 + $0x190] sm:$0xff]  ;;  %v253_v34 = vld [vmem:[#allocation2 + $0x68] sm:$0xff] }
 0x105   :  { %v1724_v17 = vpop.eup %1723  ;;  %1347 = vst.msk [vmem:[%s3129_s3 + $0x10] sm:$0xff] %vm19_vm2, %v1722_v16  ;;  %1735 = vtanh.f32 %v1242_v48  ;;  %v706_v22 = vpop.f32.mrb[16].mxu0 }
 0x106   :  { %v858_v28 = vpop.f32.mrb[16].mxu1  ;;  %v1726_v30 = vpop.eup %1725  ;;  %1385 = vst.msk [vmem:[%s3129_s3 + $0x140] sm:$0xff] %vm19_vm2, %v1724_v17  ;;  %v976_v44 = vadd.f32 %v706_v22, %v248_v1  ;;  %v291_v1 = vld [vmem:[#allocation2 + $0x198] sm:$0xff] }
 0x107   :  { %v1568_v45 = vpop.f32.mrb[17].mxu0  ;;  %v1014_v50 = vadd.f32 %v858_v28, %v286_v2  ;;  %v1644_v54 = vpop.f32.mrb[17].mxu1  ;;  %1348 = vst.msk [vmem:[%s3129_s3 + $0x18] sm:$0xff] %vm19_vm2, %v1726_v30  ;;  %v1125_v31 = vld [vmem:[#allocation2 + $0x30] sm:$0xff] }
 0x108   :  { %v1728_v47 = vpop.eup %1727  ;;  %v1163_v43 = vld [vmem:[#allocation2 + $0x160] sm:$0xff]  ;;  %v709_v0 = vpop.f32.mrb[18].mxu0  ;;  %v1205_v42 = vadd.f32 %v2683_v53, %v1125_v31  ;;  %1050 = vst.msk [vmem:[#allocation2 + $0x40] sm:$0xff] %vm19_vm2, %v976_v44 }
 0x109   :  { %v861_v49 = vpop.f32.mrb[18].mxu1  ;;  %1386 = vst.msk [vmem:[%s3129_s3 + $0x148] sm:$0xff] %vm19_vm2, %v1728_v47  ;;  %v1243_v52 = vadd.f32 %v2683_v53, %v1163_v43  ;;  %v977_v41 = vadd.f32 %v709_v0, %v249_v40  ;;  %v1569_v38 = vpop.f32.mrb[19].mxu0  ;;  %1088 = vst.msk [vmem:[#allocation2 + $0x170] sm:$0xff] %vm19_vm2, %v1014_v50 }
 0x10a   :  { %v1015_v9 = vadd.f32 %v861_v49, %v287_v29  ;;  %v1645_v51 = vpop.f32.mrb[19].mxu1  ;;  %v1126_v55 = vld [vmem:[#allocation2 + $0x38] sm:$0xff]  ;;  %1737 = vtanh.f32 %v1205_v42  ;;  %v254_v38 = vld [vmem:[#allocation2 + $0x70] sm:$0xff] }
 0x10b   :  { %v1164_v56 = vld [vmem:[#allocation2 + $0x168] sm:$0xff]  ;;  %v1206_v57 = vadd.f32 %v2683_v53, %v1126_v55  ;;  %1051 = vst.msk [vmem:[#allocation2 + $0x48] sm:$0xff] %vm19_vm2, %v977_v41  ;;  %1739 = vtanh.f32 %v1243_v52 }
 0x10c   :  { %v1244_v60 = vadd.f32 %v2683_v53, %v1164_v56  ;;  %1089 = vst.msk [vmem:[#allocation2 + $0x178] sm:$0xff] %vm19_vm2, %v1015_v9  ;;  %v1730_v63 = vpop.eup %1729  ;;  %v292_v9 = vld [vmem:[#allocation2 + $0x1a0] sm:$0xff] }
 0x10d   :  { %1741 = vtanh.f32 %v1206_v57  ;;  %v1732_v4 = vpop.eup %1731  ;;  %1349 = vst.msk [vmem:[%s3129_s3 + $0x20] sm:$0xff] %vm19_vm2, %v1730_v63  ;;  %v714_v5 = vpop.f32.mrb[20].mxu0  ;;  %v255_v57 = vld [vmem:[#allocation2 + $0x78] sm:$0xff] }
 0x10e   :  { %1743 = vtanh.f32 %v1244_v60  ;;  %v866_v7 = vpop.f32.mrb[20].mxu1  ;;  %v1734_v13 = vpop.eup %1733  ;;  %1387 = vst.msk [vmem:[%s3129_s3 + $0x150] sm:$0xff] %vm19_vm2, %v1732_v4  ;;  %v978_v14 = vadd.f32 %v714_v5, %v250_v61  ;;  %v293_v61 = vld [vmem:[#allocation2 + $0x1a8] sm:$0xff] }
 0x10f   :  { %v1572_v15 = vpop.f32.mrb[21].mxu0  ;;  %v1016_v18 = vadd.f32 %v866_v7, %v288_v62  ;;  %v1648_v19 = vpop.f32.mrb[21].mxu1  ;;  %1350 = vst.msk [vmem:[%s3129_s3 + $0x28] sm:$0xff] %vm19_vm2, %v1734_v13  ;;  %v1127_v21 = vld [vmem:[#allocation2 + $0x40] sm:$0xff] }
 0x110   :  { %v1736_v20 = vpop.eup %1735  ;;  %v1165_v24 = vld [vmem:[#allocation2 + $0x170] sm:$0xff]  ;;  %v717_v25 = vpop.f32.mrb[22].mxu0  ;;  %v1207_v27 = vadd.f32 %v2683_v53, %v1127_v21  ;;  %1052 = vst.msk [vmem:[#allocation2 + $0x50] sm:$0xff] %vm19_vm2, %v978_v14 }
 0x111   :  { %v869_v26 = vpop.f32.mrb[22].mxu1  ;;  %1388 = vst.msk [vmem:[%s3129_s3 + $0x158] sm:$0xff] %vm19_vm2, %v1736_v20  ;;  %v1245_v35 = vadd.f32 %v2683_v53, %v1165_v24  ;;  %v979_v36 = vadd.f32 %v717_v25, %v251_v6  ;;  %v1573_v37 = vpop.f32.mrb[23].mxu0  ;;  %1090 = vst.msk [vmem:[#allocation2 + $0x180] sm:$0xff] %vm19_vm2, %v1016_v18 }
 0x112   :  { %v1017_v39 = vadd.f32 %v869_v26, %v289_v12  ;;  %v1649_v46 = vpop.f32.mrb[23].mxu1  ;;  %v1128_v58 = vld [vmem:[#allocation2 + $0x48] sm:$0xff]  ;;  %1745 = vtanh.f32 %v1207_v27  ;;  %v256_v37 = vld [vmem:[#allocation2 + $0x80] sm:$0xff] }
 0x113   :  { %v1166_v59 = vld [vmem:[#allocation2 + $0x178] sm:$0xff]  ;;  %v1208_v3 = vadd.f32 %v2683_v53, %v1128_v58  ;;  %1053 = vst.msk [vmem:[#allocation2 + $0x58] sm:$0xff] %vm19_vm2, %v979_v36  ;;  %1747 = vtanh.f32 %v1245_v35 }
 0x114   :  { %v1246_v8 = vadd.f32 %v2683_v53, %v1166_v59  ;;  %1091 = vst.msk [vmem:[#allocation2 + $0x188] sm:$0xff] %vm19_vm2, %v1017_v39  ;;  %v1738_v23 = vpop.eup %1737  ;;  %v294_v39 = vld [vmem:[#allocation2 + $0x1b0] sm:$0xff] }
 0x115   :  { %1749 = vtanh.f32 %v1208_v3  ;;  %v1740_v32 = vpop.eup %1739  ;;  %1351 = vst.msk [vmem:[%s3129_s3 + $0x30] sm:$0xff] %vm19_vm2, %v1738_v23  ;;  %v722_v33 = vpop.f32.mrb[24].mxu0  ;;  %v257_v3 = vld [vmem:[#allocation2 + $0x88] sm:$0xff] }
 0x116   :  { %1751 = vtanh.f32 %v1246_v8  ;;  %v874_v48 = vpop.f32.mrb[24].mxu1  ;;  %1389 = vst.msk [vmem:[%s3129_s3 + $0x160] sm:$0xff] %vm19_vm2, %v1740_v32  ;;  %v980_v16 = vadd.f32 %v722_v33, %v252_v10  ;;  %v1576_v17 = vpop.f32.mrb[25].mxu0  ;;  %v295_v10 = vld [vmem:[#allocation2 + $0x1b8] sm:$0xff] }
 0x117   :  { %v1742_v2 = vpop.eup %1741  ;;  %v1018_v22 = vadd.f32 %v874_v48, %v290_v11  ;;  %v1652_v40 = vpop.f32.mrb[25].mxu1  ;;  %v1129_v29 = vld [vmem:[#allocation2 + $0x50] sm:$0xff] }
 0x118   :  { %v1744_v28 = vpop.eup %1743  ;;  %1352 = vst.msk [vmem:[%s3129_s3 + $0x38] sm:$0xff] %vm19_vm2, %v1742_v2  ;;  %v1167_v30 = vld [vmem:[#allocation2 + $0x180] sm:$0xff]  ;;  %v725_v44 = vpop.f32.mrb[26].mxu0  ;;  %v1209_v50 = vadd.f32 %v2683_v53, %v1129_v29  ;;  %1054 = vst.msk [vmem:[#allocation2 + $0x60] sm:$0xff] %vm19_vm2, %v980_v16 }
 0x119   :  { %v877_v45 = vpop.f32.mrb[26].mxu1  ;;  %1390 = vst.msk [vmem:[%s3129_s3 + $0x168] sm:$0xff] %vm19_vm2, %v1744_v28  ;;  %v1247_v54 = vadd.f32 %v2683_v53, %v1167_v30  ;;  %v981_v47 = vadd.f32 %v725_v44, %v253_v34  ;;  %v1577_v31 = vpop.f32.mrb[27].mxu0  ;;  %1092 = vst.msk [vmem:[#allocation2 + $0x190] sm:$0xff] %vm19_vm2, %v1018_v22 }
 0x11a   :  { %v1019_v43 = vadd.f32 %v877_v45, %v291_v1  ;;  %v1653_v0 = vpop.f32.mrb[27].mxu1  ;;  %v1130_v49 = vld [vmem:[#allocation2 + $0x58] sm:$0xff]  ;;  %1753 = vtanh.f32 %v1209_v50  ;;  %v258_v31 = vld [vmem:[#allocation2 + $0x90] sm:$0xff] }
 0x11b   :  { %v1168_v42 = vld [vmem:[#allocation2 + $0x188] sm:$0xff]  ;;  %v1210_v52 = vadd.f32 %v2683_v53, %v1130_v49  ;;  %1055 = vst.msk [vmem:[#allocation2 + $0x68] sm:$0xff] %vm19_vm2, %v981_v47  ;;  %1755 = vtanh.f32 %v1247_v54 }
 0x11c   :  { %v1248_v41 = vadd.f32 %v2683_v53, %v1168_v42  ;;  %1093 = vst.msk [vmem:[#allocation2 + $0x198] sm:$0xff] %vm19_vm2, %v1019_v43  ;;  %v1746_v51 = vpop.eup %1745  ;;  %v296_v43 = vld [vmem:[#allocation2 + $0x1c0] sm:$0xff] }
 0x11d   :  { %1757 = vtanh.f32 %v1210_v52  ;;  %v1748_v55 = vpop.eup %1747  ;;  %1353 = vst.msk [vmem:[%s3129_s3 + $0x40] sm:$0xff] %vm19_vm2, %v1746_v51  ;;  %v730_v56 = vpop.f32.mrb[28].mxu0  ;;  %v259_v52 = vld [vmem:[#allocation2 + $0x98] sm:$0xff] }
 0x11e   :  { %1759 = vtanh.f32 %v1248_v41  ;;  %v882_v60 = vpop.f32.mrb[28].mxu1  ;;  %1391 = vst.msk [vmem:[%s3129_s3 + $0x170] sm:$0xff] %vm19_vm2, %v1748_v55  ;;  %v982_v63 = vadd.f32 %v730_v56, %v254_v38  ;;  %v1580_v4 = vpop.f32.mrb[29].mxu0  ;;  %v297_v38 = vld [vmem:[#allocation2 + $0x1c8] sm:$0xff] }
 0x11f   :  { %v1750_v62 = vpop.eup %1749  ;;  %v1020_v5 = vadd.f32 %v882_v60, %v292_v9  ;;  %v1656_v6 = vpop.f32.mrb[29].mxu1  ;;  %v1131_v12 = vld [vmem:[#allocation2 + $0x60] sm:$0xff] }
 0x120   :  { %v1752_v7 = vpop.eup %1751  ;;  %1354 = vst.msk [vmem:[%s3129_s3 + $0x48] sm:$0xff] %vm19_vm2, %v1750_v62  ;;  %v1169_v13 = vld [vmem:[#allocation2 + $0x190] sm:$0xff]  ;;  %v733_v14 = vpop.f32.mrb[30].mxu0  ;;  %v1211_v18 = vadd.f32 %v2683_v53, %v1131_v12  ;;  %1056 = vst.msk [vmem:[#allocation2 + $0x70] sm:$0xff] %vm19_vm2, %v982_v63 }
 0x121   :  { %v885_v15 = vpop.f32.mrb[30].mxu1  ;;  %1392 = vst.msk [vmem:[%s3129_s3 + $0x178] sm:$0xff] %vm19_vm2, %v1752_v7  ;;  %v1249_v19 = vadd.f32 %v2683_v53, %v1169_v13  ;;  %v983_v20 = vadd.f32 %v733_v14, %v255_v57  ;;  %v1581_v21 = vpop.f32.mrb[31].mxu0  ;;  %1094 = vst.msk [vmem:[#allocation2 + $0x1a0] sm:$0xff] %vm19_vm2, %v1020_v5 }
 0x122   :  { %v1021_v24 = vadd.f32 %v885_v15, %v293_v61  ;;  %v1657_v25 = vpop.f32.mrb[31].mxu1  ;;  %v1132_v26 = vld [vmem:[#allocation2 + $0x68] sm:$0xff]  ;;  %1761 = vtanh.f32 %v1211_v18  ;;  %v260_v21 = vld [vmem:[#allocation2 + $0xa0] sm:$0xff] }
 0x123   :  { %v1170_v27 = vld [vmem:[#allocation2 + $0x198] sm:$0xff]  ;;  %v1212_v35 = vadd.f32 %v2683_v53, %v1132_v26  ;;  %1057 = vst.msk [vmem:[#allocation2 + $0x78] sm:$0xff] %vm19_vm2, %v983_v20  ;;  %1763 = vtanh.f32 %v1249_v19 }
 0x124   :  { %v1250_v36 = vadd.f32 %v2683_v53, %v1170_v27  ;;  %1095 = vst.msk [vmem:[#allocation2 + $0x1a8] sm:$0xff] %vm19_vm2, %v1021_v24  ;;  %v1754_v46 = vpop.eup %1753  ;;  %v298_v24 = vld [vmem:[#allocation2 + $0x1d0] sm:$0xff] }
 0x125   :  { %1765 = vtanh.f32 %v1212_v35  ;;  %v1756_v58 = vpop.eup %1755  ;;  %1355 = vst.msk [vmem:[%s3129_s3 + $0x50] sm:$0xff] %vm19_vm2, %v1754_v46  ;;  %v738_v59 = vpop.f32.mrb[32].mxu0  ;;  %v261_v35 = vld [vmem:[#allocation2 + $0xa8] sm:$0xff] }
 0x126   :  { %1767 = vtanh.f32 %v1250_v36  ;;  %v890_v8 = vpop.f32.mrb[32].mxu1  ;;  %1393 = vst.msk [vmem:[%s3129_s3 + $0x180] sm:$0xff] %vm19_vm2, %v1756_v58  ;;  %v984_v23 = vadd.f32 %v738_v59, %v256_v37  ;;  %v1584_v32 = vpop.f32.mrb[33].mxu0  ;;  %v299_v37 = vld [vmem:[#allocation2 + $0x1d8] sm:$0xff] }
 0x127   :  { %v1758_v11 = vpop.eup %1757  ;;  %v1022_v33 = vadd.f32 %v890_v8, %v294_v39  ;;  %v1660_v34 = vpop.f32.mrb[33].mxu1  ;;  %v1133_v1 = vld [vmem:[#allocation2 + $0x70] sm:$0xff] }
 0x128   :  { %v1760_v48 = vpop.eup %1759  ;;  %1356 = vst.msk [vmem:[%s3129_s3 + $0x58] sm:$0xff] %vm19_vm2, %v1758_v11  ;;  %v1171_v2 = vld [vmem:[#allocation2 + $0x1a0] sm:$0xff]  ;;  %v741_v16 = vpop.f32.mrb[34].mxu0  ;;  %v1213_v22 = vadd.f32 %v2683_v53, %v1133_v1  ;;  %1058 = vst.msk [vmem:[#allocation2 + $0x80] sm:$0xff] %vm19_vm2, %v984_v23 }
 0x129   :  { %v893_v17 = vpop.f32.mrb[34].mxu1  ;;  %1394 = vst.msk [vmem:[%s3129_s3 + $0x188] sm:$0xff] %vm19_vm2, %v1760_v48  ;;  %v1251_v40 = vadd.f32 %v2683_v53, %v1171_v2  ;;  %v985_v28 = vadd.f32 %v741_v16, %v257_v3  ;;  %v1585_v29 = vpop.f32.mrb[35].mxu0  ;;  %1096 = vst.msk [vmem:[#allocation2 + $0x1b0] sm:$0xff] %vm19_vm2, %v1022_v33 }
 0x12a   :  { %v1023_v30 = vadd.f32 %v893_v17, %v295_v10  ;;  %v1661_v44 = vpop.f32.mrb[35].mxu1  ;;  %v1134_v45 = vld [vmem:[#allocation2 + $0x78] sm:$0xff]  ;;  %1769 = vtanh.f32 %v1213_v22  ;;  %v262_v29 = vld [vmem:[#allocation2 + $0xb0] sm:$0xff] }
 0x12b   :  { %v1172_v50 = vld [vmem:[#allocation2 + $0x1a8] sm:$0xff]  ;;  %v1214_v54 = vadd.f32 %v2683_v53, %v1134_v45  ;;  %1059 = vst.msk [vmem:[#allocation2 + $0x88] sm:$0xff] %vm19_vm2, %v985_v28  ;;  %1771 = vtanh.f32 %v1251_v40 }
 0x12c   :  { %v1252_v47 = vadd.f32 %v2683_v53, %v1172_v50  ;;  %1097 = vst.msk [vmem:[#allocation2 + $0x1b8] sm:$0xff] %vm19_vm2, %v1023_v30  ;;  %v1762_v0 = vpop.eup %1761  ;;  %v300_v30 = vld [vmem:[#allocation2 + $0x1e0] sm:$0xff] }
 0x12d   :  { %1773 = vtanh.f32 %v1214_v54  ;;  %v1764_v49 = vpop.eup %1763  ;;  %1357 = vst.msk [vmem:[%s3129_s3 + $0x60] sm:$0xff] %vm19_vm2, %v1762_v0  ;;  %v746_v42 = vpop.f32.mrb[36].mxu0  ;;  %v263_v54 = vld [vmem:[#allocation2 + $0xb8] sm:$0xff] }
 0x12e   :  { %1775 = vtanh.f32 %v1252_v47  ;;  %v898_v41 = vpop.f32.mrb[36].mxu1  ;;  %1395 = vst.msk [vmem:[%s3129_s3 + $0x190] sm:$0xff] %vm19_vm2, %v1764_v49  ;;  %v986_v51 = vadd.f32 %v746_v42, %v258_v31  ;;  %v1588_v55 = vpop.f32.mrb[37].mxu0  ;;  %v301_v31 = vld [vmem:[#allocation2 + $0x1e8] sm:$0xff] }
 0x12f   :  { %v1766_v9 = vpop.eup %1765  ;;  %v1024_v56 = vadd.f32 %v898_v41, %v296_v43  ;;  %v1664_v57 = vpop.f32.mrb[37].mxu1  ;;  %v1135_v61 = vld [vmem:[#allocation2 + $0x80] sm:$0xff] }
 0x130   :  { %v1768_v60 = vpop.eup %1767  ;;  %1358 = vst.msk [vmem:[%s3129_s3 + $0x68] sm:$0xff] %vm19_vm2, %v1766_v9  ;;  %v1173_v62 = vld [vmem:[#allocation2 + $0x1b0] sm:$0xff]  ;;  %v749_v63 = vpop.f32.mrb[38].mxu0  ;;  %v1215_v5 = vadd.f32 %v2683_v53, %v1135_v61  ;;  %1060 = vst.msk [vmem:[#allocation2 + $0x90] sm:$0xff] %vm19_vm2, %v986_v51 }
 0x131   :  { %v901_v4 = vpop.f32.mrb[38].mxu1  ;;  %1396 = vst.msk [vmem:[%s3129_s3 + $0x198] sm:$0xff] %vm19_vm2, %v1768_v60  ;;  %v1253_v6 = vadd.f32 %v2683_v53, %v1173_v62  ;;  %v987_v7 = vadd.f32 %v749_v63, %v259_v52  ;;  %v1589_v12 = vpop.f32.mrb[39].mxu0  ;;  %1098 = vst.msk [vmem:[#allocation2 + $0x1c0] sm:$0xff] %vm19_vm2, %v1024_v56 }
 0x132   :  { %v1025_v13 = vadd.f32 %v901_v4, %v297_v38  ;;  %v1665_v14 = vpop.f32.mrb[39].mxu1  ;;  %v1136_v15 = vld [vmem:[#allocation2 + $0x88] sm:$0xff]  ;;  %1777 = vtanh.f32 %v1215_v5  ;;  %v264_v12 = vld [vmem:[#allocation2 + $0xc0] sm:$0xff] }
 0x133   :  { %v1174_v18 = vld [vmem:[#allocation2 + $0x1b8] sm:$0xff]  ;;  %v1216_v19 = vadd.f32 %v2683_v53, %v1136_v15  ;;  %1061 = vst.msk [vmem:[#allocation2 + $0x98] sm:$0xff] %vm19_vm2, %v987_v7  ;;  %1779 = vtanh.f32 %v1253_v6 }
 0x134   :  { %v1254_v20 = vadd.f32 %v2683_v53, %v1174_v18  ;;  %1099 = vst.msk [vmem:[#allocation2 + $0x1c8] sm:$0xff] %vm19_vm2, %v1025_v13  ;;  %v1770_v25 = vpop.eup %1769  ;;  %v302_v13 = vld [vmem:[#allocation2 + $0x1f0] sm:$0xff] }
 0x135   :  { %1781 = vtanh.f32 %v1216_v19  ;;  %v1772_v26 = vpop.eup %1771  ;;  %1359 = vst.msk [vmem:[%s3129_s3 + $0x70] sm:$0xff] %vm19_vm2, %v1770_v25  ;;  %v754_v27 = vpop.f32.mrb[40].mxu0  ;;  %v265_v19 = vld [vmem:[#allocation2 + $0xc8] sm:$0xff] }
 0x136   :  { %1783 = vtanh.f32 %v1254_v20  ;;  %v906_v36 = vpop.f32.mrb[40].mxu1  ;;  %1397 = vst.msk [vmem:[%s3129_s3 + $0x1a0] sm:$0xff] %vm19_vm2, %v1772_v26  ;;  %v988_v46 = vadd.f32 %v754_v27, %v260_v21  ;;  %v1592_v58 = vpop.f32.mrb[41].mxu0  ;;  %v303_v21 = vld [vmem:[#allocation2 + $0x1f8] sm:$0xff] }
 0x137   :  { %v1774_v39 = vpop.eup %1773  ;;  %v1026_v59 = vadd.f32 %v906_v36, %v298_v24  ;;  %v1668_v3 = vpop.f32.mrb[41].mxu1  ;;  %v1137_v10 = vld [vmem:[#allocation2 + $0x90] sm:$0xff] }
 0x138   :  { %v1776_v8 = vpop.eup %1775  ;;  %1360 = vst.msk [vmem:[%s3129_s3 + $0x78] sm:$0xff] %vm19_vm2, %v1774_v39  ;;  %v1175_v11 = vld [vmem:[#allocation2 + $0x1c0] sm:$0xff]  ;;  %v757_v23 = vpop.f32.mrb[42].mxu0  ;;  %v1217_v33 = vadd.f32 %v2683_v53, %v1137_v10  ;;  %1062 = vst.msk [vmem:[#allocation2 + $0xa0] sm:$0xff] %vm19_vm2, %v988_v46 }
 0x139   :  { %v909_v32 = vpop.f32.mrb[42].mxu1  ;;  %1398 = vst.msk [vmem:[%s3129_s3 + $0x1a8] sm:$0xff] %vm19_vm2, %v1776_v8  ;;  %v1255_v34 = vadd.f32 %v2683_v53, %v1175_v11  ;;  %v989_v48 = vadd.f32 %v757_v23, %v261_v35  ;;  %v1593_v1 = vpop.f32.mrb[43].mxu0  ;;  %1100 = vst.msk [vmem:[#allocation2 + $0x1d0] sm:$0xff] %vm19_vm2, %v1026_v59 }
 0x13a   :  { %v1027_v2 = vadd.f32 %v909_v32, %v299_v37  ;;  %v1669_v16 = vpop.f32.mrb[43].mxu1  ;;  %v1138_v17 = vld [vmem:[#allocation2 + $0x98] sm:$0xff]  ;;  %1785 = vtanh.f32 %v1217_v33  ;;  %v266_v1 = vld [vmem:[#allocation2 + $0xd0] sm:$0xff] }
 0x13b   :  { %v1176_v22 = vld [vmem:[#allocation2 + $0x1c8] sm:$0xff]  ;;  %v1218_v40 = vadd.f32 %v2683_v53, %v1138_v17  ;;  %1063 = vst.msk [vmem:[#allocation2 + $0xa8] sm:$0xff] %vm19_vm2, %v989_v48  ;;  %1787 = vtanh.f32 %v1255_v34 }
 0x13c   :  { %v1256_v28 = vadd.f32 %v2683_v53, %v1176_v22  ;;  %1101 = vst.msk [vmem:[#allocation2 + $0x1d8] sm:$0xff] %vm19_vm2, %v1027_v2  ;;  %v1778_v44 = vpop.eup %1777  ;;  %v304_v2 = vld [vmem:[#allocation2 + $0x200] sm:$0xff] }
 0x13d   :  { %1789 = vtanh.f32 %v1218_v40  ;;  %v1780_v45 = vpop.eup %1779  ;;  %1361 = vst.msk [vmem:[%s3129_s3 + $0x80] sm:$0xff] %vm19_vm2, %v1778_v44  ;;  %v762_v50 = vpop.f32.mrb[44].mxu0  ;;  %v267_v40 = vld [vmem:[#allocation2 + $0xd8] sm:$0xff] }
 0x13e   :  { %1791 = vtanh.f32 %v1256_v28  ;;  %v914_v47 = vpop.f32.mrb[44].mxu1  ;;  %1399 = vst.msk [vmem:[%s3129_s3 + $0x1b0] sm:$0xff] %vm19_vm2, %v1780_v45  ;;  %v990_v0 = vadd.f32 %v762_v50, %v262_v29  ;;  %v1596_v49 = vpop.f32.mrb[45].mxu0  ;;  %v305_v29 = vld [vmem:[#allocation2 + $0x208] sm:$0xff] }
 0x13f   :  { %v1782_v43 = vpop.eup %1781  ;;  %v1028_v42 = vadd.f32 %v914_v47, %v300_v30  ;;  %v1672_v52 = vpop.f32.mrb[45].mxu1  ;;  %v1139_v38 = vld [vmem:[#allocation2 + $0xa0] sm:$0xff] }
 0x140   :  { %v1784_v41 = vpop.eup %1783  ;;  %1362 = vst.msk [vmem:[%s3129_s3 + $0x88] sm:$0xff] %vm19_vm2, %v1782_v43  ;;  %v1177_v9 = vld [vmem:[#allocation2 + $0x1d0] sm:$0xff]  ;;  %v765_v51 = vpop.f32.mrb[46].mxu0  ;;  %v1219_v56 = vadd.f32 %v2683_v53, %v1139_v38  ;;  %1064 = vst.msk [vmem:[#allocation2 + $0xb0] sm:$0xff] %vm19_vm2, %v990_v0 }
 0x141   :  { %v917_v55 = vpop.f32.mrb[46].mxu1  ;;  %1400 = vst.msk [vmem:[%s3129_s3 + $0x1b8] sm:$0xff] %vm19_vm2, %v1784_v41  ;;  %v1257_v57 = vadd.f32 %v2683_v53, %v1177_v9  ;;  %v991_v60 = vadd.f32 %v765_v51, %v263_v54  ;;  %v1597_v61 = vpop.f32.mrb[47].mxu0  ;;  %1102 = vst.msk [vmem:[#allocation2 + $0x1e0] sm:$0xff] %vm19_vm2, %v1028_v42 }
 0x142   :  { %v1029_v62 = vadd.f32 %v917_v55, %v301_v31  ;;  %v1673_v63 = vpop.f32.mrb[47].mxu1  ;;  %v1140_v4 = vld [vmem:[#allocation2 + $0xa8] sm:$0xff]  ;;  %1793 = vtanh.f32 %v1219_v56  ;;  %v268_v61 = vld [vmem:[#allocation2 + $0xe0] sm:$0xff] }
 0x143   :  { %v1178_v5 = vld [vmem:[#allocation2 + $0x1d8] sm:$0xff]  ;;  %v1220_v6 = vadd.f32 %v2683_v53, %v1140_v4  ;;  %1065 = vst.msk [vmem:[#allocation2 + $0xb8] sm:$0xff] %vm19_vm2, %v991_v60  ;;  %1795 = vtanh.f32 %v1257_v57 }
 0x144   :  { %v1258_v7 = vadd.f32 %v2683_v53, %v1178_v5  ;;  %1103 = vst.msk [vmem:[#allocation2 + $0x1e8] sm:$0xff] %vm19_vm2, %v1029_v62  ;;  %v1786_v14 = vpop.eup %1785  ;;  %v306_v62 = vld [vmem:[#allocation2 + $0x210] sm:$0xff] }
 0x145   :  { %1797 = vtanh.f32 %v1220_v6  ;;  %v1788_v15 = vpop.eup %1787  ;;  %1363 = vst.msk [vmem:[%s3129_s3 + $0x90] sm:$0xff] %vm19_vm2, %v1786_v14  ;;  %v770_v18 = vpop.f32.mrb[48].mxu0  ;;  %v269_v6 = vld [vmem:[#allocation2 + $0xe8] sm:$0xff] }
 0x146   :  { %1799 = vtanh.f32 %v1258_v7  ;;  %v922_v20 = vpop.f32.mrb[48].mxu1  ;;  %1401 = vst.msk [vmem:[%s3129_s3 + $0x1c0] sm:$0xff] %vm19_vm2, %v1788_v15  ;;  %v992_v25 = vadd.f32 %v770_v18, %v264_v12  ;;  %v1600_v26 = vpop.f32.mrb[49].mxu0 }
 0x147   :  { %v1790_v24 = vpop.eup %1789  ;;  %v1030_v27 = vadd.f32 %v922_v20, %v302_v13  ;;  %v1676_v35 = vpop.f32.mrb[49].mxu1  ;;  %v1141_v37 = vld [vmem:[#allocation2 + $0xb0] sm:$0xff]  ;;  %v2986_v26 = vld [vmem:[%s3128_s2] ss:$0 sm:$0xff] }
 0x148   :  { %v1792_v36 = vpop.eup %1791  ;;  %1364 = vst.msk [vmem:[%s3129_s3 + $0x98] sm:$0xff] %vm19_vm2, %v1790_v24  ;;  %v1179_v39 = vld [vmem:[#allocation2 + $0x1e0] sm:$0xff]  ;;  %v773_v46 = vpop.f32.mrb[50].mxu0  ;;  %v1221_v59 = vadd.f32 %v2683_v53, %v1141_v37  ;;  %1066 = vst.msk [vmem:[#allocation2 + $0xc0] sm:$0xff] %vm19_vm2, %v992_v25 }
 0x149   :  { %v925_v58 = vpop.f32.mrb[50].mxu1  ;;  %1402 = vst.msk [vmem:[%s3129_s3 + $0x1c8] sm:$0xff] %vm19_vm2, %v1792_v36  ;;  %v1259_v3 = vadd.f32 %v2683_v53, %v1179_v39  ;;  %v993_v8 = vadd.f32 %v773_v46, %v265_v19  ;;  %v1601_v10 = vpop.f32.mrb[51].mxu0  ;;  %1104 = vst.msk [vmem:[#allocation2 + $0x1f0] sm:$0xff] %vm19_vm2, %v1030_v27 }
 0x14a   :  { %v1031_v11 = vadd.f32 %v925_v58, %v303_v21  ;;  %v1677_v23 = vpop.f32.mrb[51].mxu1  ;;  %v1142_v32 = vld [vmem:[#allocation2 + $0xb8] sm:$0xff]  ;;  %1801 = vtanh.f32 %v1221_v59  ;;  %v270_v10 = vld [vmem:[#allocation2 + $0xf0] sm:$0xff] }
 0x14b   :  { %v1180_v33 = vld [vmem:[#allocation2 + $0x1e8] sm:$0xff]  ;;  %v1222_v34 = vadd.f32 %v2683_v53, %v1142_v32  ;;  %1067 = vst.msk [vmem:[#allocation2 + $0xc8] sm:$0xff] %vm19_vm2, %v993_v8  ;;  %1803 = vtanh.f32 %v1259_v3 }
 0x14c   :  { %v1260_v48 = vadd.f32 %v2683_v53, %v1180_v33  ;;  %1105 = vst.msk [vmem:[#allocation2 + $0x1f8] sm:$0xff] %vm19_vm2, %v1031_v11  ;;  %v1794_v16 = vpop.eup %1793  ;;  %v308_v11 = vld [vmem:[#allocation2 + $0x220] sm:$0xff] }
 0x14d   :  { %1805 = vtanh.f32 %v1222_v34  ;;  %v1796_v17 = vpop.eup %1795  ;;  %1365 = vst.msk [vmem:[%s3129_s3 + $0xa0] sm:$0xff] %vm19_vm2, %v1794_v16  ;;  %v778_v22 = vpop.f32.mrb[52].mxu0  ;;  %v271_v34 = vld [vmem:[#allocation2 + $0xf8] sm:$0xff] }
 0x14e   :  { %1807 = vtanh.f32 %v1260_v48  ;;  %v930_v28 = vpop.f32.mrb[52].mxu1  ;;  %1403 = vst.msk [vmem:[%s3129_s3 + $0x1d0] sm:$0xff] %vm19_vm2, %v1796_v17  ;;  %v994_v44 = vadd.f32 %v778_v22, %v266_v1  ;;  %v1604_v45 = vpop.f32.mrb[53].mxu0  ;;  %v309_v1 = vld [vmem:[#allocation2 + $0x228] sm:$0xff] }
 0x14f   :  { %v1798_v30 = vpop.eup %1797  ;;  %v1032_v50 = vadd.f32 %v930_v28, %v304_v2  ;;  %v1680_v54 = vpop.f32.mrb[53].mxu1  ;;  %v1143_v31 = vld [vmem:[#allocation2 + $0xc0] sm:$0xff] }
 0x150   :  { %v1800_v47 = vpop.eup %1799  ;;  %1366 = vst.msk [vmem:[%s3129_s3 + $0xa8] sm:$0xff] %vm19_vm2, %v1798_v30  ;;  %v1181_v43 = vld [vmem:[#allocation2 + $0x1f0] sm:$0xff]  ;;  %v781_v0 = vpop.f32.mrb[54].mxu0  ;;  %v1223_v42 = vadd.f32 %v2683_v53, %v1143_v31  ;;  %1068 = vst.msk [vmem:[#allocation2 + $0xd0] sm:$0xff] %vm19_vm2, %v994_v44 }
 0x151   :  { %v933_v49 = vpop.f32.mrb[54].mxu1  ;;  %1404 = vst.msk [vmem:[%s3129_s3 + $0x1d8] sm:$0xff] %vm19_vm2, %v1800_v47  ;;  %v1261_v52 = vadd.f32 %v2683_v53, %v1181_v43  ;;  %v995_v41 = vadd.f32 %v781_v0, %v267_v40  ;;  %v1605_v38 = vpop.f32.mrb[55].mxu0  ;;  %1106 = vst.msk [vmem:[#allocation2 + $0x200] sm:$0xff] %vm19_vm2, %v1032_v50 }
 0x152   :  { %v1033_v9 = vadd.f32 %v933_v49, %v305_v29  ;;  %v1681_v51 = vpop.f32.mrb[55].mxu1  ;;  %v1144_v55 = vld [vmem:[#allocation2 + $0xc8] sm:$0xff]  ;;  %1809 = vtanh.f32 %v1223_v42  ;;  %v272_v38 = vld [vmem:[#allocation2 + $0x100] sm:$0xff] }
 0x153   :  { %v1182_v56 = vld [vmem:[#allocation2 + $0x1f8] sm:$0xff]  ;;  %v1224_v57 = vadd.f32 %v2683_v53, %v1144_v55  ;;  %1069 = vst.msk [vmem:[#allocation2 + $0xd8] sm:$0xff] %vm19_vm2, %v995_v41  ;;  %1811 = vtanh.f32 %v1261_v52 }
 0x154   :  { %v1262_v60 = vadd.f32 %v2683_v53, %v1182_v56  ;;  %1107 = vst.msk [vmem:[#allocation2 + $0x208] sm:$0xff] %vm19_vm2, %v1033_v9  ;;  %v1802_v63 = vpop.eup %1801  ;;  %v307_v53 = vld [vmem:[#allocation2 + $0x218] sm:$0xff]  ;;  %v310_v9 = vld [vmem:[#allocation2 + $0x230] sm:$0xff] }
 0x155   :  { %1813 = vtanh.f32 %v1224_v57  ;;  %v1804_v4 = vpop.eup %1803  ;;  %1367 = vst.msk [vmem:[%s3129_s3 + $0xb0] sm:$0xff] %vm19_vm2, %v1802_v63  ;;  %v786_v5 = vpop.f32.mrb[56].mxu0  ;;  %v273_v57 = vld [vmem:[#allocation2 + $0x108] sm:$0xff] }
 0x156   :  { %1815 = vtanh.f32 %v1262_v60  ;;  %v938_v7 = vpop.f32.mrb[56].mxu1  ;;  %1405 = vst.msk [vmem:[%s3129_s3 + $0x1e0] sm:$0xff] %vm19_vm2, %v1804_v4  ;;  %v996_v13 = vadd.f32 %v786_v5, %v268_v61  ;;  %v1608_v14 = vpop.f32.mrb[57].mxu0  ;;  %v311_v61 = vld [vmem:[#allocation2 + $0x238] sm:$0xff] }
 0x157   :  { %v1806_v12 = vpop.eup %1805  ;;  %v1034_v15 = vadd.f32 %v938_v7, %v306_v62  ;;  %v1684_v18 = vpop.f32.mrb[57].mxu1  ;;  %v1145_v20 = vld [vmem:[#allocation2 + $0xd0] sm:$0xff] }
 0x158   :  { %v1808_v19 = vpop.eup %1807  ;;  %1368 = vst.msk [vmem:[%s3129_s3 + $0xb8] sm:$0xff] %vm19_vm2, %v1806_v12  ;;  %v1183_v21 = vld [vmem:[#allocation2 + $0x200] sm:$0xff]  ;;  %v789_v24 = vpop.f32.mrb[58].mxu0  ;;  %v1225_v27 = vadd.f32 %v2986_v26, %v1145_v20  ;;  %1070 = vst.msk [vmem:[#allocation2 + $0xe0] sm:$0xff] %vm19_vm2, %v996_v13 }
 0x159   :  { %v941_v25 = vpop.f32.mrb[58].mxu1  ;;  %1406 = vst.msk [vmem:[%s3129_s3 + $0x1e8] sm:$0xff] %vm19_vm2, %v1808_v19  ;;  %v1263_v35 = vadd.f32 %v2986_v26, %v1183_v21  ;;  %v997_v36 = vadd.f32 %v789_v24, %v269_v6  ;;  %v1609_v37 = vpop.f32.mrb[59].mxu0  ;;  %1108 = vst.msk [vmem:[#allocation2 + $0x210] sm:$0xff] %vm19_vm2, %v1034_v15 }
 0x15a   :  { %v1035_v39 = vadd.f32 %v941_v25, %v307_v53  ;;  %v1685_v46 = vpop.f32.mrb[59].mxu1  ;;  %v1146_v58 = vld [vmem:[#allocation2 + $0xd8] sm:$0xff]  ;;  %1817 = vtanh.f32 %v1225_v27  ;;  %v274_v37 = vld [vmem:[#allocation2 + $0x110] sm:$0xff] }
 0x15b   :  { %v1184_v59 = vld [vmem:[#allocation2 + $0x208] sm:$0xff]  ;;  %v1226_v3 = vadd.f32 %v2986_v26, %v1146_v58  ;;  %1071 = vst.msk [vmem:[#allocation2 + $0xe8] sm:$0xff] %vm19_vm2, %v997_v36  ;;  %1819 = vtanh.f32 %v1263_v35 }
 0x15c   :  { %v1264_v8 = vadd.f32 %v2986_v26, %v1184_v59  ;;  %1109 = vst.msk [vmem:[#allocation2 + $0x218] sm:$0xff] %vm19_vm2, %v1035_v39  ;;  %v1810_v23 = vpop.eup %1809  ;;  %v312_v39 = vld [vmem:[#allocation2 + $0x240] sm:$0x3] }
 0x15d   :  { %1821 = vtanh.f32 %v1226_v3  ;;  %v1812_v32 = vpop.eup %1811  ;;  %1369 = vst.msk [vmem:[%s3129_s3 + $0xc0] sm:$0xff] %vm19_vm2, %v1810_v23  ;;  %v794_v33 = vpop.f32.mrb[60].mxu0  ;;  %v275_v3 = vld [vmem:[#allocation2 + $0x118] sm:$0xff] }
 0x15e   :  { %1823 = vtanh.f32 %v1264_v8  ;;  %v946_v48 = vpop.f32.mrb[60].mxu1  ;;  %1407 = vst.msk [vmem:[%s3129_s3 + $0x1f0] sm:$0xff] %vm19_vm2, %v1812_v32  ;;  %v998_v16 = vadd.f32 %v794_v33, %v270_v10  ;;  %v1612_v17 = vpop.f32.mrb[61].mxu0 }
 0x15f   :  { %v1814_v2 = vpop.eup %1813  ;;  %v1036_v22 = vadd.f32 %v946_v48, %v308_v11  ;;  %v1688_v40 = vpop.f32.mrb[61].mxu1  ;;  %v1147_v29 = vld [vmem:[#allocation2 + $0xe0] sm:$0xff] }
 0x160   :  { %v1816_v28 = vpop.eup %1815  ;;  %1370 = vst.msk [vmem:[%s3129_s3 + $0xc8] sm:$0xff] %vm19_vm2, %v1814_v2  ;;  %v1185_v30 = vld [vmem:[#allocation2 + $0x210] sm:$0xff]  ;;  %v797_v44 = vpop.f32.mrb[62].mxu0  ;;  %v1227_v50 = vadd.f32 %v2986_v26, %v1147_v29  ;;  %1072 = vst.msk [vmem:[#allocation2 + $0xf0] sm:$0xff] %vm19_vm2, %v998_v16 }
 0x161   :  { %v949_v45 = vpop.f32.mrb[62].mxu1  ;;  %1408 = vst.msk [vmem:[%s3129_s3 + $0x1f8] sm:$0xff] %vm19_vm2, %v1816_v28  ;;  %v1265_v54 = vadd.f32 %v2986_v26, %v1185_v30  ;;  %v999_v47 = vadd.f32 %v797_v44, %v271_v34  ;;  %v1613_v31 = vpop.f32.mrb[63].mxu0  ;;  %1110 = vst.msk [vmem:[#allocation2 + $0x220] sm:$0xff] %vm19_vm2, %v1036_v22 }
 0x162   :  { %v1037_v43 = vadd.f32 %v949_v45, %v309_v1  ;;  %v1689_v0 = vpop.f32.mrb[63].mxu1  ;;  %v1148_v49 = vld [vmem:[#allocation2 + $0xe8] sm:$0xff]  ;;  %1825 = vtanh.f32 %v1227_v50 }
 0x163   :  { %v1186_v42 = vld [vmem:[#allocation2 + $0x218] sm:$0xff]  ;;  %v1228_v52 = vadd.f32 %v2986_v26, %v1148_v49  ;;  %1073 = vst.msk [vmem:[#allocation2 + $0xf8] sm:$0xff] %vm19_vm2, %v999_v47  ;;  %1827 = vtanh.f32 %v1265_v54  ;;  %v276_v54 = vld [vmem:[#allocation2 + $0x120] sm:$0xff]  ;;  %v277_v0 = vld [vmem:[#allocation2 + $0x128] sm:$0xff] }
 0x164   :  { %v1266_v41 = vadd.f32 %v2986_v26, %v1186_v42  ;;  %1111 = vst.msk [vmem:[#allocation2 + $0x228] sm:$0xff] %vm19_vm2, %v1037_v43  ;;  %v1818_v51 = vpop.eup %1817 }
 0x165   :  { %1829 = vtanh.f32 %v1228_v52  ;;  %v1820_v55 = vpop.eup %1819  ;;  %1371 = vst.msk [vmem:[%s3129_s3 + $0xd0] sm:$0xff] %vm19_vm2, %v1818_v51  ;;  %v802_v56 = vpop.f32.mrb[64].mxu0 }
 0x166   :  { %1831 = vtanh.f32 %v1266_v41  ;;  %v954_v60 = vpop.f32.mrb[64].mxu1  ;;  %1409 = vst.msk [vmem:[%s3129_s3 + $0x200] sm:$0xff] %vm19_vm2, %v1820_v55  ;;  %v1000_v63 = vadd.f32 %v802_v56, %v272_v38  ;;  %v1616_v4 = vpop.f32.mrb[65].mxu0 }
 0x167   :  { %v1822_v62 = vpop.eup %1821  ;;  %v1038_v5 = vadd.f32 %v954_v60, %v310_v9  ;;  %v1692_v6 = vpop.f32.mrb[65].mxu1  ;;  %v1149_v53 = vld [vmem:[#allocation2 + $0xf0] sm:$0xff] }
 0x168   :  { %v1824_v7 = vpop.eup %1823  ;;  %1372 = vst.msk [vmem:[%s3129_s3 + $0xd8] sm:$0xff] %vm19_vm2, %v1822_v62  ;;  %v1187_v12 = vld [vmem:[#allocation2 + $0x220] sm:$0xff]  ;;  %v805_v13 = vpop.f32.mrb[66].mxu0  ;;  %v1229_v15 = vadd.f32 %v2986_v26, %v1149_v53  ;;  %1074 = vst.msk [vmem:[#allocation2 + $0x100] sm:$0xff] %vm19_vm2, %v1000_v63 }
 0x169   :  { %v957_v14 = vpop.f32.mrb[66].mxu1  ;;  %1410 = vst.msk [vmem:[%s3129_s3 + $0x208] sm:$0xff] %vm19_vm2, %v1824_v7  ;;  %v1267_v18 = vadd.f32 %v2986_v26, %v1187_v12  ;;  %v1001_v19 = vadd.f32 %v805_v13, %v273_v57  ;;  %v1617_v20 = vpop.f32.mrb[67].mxu0  ;;  %1112 = vst.msk [vmem:[#allocation2 + $0x230] sm:$0xff] %vm19_vm2, %v1038_v5 }
 0x16a   :  { %v1039_v21 = vadd.f32 %v957_v14, %v311_v61  ;;  %v1693_v24 = vpop.f32.mrb[67].mxu1  ;;  %v1150_v25 = vld [vmem:[#allocation2 + $0xf8] sm:$0xff]  ;;  %1833 = vtanh.f32 %v1229_v15 }
 0x16b   :  { %v1188_v27 = vld [vmem:[#allocation2 + $0x228] sm:$0xff]  ;;  %v1230_v35 = vadd.f32 %v2986_v26, %v1150_v25  ;;  %1075 = vst.msk [vmem:[#allocation2 + $0x108] sm:$0xff] %vm19_vm2, %v1001_v19  ;;  %1835 = vtanh.f32 %v1267_v18 }
 0x16c   :  { %v1268_v36 = vadd.f32 %v2986_v26, %v1188_v27  ;;  %1113 = vst.msk [vmem:[#allocation2 + $0x238] sm:$0xff] %vm19_vm2, %v1039_v21  ;;  %v1826_v46 = vpop.eup %1825 }
 0x16d   :  { %1837 = vtanh.f32 %v1230_v35  ;;  %v1828_v58 = vpop.eup %1827  ;;  %1373 = vst.msk [vmem:[%s3129_s3 + $0xe0] sm:$0xff] %vm19_vm2, %v1826_v46  ;;  %v810_v59 = vpop.f32.mrb[68].mxu0 }
 0x16e   :  { %1839 = vtanh.f32 %v1268_v36  ;;  %v962_v8 = vpop.f32.mrb[68].mxu1  ;;  %1411 = vst.msk [vmem:[%s3129_s3 + $0x210] sm:$0xff] %vm19_vm2, %v1828_v58  ;;  %v1002_v11 = vadd.f32 %v810_v59, %v274_v37  ;;  %v1620_v23 = vpop.f32.mrb[69].mxu0 }
 0x16f   :  { %v1830_v10 = vpop.eup %1829  ;;  %v1040_v32 = vadd.f32 %v962_v8, %v312_v39  ;;  %v1696_v33 = vpop.f32.mrb[69].mxu1  ;;  %v1151_v48 = vld [vmem:[#allocation2 + $0x100] sm:$0xff] }
 0x170   :  { %v1832_v34 = vpop.eup %1831  ;;  %1374 = vst.msk [vmem:[%s3129_s3 + $0xe8] sm:$0xff] %vm19_vm2, %v1830_v10  ;;  %v1189_v1 = vld [vmem:[#allocation2 + $0x230] sm:$0xff]  ;;  %v813_v2 = vpop.f32.mrb[70].mxu0  ;;  %v1231_v17 = vadd.f32 %v2986_v26, %v1151_v48  ;;  %1076 = vst.msk [vmem:[#allocation2 + $0x110] sm:$0xff] %vm19_vm2, %v1002_v11 }
 0x171   :  { %v965_v16 = vpop.f32.mrb[70].mxu1  ;;  %1412 = vst.msk [vmem:[%s3129_s3 + $0x218] sm:$0xff] %vm19_vm2, %v1832_v34  ;;  %v1269_v22 = vadd.f32 %v2986_v26, %v1189_v1  ;;  %v1003_v40 = vadd.f32 %v813_v2, %v275_v3  ;;  %v1621_v28 = vpop.f32.mrb[71].mxu0 }
 0x172   :  { %1115 = vst.msk [vmem:[#allocation2 + $0x240] sm:$0x3] %vm92_vm3, %v1040_v32  ;;  %v1697_v29 = vpop.f32.mrb[71].mxu1  ;;  %v1152_v30 = vld [vmem:[#allocation2 + $0x108] sm:$0xff]  ;;  %1841 = vtanh.f32 %v1231_v17 }
 0x173   :  { %v1190_v44 = vld [vmem:[#allocation2 + $0x238] sm:$0xff]  ;;  %v1232_v45 = vadd.f32 %v2986_v26, %v1152_v30  ;;  %1077 = vst.msk [vmem:[#allocation2 + $0x118] sm:$0xff] %vm19_vm2, %v1003_v40  ;;  %1843 = vtanh.f32 %v1269_v22 }
 0x174   :  { %v1270_v50 = vadd.f32 %v2986_v26, %v1190_v44  ;;  %v1834_v47 = vpop.eup %1833 }
 0x175   :  { %1845 = vtanh.f32 %v1232_v45  ;;  %v1836_v31 = vpop.eup %1835  ;;  %1375 = vst.msk [vmem:[%s3129_s3 + $0xf0] sm:$0xff] %vm19_vm2, %v1834_v47  ;;  %v818_v43 = vpop.f32.mrb[72].mxu0 }
 0x176   :  { %1847 = vtanh.f32 %v1270_v50  ;;  %1413 = vst.msk [vmem:[%s3129_s3 + $0x220] sm:$0xff] %vm19_vm2, %v1836_v31  ;;  %v1004_v42 = vadd.f32 %v818_v43, %v276_v54  ;;  %v1624_v52 = vpop.f32.mrb[73].mxu0 }
 0x177   :  { %v1838_v49 = vpop.eup %1837  ;;  %v1153_v38 = vld [vmem:[#allocation2 + $0x110] sm:$0xff]  ;;  %v821_v51 = vpop.f32.mrb[74].mxu0 }
 0x178   :  { %v1840_v41 = vpop.eup %1839  ;;  %1376 = vst.msk [vmem:[%s3129_s3 + $0xf8] sm:$0xff] %vm19_vm2, %v1838_v49  ;;  %v1233_v55 = vadd.f32 %v2986_v26, %v1153_v38  ;;  %1078 = vst.msk [vmem:[#allocation2 + $0x120] sm:$0xff] %vm19_vm2, %v1004_v42  ;;  %v1005_v57 = vadd.f32 %v821_v51, %v277_v0  ;;  %v1625_v60 = vpop.f32.mrb[75].mxu0 }
 0x179   :  { %v1191_v9 = vld [vmem:[#allocation2 + $0x240] sm:$0x3]  ;;  %1414 = vst.msk [vmem:[%s3129_s3 + $0x228] sm:$0xff] %vm19_vm2, %v1840_v41 }
 0x17a   :  { %v1271_v56 = vadd.f32 %v2986_v26, %v1191_v9  ;;  %v1154_v61 = vld [vmem:[#allocation2 + $0x118] sm:$0xff]  ;;  %1849 = vtanh.f32 %v1233_v55  ;;  %1079 = vst.msk [vmem:[#allocation2 + $0x128] sm:$0xff] %vm19_vm2, %v1005_v57 }
 0x17b   :  { %v1234_v62 = vadd.f32 %v2986_v26, %v1154_v61 }
 0x17c   :  { %1851 = vtanh.f32 %v1271_v56  ;;  %v1842_v63 = vpop.eup %1841 }
 0x17d   :  { %1853 = vtanh.f32 %v1234_v62  ;;  %v1844_v4 = vpop.eup %1843  ;;  %1377 = vst.msk [vmem:[%s3129_s3 + $0x100] sm:$0xff] %vm19_vm2, %v1842_v63 }
 0x17e   :  { %1415 = vst.msk [vmem:[%s3129_s3 + $0x230] sm:$0xff] %vm19_vm2, %v1844_v4 }
 0x17f   :  { %v1846_v5 = vpop.eup %1845  ;;  %v1155_v7 = vld [vmem:[#allocation2 + $0x120] sm:$0xff] }
 0x180   :  { %v1848_v6 = vpop.eup %1847  ;;  %1378 = vst.msk [vmem:[%s3129_s3 + $0x108] sm:$0xff] %vm19_vm2, %v1846_v5  ;;  %v1235_v53 = vadd.f32 %v2986_v26, %v1155_v7 }
 0x181   :  { %1416 = vst.msk [vmem:[%s3129_s3 + $0x238] sm:$0xff] %vm19_vm2, %v1848_v6  ;;  %v1156_v12 = vld [vmem:[#allocation2 + $0x128] sm:$0xff] }
 0x182   :  { %1855 = vtanh.f32 %v1235_v53  ;;  %v1236_v13 = vadd.f32 %v2986_v26, %v1156_v12 }
 0x184   :  { %v1850_v14 = vpop.eup %1849  ;;  %1857 = vtanh.f32 %v1236_v13 }
 0x185   :  { %1379 = vst.msk [vmem:[%s3129_s3 + $0x110] sm:$0xff] %vm19_vm2, %v1850_v14 }
 0x186   :  { %v1852_v15 = vpop.eup %1851 }
 0x187   :  { %v1854_v18 = vpop.eup %1853  ;;  %1417 = vst.msk [vmem:[%s3129_s3 + $0x240] sm:$0x3] %vm92_vm3, %v1852_v15 }
 0x188   :  { %1380 = vst.msk [vmem:[%s3129_s3 + $0x118] sm:$0xff] %vm19_vm2, %v1854_v18 }
 0x18c   :  { %v1856_v26 = vpop.eup %1855 }
 0x18d   :  { %1381 = vst.msk [vmem:[%s3129_s3 + $0x120] sm:$0xff] %vm19_vm2, %v1856_v26 }
 0x18e   :  { %v1858_v19 = vpop.eup %1857 }
 0x18f   :  { %1382 = vst.msk [vmem:[%s3129_s3 + $0x128] sm:$0xff] %vm19_vm2, %v1858_v19 }

</bundles_post_ra>
